<compile_context>
chip_gen: v7x
topology: tpu7x:2x2x1
jax: 0.10.0
libtpu: 0.0.40
codegen_flags: <defaults>
</compile_context>

<pallas_src>
import functools
import math

import jax
import jax.numpy as jnp
from jax.experimental import pallas as pl
from jax.experimental.pallas import tpu as pltpu

EPS_BN = 1e-5
RATES = (1, 6, 12, 18)


def _modulator_kernel(x_ref, w_taps_ref, w_small_ref, w_ca_ref, vecs_ref,
                      out_ref, xpad_ref, *, H, W, C, Ch, PH, PW):
    HW = H * W
    NR = len(RATES)
    f32 = jnp.float32

    x3 = x_ref[0]                              # (H, W, C)  f32
    x = x3.reshape(HW, C)                      # (HW, C)    f32 (free collapse)
    x_bf = x.astype(jnp.bfloat16)

    # ---- bf16 zero-padded copy of x for the dilated-conv taps --------------
    # NOTE: re-zeroed every grid step (see header: a program_id==0 gate is
    # unsafe when the parallel batch axis is split across TensorCores).
    xpad_ref[...] = jnp.zeros((H + 2 * PH, W + 2 * PW, C), jnp.bfloat16)
    xpad_ref[PH:PH + H, PW:PW + W, :] = x_bf.reshape(H, W, C)

    # packed bf16 weights: rows 0:4C   = SA fuse conv (branch BNs folded),
    #                      rows 4C:5C  = PA conv (PA BN folded),
    #                      rows 5C:6C  = output conv (output BN folded)
    w_fuse = w_small_ref[0:NR * C, :]
    w_pa = w_small_ref[NR * C:(NR + 1) * C, :]
    w_out = w_small_ref[(NR + 1) * C:(NR + 2) * C, :]

    # packed f32 per-channel rows:
    #   row 0        : PA BN shift
    #   rows 1:1+NR  : SA branch conv biases
    #   row 1+NR     : SA fuse conv bias (+ folded branch-BN shifts)
    #   row 2+NR     : output conv bias*scale + output BN shift + self.bias
    pa_shift = vecs_ref[0:1, :]
    b_fuse = vecs_ref[1 + NR:2 + NR, :]
    c_out = vecs_ref[2 + NR:3 + NR, :]

    # ---------------- PA: x * sigmoid(BN(1x1 conv(x))) ----------------------
    attn = jnp.dot(x_bf, w_pa, preferred_element_type=f32) + pa_shift
    pa = x * jax.nn.sigmoid(attn)                              # (HW, C) f32

    # ---------------- CA: squeeze-excite channel gate (tiny, VPU) -----------
    y_mean = jnp.mean(x, axis=0, keepdims=True)                # (1, C)
    hca = jnp.maximum(
        jnp.sum(w_ca_ref[0:Ch, :] * y_mean, axis=1, keepdims=True), 0.0)
    gate = jax.nn.sigmoid(
        jnp.sum(hca * w_ca_ref[Ch:2 * Ch, :], axis=0, keepdims=True))
    ca = x * gate                                              # (HW, C) f32

    # ---------- pa_ca = softmax(pa @ ca, dim=-1): lane-packed numerator -----
    # Per-channel (H,W)@(W,W) products; C only fills C/128 lanes, so NP groups
    # of H-rows are packed into the lanes before the broadcast-FMA loop.
    NP = math.gcd(max(1, 128 // C), H) if (C <= 128 and 128 % C == 0) else 1
    GH = H // NP
    pa3 = pa.reshape(H, W, C)
    ca3 = ca.reshape(H, W, C)
    pa_p = jnp.concatenate([pa3[s * GH:(s + 1) * GH] for s in range(NP)],
                           axis=-1)                            # (GH, W, NP*C)
    ca_t = jnp.concatenate([ca3] * NP, axis=-1)                # (H,  W, NP*C)

    scores = pa_p[:, 0:1, :] * ca_t[0:1, :, :]
    for k in range(1, W):
        scores = scores + pa_p[:, k:k + 1, :] * ca_t[k:k + 1, :, :]
    m = jnp.max(scores, axis=1, keepdims=True)
    e = jnp.exp(scores - m)                                    # unnormalised
    den = jnp.sum(e, axis=1, keepdims=True)                    # (GH, 1, NP*C)

    # ------------- SA: 4 dilated 3x3 convs -> ReLU -> fused 1x1 -------------
    # Taps that fall entirely in the zero padding are skipped at trace time
    # (for H=W=16 the rate-18 branch reduces to its centre 1x1 conv).  Each
    # kernel row's valid taps are lane-concatenated into one K<=3C MXU dot,
    # and each branch is folded straight into the 4C->C fuse conv.
    sa_acc = None
    for ri, rate in enumerate(RATES):
        dys = [(ky, d) for ky, d in enumerate((-rate, 0, rate)) if abs(d) < H]
        dxs = [(kx, d) for kx, d in enumerate((-rate, 0, rate)) if abs(d) < W]
        kx0 = dxs[0][0]
        acc = None
        for ky, dy in dys:
            taps = [xpad_ref[PH + dy:PH + dy + H,
                             PW + dx:PW + dx + W, :].reshape(HW, C)
                    for _, dx in dxs]
            lhs = taps[0] if len(taps) == 1 else jnp.concatenate(taps, axis=-1)
            w_row = w_taps_ref[ri, ky, kx0 * C:(kx0 + len(taps)) * C, :]
            d = jnp.dot(lhs, w_row, preferred_element_type=f32)
            acc = d if acc is None else acc + d
        # conv bias -> ReLU -> (branch BN folded into w_fuse) -> fuse conv
        branch = jnp.maximum(acc + vecs_ref[1 + ri:2 + ri, :], 0.0)
        fb = jnp.dot(branch.astype(jnp.bfloat16),
                     w_fuse[ri * C:(ri + 1) * C, :],
                     preferred_element_type=f32)
        sa_acc = fb if sa_acc is None else sa_acc + fb
    sa = sa_acc + b_fuse                                       # (HW, C) f32

    # ---------- out = softmax(pa@ca) @ sa, accumulated unnormalised ---------
    sa_t = jnp.concatenate([sa.reshape(H, W, C)] * NP, axis=-1)  # (H, W, NP*C)
    outa = e[:, 0:1, :] * sa_t[0:1, :, :]
    for k in range(1, W):
        outa = outa + e[:, k:k + 1, :] * sa_t[k:k + 1, :, :]
    outa = outa * pl.reciprocal(den, approx=True)              # one normalise
    # unpack (GH, W, NP*C) -> (H, W, C) -> (HW, C)
    out_flat = jnp.concatenate(
        [outa[:, :, s * C:(s + 1) * C] for s in range(NP)], axis=0
    ).reshape(HW, C)

    # -------------- output 1x1 conv + BN + bias + residual ------------------
    res = x_ref[0].reshape(HW, C)
    y = jnp.dot(out_flat.astype(jnp.bfloat16), w_out,
                preferred_element_type=f32) + c_out + res
    out_ref[0] = y.reshape(H, W, C)


def _pack_kernel_params(params, C):
    """Fold eval-mode BatchNorms into the 1x1 convs and pack into 4 arrays.

    In a real model this should run once outside the hot path (it is a handful
    of tiny XLA ops per call otherwise).
    """
    NR = len(RATES)
    w_pa_f = params['w_pa'] * params['pa_scale']                    # (C, C)
    w_fuse = params['w_saout'].reshape(NR, C, C)
    w_fuse_f = (w_fuse * params['sa_scale'][:, :, None]).reshape(NR * C, C)
    b_fuse_f = params['b_saout'] + jnp.einsum(
        'rc,rcn->n', params['sa_shift'], w_fuse)[None, :]
    w_out_f = params['w_out'] * params['out_scale']
    c_out = (params['b_out'] * params['out_scale'] + params['out_shift']
             + params['bias'])

    # dilated-conv taps grouped per kernel row: (rate, ky, kx*C + cin, cout)
    w_taps = params['w_sa'].reshape(NR, 3, 3, C, C).reshape(
        NR, 3, 3 * C, C).astype(jnp.bfloat16)
    w_small = jnp.concatenate([w_fuse_f, w_pa_f, w_out_f],
                              axis=0).astype(jnp.bfloat16)          # (6C, C)
    w_ca = jnp.concatenate([params['w_ca1'], params['w_ca2'].T],
                           axis=0)                                  # (2Ch, C)
    vecs = jnp.concatenate([params['pa_shift'], params['b_sa'],
                            b_fuse_f, c_out], axis=0)               # (3+NR, C)
    return w_taps, w_small, w_ca, vecs


def modulator_forward_nhwc(x_nhwc, params):
    """Core fused kernel, channels-last layout."""
    B, H, W, C = x_nhwc.shape
    assert H == W, "Modulator.forward's pa @ ca requires H == W"
    assert C >= 16, "Modulator requires in_ch >= 16"
    Ch = max(C // 16, 1)

    # padding needed by the dilated-conv taps that are not fully out of bounds
    PH = max([r for r in RATES if r < H], default=1)
    PW = ((max([r for r in RATES if r < W], default=1) + 15) // 16) * 16

    w_taps, w_small, w_ca, vecs = _pack_kernel_params(params, C)

    kernel = functools.partial(_modulator_kernel, H=H, W=W, C=C, Ch=Ch,
                               PH=PH, PW=PW)
    return pl.pallas_call(
        kernel,
        grid=(B,),
        in_specs=[
            pl.BlockSpec((1, H, W, C), lambda b: (b, 0, 0, 0)),
            pl.BlockSpec(w_taps.shape, lambda b: (0, 0, 0, 0)),
            pl.BlockSpec(w_small.shape, lambda b: (0, 0)),
            pl.BlockSpec(w_ca.shape, lambda b: (0, 0)),
            pl.BlockSpec(vecs.shape, lambda b: (0, 0)),
        ],
        out_specs=pl.BlockSpec((1, H, W, C), lambda b: (b, 0, 0, 0)),
        out_shape=jax.ShapeDtypeStruct((B, H, W, C), jnp.float32),
        scratch_shapes=[
            pltpu.VMEM((H + 2 * PH, W + 2 * PW, C), jnp.bfloat16),  # padded x
        ],
        compiler_params=pltpu.CompilerParams(
            dimension_semantics=("parallel",)),
    )(x_nhwc, w_taps, w_small, w_ca, vecs)


def modulator_forward(x_nchw, params):
    """NCHW wrapper matching the PyTorch interface (keep surrounding model
    NHWC to drop these two transposes)."""
    x_nhwc = jnp.transpose(x_nchw, (0, 2, 3, 1))
    out = modulator_forward_nhwc(x_nhwc, params)
    return jnp.transpose(out, (0, 3, 1, 2))


# --------------------------- pure-JAX reference -----------------------------
def modulator_reference(x_nchw, params):
    """f32 reference of Modulator.forward (eval-mode BatchNorm)."""
    B, C, H, W = x_nchw.shape
    hp = jax.lax.Precision.HIGHEST
    x = jnp.transpose(x_nchw, (0, 2, 3, 1))                        # (B,H,W,C)

    # PA
    attn = jnp.einsum('bhwc,cd->bhwd', x, params['w_pa'], precision=hp)
    attn = attn * params['pa_scale'] + params['pa_shift']
    pa = x * jax.nn.sigmoid(attn)

    # CA
    y = jnp.mean(x, axis=(1, 2))                                   # (B, C)
    h = jax.nn.relu(jnp.einsum('bc,hc->bh', y, params['w_ca1'], precision=hp))
    g = jax.nn.sigmoid(jnp.einsum('bh,ch->bc', h, params['w_ca2'],
                                  precision=hp))
    ca = x * g[:, None, None, :]

    # SA
    branches = []
    for r, rate in enumerate(RATES):
        w = params['w_sa'][r].reshape(3, 3, C, C)                  # HWIO
        z = jax.lax.conv_general_dilated(
            x, w, window_strides=(1, 1),
            padding=[(rate, rate), (rate, rate)],
            rhs_dilation=(rate, rate),
            dimension_numbers=('NHWC', 'HWIO', 'NHWC'),
            precision=hp)
        z = jax.nn.relu(z + params['b_sa'][r])
        z = z * params['sa_scale'][r] + params['sa_shift'][r]
        branches.append(z)
    cat = jnp.concatenate(branches, axis=-1)                       # (B,H,W,4C)
    sa = jnp.einsum('bhwk,kc->bhwc', cat, params['w_saout'],
                    precision=hp) + params['b_saout']

    # softmax(pa @ ca, dim=-1) @ sa : per-(b, c) (H,W)@(H,W) matmuls
    scores = jnp.einsum('bikc,bkjc->bijc', pa, ca, precision=hp)
    p = jax.nn.softmax(scores, axis=2)
    o = jnp.einsum('bikc,bkjc->bijc', p, sa, precision=hp)

    yout = jnp.einsum('bhwc,cd->bhwd', o, params['w_out'],
                      precision=hp) + params['b_out']
    yout = yout * params['out_scale'] + params['out_shift'] + params['bias'] + x
    return jnp.transpose(yout, (0, 3, 1, 2))


# --------------------------- parameter construction -------------------------
def init_params(key, C):
    Ch = C // 16
    NR = len(RATES)
    ks = jax.random.split(key, 5 + NR)

    def kaiming(k, shape, fan_out):
        return math.sqrt(2.0 / fan_out) * jax.random.normal(k, shape,
                                                            jnp.float32)

    # BN eval mode, default running stats (mean=0, var=1), gamma=1, beta=0:
    #   scale = 1/sqrt(1+eps), shift = 0
    bn_scale = jnp.full((1, C), 1.0 / math.sqrt(1.0 + EPS_BN), jnp.float32)
    bn_shift = jnp.zeros((1, C), jnp.float32)

    # dilated 3x3 conv weights stored (rate, tap=ky*3+kx, C_in, C_out)
    w_sa = jnp.stack([kaiming(ks[2 + r], (9, C, C), fan_out=9 * C)
                      for r in range(NR)], axis=0)

    return dict(
        w_pa=kaiming(ks[0], (C, C), fan_out=C),          # PA_conv 1x1 (Cin,Cout)
        pa_scale=bn_scale, pa_shift=bn_shift,            # PA_bn (eval)
        w_ca1=kaiming(ks[1], (Ch, C), fan_out=Ch),       # Linear C->C//16 (out,in)
        w_ca2=kaiming(ks[2 + NR], (C, Ch), fan_out=C),   # Linear C//16->C (out,in)
        w_sa=w_sa,                                       # 4 dilated 3x3 convs
        b_sa=jnp.zeros((NR, C), jnp.float32),            # their biases (init 0)
        sa_scale=jnp.tile(bn_scale, (NR, 1)),            # per-branch BN (eval)
        sa_shift=jnp.tile(bn_shift, (NR, 1)),
        w_saout=kaiming(ks[3 + NR], (NR * C, C), fan_out=C),  # SA_out_conv (4C->C)
        b_saout=jnp.zeros((1, C), jnp.float32),
        w_out=kaiming(ks[4 + NR], (C, C), fan_out=C),    # output_conv 1x1
        b_out=jnp.zeros((1, C), jnp.float32),
        out_scale=bn_scale, out_shift=bn_shift,          # self.norm (eval)
        bias=jnp.zeros((1, C), jnp.float32),             # self.bias parameter
    )


if __name__ == "__main__":
    # forward() requires in_ch == out_ch (residual add), in_ch >= 16, H == W
    B, C, H, W = 2, 32, 16, 16
    key = jax.random.PRNGKey(0)
    kx_, kp_ = jax.random.split(key)
    x = jax.random.normal(kx_, (B, C, H, W), jnp.float32)
    params = init_params(kp_, C)

    out = jax.jit(modulator_forward)(x, params)
    jax.block_until_ready(out)
    assert out.shape == (B, C, H, W) and out.dtype == jnp.float32

    # Tolerance check vs a pure-JAX f32 reference: bf16 MXU operands and the
    # approximate softmax reciprocal give ~1e-3 relative error, so compare
    # with a loose relative-L2 bound rather than exact match.
    ref = jax.jit(modulator_reference)(x, params)
    jax.block_until_ready(ref)
    rel = jnp.linalg.norm(out - ref) / (jnp.linalg.norm(ref) + 1e-12)
    assert float(rel) < 3e-2, f"relative L2 error vs reference: {float(rel)}"

    print("KERNEL_OK")
</pallas_src>

<mosaic_0001>
module attributes {stable_mosaic.version = 11 : i64} {
  func.func @_modulator_kernel(%arg0: i32, %arg1: memref<1x16x16x32xf32, #tpu.memory_space<vmem>>, %arg2: memref<4x3x96x32xbf16, #tpu.memory_space<vmem>>, %arg3: memref<192x32xbf16, #tpu.memory_space<vmem>>, %arg4: memref<4x32xf32, #tpu.memory_space<vmem>>, %arg5: memref<7x32xf32, #tpu.memory_space<vmem>>, %arg6: memref<1x16x16x32xf32, #tpu.memory_space<vmem>>, %arg7: memref<40x48x32xbf16, #tpu.memory_space<vmem>>) attributes {dimension_semantics = [#tpu.dimension_semantics<parallel>], iteration_bounds = array<i64: 2>, scalar_prefetch = 0 : i64, scratch_operands = 1 : i64, tpu.core_type = #tpu.core_type<tc>, window_params = [{transform_indices = @transform_0, window_bounds = array<i64: 1, 16, 16, 32>}, {pipeline_mode = #tpu.pipeline_mode<synchronous>, transform_indices = @transform_1, window_bounds = array<i64: 4, 3, 96, 32>}, {pipeline_mode = #tpu.pipeline_mode<synchronous>, transform_indices = @transform_2, window_bounds = array<i64: 192, 32>}, {pipeline_mode = #tpu.pipeline_mode<synchronous>, transform_indices = @transform_3, window_bounds = array<i64: 4, 32>}, {pipeline_mode = #tpu.pipeline_mode<synchronous>, transform_indices = @transform_4, window_bounds = array<i64: 7, 32>}, {transform_indices = @transform_5, window_bounds = array<i64: 1, 16, 16, 32>}]} {
    %c0 = arith.constant 0 : index
    %c0_0 = arith.constant 0 : index
    %c0_1 = arith.constant 0 : index
    %c0_2 = arith.constant 0 : index
    %0 = vector.load %arg1[%c0, %c0_0, %c0_1, %c0_2] : memref<1x16x16x32xf32, #tpu.memory_space<vmem>>, vector<1x16x16x32xf32>
    %1 = vector.shape_cast %0 : vector<1x16x16x32xf32> to vector<16x16x32xf32>
    %2 = vector.shape_cast %1 : vector<16x16x32xf32> to vector<256x32xf32>
    %3 = arith.truncf %2 : vector<256x32xf32> to vector<256x32xbf16>
    %cst = arith.constant 0.000000e+00 : bf16
    %4 = vector.broadcast %cst : bf16 to vector<40x48x32xbf16>
    %c0_3 = arith.constant 0 : index
    %c0_4 = arith.constant 0 : index
    %c0_5 = arith.constant 0 : index
    %5 = vector.load %arg7[%c0_3, %c0_4, %c0_5] : memref<40x48x32xbf16, #tpu.memory_space<vmem>>, vector<40x48x32xbf16>
    tpu.vector_store %arg7[%c0_3, %c0_4, %c0_5], %4 {strides = array<i32>} : memref<40x48x32xbf16, #tpu.memory_space<vmem>>, vector<40x48x32xbf16>,
    %6 = vector.shape_cast %3 : vector<256x32xbf16> to vector<16x16x32xbf16>
    %c12 = arith.constant 12 : index
    %c16 = arith.constant 16 : index
    %c0_6 = arith.constant 0 : index
    %7 = vector.load %arg7[%c12, %c16, %c0_6] : memref<40x48x32xbf16, #tpu.memory_space<vmem>>, vector<16x16x32xbf16>
    tpu.vector_store %arg7[%c12, %c16, %c0_6], %6 {strides = array<i32>} : memref<40x48x32xbf16, #tpu.memory_space<vmem>>, vector<16x16x32xbf16>,
    %c0_7 = arith.constant 0 : index
    %c0_8 = arith.constant 0 : index
    %8 = vector.load %arg3[%c0_7, %c0_8] : memref<192x32xbf16, #tpu.memory_space<vmem>>, vector<128x32xbf16>
    %c128 = arith.constant 128 : index
    %c0_9 = arith.constant 0 : index
    %9 = vector.load %arg3[%c128, %c0_9] : memref<192x32xbf16, #tpu.memory_space<vmem>>, vector<32x32xbf16>
    %c160 = arith.constant 160 : index
    %c0_10 = arith.constant 0 : index
    %10 = vector.load %arg3[%c160, %c0_10] : memref<192x32xbf16, #tpu.memory_space<vmem>>, vector<32x32xbf16>
    %c0_11 = arith.constant 0 : index
    %c0_12 = arith.constant 0 : index
    %11 = vector.load %arg5[%c0_11, %c0_12] : memref<7x32xf32, #tpu.memory_space<vmem>>, vector<1x32xf32>
    %c5 = arith.constant 5 : index
    %c0_13 = arith.constant 0 : index
    %12 = vector.load %arg5[%c5, %c0_13] : memref<7x32xf32, #tpu.memory_space<vmem>>, vector<1x32xf32>
    %c6 = arith.constant 6 : index
    %c0_14 = arith.constant 0 : index
    %13 = vector.load %arg5[%c6, %c0_14] : memref<7x32xf32, #tpu.memory_space<vmem>>, vector<1x32xf32>
    %cst_15 = arith.constant dense<0.000000e+00> : vector<256x32xf32>
    %14 = tpu.matmul %3, %9, %cst_15 {dimension_numbers = #tpu.dot_dimension_numbers<[1], [0], [0], [1], [0, 0, 1, 1], [], []>} : vector<256x32xbf16>, vector<32x32xbf16>, vector<256x32xf32> -> vector<256x32xf32>
    %15 = vector.broadcast %11 : vector<1x32xf32> to vector<256x32xf32>
    %16 = arith.addf %14, %15 : vector<256x32xf32>
    %17 = arith.negf %16 : vector<256x32xf32>
    %18 = math.exp %17 : vector<256x32xf32>
    %cst_16 = arith.constant 1.000000e+00 : f32
    %19 = vector.broadcast %cst_16 : f32 to vector<256x32xf32>
    %20 = arith.addf %19, %18 : vector<256x32xf32>
    %21 = arith.divf %19, %20 : vector<256x32xf32>
    %22 = arith.mulf %2, %21 : vector<256x32xf32>
    %cst_17 = arith.constant dense<0.000000e+00> : vector<32xf32>
    %23 = vector.multi_reduction <add>, %2, %cst_17 [0] : vector<256x32xf32> to vector<32xf32>
    %24 = vector.shape_cast %23 : vector<32xf32> to vector<1x32xf32>
    %cst_18 = arith.constant 2.560000e+02 : f32
    %25 = vector.broadcast %cst_18 : f32 to vector<1x32xf32>
    %26 = arith.divf %24, %25 : vector<1x32xf32>
    %c0_19 = arith.constant 0 : index
    %c0_20 = arith.constant 0 : index
    %27 = vector.load %arg4[%c0_19, %c0_20] : memref<4x32xf32, #tpu.memory_space<vmem>>, vector<2x32xf32>
    %28 = vector.broadcast %26 : vector<1x32xf32> to vector<2x32xf32>
    %29 = arith.mulf %27, %28 : vector<2x32xf32>
    %cst_21 = arith.constant dense<0.000000e+00> : vector<2xf32>
    %30 = vector.multi_reduction <add>, %29, %cst_21 [1] : vector<2x32xf32> to vector<2xf32>
    %31 = vector.shape_cast %30 : vector<2xf32> to vector<2x1xf32>
    %cst_22 = arith.constant 0.000000e+00 : f32
    %32 = vector.broadcast %cst_22 : f32 to vector<2x1xf32>
    %33 = arith.maximumf %31, %32 : vector<2x1xf32>
    %c2 = arith.constant 2 : index
    %c0_23 = arith.constant 0 : index
    %34 = vector.load %arg4[%c2, %c0_23] : memref<4x32xf32, #tpu.memory_space<vmem>>, vector<2x32xf32>
    %35 = vector.broadcast %33 : vector<2x1xf32> to vector<2x32xf32>
    %36 = arith.mulf %35, %34 : vector<2x32xf32>
    %cst_24 = arith.constant dense<0.000000e+00> : vector<32xf32>
    %37 = vector.multi_reduction <add>, %36, %cst_24 [0] : vector<2x32xf32> to vector<32xf32>
    %38 = vector.shape_cast %37 : vector<32xf32> to vector<1x32xf32>
    %39 = arith.negf %38 : vector<1x32xf32>
    %40 = math.exp %39 : vector<1x32xf32>
    %cst_25 = arith.constant 1.000000e+00 : f32
    %41 = vector.broadcast %cst_25 : f32 to vector<1x32xf32>
    %42 = arith.addf %41, %40 : vector<1x32xf32>
    %43 = arith.divf %41, %42 : vector<1x32xf32>
    %44 = vector.broadcast %43 : vector<1x32xf32> to vector<256x32xf32>
    %45 = arith.mulf %2, %44 : vector<256x32xf32>
    %46 = vector.shape_cast %22 : vector<256x32xf32> to vector<16x16x32xf32>
    %47 = vector.shape_cast %45 : vector<256x32xf32> to vector<16x16x32xf32>
    %48 = vector.extract_strided_slice %46 {offsets = [0, 0, 0], sizes = [4, 16, 32], strides = [1, 1, 1]} : vector<16x16x32xf32> to vector<4x16x32xf32>
    %49 = vector.extract_strided_slice %46 {offsets = [4, 0, 0], sizes = [4, 16, 32], strides = [1, 1, 1]} : vector<16x16x32xf32> to vector<4x16x32xf32>
    %50 = vector.extract_strided_slice %46 {offsets = [8, 0, 0], sizes = [4, 16, 32], strides = [1, 1, 1]} : vector<16x16x32xf32> to vector<4x16x32xf32>
    %51 = vector.extract_strided_slice %46 {offsets = [12, 0, 0], sizes = [4, 16, 32], strides = [1, 1, 1]} : vector<16x16x32xf32> to vector<4x16x32xf32>
    %52 = tpu.concatenate %48, %49, %50, %51 in 2 : vector<4x16x32xf32>, vector<4x16x32xf32>, vector<4x16x32xf32>, vector<4x16x32xf32> -> vector<4x16x128xf32>
    %53 = tpu.concatenate %47, %47, %47, %47 in 2 : vector<16x16x32xf32>, vector<16x16x32xf32>, vector<16x16x32xf32>, vector<16x16x32xf32> -> vector<16x16x128xf32>
    %54 = vector.extract_strided_slice %52 {offsets = [0, 0, 0], sizes = [4, 1, 128], strides = [1, 1, 1]} : vector<4x16x128xf32> to vector<4x1x128xf32>
    %55 = vector.extract_strided_slice %53 {offsets = [0, 0, 0], sizes = [1, 16, 128], strides = [1, 1, 1]} : vector<16x16x128xf32> to vector<1x16x128xf32>
    %56 = vector.broadcast %54 : vector<4x1x128xf32> to vector<4x16x128xf32>
    %57 = vector.broadcast %55 : vector<1x16x128xf32> to vector<4x16x128xf32>
    %58 = arith.mulf %56, %57 : vector<4x16x128xf32>
    %59 = vector.extract_strided_slice %52 {offsets = [0, 1, 0], sizes = [4, 1, 128], strides = [1, 1, 1]} : vector<4x16x128xf32> to vector<4x1x128xf32>
    %60 = vector.extract_strided_slice %53 {offsets = [1, 0, 0], sizes = [1, 16, 128], strides = [1, 1, 1]} : vector<16x16x128xf32> to vector<1x16x128xf32>
    %61 = vector.broadcast %59 : vector<4x1x128xf32> to vector<4x16x128xf32>
    %62 = vector.broadcast %60 : vector<1x16x128xf32> to vector<4x16x128xf32>
    %63 = arith.mulf %61, %62 : vector<4x16x128xf32>
    %64 = arith.addf %58, %63 : vector<4x16x128xf32>
    %65 = vector.extract_strided_slice %52 {offsets = [0, 2, 0], sizes = [4, 1, 128], strides = [1, 1, 1]} : vector<4x16x128xf32> to vector<4x1x128xf32>
    %66 = vector.extract_strided_slice %53 {offsets = [2, 0, 0], sizes = [1, 16, 128], strides = [1, 1, 1]} : vector<16x16x128xf32> to vector<1x16x128xf32>
    %67 = vector.broadcast %65 : vector<4x1x128xf32> to vector<4x16x128xf32>
    %68 = vector.broadcast %66 : vector<1x16x128xf32> to vector<4x16x128xf32>
    %69 = arith.mulf %67, %68 : vector<4x16x128xf32>
    %70 = arith.addf %64, %69 : vector<4x16x128xf32>
    %71 = vector.extract_strided_slice %52 {offsets = [0, 3, 0], sizes = [4, 1, 128], strides = [1, 1, 1]} : vector<4x16x128xf32> to vector<4x1x128xf32>
    %72 = vector.extract_strided_slice %53 {offsets = [3, 0, 0], sizes = [1, 16, 128], strides = [1, 1, 1]} : vector<16x16x128xf32> to vector<1x16x128xf32>
    %73 = vector.broadcast %71 : vector<4x1x128xf32> to vector<4x16x128xf32>
    %74 = vector.broadcast %72 : vector<1x16x128xf32> to vector<4x16x128xf32>
    %75 = arith.mulf %73, %74 : vector<4x16x128xf32>
    %76 = arith.addf %70, %75 : vector<4x16x128xf32>
    %77 = vector.extract_strided_slice %52 {offsets = [0, 4, 0], sizes = [4, 1, 128], strides = [1, 1, 1]} : vector<4x16x128xf32> to vector<4x1x128xf32>
    %78 = vector.extract_strided_slice %53 {offsets = [4, 0, 0], sizes = [1, 16, 128], strides = [1, 1, 1]} : vector<16x16x128xf32> to vector<1x16x128xf32>
    %79 = vector.broadcast %77 : vector<4x1x128xf32> to vector<4x16x128xf32>
    %80 = vector.broadcast %78 : vector<1x16x128xf32> to vector<4x16x128xf32>
    %81 = arith.mulf %79, %80 : vector<4x16x128xf32>
    %82 = arith.addf %76, %81 : vector<4x16x128xf32>
    %83 = vector.extract_strided_slice %52 {offsets = [0, 5, 0], sizes = [4, 1, 128], strides = [1, 1, 1]} : vector<4x16x128xf32> to vector<4x1x128xf32>
    %84 = vector.extract_strided_slice %53 {offsets = [5, 0, 0], sizes = [1, 16, 128], strides = [1, 1, 1]} : vector<16x16x128xf32> to vector<1x16x128xf32>
    %85 = vector.broadcast %83 : vector<4x1x128xf32> to vector<4x16x128xf32>
    %86 = vector.broadcast %84 : vector<1x16x128xf32> to vector<4x16x128xf32>
    %87 = arith.mulf %85, %86 : vector<4x16x128xf32>
    %88 = arith.addf %82, %87 : vector<4x16x128xf32>
    %89 = vector.extract_strided_slice %52 {offsets = [0, 6, 0], sizes = [4, 1, 128], strides = [1, 1, 1]} : vector<4x16x128xf32> to vector<4x1x128xf32>
    %90 = vector.extract_strided_slice %53 {offsets = [6, 0, 0], sizes = [1, 16, 128], strides = [1, 1, 1]} : vector<16x16x128xf32> to vector<1x16x128xf32>
    %91 = vector.broadcast %89 : vector<4x1x128xf32> to vector<4x16x128xf32>
    %92 = vector.broadcast %90 : vector<1x16x128xf32> to vector<4x16x128xf32>
    %93 = arith.mulf %91, %92 : vector<4x16x128xf32>
    %94 = arith.addf %88, %93 : vector<4x16x128xf32>
    %95 = vector.extract_strided_slice %52 {offsets = [0, 7, 0], sizes = [4, 1, 128], strides = [1, 1, 1]} : vector<4x16x128xf32> to vector<4x1x128xf32>
    %96 = vector.extract_strided_slice %53 {offsets = [7, 0, 0], sizes = [1, 16, 128], strides = [1, 1, 1]} : vector<16x16x128xf32> to vector<1x16x128xf32>
    %97 = vector.broadcast %95 : vector<4x1x128xf32> to vector<4x16x128xf32>
    %98 = vector.broadcast %96 : vector<1x16x128xf32> to vector<4x16x128xf32>
    %99 = arith.mulf %97, %98 : vector<4x16x128xf32>
    %100 = arith.addf %94, %99 : vector<4x16x128xf32>
    %101 = vector.extract_strided_slice %52 {offsets = [0, 8, 0], sizes = [4, 1, 128], strides = [1, 1, 1]} : vector<4x16x128xf32> to vector<4x1x128xf32>
    %102 = vector.extract_strided_slice %53 {offsets = [8, 0, 0], sizes = [1, 16, 128], strides = [1, 1, 1]} : vector<16x16x128xf32> to vector<1x16x128xf32>
    %103 = vector.broadcast %101 : vector<4x1x128xf32> to vector<4x16x128xf32>
    %104 = vector.broadcast %102 : vector<1x16x128xf32> to vector<4x16x128xf32>
    %105 = arith.mulf %103, %104 : vector<4x16x128xf32>
    %106 = arith.addf %100, %105 : vector<4x16x128xf32>
    %107 = vector.extract_strided_slice %52 {offsets = [0, 9, 0], sizes = [4, 1, 128], strides = [1, 1, 1]} : vector<4x16x128xf32> to vector<4x1x128xf32>
    %108 = vector.extract_strided_slice %53 {offsets = [9, 0, 0], sizes = [1, 16, 128], strides = [1, 1, 1]} : vector<16x16x128xf32> to vector<1x16x128xf32>
    %109 = vector.broadcast %107 : vector<4x1x128xf32> to vector<4x16x128xf32>
    %110 = vector.broadcast %108 : vector<1x16x128xf32> to vector<4x16x128xf32>
    %111 = arith.mulf %109, %110 : vector<4x16x128xf32>
    %112 = arith.addf %106, %111 : vector<4x16x128xf32>
    %113 = vector.extract_strided_slice %52 {offsets = [0, 10, 0], sizes = [4, 1, 128], strides = [1, 1, 1]} : vector<4x16x128xf32> to vector<4x1x128xf32>
    %114 = vector.extract_strided_slice %53 {offsets = [10, 0, 0], sizes = [1, 16, 128], strides = [1, 1, 1]} : vector<16x16x128xf32> to vector<1x16x128xf32>
    %115 = vector.broadcast %113 : vector<4x1x128xf32> to vector<4x16x128xf32>
    %116 = vector.broadcast %114 : vector<1x16x128xf32> to vector<4x16x128xf32>
    %117 = arith.mulf %115, %116 : vector<4x16x128xf32>
    %118 = arith.addf %112, %117 : vector<4x16x128xf32>
    %119 = vector.extract_strided_slice %52 {offsets = [0, 11, 0], sizes = [4, 1, 128], strides = [1, 1, 1]} : vector<4x16x128xf32> to vector<4x1x128xf32>
    %120 = vector.extract_strided_slice %53 {offsets = [11, 0, 0], sizes = [1, 16, 128], strides = [1, 1, 1]} : vector<16x16x128xf32> to vector<1x16x128xf32>
    %121 = vector.broadcast %119 : vector<4x1x128xf32> to vector<4x16x128xf32>
    %122 = vector.broadcast %120 : vector<1x16x128xf32> to vector<4x16x128xf32>
    %123 = arith.mulf %121, %122 : vector<4x16x128xf32>
    %124 = arith.addf %118, %123 : vector<4x16x128xf32>
    %125 = vector.extract_strided_slice %52 {offsets = [0, 12, 0], sizes = [4, 1, 128], strides = [1, 1, 1]} : vector<4x16x128xf32> to vector<4x1x128xf32>
    %126 = vector.extract_strided_slice %53 {offsets = [12, 0, 0], sizes = [1, 16, 128], strides = [1, 1, 1]} : vector<16x16x128xf32> to vector<1x16x128xf32>
    %127 = vector.broadcast %125 : vector<4x1x128xf32> to vector<4x16x128xf32>
    %128 = vector.broadcast %126 : vector<1x16x128xf32> to vector<4x16x128xf32>
    %129 = arith.mulf %127, %128 : vector<4x16x128xf32>
    %130 = arith.addf %124, %129 : vector<4x16x128xf32>
    %131 = vector.extract_strided_slice %52 {offsets = [0, 13, 0], sizes = [4, 1, 128], strides = [1, 1, 1]} : vector<4x16x128xf32> to vector<4x1x128xf32>
    %132 = vector.extract_strided_slice %53 {offsets = [13, 0, 0], sizes = [1, 16, 128], strides = [1, 1, 1]} : vector<16x16x128xf32> to vector<1x16x128xf32>
    %133 = vector.broadcast %131 : vector<4x1x128xf32> to vector<4x16x128xf32>
    %134 = vector.broadcast %132 : vector<1x16x128xf32> to vector<4x16x128xf32>
    %135 = arith.mulf %133, %134 : vector<4x16x128xf32>
    %136 = arith.addf %130, %135 : vector<4x16x128xf32>
    %137 = vector.extract_strided_slice %52 {offsets = [0, 14, 0], sizes = [4, 1, 128], strides = [1, 1, 1]} : vector<4x16x128xf32> to vector<4x1x128xf32>
    %138 = vector.extract_strided_slice %53 {offsets = [14, 0, 0], sizes = [1, 16, 128], strides = [1, 1, 1]} : vector<16x16x128xf32> to vector<1x16x128xf32>
    %139 = vector.broadcast %137 : vector<4x1x128xf32> to vector<4x16x128xf32>
    %140 = vector.broadcast %138 : vector<1x16x128xf32> to vector<4x16x128xf32>
    %141 = arith.mulf %139, %140 : vector<4x16x128xf32>
    %142 = arith.addf %136, %141 : vector<4x16x128xf32>
    %143 = vector.extract_strided_slice %52 {offsets = [0, 15, 0], sizes = [4, 1, 128], strides = [1, 1, 1]} : vector<4x16x128xf32> to vector<4x1x128xf32>
    %144 = vector.extract_strided_slice %53 {offsets = [15, 0, 0], sizes = [1, 16, 128], strides = [1, 1, 1]} : vector<16x16x128xf32> to vector<1x16x128xf32>
    %145 = vector.broadcast %143 : vector<4x1x128xf32> to vector<4x16x128xf32>
    %146 = vector.broadcast %144 : vector<1x16x128xf32> to vector<4x16x128xf32>
    %147 = arith.mulf %145, %146 : vector<4x16x128xf32>
    %148 = arith.addf %142, %147 : vector<4x16x128xf32>
    %cst_26 = arith.constant dense<0xFF800000> : vector<4x128xf32>
    %149 = vector.multi_reduction <maximumf>, %148, %cst_26 [1] : vector<4x16x128xf32> to vector<4x128xf32>
    %150 = vector.shape_cast %149 : vector<4x128xf32> to vector<4x1x128xf32>
    %151 = vector.broadcast %150 : vector<4x1x128xf32> to vector<4x16x128xf32>
    %152 = arith.subf %148, %151 : vector<4x16x128xf32>
    %153 = math.exp %152 : vector<4x16x128xf32>
    %cst_27 = arith.constant dense<0.000000e+00> : vector<4x128xf32>
    %154 = vector.multi_reduction <add>, %153, %cst_27 [1] : vector<4x16x128xf32> to vector<4x128xf32>
    %155 = vector.shape_cast %154 : vector<4x128xf32> to vector<4x1x128xf32>
    %c11 = arith.constant 11 : index
    %c15 = arith.constant 15 : index
    %c0_28 = arith.constant 0 : index
    %156 = vector.load %arg7[%c11, %c15, %c0_28] : memref<40x48x32xbf16, #tpu.memory_space<vmem>>, vector<16x16x32xbf16>
    %157 = vector.shape_cast %156 : vector<16x16x32xbf16> to vector<256x32xbf16>
    %c11_29 = arith.constant 11 : index
    %c16_30 = arith.constant 16 : index
    %c0_31 = arith.constant 0 : index
    %158 = vector.load %arg7[%c11_29, %c16_30, %c0_31] : memref<40x48x32xbf16, #tpu.memory_space<vmem>>, vector<16x16x32xbf16>
    %159 = vector.shape_cast %158 : vector<16x16x32xbf16> to vector<256x32xbf16>
    %c11_32 = arith.constant 11 : index
    %c17 = arith.constant 17 : index
    %c0_33 = arith.constant 0 : index
    %160 = vector.load %arg7[%c11_32, %c17, %c0_33] : memref<40x48x32xbf16, #tpu.memory_space<vmem>>, vector<16x16x32xbf16>
    %161 = vector.shape_cast %160 : vector<16x16x32xbf16> to vector<256x32xbf16>
    %162 = tpu.concatenate %157, %159, %161 in 1 : vector<256x32xbf16>, vector<256x32xbf16>, vector<256x32xbf16> -> vector<256x96xbf16>
    %c0_34 = arith.constant 0 : index
    %c0_35 = arith.constant 0 : index
    %c0_36 = arith.constant 0 : index
    %c0_37 = arith.constant 0 : index
    %163 = vector.load %arg2[%c0_34, %c0_35, %c0_36, %c0_37] : memref<4x3x96x32xbf16, #tpu.memory_space<vmem>>, vector<1x1x96x32xbf16>
    %164 = vector.shape_cast %163 : vector<1x1x96x32xbf16> to vector<96x32xbf16>
    %cst_38 = arith.constant dense<0.000000e+00> : vector<256x32xf32>
    %165 = tpu.matmul %162, %164, %cst_38 {dimension_numbers = #tpu.dot_dimension_numbers<[1], [0], [0], [1], [0, 0, 1, 1], [], []>} : vector<256x96xbf16>, vector<96x32xbf16>, vector<256x32xf32> -> vector<256x32xf32>
    %c12_39 = arith.constant 12 : index
    %c15_40 = arith.constant 15 : index
    %c0_41 = arith.constant 0 : index
    %166 = vector.load %arg7[%c12_39, %c15_40, %c0_41] : memref<40x48x32xbf16, #tpu.memory_space<vmem>>, vector<16x16x32xbf16>
    %167 = vector.shape_cast %166 : vector<16x16x32xbf16> to vector<256x32xbf16>
    %c12_42 = arith.constant 12 : index
    %c16_43 = arith.constant 16 : index
    %c0_44 = arith.constant 0 : index
    %168 = vector.load %arg7[%c12_42, %c16_43, %c0_44] : memref<40x48x32xbf16, #tpu.memory_space<vmem>>, vector<16x16x32xbf16>
    %169 = vector.shape_cast %168 : vector<16x16x32xbf16> to vector<256x32xbf16>
    %c12_45 = arith.constant 12 : index
    %c17_46 = arith.constant 17 : index
    %c0_47 = arith.constant 0 : index
    %170 = vector.load %arg7[%c12_45, %c17_46, %c0_47] : memref<40x48x32xbf16, #tpu.memory_space<vmem>>, vector<16x16x32xbf16>
    %171 = vector.shape_cast %170 : vector<16x16x32xbf16> to vector<256x32xbf16>
    %172 = tpu.concatenate %167, %169, %171 in 1 : vector<256x32xbf16>, vector<256x32xbf16>, vector<256x32xbf16> -> vector<256x96xbf16>
    %c0_48 = arith.constant 0 : index
    %c1 = arith.constant 1 : index
    %c0_49 = arith.constant 0 : index
    %c0_50 = arith.constant 0 : index
    %173 = vector.load %arg2[%c0_48, %c1, %c0_49, %c0_50] : memref<4x3x96x32xbf16, #tpu.memory_space<vmem>>, vector<1x1x96x32xbf16>
    %174 = vector.shape_cast %173 : vector<1x1x96x32xbf16> to vector<96x32xbf16>
    %cst_51 = arith.constant dense<0.000000e+00> : vector<256x32xf32>
    %175 = tpu.matmul %172, %174, %cst_51 {dimension_numbers = #tpu.dot_dimension_numbers<[1], [0], [0], [1], [0, 0, 1, 1], [], []>} : vector<256x96xbf16>, vector<96x32xbf16>, vector<256x32xf32> -> vector<256x32xf32>
    %176 = arith.addf %165, %175 : vector<256x32xf32>
    %c13 = arith.constant 13 : index
    %c15_52 = arith.constant 15 : index
    %c0_53 = arith.constant 0 : index
    %177 = vector.load %arg7[%c13, %c15_52, %c0_53] : memref<40x48x32xbf16, #tpu.memory_space<vmem>>, vector<16x16x32xbf16>
    %178 = vector.shape_cast %177 : vector<16x16x32xbf16> to vector<256x32xbf16>
    %c13_54 = arith.constant 13 : index
    %c16_55 = arith.constant 16 : index
    %c0_56 = arith.constant 0 : index
    %179 = vector.load %arg7[%c13_54, %c16_55, %c0_56] : memref<40x48x32xbf16, #tpu.memory_space<vmem>>, vector<16x16x32xbf16>
    %180 = vector.shape_cast %179 : vector<16x16x32xbf16> to vector<256x32xbf16>
    %c13_57 = arith.constant 13 : index
    %c17_58 = arith.constant 17 : index
    %c0_59 = arith.constant 0 : index
    %181 = vector.load %arg7[%c13_57, %c17_58, %c0_59] : memref<40x48x32xbf16, #tpu.memory_space<vmem>>, vector<16x16x32xbf16>
    %182 = vector.shape_cast %181 : vector<16x16x32xbf16> to vector<256x32xbf16>
    %183 = tpu.concatenate %178, %180, %182 in 1 : vector<256x32xbf16>, vector<256x32xbf16>, vector<256x32xbf16> -> vector<256x96xbf16>
    %c0_60 = arith.constant 0 : index
    %c2_61 = arith.constant 2 : index
    %c0_62 = arith.constant 0 : index
    %c0_63 = arith.constant 0 : index
    %184 = vector.load %arg2[%c0_60, %c2_61, %c0_62, %c0_63] : memref<4x3x96x32xbf16, #tpu.memory_space<vmem>>, vector<1x1x96x32xbf16>
    %185 = vector.shape_cast %184 : vector<1x1x96x32xbf16> to vector<96x32xbf16>
    %cst_64 = arith.constant dense<0.000000e+00> : vector<256x32xf32>
    %186 = tpu.matmul %183, %185, %cst_64 {dimension_numbers = #tpu.dot_dimension_numbers<[1], [0], [0], [1], [0, 0, 1, 1], [], []>} : vector<256x96xbf16>, vector<96x32xbf16>, vector<256x32xf32> -> vector<256x32xf32>
    %187 = arith.addf %176, %186 : vector<256x32xf32>
    %c1_65 = arith.constant 1 : index
    %c0_66 = arith.constant 0 : index
    %188 = vector.load %arg5[%c1_65, %c0_66] : memref<7x32xf32, #tpu.memory_space<vmem>>, vector<1x32xf32>
    %189 = vector.broadcast %188 : vector<1x32xf32> to vector<256x32xf32>
    %190 = arith.addf %187, %189 : vector<256x32xf32>
    %cst_67 = arith.constant 0.000000e+00 : f32
    %191 = vector.broadcast %cst_67 : f32 to vector<256x32xf32>
    %192 = arith.maximumf %190, %191 : vector<256x32xf32>
    %193 = arith.truncf %192 : vector<256x32xf32> to vector<256x32xbf16>
    %194 = vector.extract_strided_slice %8 {offsets = [0, 0], sizes = [32, 32], strides = [1, 1]} : vector<128x32xbf16> to vector<32x32xbf16>
    %cst_68 = arith.constant dense<0.000000e+00> : vector<256x32xf32>
    %195 = tpu.matmul %193, %194, %cst_68 {dimension_numbers = #tpu.dot_dimension_numbers<[1], [0], [0], [1], [0, 0, 1, 1], [], []>} : vector<256x32xbf16>, vector<32x32xbf16>, vector<256x32xf32> -> vector<256x32xf32>
    %c6_69 = arith.constant 6 : index
    %c10 = arith.constant 10 : index
    %c0_70 = arith.constant 0 : index
    %196 = vector.load %arg7[%c6_69, %c10, %c0_70] : memref<40x48x32xbf16, #tpu.memory_space<vmem>>, vector<16x16x32xbf16>
    %197 = vector.shape_cast %196 : vector<16x16x32xbf16> to vector<256x32xbf16>
    %c6_71 = arith.constant 6 : index
    %c16_72 = arith.constant 16 : index
    %c0_73 = arith.constant 0 : index
    %198 = vector.load %arg7[%c6_71, %c16_72, %c0_73] : memref<40x48x32xbf16, #tpu.memory_space<vmem>>, vector<16x16x32xbf16>
    %199 = vector.shape_cast %198 : vector<16x16x32xbf16> to vector<256x32xbf16>
    %c6_74 = arith.constant 6 : index
    %c22 = arith.constant 22 : index
    %c0_75 = arith.constant 0 : index
    %200 = vector.load %arg7[%c6_74, %c22, %c0_75] : memref<40x48x32xbf16, #tpu.memory_space<vmem>>, vector<16x16x32xbf16>
    %201 = vector.shape_cast %200 : vector<16x16x32xbf16> to vector<256x32xbf16>
    %202 = tpu.concatenate %197, %199, %201 in 1 : vector<256x32xbf16>, vector<256x32xbf16>, vector<256x32xbf16> -> vector<256x96xbf16>
    %c1_76 = arith.constant 1 : index
    %c0_77 = arith.constant 0 : index
    %c0_78 = arith.constant 0 : index
    %c0_79 = arith.constant 0 : index
    %203 = vector.load %arg2[%c1_76, %c0_77, %c0_78, %c0_79] : memref<4x3x96x32xbf16, #tpu.memory_space<vmem>>, vector<1x1x96x32xbf16>
    %204 = vector.shape_cast %203 : vector<1x1x96x32xbf16> to vector<96x32xbf16>
    %cst_80 = arith.constant dense<0.000000e+00> : vector<256x32xf32>
    %205 = tpu.matmul %202, %204, %cst_80 {dimension_numbers = #tpu.dot_dimension_numbers<[1], [0], [0], [1], [0, 0, 1, 1], [], []>} : vector<256x96xbf16>, vector<96x32xbf16>, vector<256x32xf32> -> vector<256x32xf32>
    %c12_81 = arith.constant 12 : index
    %c10_82 = arith.constant 10 : index
    %c0_83 = arith.constant 0 : index
    %206 = vector.load %arg7[%c12_81, %c10_82, %c0_83] : memref<40x48x32xbf16, #tpu.memory_space<vmem>>, vector<16x16x32xbf16>
    %207 = vector.shape_cast %206 : vector<16x16x32xbf16> to vector<256x32xbf16>
    %c12_84 = arith.constant 12 : index
    %c16_85 = arith.constant 16 : index
    %c0_86 = arith.constant 0 : index
    %208 = vector.load %arg7[%c12_84, %c16_85, %c0_86] : memref<40x48x32xbf16, #tpu.memory_space<vmem>>, vector<16x16x32xbf16>
    %209 = vector.shape_cast %208 : vector<16x16x32xbf16> to vector<256x32xbf16>
    %c12_87 = arith.constant 12 : index
    %c22_88 = arith.constant 22 : index
    %c0_89 = arith.constant 0 : index
    %210 = vector.load %arg7[%c12_87, %c22_88, %c0_89] : memref<40x48x32xbf16, #tpu.memory_space<vmem>>, vector<16x16x32xbf16>
    %211 = vector.shape_cast %210 : vector<16x16x32xbf16> to vector<256x32xbf16>
    %212 = tpu.concatenate %207, %209, %211 in 1 : vector<256x32xbf16>, vector<256x32xbf16>, vector<256x32xbf16> -> vector<256x96xbf16>
    %c1_90 = arith.constant 1 : index
    %c1_91 = arith.constant 1 : index
    %c0_92 = arith.constant 0 : index
    %c0_93 = arith.constant 0 : index
    %213 = vector.load %arg2[%c1_90, %c1_91, %c0_92, %c0_93] : memref<4x3x96x32xbf16, #tpu.memory_space<vmem>>, vector<1x1x96x32xbf16>
    %214 = vector.shape_cast %213 : vector<1x1x96x32xbf16> to vector<96x32xbf16>
    %cst_94 = arith.constant dense<0.000000e+00> : vector<256x32xf32>
    %215 = tpu.matmul %212, %214, %cst_94 {dimension_numbers = #tpu.dot_dimension_numbers<[1], [0], [0], [1], [0, 0, 1, 1], [], []>} : vector<256x96xbf16>, vector<96x32xbf16>, vector<256x32xf32> -> vector<256x32xf32>
    %216 = arith.addf %205, %215 : vector<256x32xf32>
    %c18 = arith.constant 18 : index
    %c10_95 = arith.constant 10 : index
    %c0_96 = arith.constant 0 : index
    %217 = vector.load %arg7[%c18, %c10_95, %c0_96] : memref<40x48x32xbf16, #tpu.memory_space<vmem>>, vector<16x16x32xbf16>
    %218 = vector.shape_cast %217 : vector<16x16x32xbf16> to vector<256x32xbf16>
    %c18_97 = arith.constant 18 : index
    %c16_98 = arith.constant 16 : index
    %c0_99 = arith.constant 0 : index
    %219 = vector.load %arg7[%c18_97, %c16_98, %c0_99] : memref<40x48x32xbf16, #tpu.memory_space<vmem>>, vector<16x16x32xbf16>
    %220 = vector.shape_cast %219 : vector<16x16x32xbf16> to vector<256x32xbf16>
    %c18_100 = arith.constant 18 : index
    %c22_101 = arith.constant 22 : index
    %c0_102 = arith.constant 0 : index
    %221 = vector.load %arg7[%c18_100, %c22_101, %c0_102] : memref<40x48x32xbf16, #tpu.memory_space<vmem>>, vector<16x16x32xbf16>
    %222 = vector.shape_cast %221 : vector<16x16x32xbf16> to vector<256x32xbf16>
    %223 = tpu.concatenate %218, %220, %222 in 1 : vector<256x32xbf16>, vector<256x32xbf16>, vector<256x32xbf16> -> vector<256x96xbf16>
    %c1_103 = arith.constant 1 : index
    %c2_104 = arith.constant 2 : index
    %c0_105 = arith.constant 0 : index
    %c0_106 = arith.constant 0 : index
    %224 = vector.load %arg2[%c1_103, %c2_104, %c0_105, %c0_106] : memref<4x3x96x32xbf16, #tpu.memory_space<vmem>>, vector<1x1x96x32xbf16>
    %225 = vector.shape_cast %224 : vector<1x1x96x32xbf16> to vector<96x32xbf16>
    %cst_107 = arith.constant dense<0.000000e+00> : vector<256x32xf32>
    %226 = tpu.matmul %223, %225, %cst_107 {dimension_numbers = #tpu.dot_dimension_numbers<[1], [0], [0], [1], [0, 0, 1, 1], [], []>} : vector<256x96xbf16>, vector<96x32xbf16>, vector<256x32xf32> -> vector<256x32xf32>
    %227 = arith.addf %216, %226 : vector<256x32xf32>
    %c2_108 = arith.constant 2 : index
    %c0_109 = arith.constant 0 : index
    %228 = vector.load %arg5[%c2_108, %c0_109] : memref<7x32xf32, #tpu.memory_space<vmem>>, vector<1x32xf32>
    %229 = vector.broadcast %228 : vector<1x32xf32> to vector<256x32xf32>
    %230 = arith.addf %227, %229 : vector<256x32xf32>
    %cst_110 = arith.constant 0.000000e+00 : f32
    %231 = vector.broadcast %cst_110 : f32 to vector<256x32xf32>
    %232 = arith.maximumf %230, %231 : vector<256x32xf32>
    %233 = arith.truncf %232 : vector<256x32xf32> to vector<256x32xbf16>
    %234 = vector.extract_strided_slice %8 {offsets = [32, 0], sizes = [32, 32], strides = [1, 1]} : vector<128x32xbf16> to vector<32x32xbf16>
    %cst_111 = arith.constant dense<0.000000e+00> : vector<256x32xf32>
    %235 = tpu.matmul %233, %234, %cst_111 {dimension_numbers = #tpu.dot_dimension_numbers<[1], [0], [0], [1], [0, 0, 1, 1], [], []>} : vector<256x32xbf16>, vector<32x32xbf16>, vector<256x32xf32> -> vector<256x32xf32>
    %236 = arith.addf %195, %235 : vector<256x32xf32>
    %c0_112 = arith.constant 0 : index
    %c4 = arith.constant 4 : index
    %c0_113 = arith.constant 0 : index
    %237 = vector.load %arg7[%c0_112, %c4, %c0_113] : memref<40x48x32xbf16, #tpu.memory_space<vmem>>, vector<16x16x32xbf16>
    %238 = vector.shape_cast %237 : vector<16x16x32xbf16> to vector<256x32xbf16>
    %c0_114 = arith.constant 0 : index
    %c16_115 = arith.constant 16 : index
    %c0_116 = arith.constant 0 : index
    %239 = vector.load %arg7[%c0_114, %c16_115, %c0_116] : memref<40x48x32xbf16, #tpu.memory_space<vmem>>, vector<16x16x32xbf16>
    %240 = vector.shape_cast %239 : vector<16x16x32xbf16> to vector<256x32xbf16>
    %c0_117 = arith.constant 0 : index
    %c28 = arith.constant 28 : index
    %c0_118 = arith.constant 0 : index
    %241 = vector.load %arg7[%c0_117, %c28, %c0_118] : memref<40x48x32xbf16, #tpu.memory_space<vmem>>, vector<16x16x32xbf16>
    %242 = vector.shape_cast %241 : vector<16x16x32xbf16> to vector<256x32xbf16>
    %243 = tpu.concatenate %238, %240, %242 in 1 : vector<256x32xbf16>, vector<256x32xbf16>, vector<256x32xbf16> -> vector<256x96xbf16>
    %c2_119 = arith.constant 2 : index
    %c0_120 = arith.constant 0 : index
    %c0_121 = arith.constant 0 : index
    %c0_122 = arith.constant 0 : index
    %244 = vector.load %arg2[%c2_119, %c0_120, %c0_121, %c0_122] : memref<4x3x96x32xbf16, #tpu.memory_space<vmem>>, vector<1x1x96x32xbf16>
    %245 = vector.shape_cast %244 : vector<1x1x96x32xbf16> to vector<96x32xbf16>
    %cst_123 = arith.constant dense<0.000000e+00> : vector<256x32xf32>
    %246 = tpu.matmul %243, %245, %cst_123 {dimension_numbers = #tpu.dot_dimension_numbers<[1], [0], [0], [1], [0, 0, 1, 1], [], []>} : vector<256x96xbf16>, vector<96x32xbf16>, vector<256x32xf32> -> vector<256x32xf32>
    %c12_124 = arith.constant 12 : index
    %c4_125 = arith.constant 4 : index
    %c0_126 = arith.constant 0 : index
    %247 = vector.load %arg7[%c12_124, %c4_125, %c0_126] : memref<40x48x32xbf16, #tpu.memory_space<vmem>>, vector<16x16x32xbf16>
    %248 = vector.shape_cast %247 : vector<16x16x32xbf16> to vector<256x32xbf16>
    %c12_127 = arith.constant 12 : index
    %c16_128 = arith.constant 16 : index
    %c0_129 = arith.constant 0 : index
    %249 = vector.load %arg7[%c12_127, %c16_128, %c0_129] : memref<40x48x32xbf16, #tpu.memory_space<vmem>>, vector<16x16x32xbf16>
    %250 = vector.shape_cast %249 : vector<16x16x32xbf16> to vector<256x32xbf16>
    %c12_130 = arith.constant 12 : index
    %c28_131 = arith.constant 28 : index
    %c0_132 = arith.constant 0 : index
    %251 = vector.load %arg7[%c12_130, %c28_131, %c0_132] : memref<40x48x32xbf16, #tpu.memory_space<vmem>>, vector<16x16x32xbf16>
    %252 = vector.shape_cast %251 : vector<16x16x32xbf16> to vector<256x32xbf16>
    %253 = tpu.concatenate %248, %250, %252 in 1 : vector<256x32xbf16>, vector<256x32xbf16>, vector<256x32xbf16> -> vector<256x96xbf16>
    %c2_133 = arith.constant 2 : index
    %c1_134 = arith.constant 1 : index
    %c0_135 = arith.constant 0 : index
    %c0_136 = arith.constant 0 : index
    %254 = vector.load %arg2[%c2_133, %c1_134, %c0_135, %c0_136] : memref<4x3x96x32xbf16, #tpu.memory_space<vmem>>, vector<1x1x96x32xbf16>
    %255 = vector.shape_cast %254 : vector<1x1x96x32xbf16> to vector<96x32xbf16>
    %cst_137 = arith.constant dense<0.000000e+00> : vector<256x32xf32>
    %256 = tpu.matmul %253, %255, %cst_137 {dimension_numbers = #tpu.dot_dimension_numbers<[1], [0], [0], [1], [0, 0, 1, 1], [], []>} : vector<256x96xbf16>, vector<96x32xbf16>, vector<256x32xf32> -> vector<256x32xf32>
    %257 = arith.addf %246, %256 : vector<256x32xf32>
    %c24 = arith.constant 24 : index
    %c4_138 = arith.constant 4 : index
    %c0_139 = arith.constant 0 : index
    %258 = vector.load %arg7[%c24, %c4_138, %c0_139] : memref<40x48x32xbf16, #tpu.memory_space<vmem>>, vector<16x16x32xbf16>
    %259 = vector.shape_cast %258 : vector<16x16x32xbf16> to vector<256x32xbf16>
    %c24_140 = arith.constant 24 : index
    %c16_141 = arith.constant 16 : index
    %c0_142 = arith.constant 0 : index
    %260 = vector.load %arg7[%c24_140, %c16_141, %c0_142] : memref<40x48x32xbf16, #tpu.memory_space<vmem>>, vector<16x16x32xbf16>
    %261 = vector.shape_cast %260 : vector<16x16x32xbf16> to vector<256x32xbf16>
    %c24_143 = arith.constant 24 : index
    %c28_144 = arith.constant 28 : index
    %c0_145 = arith.constant 0 : index
    %262 = vector.load %arg7[%c24_143, %c28_144, %c0_145] : memref<40x48x32xbf16, #tpu.memory_space<vmem>>, vector<16x16x32xbf16>
    %263 = vector.shape_cast %262 : vector<16x16x32xbf16> to vector<256x32xbf16>
    %264 = tpu.concatenate %259, %261, %263 in 1 : vector<256x32xbf16>, vector<256x32xbf16>, vector<256x32xbf16> -> vector<256x96xbf16>
    %c2_146 = arith.constant 2 : index
    %c2_147 = arith.constant 2 : index
    %c0_148 = arith.constant 0 : index
    %c0_149 = arith.constant 0 : index
    %265 = vector.load %arg2[%c2_146, %c2_147, %c0_148, %c0_149] : memref<4x3x96x32xbf16, #tpu.memory_space<vmem>>, vector<1x1x96x32xbf16>
    %266 = vector.shape_cast %265 : vector<1x1x96x32xbf16> to vector<96x32xbf16>
    %cst_150 = arith.constant dense<0.000000e+00> : vector<256x32xf32>
    %267 = tpu.matmul %264, %266, %cst_150 {dimension_numbers = #tpu.dot_dimension_numbers<[1], [0], [0], [1], [0, 0, 1, 1], [], []>} : vector<256x96xbf16>, vector<96x32xbf16>, vector<256x32xf32> -> vector<256x32xf32>
    %268 = arith.addf %257, %267 : vector<256x32xf32>
    %c3 = arith.constant 3 : index
    %c0_151 = arith.constant 0 : index
    %269 = vector.load %arg5[%c3, %c0_151] : memref<7x32xf32, #tpu.memory_space<vmem>>, vector<1x32xf32>
    %270 = vector.broadcast %269 : vector<1x32xf32> to vector<256x32xf32>
    %271 = arith.addf %268, %270 : vector<256x32xf32>
    %cst_152 = arith.constant 0.000000e+00 : f32
    %272 = vector.broadcast %cst_152 : f32 to vector<256x32xf32>
    %273 = arith.maximumf %271, %272 : vector<256x32xf32>
    %274 = arith.truncf %273 : vector<256x32xf32> to vector<256x32xbf16>
    %275 = vector.extract_strided_slice %8 {offsets = [64, 0], sizes = [32, 32], strides = [1, 1]} : vector<128x32xbf16> to vector<32x32xbf16>
    %cst_153 = arith.constant dense<0.000000e+00> : vector<256x32xf32>
    %276 = tpu.matmul %274, %275, %cst_153 {dimension_numbers = #tpu.dot_dimension_numbers<[1], [0], [0], [1], [0, 0, 1, 1], [], []>} : vector<256x32xbf16>, vector<32x32xbf16>, vector<256x32xf32> -> vector<256x32xf32>
    %277 = arith.addf %236, %276 : vector<256x32xf32>
    %c12_154 = arith.constant 12 : index
    %c16_155 = arith.constant 16 : index
    %c0_156 = arith.constant 0 : index
    %278 = vector.load %arg7[%c12_154, %c16_155, %c0_156] : memref<40x48x32xbf16, #tpu.memory_space<vmem>>, vector<16x16x32xbf16>
    %279 = vector.shape_cast %278 : vector<16x16x32xbf16> to vector<256x32xbf16>
    %c3_157 = arith.constant 3 : index
    %c1_158 = arith.constant 1 : index
    %c32 = arith.constant 32 : index
    %c0_159 = arith.constant 0 : index
    %280 = vector.load %arg2[%c3_157, %c1_158, %c32, %c0_159] : memref<4x3x96x32xbf16, #tpu.memory_space<vmem>>, vector<1x1x32x32xbf16>
    %281 = vector.shape_cast %280 : vector<1x1x32x32xbf16> to vector<32x32xbf16>
    %cst_160 = arith.constant dense<0.000000e+00> : vector<256x32xf32>
    %282 = tpu.matmul %279, %281, %cst_160 {dimension_numbers = #tpu.dot_dimension_numbers<[1], [0], [0], [1], [0, 0, 1, 1], [], []>} : vector<256x32xbf16>, vector<32x32xbf16>, vector<256x32xf32> -> vector<256x32xf32>
    %c4_161 = arith.constant 4 : index
    %c0_162 = arith.constant 0 : index
    %283 = vector.load %arg5[%c4_161, %c0_162] : memref<7x32xf32, #tpu.memory_space<vmem>>, vector<1x32xf32>
    %284 = vector.broadcast %283 : vector<1x32xf32> to vector<256x32xf32>
    %285 = arith.addf %282, %284 : vector<256x32xf32>
    %cst_163 = arith.constant 0.000000e+00 : f32
    %286 = vector.broadcast %cst_163 : f32 to vector<256x32xf32>
    %287 = arith.maximumf %285, %286 : vector<256x32xf32>
    %288 = arith.truncf %287 : vector<256x32xf32> to vector<256x32xbf16>
    %289 = vector.extract_strided_slice %8 {offsets = [96, 0], sizes = [32, 32], strides = [1, 1]} : vector<128x32xbf16> to vector<32x32xbf16>
    %cst_164 = arith.constant dense<0.000000e+00> : vector<256x32xf32>
    %290 = tpu.matmul %288, %289, %cst_164 {dimension_numbers = #tpu.dot_dimension_numbers<[1], [0], [0], [1], [0, 0, 1, 1], [], []>} : vector<256x32xbf16>, vector<32x32xbf16>, vector<256x32xf32> -> vector<256x32xf32>
    %291 = arith.addf %277, %290 : vector<256x32xf32>
    %292 = vector.broadcast %12 : vector<1x32xf32> to vector<256x32xf32>
    %293 = arith.addf %291, %292 : vector<256x32xf32>
    %294 = vector.shape_cast %293 : vector<256x32xf32> to vector<16x16x32xf32>
    %295 = tpu.concatenate %294, %294, %294, %294 in 2 : vector<16x16x32xf32>, vector<16x16x32xf32>, vector<16x16x32xf32>, vector<16x16x32xf32> -> vector<16x16x128xf32>
    %296 = vector.extract_strided_slice %153 {offsets = [0, 0, 0], sizes = [4, 1, 128], strides = [1, 1, 1]} : vector<4x16x128xf32> to vector<4x1x128xf32>
    %297 = vector.extract_strided_slice %295 {offsets = [0, 0, 0], sizes = [1, 16, 128], strides = [1, 1, 1]} : vector<16x16x128xf32> to vector<1x16x128xf32>
    %298 = vector.broadcast %296 : vector<4x1x128xf32> to vector<4x16x128xf32>
    %299 = vector.broadcast %297 : vector<1x16x128xf32> to vector<4x16x128xf32>
    %300 = arith.mulf %298, %299 : vector<4x16x128xf32>
    %301 = vector.extract_strided_slice %153 {offsets = [0, 1, 0], sizes = [4, 1, 128], strides = [1, 1, 1]} : vector<4x16x128xf32> to vector<4x1x128xf32>
    %302 = vector.extract_strided_slice %295 {offsets = [1, 0, 0], sizes = [1, 16, 128], strides = [1, 1, 1]} : vector<16x16x128xf32> to vector<1x16x128xf32>
    %303 = vector.broadcast %301 : vector<4x1x128xf32> to vector<4x16x128xf32>
    %304 = vector.broadcast %302 : vector<1x16x128xf32> to vector<4x16x128xf32>
    %305 = arith.mulf %303, %304 : vector<4x16x128xf32>
    %306 = arith.addf %300, %305 : vector<4x16x128xf32>
    %307 = vector.extract_strided_slice %153 {offsets = [0, 2, 0], sizes = [4, 1, 128], strides = [1, 1, 1]} : vector<4x16x128xf32> to vector<4x1x128xf32>
    %308 = vector.extract_strided_slice %295 {offsets = [2, 0, 0], sizes = [1, 16, 128], strides = [1, 1, 1]} : vector<16x16x128xf32> to vector<1x16x128xf32>
    %309 = vector.broadcast %307 : vector<4x1x128xf32> to vector<4x16x128xf32>
    %310 = vector.broadcast %308 : vector<1x16x128xf32> to vector<4x16x128xf32>
    %311 = arith.mulf %309, %310 : vector<4x16x128xf32>
    %312 = arith.addf %306, %311 : vector<4x16x128xf32>
    %313 = vector.extract_strided_slice %153 {offsets = [0, 3, 0], sizes = [4, 1, 128], strides = [1, 1, 1]} : vector<4x16x128xf32> to vector<4x1x128xf32>
    %314 = vector.extract_strided_slice %295 {offsets = [3, 0, 0], sizes = [1, 16, 128], strides = [1, 1, 1]} : vector<16x16x128xf32> to vector<1x16x128xf32>
    %315 = vector.broadcast %313 : vector<4x1x128xf32> to vector<4x16x128xf32>
    %316 = vector.broadcast %314 : vector<1x16x128xf32> to vector<4x16x128xf32>
    %317 = arith.mulf %315, %316 : vector<4x16x128xf32>
    %318 = arith.addf %312, %317 : vector<4x16x128xf32>
    %319 = vector.extract_strided_slice %153 {offsets = [0, 4, 0], sizes = [4, 1, 128], strides = [1, 1, 1]} : vector<4x16x128xf32> to vector<4x1x128xf32>
    %320 = vector.extract_strided_slice %295 {offsets = [4, 0, 0], sizes = [1, 16, 128], strides = [1, 1, 1]} : vector<16x16x128xf32> to vector<1x16x128xf32>
    %321 = vector.broadcast %319 : vector<4x1x128xf32> to vector<4x16x128xf32>
    %322 = vector.broadcast %320 : vector<1x16x128xf32> to vector<4x16x128xf32>
    %323 = arith.mulf %321, %322 : vector<4x16x128xf32>
    %324 = arith.addf %318, %323 : vector<4x16x128xf32>
    %325 = vector.extract_strided_slice %153 {offsets = [0, 5, 0], sizes = [4, 1, 128], strides = [1, 1, 1]} : vector<4x16x128xf32> to vector<4x1x128xf32>
    %326 = vector.extract_strided_slice %295 {offsets = [5, 0, 0], sizes = [1, 16, 128], strides = [1, 1, 1]} : vector<16x16x128xf32> to vector<1x16x128xf32>
    %327 = vector.broadcast %325 : vector<4x1x128xf32> to vector<4x16x128xf32>
    %328 = vector.broadcast %326 : vector<1x16x128xf32> to vector<4x16x128xf32>
    %329 = arith.mulf %327, %328 : vector<4x16x128xf32>
    %330 = arith.addf %324, %329 : vector<4x16x128xf32>
    %331 = vector.extract_strided_slice %153 {offsets = [0, 6, 0], sizes = [4, 1, 128], strides = [1, 1, 1]} : vector<4x16x128xf32> to vector<4x1x128xf32>
    %332 = vector.extract_strided_slice %295 {offsets = [6, 0, 0], sizes = [1, 16, 128], strides = [1, 1, 1]} : vector<16x16x128xf32> to vector<1x16x128xf32>
    %333 = vector.broadcast %331 : vector<4x1x128xf32> to vector<4x16x128xf32>
    %334 = vector.broadcast %332 : vector<1x16x128xf32> to vector<4x16x128xf32>
    %335 = arith.mulf %333, %334 : vector<4x16x128xf32>
    %336 = arith.addf %330, %335 : vector<4x16x128xf32>
    %337 = vector.extract_strided_slice %153 {offsets = [0, 7, 0], sizes = [4, 1, 128], strides = [1, 1, 1]} : vector<4x16x128xf32> to vector<4x1x128xf32>
    %338 = vector.extract_strided_slice %295 {offsets = [7, 0, 0], sizes = [1, 16, 128], strides = [1, 1, 1]} : vector<16x16x128xf32> to vector<1x16x128xf32>
    %339 = vector.broadcast %337 : vector<4x1x128xf32> to vector<4x16x128xf32>
    %340 = vector.broadcast %338 : vector<1x16x128xf32> to vector<4x16x128xf32>
    %341 = arith.mulf %339, %340 : vector<4x16x128xf32>
    %342 = arith.addf %336, %341 : vector<4x16x128xf32>
    %343 = vector.extract_strided_slice %153 {offsets = [0, 8, 0], sizes = [4, 1, 128], strides = [1, 1, 1]} : vector<4x16x128xf32> to vector<4x1x128xf32>
    %344 = vector.extract_strided_slice %295 {offsets = [8, 0, 0], sizes = [1, 16, 128], strides = [1, 1, 1]} : vector<16x16x128xf32> to vector<1x16x128xf32>
    %345 = vector.broadcast %343 : vector<4x1x128xf32> to vector<4x16x128xf32>
    %346 = vector.broadcast %344 : vector<1x16x128xf32> to vector<4x16x128xf32>
    %347 = arith.mulf %345, %346 : vector<4x16x128xf32>
    %348 = arith.addf %342, %347 : vector<4x16x128xf32>
    %349 = vector.extract_strided_slice %153 {offsets = [0, 9, 0], sizes = [4, 1, 128], strides = [1, 1, 1]} : vector<4x16x128xf32> to vector<4x1x128xf32>
    %350 = vector.extract_strided_slice %295 {offsets = [9, 0, 0], sizes = [1, 16, 128], strides = [1, 1, 1]} : vector<16x16x128xf32> to vector<1x16x128xf32>
    %351 = vector.broadcast %349 : vector<4x1x128xf32> to vector<4x16x128xf32>
    %352 = vector.broadcast %350 : vector<1x16x128xf32> to vector<4x16x128xf32>
    %353 = arith.mulf %351, %352 : vector<4x16x128xf32>
    %354 = arith.addf %348, %353 : vector<4x16x128xf32>
    %355 = vector.extract_strided_slice %153 {offsets = [0, 10, 0], sizes = [4, 1, 128], strides = [1, 1, 1]} : vector<4x16x128xf32> to vector<4x1x128xf32>
    %356 = vector.extract_strided_slice %295 {offsets = [10, 0, 0], sizes = [1, 16, 128], strides = [1, 1, 1]} : vector<16x16x128xf32> to vector<1x16x128xf32>
    %357 = vector.broadcast %355 : vector<4x1x128xf32> to vector<4x16x128xf32>
    %358 = vector.broadcast %356 : vector<1x16x128xf32> to vector<4x16x128xf32>
    %359 = arith.mulf %357, %358 : vector<4x16x128xf32>
    %360 = arith.addf %354, %359 : vector<4x16x128xf32>
    %361 = vector.extract_strided_slice %153 {offsets = [0, 11, 0], sizes = [4, 1, 128], strides = [1, 1, 1]} : vector<4x16x128xf32> to vector<4x1x128xf32>
    %362 = vector.extract_strided_slice %295 {offsets = [11, 0, 0], sizes = [1, 16, 128], strides = [1, 1, 1]} : vector<16x16x128xf32> to vector<1x16x128xf32>
    %363 = vector.broadcast %361 : vector<4x1x128xf32> to vector<4x16x128xf32>
    %364 = vector.broadcast %362 : vector<1x16x128xf32> to vector<4x16x128xf32>
    %365 = arith.mulf %363, %364 : vector<4x16x128xf32>
    %366 = arith.addf %360, %365 : vector<4x16x128xf32>
    %367 = vector.extract_strided_slice %153 {offsets = [0, 12, 0], sizes = [4, 1, 128], strides = [1, 1, 1]} : vector<4x16x128xf32> to vector<4x1x128xf32>
    %368 = vector.extract_strided_slice %295 {offsets = [12, 0, 0], sizes = [1, 16, 128], strides = [1, 1, 1]} : vector<16x16x128xf32> to vector<1x16x128xf32>
    %369 = vector.broadcast %367 : vector<4x1x128xf32> to vector<4x16x128xf32>
    %370 = vector.broadcast %368 : vector<1x16x128xf32> to vector<4x16x128xf32>
    %371 = arith.mulf %369, %370 : vector<4x16x128xf32>
    %372 = arith.addf %366, %371 : vector<4x16x128xf32>
    %373 = vector.extract_strided_slice %153 {offsets = [0, 13, 0], sizes = [4, 1, 128], strides = [1, 1, 1]} : vector<4x16x128xf32> to vector<4x1x128xf32>
    %374 = vector.extract_strided_slice %295 {offsets = [13, 0, 0], sizes = [1, 16, 128], strides = [1, 1, 1]} : vector<16x16x128xf32> to vector<1x16x128xf32>
    %375 = vector.broadcast %373 : vector<4x1x128xf32> to vector<4x16x128xf32>
    %376 = vector.broadcast %374 : vector<1x16x128xf32> to vector<4x16x128xf32>
    %377 = arith.mulf %375, %376 : vector<4x16x128xf32>
    %378 = arith.addf %372, %377 : vector<4x16x128xf32>
    %379 = vector.extract_strided_slice %153 {offsets = [0, 14, 0], sizes = [4, 1, 128], strides = [1, 1, 1]} : vector<4x16x128xf32> to vector<4x1x128xf32>
    %380 = vector.extract_strided_slice %295 {offsets = [14, 0, 0], sizes = [1, 16, 128], strides = [1, 1, 1]} : vector<16x16x128xf32> to vector<1x16x128xf32>
    %381 = vector.broadcast %379 : vector<4x1x128xf32> to vector<4x16x128xf32>
    %382 = vector.broadcast %380 : vector<1x16x128xf32> to vector<4x16x128xf32>
    %383 = arith.mulf %381, %382 : vector<4x16x128xf32>
    %384 = arith.addf %378, %383 : vector<4x16x128xf32>
    %385 = vector.extract_strided_slice %153 {offsets = [0, 15, 0], sizes = [4, 1, 128], strides = [1, 1, 1]} : vector<4x16x128xf32> to vector<4x1x128xf32>
    %386 = vector.extract_strided_slice %295 {offsets = [15, 0, 0], sizes = [1, 16, 128], strides = [1, 1, 1]} : vector<16x16x128xf32> to vector<1x16x128xf32>
    %387 = vector.broadcast %385 : vector<4x1x128xf32> to vector<4x16x128xf32>
    %388 = vector.broadcast %386 : vector<1x16x128xf32> to vector<4x16x128xf32>
    %389 = arith.mulf %387, %388 : vector<4x16x128xf32>
    %390 = arith.addf %384, %389 : vector<4x16x128xf32>
    %391 = tpu.reciprocal %155 {approx = true} : vector<4x1x128xf32> -> vector<4x1x128xf32>
    %392 = vector.broadcast %391 : vector<4x1x128xf32> to vector<4x16x128xf32>
    %393 = arith.mulf %390, %392 : vector<4x16x128xf32>
    %394 = vector.extract_strided_slice %393 {offsets = [0, 0, 0], sizes = [4, 16, 32], strides = [1, 1, 1]} : vector<4x16x128xf32> to vector<4x16x32xf32>
    %395 = vector.extract_strided_slice %393 {offsets = [0, 0, 32], sizes = [4, 16, 32], strides = [1, 1, 1]} : vector<4x16x128xf32> to vector<4x16x32xf32>
    %396 = vector.extract_strided_slice %393 {offsets = [0, 0, 64], sizes = [4, 16, 32], strides = [1, 1, 1]} : vector<4x16x128xf32> to vector<4x16x32xf32>
    %397 = vector.extract_strided_slice %393 {offsets = [0, 0, 96], sizes = [4, 16, 32], strides = [1, 1, 1]} : vector<4x16x128xf32> to vector<4x16x32xf32>
    %398 = tpu.concatenate %394, %395, %396, %397 in 0 : vector<4x16x32xf32>, vector<4x16x32xf32>, vector<4x16x32xf32>, vector<4x16x32xf32> -> vector<16x16x32xf32>
    %399 = vector.shape_cast %398 : vector<16x16x32xf32> to vector<256x32xf32>
    %c0_165 = arith.constant 0 : index
    %c0_166 = arith.constant 0 : index
    %c0_167 = arith.constant 0 : index
    %c0_168 = arith.constant 0 : index
    %400 = vector.load %arg1[%c0_165, %c0_166, %c0_167, %c0_168] : memref<1x16x16x32xf32, #tpu.memory_space<vmem>>, vector<1x16x16x32xf32>
    %401 = vector.shape_cast %400 : vector<1x16x16x32xf32> to vector<16x16x32xf32>
    %402 = vector.shape_cast %401 : vector<16x16x32xf32> to vector<256x32xf32>
    %403 = arith.truncf %399 : vector<256x32xf32> to vector<256x32xbf16>
    %cst_169 = arith.constant dense<0.000000e+00> : vector<256x32xf32>
    %404 = tpu.matmul %403, %10, %cst_169 {dimension_numbers = #tpu.dot_dimension_numbers<[1], [0], [0], [1], [0, 0, 1, 1], [], []>} : vector<256x32xbf16>, vector<32x32xbf16>, vector<256x32xf32> -> vector<256x32xf32>
    %405 = vector.broadcast %13 : vector<1x32xf32> to vector<256x32xf32>
    %406 = arith.addf %404, %405 : vector<256x32xf32>
    %407 = arith.addf %406, %402 : vector<256x32xf32>
    %408 = vector.shape_cast %407 : vector<256x32xf32> to vector<16x16x32xf32>
    %c0_170 = arith.constant 0 : index
    %c0_171 = arith.constant 0 : index
    %c0_172 = arith.constant 0 : index
    %c0_173 = arith.constant 0 : index
    %409 = vector.load %arg6[%c0_170, %c0_171, %c0_172, %c0_173] : memref<1x16x16x32xf32, #tpu.memory_space<vmem>>, vector<1x16x16x32xf32>
    %410 = vector.shape_cast %409 : vector<1x16x16x32xf32> to vector<16x16x32xf32>
    %411 = vector.shape_cast %408 : vector<16x16x32xf32> to vector<1x16x16x32xf32>
    tpu.vector_store %arg6[%c0_170, %c0_171, %c0_172, %c0_173], %411 {strides = array<i32>} : memref<1x16x16x32xf32, #tpu.memory_space<vmem>>, vector<1x16x16x32xf32>,
    return
  }
  func.func @transform_0(%arg0: i32) -> (i32, i32, i32, i32) {
    %c0_i32 = arith.constant 0 : i32
    %c0_i32_0 = arith.constant 0 : i32
    %c0_i32_1 = arith.constant 0 : i32
    %c0_i32_2 = arith.constant 0 : i32
    return %arg0, %c0_i32, %c0_i32_0, %c0_i32_1 : i32, i32, i32, i32
  }
  func.func @transform_1(%arg0: i32) -> (i32, i32, i32, i32) {
    %c0_i32 = arith.constant 0 : i32
    %c0_i32_0 = arith.constant 0 : i32
    %c0_i32_1 = arith.constant 0 : i32
    %c0_i32_2 = arith.constant 0 : i32
    %c0_i32_3 = arith.constant 0 : i32
    return %c0_i32, %c0_i32_0, %c0_i32_1, %c0_i32_2 : i32, i32, i32, i32
  }
  func.func @transform_2(%arg0: i32) -> (i32, i32) {
    %c0_i32 = arith.constant 0 : i32
    %c0_i32_0 = arith.constant 0 : i32
    %c0_i32_1 = arith.constant 0 : i32
    return %c0_i32, %c0_i32_0 : i32, i32
  }
  func.func @transform_3(%arg0: i32) -> (i32, i32) {
    %c0_i32 = arith.constant 0 : i32
    %c0_i32_0 = arith.constant 0 : i32
    %c0_i32_1 = arith.constant 0 : i32
    return %c0_i32, %c0_i32_0 : i32, i32
  }
  func.func @transform_4(%arg0: i32) -> (i32, i32) {
    %c0_i32 = arith.constant 0 : i32
    %c0_i32_0 = arith.constant 0 : i32
    %c0_i32_1 = arith.constant 0 : i32
    return %c0_i32, %c0_i32_0 : i32, i32
  }
  func.func @transform_5(%arg0: i32) -> (i32, i32, i32, i32) {
    %c0_i32 = arith.constant 0 : i32
    %c0_i32_0 = arith.constant 0 : i32
    %c0_i32_1 = arith.constant 0 : i32
    %c0_i32_2 = arith.constant 0 : i32
    return %arg0, %c0_i32, %c0_i32_0, %c0_i32_1 : i32, i32, i32, i32
  }
}

</mosaic_0001>

<bundles_post_ra>
// kernel: modulator_forward.1
= control target key start
LH: loop header
LB: loop body
LE: loop exit
PB: predicated region body
PF: predicated region fallthrough
CT: control target
= control target key end

     0   :  { %10 = vsyncpa [#allocation4], 0  ;;  %s18895_s0 = inlined_call_operand.vmem [shape: f32[2,16,16,32], index: 0, kind: input, shape index: {}]   ;;  %s18896_s1 = inlined_call_operand.vmem [shape: bf16[4,3,96,32], index: 1, kind: input, shape index: {}]   ;;  %s18897_s2 = inlined_call_operand.vmem [shape: bf16[192,32], index: 2, kind: input, shape index: {}]   ;;  %s18898_s3 = inlined_call_operand.vmem [shape: f32[4,32], index: 3, kind: input, shape index: {}]   ;;  %s18899_s4 = inlined_call_operand.vmem [shape: f32[7,32], index: 4, kind: input, shape index: {}]   ;;  %s18900_s5 = inlined_call_operand.hbm [shape: f32[2,16,16,32], index: 5, kind: output, shape index: {}]  }
   0x1   :  { %12 = vsyncpa [#allocation4 + $0x1], 0  ;;  %s13422_s18 = smov 0   ;;  %s13424_s19 = smov 0  }
   0x2   :  { %s13426_s20 = smov 0   ;;  %s13428_s21 = smov 0  }
   0x3 LB: > { %s13443_s22 = sadd.s32 4294967295, %s13383_s21   ;;  %s11120_s23 = sadd.s32 4294967294, %s13383_s21   ;;  %s13383_s21 = sphi %s13428_s21, %s19513_s21   ;;  %s13379_s20 = sphi %s13426_s20, %s19512_s20   ;;  %s13375_s19 = sphi %s13424_s19, %s19511_s19   ;;  %s13371_s18 = sphi %s13422_s18, %s19510_s18  }
   0x4   : > { %s13447_s24 = sadd.s32 1, %s13383_s21   ;;  %s135_s25 = sadd.s32 1, %s13379_s20 }
   0x5   : > { %s132_s26 = ssub.s32 %s13383_s21, %s13447_s24  ;;  %p145_p0 = scmp.ne.s32.totalorder %s13379_s20, %s13375_s19 }
   0x6   : > { %p133_p1 = scmp.eq.s32.totalorder %s132_s26, 0  ;;  %p146_p2 = scmp.eq.s32.totalorder %s13443_s22, 1 }
   0x7   : > { %p151_p3 = scmp.ne.s32.totalorder %s13375_s19, %s13371_s18  ;;  %p152_p4 = scmp.eq.s32.totalorder %s11120_s23, 1 }
   0x8   : > { %s13458_s27 = scalar_select %p133_p1, %s13379_s20, %s135_s25  }
   0x9   : > { %p13460_p5 = por %p146_p2, %p145_p0  ;;  %p13464_p6 = por %p152_p4, %p151_p3 }
   0xa   : > { %p11123_p7 = scmp.ge.s32.totalorder %s13383_s21, 1  ;;  %p190_p8 = scmp.lt.s32.totalorder %s13383_s21, 3 }
   0xc   : > { %p191_p9 = pnand %p11123_p7, %p190_p8 }
   0xe   : > { %194 = sbr.rel (%p191_p9) target bundleno = 2097 (0x831), region = 40 }
  0x15   : > { %p218_p10 = scmp.lt.s32.totalorder %s13443_s22, 1  ;;  %vm272_vm0 = vcmask 261120   ;;  %v13474_v0 = vld [vmem:[%s18897_s2 + $0x40] sm:$0xff]   ;;  %v13385_v1 = vmov 0   ;;  %v12968_v2 = vld [vmem:[%s18897_s2 + $0x48] sm:$0xff]   ;;  %v12971_v26 = vld [vmem:[%s18896_s1 + $0xd0] sm:$0xff]  }
  0x16   : > { %319 = vst.msk [vmem:[#allocation2 + $0x170] sm:$0xff] %vm272_vm0, %v13385_v1  ;;  %273 = vst.msk [vmem:[#allocation2] sm:$0xff] %vm272_vm0, %v13385_v1  ;;  %11922 = vmatprep.subr.bf16.mxu0 %v13474_v0  ;;  %v12969_v3 = vld [vmem:[%s18896_s1 + $0xc0] sm:$0xff]   ;;  %v12970_v18 = vld [vmem:[%s18896_s1 + $0xc8] sm:$0xff]   ;;  %vm4709_vm1 = vcmask 1044480   ;;  %s13386_s26 = smov 32  }
  0x17   : > { %274 = vst.msk [vmem:[#allocation2 + $0x8] sm:$0xff] %vm272_vm0, %v13385_v1  ;;  %275 = vst.msk [vmem:[#allocation2 + $0x10] sm:$0xff] %vm272_vm0, %v13385_v1  ;;  %s219_s9 = scalar_select %p218_p10, %s13443_s22, 1  ;;  %11923 = vmatpush3.bf16.msra.mxu0 %v13474_v0  ;;  %vm4580_vm2 = vcmask 1042432   ;;  %vm1115_vm3 = vcmask 523264   ;;  %vm1124_vm4 = vcmask 785408  }
  0x18   : > { %276 = vst.msk [vmem:[#allocation2 + $0x18] sm:$0xff] %vm272_vm0, %v13385_v1  ;;  %277 = vst.msk [vmem:[#allocation2 + $0x20] sm:$0xff] %vm272_vm0, %v13385_v1  ;;  %11924 = vmatprep.subr.bf16.mxu0 %v12968_v2  ;;  %s13387_s30 = smov 64   ;;  %vm2375_vm5 = vsmask.f32 7424  ;;  %vm7117_vm6 = vcmask 1041408  }
  0x19   : > { %278 = vst.msk [vmem:[#allocation2 + $0x28] sm:$0xff] %vm272_vm0, %v13385_v1  ;;  %279 = vst.msk [vmem:[#allocation2 + $0x30] sm:$0xff] %vm272_vm0, %v13385_v1  ;;  %s11596_s10 = sshll.u32 %s219_s9, 8  ;;  %vm2166_vm7 = vsmask.f32 256  ;;  %vm6988_vm8 = vcmask 1045504  }
  0x1a   : > { %280 = vst.msk [vmem:[#allocation2 + $0x38] sm:$0xff] %vm272_vm0, %v13385_v1  ;;  %281 = vst.msk [vmem:[#allocation2 + $0x40] sm:$0xff] %vm272_vm0, %v13385_v1  ;;  %s13730_s15 = scalar_lea.vmem %s18895_s0, %s11596_s10  ;;  %s13388_s12 = smov 96   ;;  %vm959_vm9 = vcmask 254976  }
  0x1b   : > { %282 = vst.msk [vmem:[#allocation2 + $0x48] sm:$0xff] %vm272_vm0, %v13385_v1  ;;  %283 = vst.msk [vmem:[#allocation2 + $0x50] sm:$0xff] %vm272_vm0, %v13385_v1  ;;  %v230_v4 = vld [vmem:[%s13730_s15 + $0x30] sm:$0xff]  ;;  %v231_v5 = vld [vmem:[%s13730_s15 + $0x38] sm:$0xff]  ;;  %11925 = vmatpush3.bf16.msra.mxu0 %v12968_v2  ;;  %s11597_s16 = sshll.u32 %s13443_s22, 12  ;;  %s13389_s7 = smov [#allocation3]  }
  0x1c   : > { %284 = vst.msk [vmem:[#allocation2 + $0x58] sm:$0xff] %vm272_vm0, %v13385_v1  ;;  %285 = vst.msk [vmem:[#allocation2 + $0x60] sm:$0xff] %vm272_vm0, %v13385_v1  ;;  %v224_v6 = vld [vmem:[%s13730_s15] sm:$0xff]  ;;  %v13735_v7 = vpack.c.bf16 %v231_v5, %v230_v4  ;;  %v225_v8 = vld [vmem:[%s13730_s15 + $0x8] sm:$0xff]  ;;  %12090 = vmatprep.subr.bf16.mxu0 %v12969_v3  ;;  %s18842_s6 = scalar_lea.hbm %s18900_s5, %s11597_s16  ;;  %s13325_s8 = sshll.u32 %s13389_s7, 4  ;;  %s13326_s8 = int_to_ptr.vmem [resolvable:$false] %s13325_s8 }
  0x1d   : > { %286 = vst.msk [vmem:[#allocation2 + $0x68] sm:$0xff] %vm272_vm0, %v13385_v1  ;;  %287 = vst.msk [vmem:[#allocation2 + $0x70] sm:$0xff] %vm272_vm0, %v13385_v1  ;;  %v234_v9 = vld [vmem:[%s13730_s15 + $0x50] sm:$0xff]  ;;  %v235_v10 = vld [vmem:[%s13730_s15 + $0x58] sm:$0xff]  ;;  %v256_v11 = vpack.c.bf16 %v225_v8, %v224_v6  ;;  %s13327_s9 = scalar_lea.vmem %s13326_s8, 8192 }
  0x1e   : > { %288 = vst.msk [vmem:[#allocation2 + $0x78] sm:$0xff] %vm272_vm0, %v13385_v1  ;;  %289 = vst.msk [vmem:[#allocation2 + $0x80] sm:$0xff] %vm272_vm0, %v13385_v1  ;;  %v13740_v12 = vpack.c.bf16 %v235_v10, %v234_v9  ;;  %v226_v13 = vld [vmem:[%s13730_s15 + $0x10] sm:$0xff]  ;;  %v227_v14 = vld [vmem:[%s13730_s15 + $0x18] sm:$0xff] }
  0x1f   : > { %290 = vst.msk [vmem:[#allocation2 + $0x88] sm:$0xff] %vm272_vm0, %v13385_v1  ;;  %291 = vst.msk [vmem:[#allocation2 + $0x90] sm:$0xff] %vm272_vm0, %v13385_v1  ;;  %v257_v15 = vpack.c.bf16 %v227_v14, %v226_v13  ;;  %v228_v16 = vld [vmem:[%s13730_s15 + $0x20] sm:$0xff]  ;;  %v229_v17 = vld [vmem:[%s13730_s15 + $0x28] sm:$0xff]  ;;  %11926 = vmatprep.mubr.msk.bf16.mxu0 %vm272_vm0, %v256_v11 }
  0x20   : > { %292 = vst.msk [vmem:[#allocation2 + $0x98] sm:$0xff] %vm272_vm0, %v13385_v1  ;;  %293 = vst.msk [vmem:[#allocation2 + $0xa0] sm:$0xff] %vm272_vm0, %v13385_v1  ;;  %v258_v19 = vpack.c.bf16 %v229_v17, %v228_v16  ;;  %v232_v20 = vld [vmem:[%s13730_s15 + $0x40] sm:$0xff]  ;;  %v233_v21 = vld [vmem:[%s13730_s15 + $0x48] sm:$0xff] }
  0x21   : > { %294 = vst.msk [vmem:[#allocation2 + $0xa8] sm:$0xff] %vm272_vm0, %v13385_v1  ;;  %295 = vst.msk [vmem:[#allocation2 + $0xb0] sm:$0xff] %vm272_vm0, %v13385_v1  ;;  %v260_v22 = vpack.c.bf16 %v233_v21, %v232_v20  ;;  %v238_v23 = vld [vmem:[%s13730_s15 + $0x70] sm:$0xff]  ;;  %11927 = vmatmul.mubr.msk.bf16.vlgmr.msra.gmra.mrb[0].mxu0 %vm272_vm0, %v257_v15  ;;  %v239_v24 = vld [vmem:[%s13730_s15 + $0x78] sm:$0xff] }
  0x22   : > { %296 = vst.msk [vmem:[#allocation2 + $0xb8] sm:$0xff] %vm272_vm0, %v13385_v1  ;;  %297 = vst.msk [vmem:[#allocation2 + $0xc0] sm:$0xff] %vm272_vm0, %v13385_v1  ;;  %11930 = vmatprep.mubr.msk.bf16.mxu0 %vm272_vm0, %v258_v19  ;;  %12091 = vmatpush3.bf16.msra.mxu0 %v12969_v3  ;;  %v236_v25 = vld [vmem:[%s13730_s15 + $0x60] sm:$0xff]  ;;  %v13768_v27 = vpack.c.bf16 %v239_v24, %v238_v23  ;;  %v237_v28 = vld [vmem:[%s13730_s15 + $0x68] sm:$0xff] }
  0x23   : > { %298 = vst.msk [vmem:[#allocation2 + $0xc8] sm:$0xff] %vm272_vm0, %v13385_v1  ;;  %299 = vst.msk [vmem:[#allocation2 + $0xd0] sm:$0xff] %vm272_vm0, %v13385_v1  ;;  %12092 = vmatprep.subr.bf16.mxu0 %v12970_v18  ;;  %v242_v29 = vld [vmem:[%s13730_s15 + $0x90] sm:$0xff]  ;;  %v13772_v31 = vpack.c.bf16 %v237_v28, %v236_v25  ;;  %v243_v32 = vld [vmem:[%s13730_s15 + $0x98] sm:$0xff] }
  0x24   : > { %300 = vst.msk [vmem:[#allocation2 + $0xd8] sm:$0xff] %vm272_vm0, %v13385_v1  ;;  %301 = vst.msk [vmem:[#allocation2 + $0xe0] sm:$0xff] %vm272_vm0, %v13385_v1  ;;  %v240_v33 = vld [vmem:[%s13730_s15 + $0x80] sm:$0xff]  ;;  %v13780_v35 = vpack.c.bf16 %v243_v32, %v242_v29  ;;  %v241_v36 = vld [vmem:[%s13730_s15 + $0x88] sm:$0xff] }
  0x25   : > { %302 = vst.msk [vmem:[#allocation2 + $0xe8] sm:$0xff] %vm272_vm0, %v13385_v1  ;;  %303 = vst.msk [vmem:[#allocation2 + $0xf0] sm:$0xff] %vm272_vm0, %v13385_v1  ;;  %v13793_v42 = vpack.c.bf16 %v241_v36, %v240_v33 }
  0x26   : > { %304 = vst.msk [vmem:[#allocation2 + $0xf8] sm:$0xff] %vm272_vm0, %v13385_v1  ;;  %305 = vst.msk [vmem:[#allocation2 + $0x100] sm:$0xff] %vm272_vm0, %v13385_v1  ;;  %12093 = vmatpush3.bf16.msra.mxu0 %v12970_v18 }
  0x27   : > { %306 = vst.msk [vmem:[#allocation2 + $0x108] sm:$0xff] %vm272_vm0, %v13385_v1  ;;  %307 = vst.msk [vmem:[#allocation2 + $0x110] sm:$0xff] %vm272_vm0, %v13385_v1  ;;  %12094 = vmatprep.subr.bf16.mxu0 %v12971_v26 }
  0x28   : > { %308 = vst.msk [vmem:[#allocation2 + $0x118] sm:$0xff] %vm272_vm0, %v13385_v1  ;;  %309 = vst.msk [vmem:[#allocation2 + $0x120] sm:$0xff] %vm272_vm0, %v13385_v1 }
  0x29   : > { %310 = vst.msk [vmem:[#allocation2 + $0x128] sm:$0xff] %vm272_vm0, %v13385_v1  ;;  %311 = vst.msk [vmem:[#allocation2 + $0x130] sm:$0xff] %vm272_vm0, %v13385_v1  ;;  %11931 = vmatmul.mubr.msk.bf16.gmra.mrb[4].mxu0 %vm272_vm0, %v13735_v7 }
  0x2a   : > { %312 = vst.msk [vmem:[#allocation2 + $0x138] sm:$0xff] %vm272_vm0, %v13385_v1  ;;  %313 = vst.msk [vmem:[#allocation2 + $0x140] sm:$0xff] %vm272_vm0, %v13385_v1  ;;  %11934 = vmatprep.mubr.msk.bf16.mxu0 %vm272_vm0, %v260_v22  ;;  %12095 = vmatpush3.bf16.msra.mxu0 %v12971_v26 }
  0x2b   : > { %314 = vst.msk [vmem:[#allocation2 + $0x148] sm:$0xff] %vm272_vm0, %v13385_v1  ;;  %315 = vst.msk [vmem:[#allocation2 + $0x150] sm:$0xff] %vm272_vm0, %v13385_v1 }
  0x2c   : > { %316 = vst.msk [vmem:[#allocation2 + $0x158] sm:$0xff] %vm272_vm0, %v13385_v1  ;;  %317 = vst.msk [vmem:[#allocation2 + $0x160] sm:$0xff] %vm272_vm0, %v13385_v1 }
  0x2d   : > { %318 = vst.msk [vmem:[#allocation2 + $0x168] sm:$0xff] %vm272_vm0, %v13385_v1  ;;  %320 = vst.msk [vmem:[#allocation2 + $0x178] sm:$0xff] %vm272_vm0, %v13385_v1 }
  0x2e   : > { %321 = vst.msk [vmem:[#allocation2 + $0x180] sm:$0xff] %vm272_vm0, %v13385_v1  ;;  %322 = vst.msk [vmem:[#allocation2 + $0x188] sm:$0xff] %vm272_vm0, %v13385_v1 }
  0x2f   : > { %323 = vst.msk [vmem:[#allocation2 + $0x190] sm:$0xff] %vm272_vm0, %v13385_v1  ;;  %324 = vst.msk [vmem:[#allocation2 + $0x198] sm:$0xff] %vm272_vm0, %v13385_v1 }
  0x30   : > { %325 = vst.msk [vmem:[#allocation2 + $0x1a0] sm:$0xff] %vm272_vm0, %v13385_v1  ;;  %326 = vst.msk [vmem:[#allocation2 + $0x1a8] sm:$0xff] %vm272_vm0, %v13385_v1  ;;  %v5044_v30 = vld [vmem:[#allocation2 + $0x130] sm:$0x7] }
  0x31   : > { %327 = vst.msk [vmem:[#allocation2 + $0x1b0] sm:$0xff] %vm272_vm0, %v13385_v1  ;;  %328 = vst.msk [vmem:[#allocation2 + $0x1b8] sm:$0xff] %vm272_vm0, %v13385_v1  ;;  %v5108_v46 = vrot.slane %v5044_v30, 3  ;;  %11935 = vmatmul.mubr.msk.bf16.gmra.mrb[8].mxu0 %vm272_vm0, %v13740_v12 }
  0x32   : > { %329 = vst.msk [vmem:[#allocation2 + $0x1c0] sm:$0xff] %vm272_vm0, %v13385_v1  ;;  %330 = vst.msk [vmem:[#allocation2 + $0x1c8] sm:$0xff] %vm272_vm0, %v13385_v1  ;;  %v5046_v47 = vld [vmem:[#allocation2 + $0x148] sm:$0x7]  ;;  %11938 = vmatprep.mubr.msk.bf16.mxu0 %vm272_vm0, %v13772_v31 }
  0x33   : > { %331 = vst.msk [vmem:[#allocation2 + $0x1d0] sm:$0xff] %vm272_vm0, %v13385_v1  ;;  %332 = vst.msk [vmem:[#allocation2 + $0x1d8] sm:$0xff] %vm272_vm0, %v13385_v1  ;;  %v5111_v59 = vrot.slane %v5046_v47, 3  ;;  %v5048_v8 = vld [vmem:[#allocation2 + $0x160] sm:$0x7]  ;;  %v246_v47 = vld [vmem:[%s13730_s15 + $0xb0] sm:$0xff] }
  0x34   : > { %333 = vst.msk [vmem:[#allocation2 + $0x1e0] sm:$0xff] %vm272_vm0, %v13385_v1  ;;  %334 = vst.msk [vmem:[#allocation2 + $0x1e8] sm:$0xff] %vm272_vm0, %v13385_v1 }
  0x35   : > { %335 = vst.msk [vmem:[#allocation2 + $0x1f0] sm:$0xff] %vm272_vm0, %v13385_v1  ;;  %336 = vst.msk [vmem:[#allocation2 + $0x1f8] sm:$0xff] %vm272_vm0, %v13385_v1 }
  0x36   : > { %337 = vst.msk [vmem:[#allocation2 + $0x200] sm:$0xff] %vm272_vm0, %v13385_v1  ;;  %338 = vst.msk [vmem:[#allocation2 + $0x208] sm:$0xff] %vm272_vm0, %v13385_v1  ;;  %v5052_v16 = vld [vmem:[#allocation2 + $0x190] sm:$0x7] }
  0x37   : > { %339 = vst.msk [vmem:[#allocation2 + $0x210] sm:$0xff] %vm272_vm0, %v13385_v1  ;;  %340 = vst.msk [vmem:[#allocation2 + $0x218] sm:$0xff] %vm272_vm0, %v13385_v1  ;;  %v5120_v32 = vrot.slane %v5052_v16, 3 }
  0x38   : > { %341 = vst.msk [vmem:[#allocation2 + $0x220] sm:$0xff] %vm272_vm0, %v13385_v1  ;;  %342 = vst.msk [vmem:[#allocation2 + $0x228] sm:$0xff] %vm272_vm0, %v13385_v1 }
  0x39   : > { %343 = vst.msk [vmem:[#allocation2 + $0x230] sm:$0xff] %vm272_vm0, %v13385_v1  ;;  %344 = vst.msk [vmem:[#allocation2 + $0x238] sm:$0xff] %vm272_vm0, %v13385_v1  ;;  %11939 = vmatmul.mubr.msk.bf16.gmra.mrb[12].mxu0 %vm272_vm0, %v13768_v27 }
  0x3a   : > { %345 = vst.msk [vmem:[#allocation2 + $0x240] sm:$0xff] %vm272_vm0, %v13385_v1  ;;  %346 = vst.msk [vmem:[#allocation2 + $0x248] sm:$0xff] %vm272_vm0, %v13385_v1  ;;  %11942 = vmatprep.mubr.msk.bf16.mxu0 %vm272_vm0, %v13793_v42 }
  0x3b   : > { %347 = vst.msk [vmem:[#allocation2 + $0x250] sm:$0xff] %vm272_vm0, %v13385_v1  ;;  %348 = vst.msk [vmem:[#allocation2 + $0x258] sm:$0xff] %vm272_vm0, %v13385_v1 }
  0x3c   : > { %349 = vst.msk [vmem:[#allocation2 + $0x260] sm:$0xff] %vm272_vm0, %v13385_v1  ;;  %350 = vst.msk [vmem:[#allocation2 + $0x268] sm:$0xff] %vm272_vm0, %v13385_v1 }
  0x3d   : > { %351 = vst.msk [vmem:[#allocation2 + $0x270] sm:$0xff] %vm272_vm0, %v13385_v1  ;;  %352 = vst.msk [vmem:[#allocation2 + $0x278] sm:$0xff] %vm272_vm0, %v13385_v1 }
  0x3e   : > { %353 = vst.msk [vmem:[#allocation2 + $0x280] sm:$0xff] %vm272_vm0, %v13385_v1  ;;  %354 = vst.msk [vmem:[#allocation2 + $0x288] sm:$0xff] %vm272_vm0, %v13385_v1 }
  0x3f   : > { %355 = vst.msk [vmem:[#allocation2 + $0x290] sm:$0xff] %vm272_vm0, %v13385_v1  ;;  %356 = vst.msk [vmem:[#allocation2 + $0x298] sm:$0xff] %vm272_vm0, %v13385_v1 }
  0x40   : > { %357 = vst.msk [vmem:[#allocation2 + $0x2a0] sm:$0xff] %vm272_vm0, %v13385_v1  ;;  %358 = vst.msk [vmem:[#allocation2 + $0x2a8] sm:$0xff] %vm272_vm0, %v13385_v1 }
  0x41   : > { %359 = vst.msk [vmem:[#allocation2 + $0x2b0] sm:$0xff] %vm272_vm0, %v13385_v1  ;;  %360 = vst.msk [vmem:[#allocation2 + $0x2b8] sm:$0xff] %vm272_vm0, %v13385_v1  ;;  %11943 = vmatmul.mubr.msk.bf16.gmra.mrb[16].mxu0 %vm272_vm0, %v13780_v35 }
  0x42   : > { %361 = vst.msk [vmem:[#allocation2 + $0x2c0] sm:$0xff] %vm272_vm0, %v13385_v1  ;;  %362 = vst.msk [vmem:[#allocation2 + $0x2c8] sm:$0xff] %vm272_vm0, %v13385_v1 }
  0x43   : > { %363 = vst.msk [vmem:[#allocation2 + $0x2d0] sm:$0xff] %vm272_vm0, %v13385_v1  ;;  %364 = vst.msk [vmem:[#allocation2 + $0x2d8] sm:$0xff] %vm272_vm0, %v13385_v1 }
  0x44   : > { %365 = vst.msk [vmem:[#allocation2 + $0x2e0] sm:$0xff] %vm272_vm0, %v13385_v1  ;;  %366 = vst.msk [vmem:[#allocation2 + $0x2e8] sm:$0xff] %vm272_vm0, %v13385_v1 }
  0x45   : > { %367 = vst.msk [vmem:[#allocation2 + $0x2f0] sm:$0xff] %vm272_vm0, %v13385_v1  ;;  %368 = vst.msk [vmem:[#allocation2 + $0x2f8] sm:$0xff] %vm272_vm0, %v13385_v1 }
  0x46   : > { %369 = vst.msk [vmem:[#allocation2 + $0x300] sm:$0xff] %vm272_vm0, %v13385_v1  ;;  %370 = vst.msk [vmem:[#allocation2 + $0x308] sm:$0xff] %vm272_vm0, %v13385_v1 }
  0x47   : > { %371 = vst.msk [vmem:[#allocation2 + $0x310] sm:$0xff] %vm272_vm0, %v13385_v1  ;;  %372 = vst.msk [vmem:[#allocation2 + $0x318] sm:$0xff] %vm272_vm0, %v13385_v1 }
  0x48   : > { %373 = vst.msk [vmem:[#allocation2 + $0x320] sm:$0xff] %vm272_vm0, %v13385_v1  ;;  %374 = vst.msk [vmem:[#allocation2 + $0x328] sm:$0xff] %vm272_vm0, %v13385_v1 }
  0x49   : > { %375 = vst.msk [vmem:[#allocation2 + $0x330] sm:$0xff] %vm272_vm0, %v13385_v1  ;;  %376 = vst.msk [vmem:[#allocation2 + $0x338] sm:$0xff] %vm272_vm0, %v13385_v1 }
  0x4a   : > { %377 = vst.msk [vmem:[#allocation2 + $0x340] sm:$0xff] %vm272_vm0, %v13385_v1  ;;  %378 = vst.msk [vmem:[#allocation2 + $0x348] sm:$0xff] %vm272_vm0, %v13385_v1 }
  0x4b   : > { %379 = vst.msk [vmem:[#allocation2 + $0x350] sm:$0xff] %vm272_vm0, %v13385_v1  ;;  %380 = vst.msk [vmem:[#allocation2 + $0x358] sm:$0xff] %vm272_vm0, %v13385_v1 }
  0x4c   : > { %381 = vst.msk [vmem:[#allocation2 + $0x360] sm:$0xff] %vm272_vm0, %v13385_v1  ;;  %382 = vst.msk [vmem:[#allocation2 + $0x368] sm:$0xff] %vm272_vm0, %v13385_v1 }
  0x4d   : > { %383 = vst.msk [vmem:[#allocation2 + $0x370] sm:$0xff] %vm272_vm0, %v13385_v1  ;;  %384 = vst.msk [vmem:[#allocation2 + $0x378] sm:$0xff] %vm272_vm0, %v13385_v1 }
  0x4e   : > { %385 = vst.msk [vmem:[#allocation2 + $0x380] sm:$0xff] %vm272_vm0, %v13385_v1  ;;  %386 = vst.msk [vmem:[#allocation2 + $0x388] sm:$0xff] %vm272_vm0, %v13385_v1 }
  0x4f   : > { %387 = vst.msk [vmem:[#allocation2 + $0x390] sm:$0xff] %vm272_vm0, %v13385_v1  ;;  %388 = vst.msk [vmem:[#allocation2 + $0x398] sm:$0xff] %vm272_vm0, %v13385_v1 }
  0x50   : > { %389 = vst.msk [vmem:[#allocation2 + $0x3a0] sm:$0xff] %vm272_vm0, %v13385_v1  ;;  %390 = vst.msk [vmem:[#allocation2 + $0x3a8] sm:$0xff] %vm272_vm0, %v13385_v1 }
  0x51   : > { %391 = vst.msk [vmem:[#allocation2 + $0x3b0] sm:$0xff] %vm272_vm0, %v13385_v1  ;;  %392 = vst.msk [vmem:[#allocation2 + $0x3b8] sm:$0xff] %vm272_vm0, %v13385_v1  ;;  %v5050_v1 = vld [vmem:[#allocation2 + $0x178] sm:$0x7] }
  0x52   : > { %397 = vst.msk [vmem:[#allocation2 + $0x170] sm:$0xff] %vm272_vm0, %v13735_v7  ;;  %394 = vst.msk [vmem:[#allocation2 + $0x128] sm:$0xff] %vm272_vm0, %v256_v11  ;;  %v5117_v10 = vrot.slane %v5050_v1, 3  ;;  %v5054_v11 = vld [vmem:[#allocation2 + $0x1a8] sm:$0x7] }
  0x53   : > { %399 = vst.msk [vmem:[#allocation2 + $0x1a0] sm:$0xff] %vm272_vm0, %v13740_v12  ;;  %395 = vst.msk [vmem:[#allocation2 + $0x140] sm:$0xff] %vm272_vm0, %v257_v15  ;;  %v5123_v30 = vrot.slane %v5054_v11, 3  ;;  %v252_v11 = vld [vmem:[%s13730_s15 + $0xe0] sm:$0xff] }
  0x54   : > { %396 = vst.msk [vmem:[#allocation2 + $0x158] sm:$0xff] %vm272_vm0, %v258_v19  ;;  %398 = vst.msk [vmem:[#allocation2 + $0x188] sm:$0xff] %vm272_vm0, %v260_v22  ;;  %v5114_v22 = vrot.slane %v5048_v8, 3  ;;  %v254_v8 = vld [vmem:[%s13730_s15 + $0xf0] sm:$0xff] }
  0x55   : > { %401 = vst.msk [vmem:[#allocation2 + $0x1d0] sm:$0xff] %vm272_vm0, %v13768_v27  ;;  %400 = vst.msk [vmem:[#allocation2 + $0x1b8] sm:$0xff] %vm272_vm0, %v13772_v31 }
  0x56   : > { %403 = vst.msk [vmem:[#allocation2 + $0x200] sm:$0xff] %vm272_vm0, %v13780_v35  ;;  %402 = vst.msk [vmem:[#allocation2 + $0x1e8] sm:$0xff] %vm272_vm0, %v13793_v42  ;;  %v12972_v42 = vld [vmem:[%s18896_s1 + $0xd8] sm:$0xff]  }
  0x57   : > { %12096 = vmatprep.subr.bf16.mxu0 %v12972_v42 }
  0x58   : > { %12097 = vmatpush3.bf16.msra.mxu0 %v12972_v42 }
  0x59   : > { %v13776_v34 = vld [vmem:[#allocation2 + $0x170] sm:$0xff]  ;;  %v13787_v39 = vld [vmem:[#allocation2 + $0x128] sm:$0xff] }
  0x5a   : > { %3034 = vrot.lane.b32.xlu1 %v13776_v34, %s13386_s26  ;;  %v18925_v37 = vshrl.u32 %v13776_v34, 16  ;;  %v18926_v38 = vshll.u32 %v13776_v34, 16  ;;  %v13789_v40 = vld [vmem:[#allocation2 + $0x1a0] sm:$0xff]  ;;  %v5043_v41 = vld [vmem:[#allocation2 + $0x128] sm:$0xf8]  ;;  %3028 = vrot.lane.b32.xlu0 %v13787_v39, %s13386_s26  ;;  %v18932_v29 = vshrl.u32 %v13787_v39, 16 }
  0x5b   : > { %v18920_v43 = vshrl.u32 %v13789_v40, 16  ;;  %v18922_v44 = vshll.u32 %v13789_v40, 16  ;;  %v13799_v45 = vld [vmem:[#allocation2 + $0x140] sm:$0xff]  ;;  %v5107_v51 = vrot.slane %v5043_v41, 3  ;;  %v13807_v52 = vld [vmem:[#allocation2 + $0x158] sm:$0xff]  ;;  %v13835_v0 = vld [vmem:[#allocation2 + $0x188] sm:$0xff] }
  0x5c   : > { %v2735_v48 = vrot.slane %v18925_v37, 7  ;;  %v18928_v49 = vshrl.u32 %v13799_v45, 16  ;;  %v2712_v50 = vshll.u32 %v13799_v45, 16  ;;  %v18927_v54 = vshrl.u32 %v13807_v52, 16  ;;  %v5045_v55 = vld [vmem:[#allocation2 + $0x140] sm:$0xf8] }
  0x5d   : > { %v2759_v53 = vrot.slane %v18920_v43, 7  ;;  %v18931_v58 = vshll.u32 %v13807_v52, 16  ;;  %v5109_v61 = vsel %vm4709_vm1, %v5107_v51, %v5108_v46  ;;  %v5110_v63 = vrot.slane %v5045_v55, 3  ;;  %v5049_v5 = vld [vmem:[#allocation2 + $0x170] sm:$0xf8]  ;;  %v13857_v19 = vld [vmem:[#allocation2 + $0x1b8] sm:$0xff] }
  0x5e   : > { %v13819_v56 = vor.u32 %v18926_v38, %v2735_v48  ;;  %3038 = vrot.lane.b32.xlu1 %v13789_v40, %s13386_s26  ;;  %v2711_v57 = vrot.slane %v18928_v49, 7  ;;  %3030 = vrot.lane.b32.xlu0 %v13799_v45, %s13386_s26  ;;  %v2723_v62 = vrot.slane %v18927_v54, 7  ;;  %v18923_v3 = vshrl.u32 %v13835_v0, 16  ;;  %v5047_v7 = vld [vmem:[#allocation2 + $0x158] sm:$0xf8]  ;;  %v13850_v13 = vld [vmem:[#allocation2 + $0x1d0] sm:$0xff] }
  0x5f   : > { %v13828_v60 = vor.u32 %v18922_v44, %v2759_v53  ;;  %v18924_v4 = vshll.u32 %v13835_v0, 16  ;;  %v5112_v14 = vsel %vm4709_vm1, %v5110_v63, %v5111_v59  ;;  %v5116_v15 = vrot.slane %v5049_v5, 3  ;;  %v5053_v23 = vld [vmem:[#allocation2 + $0x1a0] sm:$0xf8]  ;;  %v5051_v25 = vld [vmem:[#allocation2 + $0x188] sm:$0xf8] }
  0x60   : > { %v13839_v2 = vor.u32 %v2712_v50, %v2711_v57  ;;  %v13845_v6 = vor.u32 %v18931_v58, %v2723_v62  ;;  %v2747_v9 = vrot.slane %v18923_v3, 7  ;;  %v18906_v17 = vshrl.u32 %v13850_v13, 16  ;;  %v13875_v33 = vld [vmem:[#allocation2 + $0x1e8] sm:$0xff]  ;;  %v247_v48 = vld [vmem:[%s13730_s15 + $0xb8] sm:$0xff]  ;;  %v244_v51 = vld [vmem:[%s13730_s15 + $0xa0] sm:$0xff] }
  0x61   : > { %19072 = vst [vmem:[#allocation6_spill] sm:$0xff] %v13828_v60  ;;  %v18910_v18 = vshll.u32 %v13850_v13, 16  ;;  %v5113_v21 = vrot.slane %v5047_v7, 3  ;;  %v18918_v24 = vshrl.u32 %v13857_v19, 16  ;;  %v18921_v28 = vshll.u32 %v13857_v19, 16  ;;  %v250_v62 = vld [vmem:[%s13730_s15 + $0xd0] sm:$0xff] }
  0x62   : > { %5155 = vrot.lane.b32.xlu1 %v5109_v61, %s13387_s30  ;;  %3032 = vrot.lane.b32.xlu0 %v13807_v52, %s13386_s26  ;;  %v13861_v20 = vor.u32 %v18924_v4, %v2747_v9  ;;  %v2783_v26 = vrot.slane %v18906_v17, 7  ;;  %v5118_v31 = vsel %vm4709_vm1, %v5116_v15, %v5117_v10  ;;  %v5122_v36 = vrot.slane %v5053_v23, 3  ;;  %v245_v61 = vld [vmem:[%s13730_s15 + $0xa8] sm:$0xff]  ;;  %v251_v63 = vld [vmem:[%s13730_s15 + $0xd8] sm:$0xff]  ;;  %v13980_v42 = vld [vmem:[#allocation2 + $0x200] sm:$0xff] }
  0x63   : > { %v2771_v12 = vrot.slane %v18918_v24, 7  ;;  %v18901_v46 = vshrl.u32 %v13875_v33, 16  ;;  %v5115_v53 = vsel %vm4709_vm1, %v5113_v21, %v5114_v22  ;;  %v5119_v55 = vrot.slane %v5051_v25, 3  ;;  %v248_v5 = vld [vmem:[%s13730_s15 + $0xc0] sm:$0xff]  ;;  %v249_v7 = vld [vmem:[%s13730_s15 + $0xc8] sm:$0xff]  ;;  %v255_v10 = vld [vmem:[%s13730_s15 + $0xf8] sm:$0xff] }
  0x64   : > { %v13882_v41 = vor.u32 %v18910_v18, %v2783_v26  ;;  %v18908_v59 = vshll.u32 %v13875_v33, 16  ;;  %v13903_v9 = vpack.c.bf16 %v247_v48, %v246_v47  ;;  %v2700_v15 = vshll.u32 %v13787_v39, 16  ;;  %v5057_v26 = vld [vmem:[#allocation2 + $0x1d0] sm:$0xf8]  ;;  %v4675_v24 = vld [vmem:[#allocation2 + $0x200] sm:$0xf8] }
  0x65   : > { %v13891_v57 = vor.u32 %v18921_v28, %v2771_v12  ;;  %v2795_v1 = vrot.slane %v18901_v46, 7  ;;  %v5124_v16 = vsel %vm4709_vm1, %v5122_v36, %v5123_v30  ;;  %v266_v22 = vpack.c.bf16 %v245_v61, %v244_v51  ;;  %v5058_v12 = vld [vmem:[#allocation2 + $0x1d8] sm:$0x7]  ;;  %v5055_v30 = vld [vmem:[#allocation2 + $0x1b8] sm:$0xf8] }
  0x66   : > { %5157 = vrot.lane.b32.xlu1 %v5112_v14, %s13387_s30  ;;  %3036 = vrot.lane.b32.xlu0 %v13835_v0, %s13386_s26  ;;  %19073 = vst [vmem:[#allocation7_spill] sm:$0xff] %v13882_v41  ;;  %v253_v14 = vld [vmem:[%s13730_s15 + $0xe8] sm:$0xff]  ;;  %v2699_v23 = vrot.slane %v18932_v29, 7  ;;  %v5121_v25 = vsel %vm4709_vm1, %v5119_v55, %v5120_v32  ;;  %405 = vst.msk [vmem:[#allocation2 + $0x230] sm:$0xff] %vm272_vm0, %v13903_v9  ;;  %v13922_v47 = vpack.c.bf16 %v249_v7, %v248_v5  ;;  %v5056_v36 = vld [vmem:[#allocation2 + $0x1c0] sm:$0x7] }
  0x67   : > { %19074 = vst [vmem:[#allocation8_spill] sm:$0xff] %v13891_v57  ;;  %v13913_v21 = vor.u32 %v18908_v59, %v2795_v1  ;;  %404 = vst.msk [vmem:[#allocation2 + $0x218] sm:$0xff] %vm272_vm0, %v266_v22  ;;  %v13927_v48 = vpack.c.bf16 %v255_v10, %v254_v8  ;;  %v13929_v51 = vpack.c.bf16 %v253_v14, %v252_v11  ;;  %v5128_v27 = vrot.slane %v5057_v26, 3  ;;  %v5061_v5 = vld [vmem:[#allocation2 + $0x200] sm:$0xf8] }
  0x68   : > { %406 = vst.msk [vmem:[#allocation2 + $0x248] sm:$0xff] %vm272_vm0, %v13922_v47  ;;  %v5129_v32 = vrot.slane %v5058_v12, 3  ;;  %v5126_v55 = vrot.slane %v5056_v36, 3  ;;  %v13948_v61 = vor.u32 %v2700_v15, %v2699_v23  ;;  %v12973_v8 = vld [vmem:[%s18896_s1 + $0xe0] sm:$0xff]   ;;  %v5059_v11 = vld [vmem:[#allocation2 + $0x1e8] sm:$0xf8]  ;;  %11946 = vmatprep.mubr.msk.bf16.mxu0 %vm272_vm0, %v266_v22 }
  0x69   : > { %19075 = vst [vmem:[#allocation9_spill] sm:$0xff] %v13913_v21  ;;  %409 = vst.msk [vmem:[#allocation2 + $0x290] sm:$0xff] %vm272_vm0, %v13927_v48  ;;  %12098 = vmatprep.subr.bf16.mxu0 %v12973_v8  ;;  %v5134_v36 = vrot.slane %v5061_v5, 3  ;;  %v5131_v22 = vrot.slane %v5059_v11, 3  ;;  %v5066_v59 = vld [vmem:[#allocation2 + $0x238] sm:$0x7]  ;;  %11947 = vmatmul.mubr.msk.bf16.gmra.mrb[20].mxu0 %vm272_vm0, %v13903_v9 }
  0x6a   : > { %5161 = vrot.lane.b32.xlu1 %v5118_v31, %s13387_s30  ;;  %5159 = vrot.lane.b32.xlu0 %v5115_v53, %s13387_s30  ;;  %v13920_v31 = vpack.c.bf16 %v251_v63, %v250_v62  ;;  %408 = vst.msk [vmem:[#allocation2 + $0x278] sm:$0xff] %vm272_vm0, %v13929_v51  ;;  %v5125_v53 = vrot.slane %v5055_v30, 3  ;;  %v5062_v62 = vld [vmem:[#allocation2 + $0x208] sm:$0x7]  ;;  %v5060_v63 = vld [vmem:[#allocation2 + $0x1f0] sm:$0x7]  ;;  %v5130_v1 = vsel %vm4709_vm1, %v5128_v27, %v5129_v32 }
  0x6b   : > { %v12974_v30 = vld [vmem:[%s18896_s1 + $0xe8] sm:$0xff]   ;;  %v5135_v27 = vrot.slane %v5062_v62, 3  ;;  %12099 = vmatpush3.bf16.msra.mxu0 %v12973_v8  ;;  %11950 = vmatprep.mubr.msk.bf16.mxu0 %vm272_vm0, %v13922_v47  ;;  %v14044_v47 = vld [vmem:[%s18896_s1 + $0x90] sm:$0xff]   ;;  %v4934_v28 = vld [vmem:[#allocation2 + $0x140] sm:$0x1f] }
  0x6c   : > { %407 = vst.msk [vmem:[#allocation2 + $0x260] sm:$0xff] %vm272_vm0, %v13920_v31  ;;  %v5127_v10 = vsel %vm4709_vm1, %v5125_v53, %v5126_v55  ;;  %v5132_v53 = vrot.slane %v5060_v63, 3  ;;  %12100 = vmatprep.subr.bf16.mxu0 %v12974_v30  ;;  %v14149_v3 = vld [vmem:[#allocation2 + $0x168] sm:$0xe0]  ;;  %v14151_v4 = vld [vmem:[#allocation2 + $0x170] sm:$0x1f] }
  0x6d   : > { %v13955_v7 = vld [vmem:[#allocation2 + $0x230] sm:$0xff]  ;;  %v4999_v54 = vrot.slane %v4934_v28, 5  ;;  %v14386_v41 = vld [vmem:[#allocation2 + $0x1a0] sm:$0xff] }
  0x6e   : > { %5165 = vrot.lane.b32.xlu1 %v5124_v16, %s13387_s30  ;;  %5163 = vrot.lane.b32.xlu0 %v5121_v25, %s13387_s30  ;;  %v18903_v14 = vshrl.u32 %v13955_v7, 16  ;;  %v18905_v16 = vshll.u32 %v13955_v7, 16  ;;  %v13963_v23 = vld [vmem:[#allocation2 + $0x218] sm:$0xff]  ;;  %v14162_v49 = vld [vmem:[#allocation2 + $0x150] sm:$0xe0] }
  0x6f   : > { %v18904_v25 = vshrl.u32 %v13963_v23, 16  ;;  %v18911_v26 = vshll.u32 %v13963_v23, 16  ;;  %12101 = vmatpush3.bf16.msra.mxu0 %v12974_v30  ;;  %v2884_v58 = vld [vmem:[#allocation2 + $0x130] sm:$0x1] }
  0x70   : > { %v2831_v35 = vrot.slane %v18903_v14, 7  ;;  %v13999_v11 = vld [vmem:[#allocation2 + $0x290] sm:$0xff]  ;;  %12134 = vmatprep.subr.bf16.mxu0 %v14044_v47 }
  0x71   : > { %v2819_v55 = vrot.slane %v18904_v25, 7  ;;  %v18912_v14 = vshrl.u32 %v13999_v11, 16  ;;  %v14010_v25 = vld [vmem:[#allocation2 + $0x278] sm:$0xff]  ;;  %11951 = vmatmul.mubr.msk.bf16.gmra.mrb[24].mxu0 %vm272_vm0, %v13920_v31 }
  0x72   : > { %3042 = vrot.lane.b32.xlu1 %v13850_v13, %s13386_s26  ;;  %3040 = vrot.lane.b32.xlu0 %v13857_v19, %s13386_s26  ;;  %v13989_v62 = vor.u32 %v18905_v16, %v2831_v35  ;;  %v18915_v16 = vshll.u32 %v13999_v11, 16  ;;  %v18914_v17 = vshrl.u32 %v14010_v25, 16  ;;  %v18917_v18 = vshll.u32 %v14010_v25, 16 }
  0x73   : > { %v13969_v12 = vld [vmem:[#allocation2 + $0x260] sm:$0xff]  ;;  %v13997_v63 = vor.u32 %v18911_v26, %v2819_v55  ;;  %v5136_v55 = vsel %vm4709_vm1, %v5134_v36, %v5135_v27  ;;  %v2879_v30 = vrot.slane %v18912_v14, 7  ;;  %v5063_v36 = vld [vmem:[#allocation2 + $0x218] sm:$0xf8]  ;;  %11954 = vmatprep.mubr.msk.bf16.mxu0 %vm272_vm0, %v13929_v51  ;;  %v5074_v51 = vld [vmem:[#allocation2 + $0x298] sm:$0x7] }
  0x74   : > { %v18902_v32 = vshrl.u32 %v13969_v12, 16  ;;  %v18907_v46 = vshll.u32 %v13969_v12, 16  ;;  %19076 = vst [vmem:[#allocation10_spill] sm:$0xff] %v13989_v62  ;;  %v5064_v27 = vld [vmem:[#allocation2 + $0x220] sm:$0x7]  ;;  %v2867_v26 = vrot.slane %v18914_v17, 7 }
  0x75   : > { %19077 = vst [vmem:[#allocation11_spill] sm:$0xff] %v13997_v63  ;;  %v5137_v14 = vrot.slane %v5063_v36, 3 }
  0x76   : > { %5169 = vrot.lane.b32.xlu1 %v5130_v1, %s13387_s30  ;;  %5167 = vrot.lane.b32.xlu0 %v5127_v10, %s13387_s30  ;;  %v13985_v1 = vld [vmem:[#allocation2 + $0x248] sm:$0xff]  ;;  %v2855_v5 = vrot.slane %v18902_v32, 7  ;;  %v14039_v9 = vor.u32 %v18917_v18, %v2867_v26  ;;  %v5069_v26 = vld [vmem:[#allocation2 + $0x260] sm:$0xf8] }
  0x77   : > { %v18909_v8 = vshrl.u32 %v13985_v1, 16  ;;  %v18913_v10 = vshll.u32 %v13985_v1, 16  ;;  %v5146_v36 = vrot.slane %v5069_v26, 3 }
  0x78   : > { %v14005_v35 = vor.u32 %v18907_v46, %v2855_v5  ;;  %v5133_v5 = vsel %vm4709_vm1, %v5131_v22, %v5132_v53  ;;  %v5065_v46 = vld [vmem:[#allocation2 + $0x230] sm:$0xf8]  ;;  %v5141_v53 = vrot.slane %v5066_v59, 3  ;;  %19081 = vst [vmem:[#allocation15_spill] sm:$0xff] %v14039_v9 }
  0x79   : > { %v2843_v32 = vrot.slane %v18909_v8, 7  ;;  %v5140_v22 = vrot.slane %v5065_v46, 3  ;;  %11955 = vmatmul.mubr.msk.bf16.gmra.mrb[28].mxu0 %vm272_vm0, %v13927_v48 }
  0x7a   : > { %3046 = vrot.lane.b32.xlu1 %v13980_v42, %s13386_s26  ;;  %19078 = vst [vmem:[#allocation12_spill] sm:$0xff] %v14005_v35  ;;  %3044 = vrot.lane.b32.xlu0 %v13875_v33, %s13386_s26  ;;  %v14200_v35 = vld [vmem:[#allocation2 + $0x140] sm:$0xff] }
  0x7b   : > { %v14020_v8 = vor.u32 %v18913_v10, %v2843_v32  ;;  %v14034_v32 = vor.u32 %v18915_v16, %v2879_v30  ;;  %v5138_v10 = vrot.slane %v5064_v27, 3  ;;  %v5142_v46 = vsel %vm4709_vm1, %v5140_v22, %v5141_v53  ;;  %v5068_v30 = vld [vmem:[#allocation2 + $0x250] sm:$0x7]  ;;  %v4649_v16 = vld [vmem:[#allocation2 + $0xc8] sm:$0xf8] }
  0x7c   : > { %v5144_v53 = vrot.slane %v5068_v30, 3 }
  0x7d   : > { %19079 = vst [vmem:[#allocation13_spill] sm:$0xff] %v14020_v8  ;;  %19080 = vst [vmem:[#allocation14_spill] sm:$0xff] %v14034_v32  ;;  %v5139_v59 = vsel %vm4709_vm1, %v5137_v14, %v5138_v10  ;;  %v5073_v10 = vld [vmem:[#allocation2 + $0x290] sm:$0xf8] }
  0x7e   : > { %5173 = vrot.lane.b32.xlu1 %v5136_v55, %s13387_s30  ;;  %5171 = vrot.lane.b32.xlu0 %v5133_v5, %s13387_s30  ;;  %v5070_v55 = vld [vmem:[#allocation2 + $0x268] sm:$0x7]  ;;  %v5067_v5 = vld [vmem:[#allocation2 + $0x248] sm:$0xf8]  ;;  %v5152_v26 = vrot.slane %v5073_v10, 3 }
  0x7f   : > { %v5147_v27 = vrot.slane %v5070_v55, 3  ;;  %v5143_v22 = vrot.slane %v5067_v5, 3  ;;  %v5153_v55 = vrot.slane %v5074_v51, 3 }
  0x81   : > { %v5148_v31 = vsel %vm4709_vm1, %v5146_v36, %v5147_v27  ;;  %v5145_v14 = vsel %vm4709_vm1, %v5143_v22, %v5144_v53  ;;  %v5154_v36 = vsel %vm4709_vm1, %v5152_v26, %v5153_v55  ;;  %v4647_v27 = vld [vmem:[#allocation2 + $0xb0] sm:$0xf8]  ;;  %v4648_v22 = vld [vmem:[#allocation2 + $0xb8] sm:$0x7]  ;;  %v4645_v53 = vld [vmem:[#allocation2 + $0x98] sm:$0xf8] }
  0x82   : > { %3050 = vrot.lane.b32.xlu1 %v13955_v7, %s13386_s26  ;;  %3048 = vrot.lane.b32.xlu0 %v13963_v23, %s13386_s26  ;;  %v4713_v10 = vrot.slane %v4647_v27, 3  ;;  %v4714_v51 = vrot.slane %v4648_v22, 3 }
  0x84   : > { %v4715_v26 = vsel %vm4709_vm1, %v4713_v10, %v4714_v51  ;;  %v4655_v10 = vld [vmem:[#allocation2 + $0x110] sm:$0xf8] }
  0x86   : > { %5177 = vrot.lane.b32.xlu1 %v5142_v46, %s13387_s30  ;;  %5175 = vrot.lane.b32.xlu0 %v5139_v59, %s13387_s30  ;;  %v5071_v46 = vld [vmem:[#allocation2 + $0x278] sm:$0xf8]  ;;  %v5072_v59 = vld [vmem:[#allocation2 + $0x280] sm:$0x7] }
  0x87   : > { %v5149_v5 = vrot.slane %v5071_v46, 3  ;;  %v5150_v30 = vrot.slane %v5072_v59, 3  ;;  %v4629_v46 = vld [vmem:[#allocation2 + $0x98] sm:$0xff]  ;;  %v4710_v59 = vrot.slane %v4645_v53, 3  ;;  %v4631_v53 = vld [vmem:[#allocation2 + $0xc8] sm:$0xff] }
  0x89   : > { %v5151_v48 = vsel %vm4709_vm1, %v5149_v5, %v5150_v30  ;;  %v4651_v5 = vld [vmem:[#allocation2 + $0xe0] sm:$0xf8]  ;;  %v4652_v30 = vld [vmem:[#allocation2 + $0xe8] sm:$0x7] }
  0x8a   : > { %3054 = vrot.lane.b32.xlu1 %v13969_v12, %s13386_s26  ;;  %3052 = vrot.lane.b32.xlu0 %v13985_v1, %s13386_s26  ;;  %v4719_v27 = vrot.slane %v4651_v5, 3  ;;  %v4720_v22 = vrot.slane %v4652_v30, 3  ;;  %v4725_v5 = vrot.slane %v4655_v10, 3  ;;  %v4633_v30 = vld [vmem:[#allocation2 + $0xf8] sm:$0xff] }
  0x8e   : > { %5181 = vrot.lane.b32.xlu1 %v5148_v31, %s13387_s30  ;;  %5179 = vrot.lane.b32.xlu0 %v5145_v14, %s13387_s30  ;;  %v4646_v31 = vld [vmem:[#allocation2 + $0xa0] sm:$0x7]  ;;  %v4630_v14 = vld [vmem:[#allocation2 + $0xb0] sm:$0xff] }
  0x8f   : > { %v4711_v17 = vrot.slane %v4646_v31, 3  ;;  %v4716_v31 = vrot.slane %v4649_v16, 3 }
  0x91   : > { %v4712_v55 = vsel %vm4709_vm1, %v4710_v59, %v4711_v17  ;;  %v4721_v17 = vsel %vm4709_vm1, %v4719_v27, %v4720_v22  ;;  %v4653_v59 = vld [vmem:[#allocation2 + $0xf8] sm:$0xf8]  ;;  %v4659_v22 = vld [vmem:[#allocation2 + $0x140] sm:$0xf8] }
  0x92   : > { %3058 = vrot.lane.b32.xlu1 %v13999_v11, %s13386_s26  ;;  %3056 = vrot.lane.b32.xlu0 %v14010_v25, %s13386_s26  ;;  %v4731_v10 = vrot.slane %v4659_v22, 3 }
  0x96   : > { %5185 = vrot.lane.b32.xlu1 %v5154_v36, %s13387_s30  ;;  %5183 = vrot.lane.b32.xlu0 %v5151_v48, %s13387_s30  ;;  %v4650_v36 = vld [vmem:[#allocation2 + $0xd0] sm:$0x7]  ;;  %v4632_v48 = vld [vmem:[#allocation2 + $0xe0] sm:$0xff] }
  0x9a   : > { %4776 = vrot.lane.b32.xlu1 %v4630_v14, %s13386_s26  ;;  %4774 = vrot.lane.b32.xlu0 %v4629_v46, %s13386_s26  ;;  %v4717_v14 = vrot.slane %v4650_v36, 3  ;;  %v4656_v46 = vld [vmem:[#allocation2 + $0x118] sm:$0x7]  ;;  %v4722_v36 = vrot.slane %v4653_v59, 3 }
  0x9b   : > { %v4726_v16 = vrot.slane %v4656_v46, 3 }
  0x9c   : > { %v4718_v51 = vsel %vm4709_vm1, %v4716_v31, %v4717_v14  ;;  %v4660_v31 = vld [vmem:[#allocation2 + $0x148] sm:$0x7]  ;;  %v4657_v14 = vld [vmem:[#allocation2 + $0x128] sm:$0xf8] }
  0x9d   : > { %v4727_v27 = vsel %vm4709_vm1, %v4725_v5, %v4726_v16  ;;  %v4728_v46 = vrot.slane %v4657_v14, 3  ;;  %v4663_v5 = vld [vmem:[#allocation2 + $0x170] sm:$0xf8]  ;;  %v4664_v16 = vld [vmem:[#allocation2 + $0x178] sm:$0x7] }
  0x9e   : > { %4808 = vrot.lane.b32.xlu1 %v4715_v26, %s13387_s30  ;;  %4806 = vrot.lane.b32.xlu0 %v4712_v55, %s13387_s30  ;;  %v4654_v26 = vld [vmem:[#allocation2 + $0x100] sm:$0x7]  ;;  %v4634_v55 = vld [vmem:[#allocation2 + $0x110] sm:$0xff] }
  0xa2   : > { %4780 = vrot.lane.b32.xlu1 %v4632_v48, %s13386_s26  ;;  %4778 = vrot.lane.b32.xlu0 %v4631_v53, %s13386_s26  ;;  %v4723_v48 = vrot.slane %v4654_v26, 3 }
  0xa4   : > { %v4724_v53 = vsel %vm4709_vm1, %v4722_v36, %v4723_v48  ;;  %v4662_v36 = vld [vmem:[#allocation2 + $0x160] sm:$0x7]  ;;  %v4737_v48 = vrot.slane %v4663_v5, 3 }
  0xa6   : > { %4812 = vrot.lane.b32.xlu1 %v4721_v17, %s13387_s30  ;;  %4810 = vrot.lane.b32.xlu0 %v4718_v51, %s13387_s30  ;;  %v4658_v17 = vld [vmem:[#allocation2 + $0x130] sm:$0x7]  ;;  %v4732_v51 = vrot.slane %v4660_v31, 3 }
  0xa7   : > { %v4729_v59 = vrot.slane %v4658_v17, 3  ;;  %v4667_v17 = vld [vmem:[#allocation2 + $0x1a0] sm:$0xf8] }
  0xa8   : > { %v4733_v26 = vsel %vm4709_vm1, %v4731_v10, %v4732_v51  ;;  %v4668_v10 = vld [vmem:[#allocation2 + $0x1a8] sm:$0x7]  ;;  %v4665_v51 = vld [vmem:[#allocation2 + $0x188] sm:$0xf8] }
  0xaa   : > { %4784 = vrot.lane.b32.xlu1 %v4634_v55, %s13386_s26  ;;  %4782 = vrot.lane.b32.xlu0 %v4633_v30, %s13386_s26  ;;  %v4730_v55 = vsel %vm4709_vm1, %v4728_v46, %v4729_v59  ;;  %v4661_v30 = vld [vmem:[#allocation2 + $0x158] sm:$0xf8]  ;;  %v4666_v46 = vld [vmem:[#allocation2 + $0x190] sm:$0x7]  ;;  %v4743_v59 = vrot.slane %v4667_v17, 3 }
  0xab   : > { %v4734_v22 = vrot.slane %v4661_v30, 3  ;;  %v4741_v5 = vrot.slane %v4666_v46, 3 }
  0xae   : > { %4816 = vrot.lane.b32.xlu1 %v4727_v27, %s13387_s30  ;;  %4814 = vrot.lane.b32.xlu0 %v4724_v53, %s13387_s30  ;;  %v4738_v27 = vrot.slane %v4664_v16, 3  ;;  %v4735_v53 = vrot.slane %v4662_v36, 3  ;;  %v14111_v16 = vld [vmem:[#allocation2 + $0x110] sm:$0xff] }
  0xaf   : > { %v18916_v30 = vshrl.u32 %v14111_v16, 16  ;;  %v18919_v17 = vshll.u32 %v14111_v16, 16 }
  0xb0   : > { %v4739_v31 = vsel %vm4709_vm1, %v4737_v48, %v4738_v27  ;;  %v4736_v14 = vsel %vm4709_vm1, %v4734_v22, %v4735_v53  ;;  %v4671_v22 = vld [vmem:[#allocation2 + $0x1d0] sm:$0xf8]  ;;  %v4672_v53 = vld [vmem:[#allocation2 + $0x1d8] sm:$0x7] }
  0xb1   : > { %v2174_v48 = vrot.slane %v18916_v30, 7  ;;  %v4750_v46 = vrot.slane %v4672_v53, 3 }
  0xb2   : > { %4788 = vrot.lane.b32.xlu1 %v13799_v45, %s13386_s26  ;;  %4786 = vrot.lane.b32.xlu0 %v13787_v39, %s13386_s26 }
  0xb6   : > { %4820 = vrot.lane.b32.xlu1 %v4733_v26, %s13387_s30  ;;  %4818 = vrot.lane.b32.xlu0 %v4730_v55, %s13387_s30  ;;  %v4744_v26 = vrot.slane %v4668_v10, 3  ;;  %v4740_v55 = vrot.slane %v4665_v51, 3  ;;  %v4931_v10 = vld [vmem:[#allocation2 + $0x120] sm:$0xe0]  ;;  %v4749_v51 = vrot.slane %v4671_v22, 3  ;;  %v14138_v22 = vld [vmem:[#allocation2 + $0x128] sm:$0xff] }
  0xb7   : > { %v4995_v18 = vrot.slane %v4931_v10, 5  ;;  %v18929_v10 = vshrl.u32 %v14138_v22, 16 }
  0xb8   : > { %v4745_v36 = vsel %vm4709_vm1, %v4743_v59, %v4744_v26  ;;  %v4742_v27 = vsel %vm4709_vm1, %v4740_v55, %v4741_v5  ;;  %v14127_v59 = vor.u32 %v18919_v17, %v2174_v48  ;;  %v4932_v55 = vld [vmem:[#allocation2 + $0x128] sm:$0x1f]  ;;  %v12982_v5 = vld [vmem:[%s18896_s1 + $0x30] sm:$0xff]   ;;  %v14136_v48 = vrot.slane %v2700_v15, 1  ;;  %v4933_v15 = vld [vmem:[#allocation2 + $0x138] sm:$0xe0] }
  0xb9   : > { %11958 = vmatprep.subr.bf16.mxu1 %v12982_v5  ;;  %v4751_v53 = vsel %vm4709_vm1, %v4749_v51, %v4750_v46  ;;  %v2186_v51 = vrot.slane %v18929_v10, 7  ;;  %v18930_v46 = vshll.u32 %v14138_v22, 16  ;;  %v4998_v38 = vrot.slane %v4933_v15, 5  ;;  %v5854_v15 = vld [vmem:[#allocation2 + $0x1d8] sm:$0x7] }
  0xba   : > { %4792 = vrot.lane.b32.xlu1 %v13776_v34, %s13386_s26  ;;  %4790 = vrot.lane.b32.xlu0 %v13807_v52, %s13386_s26  ;;  %19082 = vst [vmem:[#allocation16_spill] sm:$0xff] %v14127_v59  ;;  %v14193_v59 = vld [vmem:[#allocation2 + $0x158] sm:$0xff] }
  0xbb   : > { %11959 = vmatpush3.bf16.msra.mxu1 %v12982_v5  ;;  %v14166_v10 = vor.u32 %v18930_v46, %v2186_v51  ;;  %v14180_v51 = vld [vmem:[#allocation2 + $0x1b8] sm:$0xf8]  ;;  %v14182_v46 = vld [vmem:[#allocation2 + $0x1c0] sm:$0x7]  ;;  %v5000_v9 = vsel %vm4580_vm2, %v4998_v38, %v4999_v54  ;;  %v18934_v38 = vshrl.u32 %v14200_v35, 16 }
  0xbc   : > { %v5916_v54 = vrot.slane %v14182_v46, 3 }
  0xbd   : > { %19083 = vst [vmem:[#allocation17_spill] sm:$0xff] %v14166_v10  ;;  %v5001_v10 = vrot.slane %v14162_v49, 5  ;;  %v5919_v49 = vrot.slane %v5854_v15, 3  ;;  %v2198_v46 = vrot.slane %v18934_v38, 7 }
  0xbe   : > { %4824 = vrot.lane.b32.xlu1 %v4739_v31, %s13387_s30  ;;  %4822 = vrot.lane.b32.xlu0 %v4736_v14, %s13387_s30  ;;  %v4669_v31 = vld [vmem:[#allocation2 + $0x1b8] sm:$0xf8]  ;;  %v4670_v14 = vld [vmem:[#allocation2 + $0x1c0] sm:$0x7] }
  0xbf   : > { %v4746_v26 = vrot.slane %v4669_v31, 3  ;;  %v4747_v30 = vrot.slane %v4670_v14, 3  ;;  %v4996_v31 = vrot.slane %v4932_v55, 5  ;;  %v4674_v14 = vld [vmem:[#allocation2 + $0x1f0] sm:$0x7]  ;;  %v4755_v55 = vrot.slane %v4675_v24, 3 }
  0xc0   : > { %v12984_v24 = vld [vmem:[%s18896_s1 + $0x38] sm:$0xff]  }
  0xc1   : > { %v4748_v43 = vsel %vm4709_vm1, %v4746_v26, %v4747_v30  ;;  %v14159_v30 = vrot.slane %v2712_v50, 1  ;;  %v4753_v26 = vrot.slane %v4674_v14, 3  ;;  %v4997_v28 = vsel %vm4580_vm2, %v4995_v18, %v4996_v31  ;;  %v5853_v14 = vld [vmem:[#allocation2 + $0x1d0] sm:$0xf8]  ;;  %11960 = vmatprep.subr.bf16.mxu1 %v12984_v24 }
  0xc2   : > { %4796 = vrot.lane.b32.xlu1 %v13789_v40, %s13386_s26  ;;  %4794 = vrot.lane.b32.xlu0 %v13835_v0, %s13386_s26 }
  0xc3   : > { %11961 = vmatpush3.bf16.msra.mxu1 %v12984_v24 }
  0xc6   : > { %4828 = vrot.lane.b32.xlu1 %v4745_v36, %s13387_s30  ;;  %4826 = vrot.lane.b32.xlu0 %v4742_v27, %s13387_s30  ;;  %v4676_v36 = vld [vmem:[#allocation2 + $0x208] sm:$0x7]  ;;  %v4673_v27 = vld [vmem:[#allocation2 + $0x1e8] sm:$0xf8] }
  0xc7   : > { %v4756_v5 = vrot.slane %v4676_v36, 3  ;;  %v4752_v37 = vrot.slane %v4673_v27, 3  ;;  %v14187_v27 = vld [vmem:[#allocation2 + $0x180] sm:$0xe0] }
  0xc9   : > { %v4757_v50 = vsel %vm4709_vm1, %v4755_v55, %v4756_v5  ;;  %v4754_v29 = vsel %vm4709_vm1, %v4752_v37, %v4753_v26  ;;  %v18933_v5 = vshrl.u32 %v14193_v59, 16  ;;  %v5918_v37 = vrot.slane %v5853_v14, 3 }
  0xca   : > { %4800 = vrot.lane.b32.xlu1 %v13850_v13, %s13386_s26  ;;  %4798 = vrot.lane.b32.xlu0 %v13857_v19, %s13386_s26  ;;  %v5915_v26 = vrot.slane %v14180_v51, 3  ;;  %v14219_v51 = vld [vmem:[#allocation2 + $0x198] sm:$0xe0] }
  0xcc   : > { %v14144_v17 = vpop.permute.xlu1 %3034  ;;  %v14147_v44 = vpop.permute.xlu0 %3028 }
  0xcd   : > { %v5188_v31 = vsel %vm272_vm0, %v4997_v28, %v14147_v44  ;;  %v12986_v28 = vld [vmem:[%s18896_s1 + $0x40] sm:$0xff]  }
  0xce   : > { %4832 = vrot.lane.b32.xlu1 %v4751_v53, %s13387_s30  ;;  %4830 = vrot.lane.b32.xlu0 %v4748_v43, %s13387_s30  ;;  %v4936_v43 = vld [vmem:[#allocation2 + $0x158] sm:$0x1f] }
  0xcf   : > { %v5002_v55 = vrot.slane %v4936_v43, 5  ;;  %v2903_v43 = vshll.u32 %v2884_v58, 16  ;;  %11962 = vmatprep.subr.bf16.mxu1 %v12986_v28  ;;  %v12976_v58 = vld [vmem:[%s18896_s1 + $0x98] sm:$0xff]  }
  0xd0   : > { %v14171_v36 = vpop.permute.xlu1 %3038  ;;  %v14175_v53 = vpop.permute.xlu0 %3030  ;;  %11963 = vmatpush3.bf16.msra.mxu1 %v12986_v28 }
  0xd1   : > { %19084 = vst [vmem:[#allocation18_spill] sm:$0xff] %v14171_v36  ;;  %v5190_v15 = vsel %vm272_vm0, %v5000_v9, %v14175_v53  ;;  %v19086_v9 = vshll.u32 %v14193_v59, 16  ;;  %v5003_v28 = vsel %vm4580_vm2, %v5001_v10, %v5002_v55  ;;  %v19090_v10 = vshll.u32 %v13807_v52, 16 }
  0xd2   : > { %4804 = vrot.lane.b32.xlu1 %v13980_v42, %s13386_s26  ;;  %4802 = vrot.lane.b32.xlu0 %v13875_v33, %s13386_s26 }
  0xd3   : > { %v14256_v55 = vrot.slane %v19090_v10, 1  ;;  %v5857_v10 = vld [vmem:[#allocation2 + $0x200] sm:$0xf8] }
  0xd4   : > { %v5156_v18 = vpop.permute.xlu1 %5155  ;;  %v14196_v32 = vpop.permute.xlu0 %3032 }
  0xd5   : > { %v5220_v24 = vsel %vm1115_vm3, %v5188_v31, %v5156_v18  ;;  %v4940_v18 = vld [vmem:[#allocation2 + $0x188] sm:$0x1f]  ;;  %v2210_v31 = vrot.slane %v18933_v5, 7 }
  0xd6   : > { %4836 = vrot.lane.b32.xlu1 %v4757_v50, %s13387_s30  ;;  %12102 = vmatprep.mubr.msk.bf16.mxu0 %vm1124_vm4, %v5220_v24  ;;  %v12988_v50 = vld [vmem:[%s18896_s1 + $0x48] sm:$0xff]   ;;  %v18935_v24 = vshll.u32 %v14200_v35, 16  ;;  %v5008_v62 = vrot.slane %v4940_v18, 5 }
  0xd7   : > { %4834 = vrot.lane.b32.xlu0 %v4754_v29, %s13387_s30  ;;  %v5007_v29 = vrot.slane %v14187_v27, 5  ;;  %v14233_v63 = vor.u32 %v19086_v9, %v2210_v31  ;;  %11964 = vmatprep.subr.bf16.mxu1 %v12988_v50  ;;  %v12990_v27 = vld [vmem:[%s18896_s1 + $0x50] sm:$0xff]   ;;  %v5920_v31 = vsel %vm4709_vm1, %v5918_v37, %v5919_v49  ;;  %v19089_v9 = vshrl.u32 %v13787_v39, 16  ;;  %v2885_v37 = vld [vmem:[#allocation2 + $0x148] sm:$0x1] }
  0xd8   : > { %v5158_v14 = vpop.permute.xlu1 %5157  ;;  %v14229_v8 = vpop.permute.xlu0 %3036  ;;  %v14244_v18 = vor.u32 %v18935_v24, %v2198_v46  ;;  %v5917_v24 = vsel %vm4709_vm1, %v5915_v26, %v5916_v54  ;;  %11965 = vmatpush3.bf16.msra.mxu1 %v12988_v50  ;;  %v19091_v39 = vrot.slane %v14151_v4, 5  ;;  %v12977_v26 = vld [vmem:[%s18896_s1 + $0xa0] sm:$0xff]  }
  0xd9   : > { %v5222_v5 = vsel %vm1115_vm3, %v5190_v15, %v5158_v14  ;;  %19085 = vst [vmem:[#allocation19_spill] sm:$0xff] %v14229_v8  ;;  %19087 = vst [vmem:[#allocation20_spill] sm:$0xff] %v14233_v63  ;;  %v5855_v14 = vld [vmem:[#allocation2 + $0x1e8] sm:$0xf8]  ;;  %v14249_v15 = vld [vmem:[#allocation2 + $0x1a0] sm:$0x1f]  ;;  %v2901_v38 = vor.u32 %v14136_v48, %v19089_v9  ;;  %11966 = vmatprep.subr.bf16.mxu1 %v12990_v27  ;;  %v5009_v4 = vsel %vm4580_vm2, %v5007_v29, %v5008_v62 }
  0xda   : > { %5981 = vrot.lane.b32.xlu1 %v13850_v13, %s13386_s26  ;;  %12103 = vmatmul.mubr.msk.bf16.vlgmr.msra.gmra.mrb[32].mxu0 %vm1124_vm4, %v5222_v5  ;;  %19088 = vst [vmem:[#allocation21_spill] sm:$0xff] %v14244_v18  ;;  %v2905_v63 = vrot.slane %v2903_v43, 1  ;;  %v5856_v5 = vld [vmem:[#allocation2 + $0x1f0] sm:$0x7]  ;;  %v14260_v18 = vld [vmem:[#allocation2 + $0x1b0] sm:$0xe0]  ;;  %v5192_v43 = vsel %vm272_vm0, %v5003_v28, %v14196_v32 }
  0xdb   : > { %5979 = vrot.lane.b32.xlu0 %v13857_v19, %s13386_s26  ;;  %12135 = vmatpush3.bf16.msra.mxu0 %v14044_v47  ;;  %v19092_v48 = vrot.slane %v14149_v3, 5  ;;  %v5010_v47 = vrot.slane %v14219_v51, 5  ;;  %v5921_v3 = vrot.slane %v5855_v14, 3  ;;  %v5922_v50 = vrot.slane %v5856_v5, 3  ;;  %v4944_v51 = vld [vmem:[#allocation2 + $0x1b8] sm:$0x1f] }
  0xdc   : > { %v5162_v46 = vpop.permute.xlu1 %5161  ;;  %12136 = vmatprep.subr.bf16.mxu0 %v12976_v58  ;;  %v5160_v9 = vpop.permute.xlu0 %5159  ;;  %v2906_v28 = vsel %vm2375_vm5, %v2901_v38, %v2905_v63  ;;  %v2910_v62 = vshll.u32 %v2885_v37, 16  ;;  %v2886_v29 = vld [vmem:[#allocation2 + $0x160] sm:$0x1]  ;;  %v14283_v14 = vld [vmem:[#allocation2 + $0x188] sm:$0xff]  ;;  %11967 = vmatpush3.bf16.msra.mxu1 %v12990_v27  ;;  %v5196_v63 = vsel %vm272_vm0, %v5009_v4, %v14229_v8  ;;  %v5924_v27 = vrot.slane %v5857_v10, 3 }
  0xdd   : > { %v5006_v49 = vsel %vm4580_vm2, %v19092_v48, %v19091_v39  ;;  %v5224_v54 = vsel %vm1115_vm3, %v5192_v43, %v5160_v9  ;;  %v5858_v39 = vld [vmem:[#allocation2 + $0x208] sm:$0x7]  ;;  %v5011_v43 = vrot.slane %v14249_v15, 5  ;;  %v18936_v5 = vshrl.u32 %v14283_v14, 16 }
  0xde   : > { %6013 = vrot.lane.b32.xlu1 %v5920_v31, %s13387_s30  ;;  %12106 = vmatprep.mubr.msk.bf16.mxu0 %vm1124_vm4, %v5224_v54  ;;  %v5194_v48 = vsel %vm272_vm0, %v5006_v49, %v14144_v17  ;;  %v5013_v31 = vrot.slane %v14260_v18, 5  ;;  %v12978_v15 = vld [vmem:[%s18896_s1 + $0xa8] sm:$0xff]   ;;  %v5923_v37 = vsel %vm4709_vm1, %v5921_v3, %v5922_v50  ;;  %v2917_v49 = vshll.u32 %v2886_v29, 16  ;;  %v12992_v3 = vld [vmem:[%s18896_s1 + $0x58] sm:$0xff]  }
  0xdf   : > { %6011 = vrot.lane.b32.xlu0 %v5917_v24, %s13387_s30  ;;  %12137 = vmatpush3.bf16.msra.mxu0 %v12976_v58  ;;  %v5226_v24 = vsel %vm1115_vm3, %v5194_v48, %v5162_v46  ;;  %v5014_v58 = vrot.slane %v4944_v51, 5  ;;  %v5925_v46 = vrot.slane %v5858_v39, 3  ;;  %v2234_v54 = vrot.slane %v18936_v5, 7  ;;  %v14302_v48 = vld [vmem:[#allocation2 + $0x170] sm:$0xff]  ;;  %v4948_v5 = vld [vmem:[#allocation2 + $0x1e8] sm:$0x1f] }
  0xe0   : > { %v5166_v9 = vpop.permute.xlu1 %5165  ;;  %v5164_v38 = vpop.permute.xlu0 %5163  ;;  %12138 = vmatprep.subr.bf16.mxu0 %v12977_v26  ;;  %v18938_v4 = vshll.u32 %v14283_v14, 16  ;;  %v2912_v10 = vrot.slane %v2910_v62, 1  ;;  %v18937_v39 = vshrl.u32 %v14302_v48, 16  ;;  %v5012_v50 = vsel %vm4580_vm2, %v5010_v47, %v5011_v43  ;;  %11968 = vmatprep.subr.bf16.mxu1 %v12992_v3  ;;  %v5860_v43 = vld [vmem:[#allocation2 + $0x220] sm:$0x7] }
  0xe1   : > { %v5228_v18 = vsel %vm1115_vm3, %v5196_v63, %v5164_v38  ;;  %v12979_v63 = vld [vmem:[%s18896_s1 + $0xb0] sm:$0xff]   ;;  %v5015_v62 = vsel %vm4580_vm2, %v5013_v31, %v5014_v58  ;;  %v5926_v38 = vsel %vm4709_vm1, %v5924_v27, %v5925_v46  ;;  %11969 = vmatpush3.bf16.msra.mxu1 %v12992_v3  ;;  %v5198_v31 = vsel %vm272_vm0, %v5012_v50, %v14171_v36  ;;  %v13194_v36 = vld [vmem:[#allocation2 + $0x278] sm:$0xff] }
  0xe2   : > { %12107 = vmatmul.mubr.msk.bf16.gmra.mrb[36].mxu0 %vm1124_vm4, %v5226_v24  ;;  %3060 = vrot.lane.b32.xlu1 %v2906_v28, %s13387_s30  ;;  %v19094_v28 = vshrl.u32 %v13799_v45, 16  ;;  %v14321_v45 = vor.u32 %v18938_v4, %v2234_v54  ;;  %v2222_v47 = vrot.slane %v18937_v39, 7  ;;  %v5859_v4 = vld [vmem:[#allocation2 + $0x218] sm:$0xf8] }
  0xe3   : > { %5983 = vrot.lane.b32.xlu0 %v13875_v33, %s13386_s26  ;;  %12110 = vmatprep.mubr.msk.bf16.mxu0 %vm1124_vm4, %v5228_v18  ;;  %v19097_v18 = vshrl.u32 %v13807_v52, 16  ;;  %v19099_v52 = vshll.u32 %v14302_v48, 16 }
  0xe4   : > { %v14304_v24 = vpop.permute.xlu1 %3042  ;;  %v2908_v51 = vor.u32 %v14159_v30, %v19094_v28  ;;  %12139 = vmatpush3.bf16.msra.mxu0 %v12977_v26  ;;  %v14314_v29 = vpop.permute.xlu0 %3040  ;;  %19096 = vst [vmem:[#allocation24_spill] sm:$0xff] %v14321_v45  ;;  %v4945_v30 = vld [vmem:[#allocation2 + $0x1c8] sm:$0xe0]  ;;  %v4946_v26 = vld [vmem:[#allocation2 + $0x1d0] sm:$0x1f] }
  0xe5   : > { %19093 = vst [vmem:[#allocation22_spill] sm:$0xff] %v14304_v24  ;;  %19095 = vst [vmem:[#allocation23_spill] sm:$0xff] %v14314_v29  ;;  %12140 = vmatprep.subr.bf16.mxu0 %v12978_v15  ;;  %v2915_v54 = vor.u32 %v14256_v55, %v19097_v18  ;;  %v4947_v28 = vld [vmem:[#allocation2 + $0x1e0] sm:$0xe0]  ;;  %v14341_v27 = vor.u32 %v19099_v52, %v2222_v47  ;;  %v5230_v55 = vsel %vm1115_vm3, %v5198_v31, %v5166_v9  ;;  %v2887_v18 = vld [vmem:[#allocation2 + $0x178] sm:$0x1] }
  0xe6   : > { %6015 = vrot.lane.b32.xlu1 %v5923_v37, %s13387_s30  ;;  %v2919_v37 = vrot.slane %v2917_v49, 1  ;;  %v2913_v39 = vsel %vm2375_vm5, %v2908_v51, %v2912_v10  ;;  %v5016_v46 = vrot.slane %v4945_v30, 5  ;;  %v5017_v49 = vrot.slane %v4946_v26, 5  ;;  %v12980_v51 = vld [vmem:[%s18896_s1 + $0xb8] sm:$0xff]   ;;  %v14354_v9 = vld [vmem:[#allocation2 + $0x200] sm:$0x1f] }
  0xe7   : > { %5985 = vrot.lane.b32.xlu0 %v13980_v42, %s13386_s26  ;;  %v19098_v42 = vshll.u32 %v13776_v34, 16  ;;  %19100 = vst [vmem:[#allocation25_spill] sm:$0xff] %v14341_v27  ;;  %v5200_v3 = vsel %vm272_vm0, %v5015_v62, %v14314_v29  ;;  %v14352_v10 = vld [vmem:[#allocation2 + $0x1f8] sm:$0xe0]  ;;  %v5019_v30 = vrot.slane %v4947_v28, 5  ;;  %v5020_v26 = vrot.slane %v4948_v5, 5 }
  0xe8   : > { %v5170_v58 = vpop.permute.xlu1 %5169  ;;  %12141 = vmatpush3.bf16.msra.mxu0 %v12978_v15  ;;  %v5168_v50 = vpop.permute.xlu0 %5167  ;;  %v2920_v62 = vsel %vm2375_vm5, %v2915_v54, %v2919_v37  ;;  %v5927_v47 = vrot.slane %v5859_v4, 3  ;;  %v5928_v31 = vrot.slane %v5860_v43, 3  ;;  %v5862_v52 = vld [vmem:[#allocation2 + $0x238] sm:$0x7]  ;;  %v2888_v27 = vld [vmem:[#allocation2 + $0x190] sm:$0x1]  ;;  %v5018_v5 = vsel %vm4580_vm2, %v5016_v46, %v5017_v49 }
  0xe9   : > { %v2921_v45 = vrot.slane %v19098_v42, 1  ;;  %12142 = vmatprep.subr.bf16.mxu0 %v12979_v63  ;;  %v5232_v15 = vsel %vm1115_vm3, %v5200_v3, %v5168_v50  ;;  %v5861_v42 = vld [vmem:[#allocation2 + $0x230] sm:$0xf8]  ;;  %v2924_v50 = vshll.u32 %v2887_v18, 16  ;;  %v14363_v28 = vld [vmem:[#allocation2 + $0x1b8] sm:$0xff]  ;;  %v5022_v54 = vrot.slane %v14352_v10, 5 }
  0xea   : > { %12111 = vmatmul.mubr.msk.bf16.gmra.mrb[40].mxu0 %vm1124_vm4, %v5230_v55  ;;  %6017 = vrot.lane.b32.xlu1 %v5926_v38, %s13387_s30  ;;  %v19102_v38 = vshrl.u32 %v13776_v34, 16  ;;  %v4951_v4 = vld [vmem:[#allocation2 + $0x210] sm:$0xe0]  ;;  %v19104_v43 = vshll.u32 %v13835_v0, 16  ;;  %v5021_v46 = vsel %vm4580_vm2, %v5019_v30, %v5020_v26  ;;  %v5930_v49 = vrot.slane %v5861_v42, 3 }
  0xeb   : > { %3062 = vrot.lane.b32.xlu0 %v2913_v39, %s13387_s30  ;;  %12114 = vmatprep.mubr.msk.bf16.mxu0 %vm1124_vm4, %v5232_v15  ;;  %v14374_v34 = vld [vmem:[%s18896_s1 + $0xf0] sm:$0xff]   ;;  %v5931_v18 = vrot.slane %v5862_v52, 3  ;;  %v4952_v15 = vld [vmem:[#allocation2 + $0x218] sm:$0x1f]  ;;  %v5929_v10 = vsel %vm4709_vm1, %v5927_v47, %v5928_v31  ;;  %v18940_v21 = vshll.u32 %v14363_v28, 16  ;;  %v2926_v26 = vrot.slane %v2924_v50, 1 }
  0xec   : > { %v14359_v3 = vpop.permute.xlu1 %3046  ;;  %v2922_v55 = vor.u32 %v2921_v45, %v19102_v38  ;;  %12143 = vmatpush3.bf16.msra.mxu0 %v12979_v63  ;;  %v14366_v39 = vpop.permute.xlu0 %3044  ;;  %v2928_v37 = vrot.slane %v19104_v43, 1  ;;  %v18939_v63 = vshrl.u32 %v14363_v28, 16  ;;  %v5023_v45 = vrot.slane %v14354_v9, 5  ;;  %v5864_v50 = vld [vmem:[#allocation2 + $0x250] sm:$0x7] }
  0xed   : > { %19101 = vst [vmem:[#allocation26_spill] sm:$0xff] %v14359_v3  ;;  %19103 = vst [vmem:[#allocation27_spill] sm:$0xff] %v14366_v39  ;;  %12144 = vmatprep.subr.bf16.mxu0 %v12980_v51  ;;  %v2931_v38 = vshll.u32 %v2888_v27, 16  ;;  %v5202_v9 = vsel %vm272_vm0, %v5018_v5, %v14304_v24  ;;  %v18941_v42 = vshrl.u32 %v14386_v41, 16  ;;  %v5204_v27 = vsel %vm272_vm0, %v5021_v46, %v14366_v39  ;;  %v14463_v24 = vld [vmem:[#allocation2 + $0x200] sm:$0xff] }
  0xee   : > { %3064 = vrot.lane.b32.xlu1 %v2920_v62, %s13387_s30  ;;  %v2258_v43 = vrot.slane %v18939_v63, 7  ;;  %v5025_v62 = vrot.slane %v4951_v4, 5  ;;  %v5234_v52 = vsel %vm1115_vm3, %v5202_v9, %v5170_v58  ;;  %v5026_v31 = vrot.slane %v4952_v15, 5  ;;  %v4953_v15 = vld [vmem:[#allocation2 + $0x228] sm:$0xe0] }
  0xef   : > { %5987 = vrot.lane.b32.xlu0 %v13963_v23, %s13386_s26  ;;  %v2246_v58 = vrot.slane %v18941_v42, 7  ;;  %v18942_v4 = vshll.u32 %v14386_v41, 16  ;;  %v5932_v46 = vsel %vm4709_vm1, %v5930_v49, %v5931_v18  ;;  %v19106_v9 = vshrl.u32 %v13835_v0, 16  ;;  %v2889_v18 = vld [vmem:[#allocation2 + $0x1a8] sm:$0x1] }
  0xf0   : > { %v5174_v30 = vpop.permute.xlu1 %5173  ;;  %12145 = vmatpush3.bf16.msra.mxu0 %v12980_v51  ;;  %v5172_v47 = vpop.permute.xlu0 %5171  ;;  %v14397_v63 = vor.u32 %v18940_v21, %v2258_v43  ;;  %v5863_v51 = vld [vmem:[#allocation2 + $0x248] sm:$0xf8]  ;;  %v4954_v43 = vld [vmem:[#allocation2 + $0x230] sm:$0x1f]  ;;  %v5024_v42 = vsel %vm4580_vm2, %v5022_v54, %v5023_v45  ;;  %v5934_v49 = vrot.slane %v5864_v50, 3  ;;  %v5028_v0 = vrot.slane %v4953_v15, 5 }
  0xf1   : > { %12178 = vmatprep.subr.bf16.mxu0 %v14374_v34  ;;  %v5236_v5 = vsel %vm1115_vm3, %v5204_v27, %v5172_v47  ;;  %v2927_v47 = vsel %vm2375_vm5, %v2922_v55, %v2926_v26  ;;  %v14416_v21 = vor.u32 %v18942_v4, %v2246_v58  ;;  %v19110_v55 = vshll.u32 %v13789_v40, 16  ;;  %v4956_v54 = vld [vmem:[#allocation2 + $0x248] sm:$0x1f]  ;;  %v5865_v45 = vld [vmem:[#allocation2 + $0x260] sm:$0xf8] }
  0xf2   : > { %19105 = vst [vmem:[#allocation28_spill] sm:$0xff] %v14397_v63  ;;  %12115 = vmatmul.mubr.msk.bf16.gmra.mrb[44].mxu0 %vm1124_vm4, %v5234_v52  ;;  %6019 = vrot.lane.b32.xlu1 %v5929_v10, %s13387_s30  ;;  %v2929_v52 = vor.u32 %v2928_v37, %v19106_v9  ;;  %v2933_v10 = vrot.slane %v2931_v38, 1  ;;  %v5029_v37 = vrot.slane %v4954_v43, 5  ;;  %v5027_v38 = vsel %vm4580_vm2, %v5025_v62, %v5026_v31  ;;  %v4955_v9 = vld [vmem:[#allocation2 + $0x240] sm:$0xe0]  ;;  %v14429_v4 = vld [vmem:[#allocation2 + $0x1e8] sm:$0xff] }
  0xf3   : > { %5989 = vrot.lane.b32.xlu0 %v13955_v7, %s13386_s26  ;;  %12118 = vmatprep.mubr.msk.bf16.mxu0 %vm1124_vm4, %v5236_v5  ;;  %19108 = vst [vmem:[#allocation30_spill] sm:$0xff] %v14416_v21  ;;  %v5933_v5 = vrot.slane %v5863_v51, 3  ;;  %v2935_v26 = vrot.slane %v19110_v55, 1  ;;  %v19111_v51 = vshll.u32 %v13857_v19, 16  ;;  %v2938_v62 = vshll.u32 %v2889_v18, 16 }
  0xf4   : > { %v14411_v27 = vpop.permute.xlu1 %3050  ;;  %v14419_v63 = vpop.permute.xlu0 %3048  ;;  %v2934_v58 = vsel %vm2375_vm5, %v2929_v52, %v2933_v10  ;;  %v5866_v31 = vld [vmem:[#allocation2 + $0x268] sm:$0x7]  ;;  %v2890_v43 = vld [vmem:[#allocation2 + $0x1c0] sm:$0x1]  ;;  %v18947_v55 = vshrl.u32 %v14429_v4, 16 }
  0xf5   : > { %19107 = vst [vmem:[#allocation29_spill] sm:$0xff] %v14411_v27  ;;  %19109 = vst [vmem:[#allocation31_spill] sm:$0xff] %v14419_v63  ;;  %v2942_v50 = vrot.slane %v19111_v51, 1  ;;  %v5208_v52 = vsel %vm272_vm0, %v5027_v38, %v14419_v63  ;;  %v5935_v21 = vsel %vm4709_vm1, %v5933_v5, %v5934_v49  ;;  %v5031_v51 = vrot.slane %v4955_v9, 5  ;;  %v5868_v29 = vld [vmem:[#allocation2 + $0x280] sm:$0x7] }
  0xf6   : > { %6021 = vrot.lane.b32.xlu1 %v5932_v46, %s13387_s30  ;;  %v5206_v46 = vsel %vm272_vm0, %v5024_v42, %v14359_v3  ;;  %v5032_v42 = vrot.slane %v4956_v54, 5  ;;  %v2282_v18 = vrot.slane %v18947_v55, 7  ;;  %v18952_v3 = vshll.u32 %v14429_v4, 16 }
  0xf7   : > { %3066 = vrot.lane.b32.xlu0 %v2927_v47, %s13387_s30  ;;  %v5238_v47 = vsel %vm1115_vm3, %v5206_v46, %v5174_v30  ;;  %v14444_v30 = vld [vmem:[#allocation2 + $0x1d0] sm:$0xff]  ;;  %v13191_v46 = vld [vmem:[#allocation2 + $0x248] sm:$0xff]  ;;  %v5936_v5 = vrot.slane %v5865_v45, 3  ;;  %v5937_v49 = vrot.slane %v5866_v31, 3  ;;  %v2945_v38 = vshll.u32 %v2890_v43, 16 }
  0xf8   : > { %v5178_v15 = vpop.permute.xlu1 %5177  ;;  %v5176_v10 = vpop.permute.xlu0 %5175  ;;  %v18953_v9 = vshrl.u32 %v14444_v30, 16  ;;  %v19113_v54 = vshrl.u32 %v13789_v40, 16  ;;  %v14455_v55 = vor.u32 %v18952_v3, %v2282_v18  ;;  %v4959_v45 = vld [vmem:[#allocation2 + $0x270] sm:$0xe0]  ;;  %v4960_v18 = vld [vmem:[#allocation2 + $0x278] sm:$0x1f] }
  0xf9   : > { %v5240_v39 = vsel %vm1115_vm3, %v5208_v52, %v5176_v10  ;;  %v2940_v10 = vrot.slane %v2938_v62, 1  ;;  %v5033_v62 = vsel %vm4580_vm2, %v5031_v51, %v5032_v42  ;;  %v13193_v3 = vld [vmem:[#allocation2 + $0x260] sm:$0xff]  ;;  %v5938_v43 = vsel %vm4709_vm1, %v5936_v5, %v5937_v49 }
  0xfa   : > { %12119 = vmatmul.mubr.msk.bf16.gmra.mrb[48].mxu0 %vm1124_vm4, %v5238_v47  ;;  %3068 = vrot.lane.b32.xlu1 %v2934_v58, %s13387_s30  ;;  %v4957_v58 = vld [vmem:[#allocation2 + $0x258] sm:$0xe0]  ;;  %v2936_v52 = vor.u32 %v2935_v26, %v19113_v54  ;;  %19114 = vst [vmem:[#allocation33_spill] sm:$0xff] %v14455_v55  ;;  %v2270_v31 = vrot.slane %v18953_v9, 7  ;;  %v2947_v55 = vrot.slane %v2945_v38, 1  ;;  %v19117_v40 = vshll.u32 %v14444_v30, 16 }
  0xfb   : > { %5991 = vrot.lane.b32.xlu0 %v13191_v46, %s13386_s26  ;;  %12122 = vmatprep.mubr.msk.bf16.mxu0 %vm1124_vm4, %v5240_v39  ;;  %v5030_v46 = vsel %vm4580_vm2, %v5028_v0, %v5029_v37  ;;  %v4958_v39 = vld [vmem:[#allocation2 + $0x260] sm:$0x1f]  ;;  %v19116_v0 = vshrl.u32 %v13857_v19, 16  ;;  %v5867_v54 = vld [vmem:[#allocation2 + $0x278] sm:$0xf8]  ;;  %v5034_v9 = vrot.slane %v4957_v58, 5 }
  0xfc   : > { %v14449_v47 = vpop.permute.xlu1 %3054  ;;  %v14458_v63 = vpop.permute.xlu0 %3052  ;;  %v14475_v26 = vor.u32 %v19117_v40, %v2270_v31  ;;  %v5035_v51 = vrot.slane %v4958_v39, 5  ;;  %v5037_v42 = vrot.slane %v4959_v45, 5  ;;  %v5038_v49 = vrot.slane %v4960_v18, 5  ;;  %v2891_v58 = vld [vmem:[#allocation2 + $0x1d8] sm:$0x1] }
  0xfd   : > { %19112 = vst [vmem:[#allocation32_spill] sm:$0xff] %v14449_v47  ;;  %19115 = vst [vmem:[#allocation34_spill] sm:$0xff] %v14458_v63  ;;  %v2943_v37 = vor.u32 %v2942_v50, %v19116_v0  ;;  %v2941_v50 = vsel %vm2375_vm5, %v2936_v52, %v2940_v10  ;;  %v5939_v38 = vrot.slane %v5867_v54, 3  ;;  %v14486_v39 = vld [vmem:[#allocation2 + $0x218] sm:$0xff]  ;;  %v19119_v52 = vshll.u32 %v13963_v23, 16 }
  0xfe   : > { %6023 = vrot.lane.b32.xlu1 %v5935_v21, %s13387_s30  ;;  %19118 = vst [vmem:[#allocation35_spill] sm:$0xff] %v14475_v26  ;;  %v5210_v21 = vsel %vm272_vm0, %v5030_v46, %v14411_v27  ;;  %v5940_v46 = vrot.slane %v5868_v29, 3  ;;  %v19120_v45 = vshll.u32 %v13850_v13, 16  ;;  %v18962_v18 = vshrl.u32 %v14486_v39, 16  ;;  %v4961_v54 = vld [vmem:[#allocation2 + $0x288] sm:$0xe0] }
  0xff   : > { %5993 = vrot.lane.b32.xlu0 %v13193_v3, %s13386_s26  ;;  %v5242_v0 = vsel %vm1115_vm3, %v5210_v21, %v5178_v15  ;;  %v5212_v3 = vsel %vm272_vm0, %v5033_v62, %v14458_v63  ;;  %v14490_v10 = vrot.slane %v19119_v52, 1  ;;  %v2948_v15 = vsel %vm2375_vm5, %v2943_v37, %v2947_v55  ;;  %v5869_v62 = vld [vmem:[#allocation2 + $0x290] sm:$0xf8]  ;;  %v4517_v27 = vld [vmem:[#allocation2 + $0x98] sm:$0x1f] }
 0x100   : > { %v5182_v19 = vpop.permute.xlu1 %5181  ;;  %v5180_v5 = vpop.permute.xlu0 %5179  ;;  %v2949_v40 = vrot.slane %v19120_v45, 1  ;;  %v2952_v21 = vshll.u32 %v2891_v58, 16  ;;  %v4962_v55 = vld [vmem:[#allocation2 + $0x290] sm:$0x1f]  ;;  %v19123_v37 = vshll.u32 %v13875_v33, 16  ;;  %v2306_v45 = vrot.slane %v18962_v18, 7 }
 0x101   : > { %v5244_v31 = vsel %vm1115_vm3, %v5212_v3, %v5180_v5  ;;  %v2892_v3 = vld [vmem:[#allocation2 + $0x1f0] sm:$0x1]  ;;  %v5036_v5 = vsel %vm4580_vm2, %v5034_v9, %v5035_v51  ;;  %v18965_v26 = vshll.u32 %v14486_v39, 16  ;;  %v5039_v58 = vsel %vm4580_vm2, %v5037_v42, %v5038_v49 }
 0x102   : > { %12123 = vmatmul.mubr.msk.bf16.gmra.mrb[52].mxu0 %vm1124_vm4, %v5242_v0  ;;  %6025 = vrot.lane.b32.xlu1 %v5938_v43, %s13387_s30  ;;  %v14498_v43 = vld [vmem:[#allocation2 + $0x200] sm:$0xff]  ;;  %v5870_v0 = vld [vmem:[#allocation2 + $0x298] sm:$0x7]  ;;  %v2956_v52 = vrot.slane %v19123_v37, 1  ;;  %v5941_v63 = vsel %vm4709_vm1, %v5939_v38, %v5940_v46  ;;  %v5942_v37 = vrot.slane %v5869_v62, 3  ;;  %v2959_v60 = vshll.u32 %v2892_v3, 16 }
 0x103   : > { %3070 = vrot.lane.b32.xlu0 %v2941_v50, %s13387_s30  ;;  %12126 = vmatprep.mubr.msk.bf16.mxu0 %vm1124_vm4, %v5244_v31  ;;  %v4516_v50 = vld [vmem:[#allocation2 + $0x90] sm:$0xe0]  ;;  %v19124_v9 = vshrl.u32 %v14498_v43, 16  ;;  %v5943_v18 = vrot.slane %v5870_v0, 3  ;;  %v5214_v42 = vsel %vm272_vm0, %v5036_v5, %v14449_v47  ;;  %v14524_v38 = vld [vmem:[#allocation2 + $0xa8] sm:$0xe0] }
 0x104   : > { %v14500_v29 = vpop.permute.xlu1 %3058  ;;  %v14504_v31 = vpop.permute.xlu0 %3056  ;;  %v14526_v46 = vld [vmem:[#allocation2 + $0xb0] sm:$0x1f]  ;;  %v2954_v8 = vrot.slane %v2952_v21, 1  ;;  %v5246_v0 = vsel %vm1115_vm3, %v5214_v42, %v5182_v19  ;;  %v5040_v3 = vrot.slane %v4961_v54, 5  ;;  %v19129_v21 = vshrl.u32 %v13875_v33, 16 }
 0x105   : > { %19121 = vst [vmem:[#allocation36_spill] sm:$0xff] %v14500_v29  ;;  %19122 = vst [vmem:[#allocation37_spill] sm:$0xff] %v14504_v31  ;;  %v2294_v51 = vrot.slane %v19124_v9, 7  ;;  %v19126_v9 = vshrl.u32 %v13850_v13, 16  ;;  %v5216_v5 = vsel %vm272_vm0, %v5039_v58, %v14504_v31  ;;  %v4581_v13 = vrot.slane %v4516_v50, 5  ;;  %v13195_v54 = vld [vmem:[#allocation2 + $0x290] sm:$0xff] }
 0x106   : > { %3072 = vrot.lane.b32.xlu1 %v2948_v15, %s13387_s30  ;;  %v14520_v15 = vor.u32 %v18965_v26, %v2306_v45  ;;  %v5041_v45 = vrot.slane %v4962_v55, 5  ;;  %v5871_v19 = vld [vmem:[#allocation2 + $0x2a8] sm:$0xf8]  ;;  %v4584_v55 = vrot.slane %v14524_v38, 5  ;;  %v4585_v58 = vrot.slane %v14526_v46, 5 }
 0x107   : > { %5995 = vrot.lane.b32.xlu0 %v13194_v36, %s13386_s26  ;;  %v2950_v57 = vor.u32 %v2949_v40, %v19126_v9  ;;  %v19127_v36 = vshll.u32 %v14498_v43, 16  ;;  %v4582_v40 = vrot.slane %v4517_v27, 5  ;;  %v2961_v42 = vrot.slane %v2959_v60, 1  ;;  %v4521_v27 = vld [vmem:[#allocation2 + $0xc8] sm:$0x1f] }
 0x108   : > { %19125 = vst [vmem:[#allocation38_spill] sm:$0xff] %v14520_v15  ;;  %v5186_v49 = vpop.permute.xlu1 %5185  ;;  %v5184_v26 = vpop.permute.xlu0 %5183  ;;  %v14537_v15 = vld [vmem:[#allocation2 + $0xc0] sm:$0xe0]  ;;  %v5872_v50 = vld [vmem:[#allocation2 + $0x2b0] sm:$0x7]  ;;  %v5945_v38 = vrot.slane %v5871_v19, 3 }
 0x109   : > { %v14532_v62 = vor.u32 %v19127_v36, %v2294_v51  ;;  %v5248_v47 = vsel %vm1115_vm3, %v5216_v5, %v5184_v26  ;;  %v2957_v51 = vor.u32 %v2956_v52, %v19129_v21  ;;  %v5944_v26 = vsel %vm4709_vm1, %v5942_v37, %v5943_v18  ;;  %v2893_v52 = vld [vmem:[#allocation2 + $0x208] sm:$0x1]  ;;  %v5873_v37 = vld [vmem:[#allocation2 + $0x2c0] sm:$0xf8]  ;;  %v2894_v19 = vld [vmem:[#allocation2 + $0x220] sm:$0x1] }
 0x10a   : > { %12127 = vmatmul.mubr.msk.bf16.gmra.mrb[56].mxu0 %vm1124_vm4, %v5246_v0  ;;  %6027 = vrot.lane.b32.xlu1 %v5941_v63, %s13387_s30  ;;  %v2955_v63 = vsel %vm2375_vm5, %v2950_v57, %v2954_v8  ;;  %v4587_v33 = vrot.slane %v14537_v15, 5  ;;  %v14553_v36 = vld [vmem:[#allocation2 + $0x248] sm:$0xff]  ;;  %v4583_v18 = vsel %vm4580_vm2, %v4581_v13, %v4582_v40  ;;  %v5946_v8 = vrot.slane %v5872_v50, 3 }
 0x10b   : > { %19128 = vst [vmem:[#allocation39_spill] sm:$0xff] %v14532_v62  ;;  %5997 = vrot.lane.b32.xlu0 %v13195_v54, %s13386_s26  ;;  %12130 = vmatprep.mubr.msk.bf16.mxu0 %vm1124_vm4, %v5248_v47  ;;  %v5042_v47 = vsel %vm4580_vm2, %v5040_v3, %v5041_v45  ;;  %v18968_v46 = vshrl.u32 %v14553_v36, 16  ;;  %v5845_v60 = vld [vmem:[#allocation2 + $0x2a8] sm:$0xff]  ;;  %v2962_v57 = vsel %vm2375_vm5, %v2957_v51, %v2961_v42  ;;  %v19130_v21 = vshll.u32 %v14463_v24, 16 }
 0x10c   : > { %v14549_v9 = vpop.permute.xlu1 %4776  ;;  %v4775_v0 = vpop.permute.xlu0 %4774  ;;  %v5874_v15 = vld [vmem:[#allocation2 + $0x2c8] sm:$0x7]  ;;  %v5218_v3 = vsel %vm272_vm0, %v5042_v47, %v14500_v29  ;;  %v2966_v40 = vshll.u32 %v2893_v52, 16  ;;  %v18970_v54 = vshll.u32 %v14553_v36, 16  ;;  %v4588_v50 = vrot.slane %v4521_v27, 5 }
 0x10d   : > { %v2330_v5 = vrot.slane %v18968_v46, 7  ;;  %v2963_v13 = vrot.slane %v19130_v21, 1  ;;  %v5250_v51 = vsel %vm1115_vm3, %v5218_v3, %v5186_v49  ;;  %v4840_v42 = vsel %vm272_vm0, %v4583_v18, %v4775_v0 }
 0x10e   : > { %6029 = vrot.lane.b32.xlu1 %v5944_v26, %s13387_s30  ;;  %v14568_v26 = vld [vmem:[#allocation2 + $0x230] sm:$0xff]  ;;  %v5948_v52 = vrot.slane %v5873_v37, 3  ;;  %v5949_v21 = vrot.slane %v5874_v15, 3  ;;  %v5947_v49 = vsel %vm4709_vm1, %v5945_v38, %v5946_v8  ;;  %v2973_v27 = vshll.u32 %v2894_v19, 16 }
 0x10f   : > { %3074 = vrot.lane.b32.xlu0 %v2955_v63, %s13387_s30  ;;  %v18969_v46 = vshrl.u32 %v14568_v26, 16  ;;  %v14578_v62 = vor.u32 %v18970_v54, %v2330_v5  ;;  %v18971_v18 = vshll.u32 %v14568_v26, 16  ;;  %v19132_v37 = vshrl.u32 %v14463_v24, 16  ;;  %v14604_v54 = vld [vmem:[#allocation2 + $0x260] sm:$0xff] }
 0x110   : > { %v4809_v45 = vpop.permute.xlu1 %4808  ;;  %v4807_v63 = vpop.permute.xlu0 %4806  ;;  %v2968_v5 = vrot.slane %v2966_v40, 1  ;;  %v19134_v8 = vshll.u32 %v13955_v7, 16 }
 0x111   : > { %v4887_v47 = vsel %vm1115_vm3, %v4840_v42, %v4807_v63  ;;  %19131 = vst [vmem:[#allocation40_spill] sm:$0xff] %v14578_v62  ;;  %v2318_v0 = vrot.slane %v18969_v46, 7  ;;  %v2964_v15 = vor.u32 %v2963_v13, %v19132_v37  ;;  %v4523_v63 = vld [vmem:[#allocation2 + $0xe0] sm:$0x1f]  ;;  %v4524_v46 = vld [vmem:[#allocation2 + $0xf0] sm:$0xe0]  ;;  %v5950_v13 = vsel %vm4709_vm1, %v5948_v52, %v5949_v21 }
 0x112   : > { %12131 = vmatmul.mubr.msk.bf16.gmra.mrb[60].mxu0 %vm1124_vm4, %v5250_v51  ;;  %3076 = vrot.lane.b32.xlu1 %v2962_v57, %s13387_s30  ;;  %v5846_v57 = vld [vmem:[#allocation2 + $0x2c0] sm:$0xff]  ;;  %v4586_v51 = vsel %vm4580_vm2, %v4584_v55, %v4585_v58  ;;  %v2977_v19 = vrot.slane %v19134_v8, 1  ;;  %v4525_v55 = vld [vmem:[#allocation2 + $0xf8] sm:$0x1f]  ;;  %v19135_v58 = vshrl.u32 %v13963_v23, 16  ;;  %v4591_v21 = vrot.slane %v4523_v63, 5 }
 0x113   : > { %5999 = vrot.lane.b32.xlu0 %v5845_v60, %s13386_s26  ;;  %12146 = vmatprep.mubr.msk.bf16.mxu0 %vm1124_vm4, %v4887_v47  ;;  %v4522_v60 = vld [vmem:[#allocation2 + $0xd8] sm:$0xe0]  ;;  %v14593_v38 = vor.u32 %v18971_v18, %v2318_v0  ;;  %v4589_v47 = vsel %vm4580_vm2, %v4587_v33, %v4588_v50  ;;  %v2975_v0 = vrot.slane %v2973_v27, 1  ;;  %v4843_v8 = vsel %vm272_vm0, %v4586_v51, %v14549_v9  ;;  %v5876_v18 = vld [vmem:[#allocation2 + $0x2e0] sm:$0x7] }
 0x114   : > { %v14586_v3 = vpop.permute.xlu1 %4780  ;;  %v4779_v42 = vpop.permute.xlu0 %4778  ;;  %v2971_v40 = vor.u32 %v14490_v10, %v19135_v58  ;;  %v5875_v37 = vld [vmem:[#allocation2 + $0x2d8] sm:$0xf8]  ;;  %v4590_v33 = vrot.slane %v4522_v60, 5  ;;  %v4889_v52 = vsel %vm1115_vm3, %v4843_v8, %v4809_v45  ;;  %v4593_v27 = vrot.slane %v4524_v46, 5  ;;  %v2895_v58 = vld [vmem:[#allocation2 + $0x238] sm:$0x1] }
 0x115   : > { %19133 = vst [vmem:[#allocation41_spill] sm:$0xff] %v14593_v38  ;;  %v4846_v23 = vsel %vm272_vm0, %v4589_v47, %v4779_v42  ;;  %v12983_v62 = vld [vmem:[%s18896_s1 + $0xf8] sm:$0xff]   ;;  %v5951_v60 = vrot.slane %v5875_v37, 3  ;;  %v5952_v42 = vrot.slane %v5876_v18, 3  ;;  %v5877_v63 = vld [vmem:[#allocation2 + $0x2f0] sm:$0xf8] }
 0x116   : > { %6031 = vrot.lane.b32.xlu1 %v5947_v49, %s13387_s30  ;;  %v2969_v49 = vsel %vm2375_vm5, %v2964_v15, %v2968_v5  ;;  %v4594_v15 = vrot.slane %v4525_v55, 5  ;;  %v18973_v5 = vshll.u32 %v14604_v54, 16  ;;  %v5847_v46 = vld [vmem:[#allocation2 + $0x2d8] sm:$0xff]  ;;  %v2976_v51 = vsel %vm2375_vm5, %v2971_v40, %v2975_v0  ;;  %v4526_v37 = vld [vmem:[#allocation2 + $0x108] sm:$0xe0] }
 0x117   : > { %6001 = vrot.lane.b32.xlu0 %v5846_v57, %s13386_s26  ;;  %v18972_v57 = vshrl.u32 %v14604_v54, 16  ;;  %v14624_v47 = vld [vmem:[#allocation2 + $0x278] sm:$0xff]  ;;  %v19138_v40 = vshll.u32 %v13985_v1, 16  ;;  %v4592_v18 = vsel %vm4580_vm2, %v4590_v33, %v4591_v21  ;;  %v5953_v21 = vsel %vm4709_vm1, %v5951_v60, %v5952_v42 }
 0x118   : > { %v4813_v50 = vpop.permute.xlu1 %4812  ;;  %v4811_v10 = vpop.permute.xlu0 %4810  ;;  %19136 = vst [vmem:[#allocation42_spill] sm:$0xff] %v14624_v47  ;;  %v5878_v55 = vld [vmem:[#allocation2 + $0x2f8] sm:$0x7]  ;;  %v18979_v33 = vshll.u32 %v14624_v47, 16  ;;  %v5954_v38 = vrot.slane %v5877_v63, 3 }
 0x119   : > { %v4891_v9 = vsel %vm1115_vm3, %v4846_v23, %v4811_v10  ;;  %v2342_v45 = vrot.slane %v18972_v57, 7  ;;  %v18978_v23 = vshrl.u32 %v14624_v47, 16  ;;  %v2984_v0 = vrot.slane %v19138_v40, 1  ;;  %v14657_v63 = vld [vmem:[#allocation2 + $0x138] sm:$0xe0] }
 0x11a   : > { %12147 = vmatmul.mubr.msk.bf16.vlgmr.msra.gmra.mrb[32].mxu0 %vm1124_vm4, %v4889_v52  ;;  %6033 = vrot.lane.b32.xlu1 %v5950_v13, %s13387_s30  ;;  %v2980_v13 = vshll.u32 %v2895_v58, 16  ;;  %v2896_v52 = vld [vmem:[#allocation2 + $0x250] sm:$0x1]  ;;  %v12985_v58 = vld [vmem:[%s18896_s1 + $0x100] sm:$0xff]   ;;  %v19139_v57 = vshrl.u32 %v13955_v7, 16  ;;  %v5955_v29 = vrot.slane %v5878_v55, 3 }
 0x11b   : > { %3078 = vrot.lane.b32.xlu0 %v2969_v49, %s13387_s30  ;;  %12150 = vmatprep.mubr.msk.bf16.mxu0 %vm1124_vm4, %v4891_v9  ;;  %v14631_v49 = vor.u32 %v18973_v5, %v2342_v45  ;;  %v4527_v9 = vld [vmem:[#allocation2 + $0x110] sm:$0x1f]  ;;  %v4528_v45 = vld [vmem:[#allocation2 + $0x120] sm:$0xe0]  ;;  %v2354_v40 = vrot.slane %v18978_v23, 7  ;;  %v2987_v31 = vshll.u32 %v2896_v52, 16 }
 0x11c   : > { %v14626_v8 = vpop.permute.xlu1 %4784  ;;  %12179 = vmatpush3.bf16.msra.mxu0 %v14374_v34  ;;  %v4783_v10 = vpop.permute.xlu0 %4782  ;;  %v4595_v34 = vsel %vm4580_vm2, %v4593_v27, %v4594_v15  ;;  %v2978_v5 = vor.u32 %v2977_v19, %v19139_v57  ;;  %v4849_v27 = vsel %vm272_vm0, %v4592_v18, %v14586_v3  ;;  %v4596_v15 = vrot.slane %v4526_v37, 5  ;;  %v5848_v7 = vld [vmem:[#allocation2 + $0x2f0] sm:$0xff]  ;;  %v12987_v3 = vld [vmem:[%s18896_s1 + $0x108] sm:$0xff]   ;;  %v14672_v37 = vld [vmem:[%s18896_s1] sm:$0xff]  }
 0x11d   : > { %19137 = vst [vmem:[#allocation43_spill] sm:$0xff] %v14631_v49  ;;  %12180 = vmatprep.subr.bf16.mxu0 %v12983_v62  ;;  %v4529_v49 = vld [vmem:[#allocation2 + $0x128] sm:$0x1f]  ;;  %v2982_v19 = vrot.slane %v2980_v13, 1  ;;  %v14653_v57 = vor.u32 %v18979_v33, %v2354_v40  ;;  %v4597_v23 = vrot.slane %v4527_v9, 5  ;;  %v4852_v60 = vsel %vm272_vm0, %v4595_v34, %v4783_v10  ;;  %12002 = vmatprep.subr.bf16.mxu1 %v14672_v37 }
 0x11e   : > { %3080 = vrot.lane.b32.xlu1 %v2976_v51, %s13387_s30  ;;  %v19141_v13 = vshll.u32 %v13969_v12, 16  ;;  %v4600_v52 = vrot.slane %v4529_v49, 5  ;;  %v5879_v18 = vld [vmem:[#allocation2 + $0x308] sm:$0xf8]  ;;  %v5956_v10 = vsel %vm4709_vm1, %v5954_v38, %v5955_v29  ;;  %v19142_v9 = vshrl.u32 %v13985_v1, 16 }
 0x11f   : > { %6003 = vrot.lane.b32.xlu0 %v5847_v46, %s13386_s26  ;;  %19140 = vst [vmem:[#allocation44_spill] sm:$0xff] %v14653_v57  ;;  %v4893_v46 = vsel %vm1115_vm3, %v4849_v27, %v4813_v50  ;;  %v4599_v50 = vrot.slane %v4528_v45, 5  ;;  %v2989_v40 = vrot.slane %v2987_v31, 1  ;;  %v5880_v27 = vld [vmem:[#allocation2 + $0x310] sm:$0x7]  ;;  %v19144_v49 = vshll.u32 %v14010_v25, 16 }
 0x120   : > { %v4817_v51 = vpop.permute.xlu1 %4816  ;;  %12181 = vmatpush3.bf16.msra.mxu0 %v12983_v62  ;;  %v4815_v42 = vpop.permute.xlu0 %4814  ;;  %v14664_v62 = vrot.slane %v19141_v13, 1  ;;  %v2985_v34 = vor.u32 %v2984_v0, %v19142_v9  ;;  %v4598_v1 = vsel %vm4580_vm2, %v4596_v15, %v4597_v23  ;;  %v4531_v31 = vld [vmem:[#allocation2 + $0x140] sm:$0x1f]  ;;  %v4602_v38 = vrot.slane %v14657_v63, 5  ;;  %v12989_v13 = vld [vmem:[%s18896_s1 + $0x110] sm:$0xff]   ;;  %v5849_v23 = vld [vmem:[#allocation2 + $0x308] sm:$0xff] }
 0x121   : > { %12182 = vmatprep.subr.bf16.mxu0 %v12985_v58  ;;  %v4895_v55 = vsel %vm1115_vm3, %v4852_v60, %v4815_v42  ;;  %v14683_v45 = vrot.slane %v19144_v49, 1  ;;  %v2983_v60 = vsel %vm2375_vm5, %v2978_v5, %v2982_v19  ;;  %v4532_v42 = vld [vmem:[#allocation2 + $0x150] sm:$0xe0]  ;;  %v4601_v5 = vsel %vm4580_vm2, %v4599_v50, %v4600_v52  ;;  %v5881_v49 = vld [vmem:[#allocation2 + $0x320] sm:$0xf8] }
 0x122   : > { %12151 = vmatmul.mubr.msk.bf16.gmra.mrb[36].mxu0 %vm1124_vm4, %v4893_v46  ;;  %6035 = vrot.lane.b32.xlu1 %v5953_v21, %s13387_s30  ;;  %v14679_v21 = vld [vmem:[#allocation2 + $0x140] sm:$0xff]  ;;  %v5957_v19 = vrot.slane %v5879_v18, 3  ;;  %v2990_v15 = vsel %vm2375_vm5, %v2985_v34, %v2989_v40  ;;  %v5958_v63 = vrot.slane %v5880_v27, 3  ;;  %v4855_v50 = vsel %vm272_vm0, %v4598_v1, %v14626_v8  ;;  %v5882_v57 = vld [vmem:[#allocation2 + $0x328] sm:$0x7]  ;;  %v14713_v8 = vld [vmem:[#allocation2 + $0x158] sm:$0xff] }
 0x123   : > { %6005 = vrot.lane.b32.xlu0 %v5848_v7, %s13386_s26  ;;  %12154 = vmatprep.mubr.msk.bf16.mxu0 %vm1124_vm4, %v4895_v55  ;;  %19143 = vst [vmem:[#allocation45_spill] sm:$0xff] %v14679_v21  ;;  %v2897_v7 = vld [vmem:[#allocation2 + $0x268] sm:$0x1]  ;;  %v18980_v29 = vshrl.u32 %v14679_v21, 16  ;;  %v18981_v33 = vshll.u32 %v14679_v21, 16  ;;  %v4603_v52 = vrot.slane %v4531_v31, 5 }
 0x124   : > { %v14685_v46 = vpop.permute.xlu1 %4788  ;;  %12183 = vmatpush3.bf16.msra.mxu0 %v12985_v58  ;;  %v4787_v0 = vpop.permute.xlu0 %4786  ;;  %v4533_v58 = vld [vmem:[#allocation2 + $0x158] sm:$0x1f]  ;;  %v2994_v9 = vshll.u32 %v2897_v7, 16  ;;  %v2898_v18 = vld [vmem:[#allocation2 + $0x280] sm:$0x1]  ;;  %v4605_v27 = vrot.slane %v4532_v42, 5  ;;  %v5959_v42 = vsel %vm4709_vm1, %v5957_v19, %v5958_v63 }
 0x125   : > { %12184 = vmatprep.subr.bf16.mxu0 %v12987_v3  ;;  %v3683_v55 = vrot.slane %v18980_v29, 7  ;;  %v4897_v29 = vsel %vm1115_vm3, %v4855_v50, %v4817_v51  ;;  %v4858_v34 = vsel %vm272_vm0, %v4601_v5, %v4787_v0  ;;  %v5960_v31 = vrot.slane %v5881_v49, 3  ;;  %v5850_v0 = vld [vmem:[#allocation2 + $0x320] sm:$0xff]  ;;  %v2899_v49 = vld [vmem:[#allocation2 + $0x298] sm:$0x1] }
 0x126   : > { %6037 = vrot.lane.b32.xlu1 %v5956_v10, %s13387_s30  ;;  %v18982_v51 = vshrl.u32 %v14713_v8, 16  ;;  %v2996_v5 = vrot.slane %v2994_v9, 1  ;;  %v3001_v50 = vshll.u32 %v2898_v18, 16  ;;  %v19147_v19 = vshll.u32 %v13999_v11, 16  ;;  %v4534_v9 = vld [vmem:[#allocation2 + $0x168] sm:$0xe0] }
 0x127   : > { %3082 = vrot.lane.b32.xlu0 %v2983_v60, %s13387_s30  ;;  %v12991_v60 = vld [vmem:[%s18896_s1 + $0x118] sm:$0xff]   ;;  %v14711_v7 = vor.u32 %v18981_v33, %v3683_v55  ;;  %v5961_v55 = vrot.slane %v5882_v57, 3  ;;  %v7451_v33 = vld [vmem:[#allocation2 + $0x128] sm:$0xc0]  ;;  %v4604_v57 = vsel %vm4580_vm2, %v4602_v38, %v4603_v52  ;;  %v3008_v47 = vshll.u32 %v2899_v49, 16 }
 0x128   : > { %v4821_v10 = vpop.permute.xlu1 %4820  ;;  %12185 = vmatpush3.bf16.msra.mxu0 %v12987_v3  ;;  %v4819_v40 = vpop.permute.xlu0 %4818  ;;  %v4606_v3 = vrot.slane %v4533_v58, 5  ;;  %v3005_v63 = vrot.slane %v19147_v19, 1 }
 0x129   : > { %12186 = vmatprep.subr.bf16.mxu0 %v12989_v13  ;;  %19145 = vst [vmem:[#allocation46_spill] sm:$0xff] %v14711_v7  ;;  %v4899_v1 = vsel %vm1115_vm3, %v4858_v34, %v4819_v40  ;;  %v18987_v40 = vshll.u32 %v14713_v8, 16  ;;  %v5962_v52 = vsel %vm4709_vm1, %v5960_v31, %v5961_v55  ;;  %v7515_v7 = vrot.slane %v7451_v33, 6 }
 0x12a   : > { %12155 = vmatmul.mubr.msk.bf16.gmra.mrb[40].mxu0 %vm1124_vm4, %v4897_v29  ;;  %3084 = vrot.lane.b32.xlu1 %v2990_v15, %s13387_s30  ;;  %v19146_v29 = vshrl.u32 %v13969_v12, 16  ;;  %v7452_v15 = vld [vmem:[#allocation2 + $0x130] sm:$0x3f]  ;;  %v3010_v49 = vrot.slane %v3008_v47, 1  ;;  %v4541_v47 = vld [vmem:[#allocation2 + $0x1b8] sm:$0x1f] }
 0x12b   : > { %6007 = vrot.lane.b32.xlu0 %v5849_v23, %s13386_s26  ;;  %12158 = vmatprep.mubr.msk.bf16.mxu0 %vm1124_vm4, %v4899_v1  ;;  %v3695_v23 = vrot.slane %v18982_v51, 7  ;;  %v14736_v12 = vld [vmem:[%s18896_s1 + $0x150] sm:$0xff]   ;;  %v4536_v1 = vld [vmem:[#allocation2 + $0x180] sm:$0xe0]  ;;  %v4537_v51 = vld [vmem:[#allocation2 + $0x188] sm:$0x1f] }
 0x12c   : > { %v14722_v34 = vpop.permute.xlu1 %4792  ;;  %v2992_v58 = vor.u32 %v14664_v62, %v19146_v29  ;;  %12187 = vmatpush3.bf16.msra.mxu0 %v12989_v13  ;;  %v4791_v18 = vpop.permute.xlu0 %4790  ;;  %v4535_v62 = vld [vmem:[#allocation2 + $0x170] sm:$0x1f]  ;;  %v4607_v13 = vsel %vm4580_vm2, %v4605_v27, %v4606_v3  ;;  %v19148_v29 = vshrl.u32 %v14010_v25, 16  ;;  %v7516_v21 = vrot.slane %v7452_v15, 6 }
 0x12d   : > { %12188 = vmatprep.subr.bf16.mxu0 %v12991_v60  ;;  %v14745_v38 = vor.u32 %v18987_v40, %v3695_v23  ;;  %v4861_v27 = vsel %vm272_vm0, %v4604_v57, %v14685_v46  ;;  %v4609_v40 = vrot.slane %v4535_v62, 5  ;;  %v4864_v31 = vsel %vm272_vm0, %v4607_v13, %v4791_v18  ;;  %v14758_v46 = vld [vmem:[#allocation2 + $0x198] sm:$0xe0]  ;;  %v14767_v18 = vld [vmem:[#allocation2 + $0x170] sm:$0xff] }
 0x12e   : > { %6039 = vrot.lane.b32.xlu1 %v5959_v42, %s13387_s30  ;;  %v2999_v19 = vor.u32 %v14683_v45, %v19148_v29  ;;  %v2997_v25 = vsel %vm2375_vm5, %v2992_v58, %v2996_v5  ;;  %v3003_v42 = vrot.slane %v3001_v50, 1  ;;  %v7453_v45 = vld [vmem:[#allocation2 + $0x140] sm:$0xc0]  ;;  %v7454_v29 = vld [vmem:[#allocation2 + $0x148] sm:$0x3f]  ;;  %v4901_v23 = vsel %vm1115_vm3, %v4861_v27, %v4821_v10 }
 0x12f   : > { %19149 = vst [vmem:[#allocation47_spill] sm:$0xff] %v14745_v38  ;;  %6009 = vrot.lane.b32.xlu0 %v5850_v0, %s13386_s26  ;;  %v4608_v0 = vrot.slane %v4534_v9, 5  ;;  %v14760_v5 = vld [vmem:[#allocation2 + $0x1a0] sm:$0x1f]  ;;  %v4612_v50 = vrot.slane %v4537_v51, 5  ;;  %v19150_v10 = vshrl.u32 %v13999_v11, 16  ;;  %v7517_v15 = vsel %vm7117_vm6, %v7515_v7, %v7516_v21 }
 0x130   : > { %v4825_v3 = vpop.permute.xlu1 %4824  ;;  %12189 = vmatpush3.bf16.msra.mxu0 %v12991_v60  ;;  %v4823_v33 = vpop.permute.xlu0 %4822  ;;  %v4611_v60 = vrot.slane %v4536_v1, 5  ;;  %v7518_v57 = vrot.slane %v7453_v45, 6  ;;  %v7519_v9 = vrot.slane %v7454_v29, 6  ;;  %v3004_v13 = vsel %vm2375_vm5, %v2999_v19, %v3003_v42  ;;  %v4540_v1 = vld [vmem:[#allocation2 + $0x1b0] sm:$0xe0] }
 0x131   : > { %12294 = vmatprep.subr.bf16.mxu0 %v14736_v12  ;;  %v4903_v55 = vsel %vm1115_vm3, %v4864_v31, %v4823_v33  ;;  %v3006_v58 = vor.u32 %v3005_v63, %v19150_v10  ;;  %v2359_v51 = vld [vmem:[#allocation2 + $0x118] sm:$0x1]  ;;  %v18989_v11 = vshrl.u32 %v14767_v18, 16  ;;  %v4610_v63 = vsel %vm4580_vm2, %v4608_v0, %v4609_v40  ;;  %v7455_v19 = vld [vmem:[#allocation2 + $0x158] sm:$0xc0] }
 0x132   : > { %12159 = vmatmul.mubr.msk.bf16.gmra.mrb[44].mxu0 %vm1124_vm4, %v4901_v23  ;;  %6041 = vrot.lane.b32.xlu1 %v5962_v52, %s13387_s30  ;;  %v4614_v52 = vrot.slane %v14758_v46, 5  ;;  %v4615_v27 = vrot.slane %v14760_v5, 5  ;;  %v4613_v7 = vsel %vm4580_vm2, %v4611_v60, %v4612_v50  ;;  %v18990_v29 = vshll.u32 %v14767_v18, 16  ;;  %v7456_v33 = vld [vmem:[#allocation2 + $0x160] sm:$0x3f] }
 0x133   : > { %3086 = vrot.lane.b32.xlu0 %v2997_v25, %s13387_s30  ;;  %12162 = vmatprep.mubr.msk.bf16.mxu0 %vm1124_vm4, %v4903_v55  ;;  %v19151_v25 = vshll.u32 %v14111_v16, 16  ;;  %v3707_v42 = vrot.slane %v18989_v11, 7  ;;  %v3011_v40 = vsel %vm2375_vm5, %v3006_v58, %v3010_v49  ;;  %v7520_v23 = vsel %vm7117_vm6, %v7518_v57, %v7519_v9  ;;  %v14786_v55 = vld [vmem:[#allocation2 + $0x188] sm:$0xff]  ;;  %v2360_v50 = vld [vmem:[#allocation2 + $0x130] sm:$0x1] }
 0x134   : > { %v14769_v62 = vpop.permute.xlu1 %4796  ;;  %v4795_v21 = vpop.permute.xlu0 %4794  ;;  %v4617_v0 = vrot.slane %v4540_v1, 5  ;;  %v2379_v31 = vshll.u32 %v2359_v51, 16  ;;  %v4867_v46 = vsel %vm272_vm0, %v4610_v63, %v14722_v34  ;;  %v4618_v60 = vrot.slane %v4541_v47, 5  ;;  %v14797_v9 = vld [vmem:[#allocation2 + $0x1c8] sm:$0xe0] }
 0x135   : > { %v2376_v45 = vrot.slane %v19151_v25, 1  ;;  %v14792_v10 = vor.u32 %v18990_v29, %v3707_v42  ;;  %v4905_v58 = vsel %vm1115_vm3, %v4867_v46, %v4825_v3  ;;  %v4870_v49 = vsel %vm272_vm0, %v4613_v7, %v4795_v21  ;;  %v14806_v25 = vld [vmem:[#allocation2 + $0x1f8] sm:$0xe0]  ;;  %v14815_v42 = vld [vmem:[#allocation2 + $0x1e0] sm:$0xe0]  ;;  %v13196_v29 = vld [vmem:[#allocation2 + $0x128] sm:$0xff] }
 0x136   : > { %7563 = vrot.lane.b32.xlu1 %v7517_v15, %s13387_s30  ;;  %v18988_v15 = vshrl.u32 %v14786_v55, 16  ;;  %v19153_v34 = vshll.u32 %v14138_v22, 16  ;;  %v7521_v51 = vrot.slane %v7455_v19, 6  ;;  %v7522_v47 = vrot.slane %v7456_v33, 6  ;;  %v14813_v19 = vld [vmem:[#allocation2 + $0x200] sm:$0x1f] }
 0x137   : > { %3088 = vrot.lane.b32.xlu0 %v3004_v13, %s13387_s30  ;;  %19152 = vst [vmem:[#allocation48_spill] sm:$0xff] %v14792_v10  ;;  %v14799_v13 = vld [vmem:[#allocation2 + $0x1d0] sm:$0x1f]  ;;  %v18991_v21 = vshll.u32 %v14786_v55, 16  ;;  %v2381_v7 = vrot.slane %v2379_v31, 1  ;;  %v2386_v46 = vshll.u32 %v2360_v50, 16  ;;  %v4619_v50 = vsel %vm4580_vm2, %v4617_v0, %v4618_v60 }
 0x138   : > { %v4829_v5 = vpop.permute.xlu1 %4828  ;;  %v4827_v57 = vpop.permute.xlu0 %4826  ;;  %v2383_v1 = vrot.slane %v19153_v34, 1  ;;  %v3719_v3 = vrot.slane %v18988_v15, 7  ;;  %v7458_v34 = vld [vmem:[#allocation2 + $0x178] sm:$0x3f]  ;;  %v4620_v31 = vrot.slane %v14797_v9, 5 }
 0x139   : > { %v4907_v63 = vsel %vm1115_vm3, %v4870_v49, %v4827_v57  ;;  %v4545_v49 = vld [vmem:[#allocation2 + $0x1e8] sm:$0x1f]  ;;  %v7457_v57 = vld [vmem:[#allocation2 + $0x170] sm:$0xc0]  ;;  %v7525_v0 = vrot.slane %v7458_v34, 6  ;;  %v2388_v60 = vrot.slane %v2386_v46, 1 }
 0x13a   : > { %12163 = vmatmul.mubr.msk.bf16.gmra.mrb[48].mxu0 %vm1124_vm4, %v4905_v58  ;;  %7565 = vrot.lane.b32.xlu1 %v7520_v23, %s13387_s30  ;;  %v19154_v23 = vshrl.u32 %v14111_v16, 16  ;;  %v14823_v15 = vor.u32 %v18991_v21, %v3719_v3  ;;  %v7523_v16 = vsel %vm7117_vm6, %v7521_v51, %v7522_v47  ;;  %v4623_v3 = vrot.slane %v14815_v42, 5  ;;  %v14834_v21 = vld [vmem:[#allocation2 + $0x1c8] sm:$0xe0]  ;;  %v14842_v42 = vld [vmem:[#allocation2 + $0x1d0] sm:$0x1f] }
 0x13b   : > { %3090 = vrot.lane.b32.xlu0 %v3011_v40, %s13387_s30  ;;  %12166 = vmatprep.mubr.msk.bf16.mxu0 %vm1124_vm4, %v4907_v63  ;;  %v4616_v40 = vsel %vm4580_vm2, %v4614_v52, %v4615_v27  ;;  %v4621_v63 = vrot.slane %v14799_v13, 5  ;;  %v13197_v52 = vld [vmem:[#allocation2 + $0x110] sm:$0xff]  ;;  %v4624_v27 = vrot.slane %v4545_v49, 5  ;;  %v7524_v9 = vrot.slane %v7457_v57, 6  ;;  %v2361_v13 = vld [vmem:[#allocation2 + $0x148] sm:$0x1] }
 0x13c   : > { %v14817_v58 = vpop.permute.xlu1 %4800  ;;  %v2377_v33 = vor.u32 %v2376_v45, %v19154_v23  ;;  %19155 = vst [vmem:[#allocation49_spill] sm:$0xff] %v14823_v15  ;;  %v4799_v11 = vpop.permute.xlu0 %4798  ;;  %v19156_v51 = vshrl.u32 %v14138_v22, 16  ;;  %v7459_v15 = vld [vmem:[#allocation2 + $0x188] sm:$0xc0]  ;;  %v7460_v10 = vld [vmem:[#allocation2 + $0x190] sm:$0x3f] }
 0x13d   : > { %v4876_v49 = vsel %vm272_vm0, %v4619_v50, %v4799_v11  ;;  %v19157_v46 = vshll.u32 %v14193_v59, 16  ;;  %v14851_v22 = vld [vmem:[#allocation2 + $0x1b0] sm:$0xe0]  ;;  %v2393_v11 = vshll.u32 %v2361_v13, 16  ;;  %v7526_v50 = vsel %vm7117_vm6, %v7524_v9, %v7525_v0 }
 0x13e   : > { %2506 = vrot.lane.b32.xlu1 %v13196_v29, %s13386_s26  ;;  %v4873_v29 = vsel %vm272_vm0, %v4616_v40, %v14769_v62  ;;  %v2384_v47 = vor.u32 %v2383_v1, %v19156_v51  ;;  %v2382_v23 = vsel %vm2375_vm5, %v2377_v33, %v2381_v7  ;;  %v19158_v7 = vshll.u32 %v14200_v35, 16  ;;  %v14858_v33 = vld [vmem:[#allocation2 + $0x1b8] sm:$0x1f]  ;;  %v2362_v40 = vld [vmem:[#allocation2 + $0x160] sm:$0x1] }
 0x13f   : > { %2504 = vrot.lane.b32.xlu0 %v13197_v52, %s13386_s26  ;;  %v4909_v52 = vsel %vm1115_vm3, %v4873_v29, %v4829_v5  ;;  %v14848_v34 = vrot.slane %v19157_v46, 1  ;;  %v7527_v51 = vrot.slane %v7459_v15, 6  ;;  %v5787_v13 = vrot.slane %v14851_v22, 5  ;;  %v7462_v15 = vld [vmem:[#allocation2 + $0x1a8] sm:$0x3f] }
 0x140   : > { %v4833_v45 = vpop.permute.xlu1 %4832  ;;  %v4831_v57 = vpop.permute.xlu0 %4830  ;;  %v2390_v5 = vrot.slane %v19158_v7, 1  ;;  %v2389_v46 = vsel %vm2375_vm5, %v2384_v47, %v2388_v60  ;;  %v2660_v7 = vld [vmem:[#allocation2 + $0x120] sm:$0x80]  ;;  %v4625_v9 = vsel %vm4580_vm2, %v4623_v3, %v4624_v27  ;;  %v2400_v62 = vshll.u32 %v2362_v40, 16 }
 0x141   : > { %v4911_v1 = vsel %vm1115_vm3, %v4876_v49, %v4831_v57  ;;  %v7528_v49 = vrot.slane %v7460_v10, 6  ;;  %v5788_v10 = vrot.slane %v14858_v33, 5  ;;  %v2395_v29 = vrot.slane %v2393_v11, 1  ;;  %v14878_v47 = vld [vmem:[#allocation2 + $0x1e0] sm:$0xe0]  ;;  %v14889_v11 = vld [vmem:[#allocation2 + $0x1b8] sm:$0xff] }
 0x142   : > { %12167 = vmatmul.mubr.msk.bf16.gmra.mrb[52].mxu0 %vm1124_vm4, %v4909_v52  ;;  %7567 = vrot.lane.b32.xlu1 %v7523_v16, %s13387_s30  ;;  %v14864_v52 = vld [vmem:[#allocation2 + $0x1a0] sm:$0xc0]  ;;  %v14887_v33 = vld [vmem:[#allocation2 + $0x1e8] sm:$0x1f]  ;;  %v2693_v40 = vshrl.u32 %v2660_v7, 16  ;;  %v7531_v38 = vrot.slane %v7462_v15, 6 }
 0x143   : > { %2536 = vrot.lane.b32.xlu0 %v2382_v23, %s13387_s30  ;;  %12170 = vmatprep.mubr.msk.bf16.mxu0 %vm1124_vm4, %v4911_v1  ;;  %v14866_v16 = vld [vmem:[#allocation2 + $0x1a0] sm:$0xff]  ;;  %v4622_v1 = vsel %vm4580_vm2, %v4620_v31, %v4621_v63  ;;  %v7530_v60 = vrot.slane %v14864_v52, 6  ;;  %v19160_v63 = vshrl.u32 %v14200_v35, 16  ;;  %v7529_v27 = vsel %vm7117_vm6, %v7527_v51, %v7528_v49 }
 0x144   : > { %19159 = vst [vmem:[#allocation50_spill] sm:$0xff] %v14866_v16  ;;  %v14868_v57 = vpop.permute.xlu1 %4804  ;;  %v18992_v23 = vshrl.u32 %v14866_v16, 16  ;;  %v4803_v0 = vpop.permute.xlu0 %4802  ;;  %v18993_v31 = vshll.u32 %v14866_v16, 16  ;;  %v18994_v35 = vshrl.u32 %v14889_v11, 16  ;;  %v2402_v7 = vrot.slane %v2400_v62, 1 }
 0x145   : > { %v2391_v3 = vor.u32 %v2390_v5, %v19160_v63  ;;  %v4882_v51 = vsel %vm272_vm0, %v4625_v9, %v4803_v0  ;;  %v18997_v9 = vshll.u32 %v14889_v11, 16  ;;  %v13199_v0 = vld [vmem:[#allocation2 + $0x140] sm:$0xff]  ;;  %v2695_v62 = vrot.slane %v2693_v40, 7  ;;  %v2363_v40 = vld [vmem:[#allocation2 + $0x178] sm:$0x1] }
 0x146   : > { %7569 = vrot.lane.b32.xlu1 %v7526_v50, %s13387_s30  ;;  %v3731_v22 = vrot.slane %v18992_v23, 7  ;;  %v4879_v50 = vsel %vm272_vm0, %v4622_v1, %v14817_v58  ;;  %v14893_v23 = vld [vmem:[#allocation2 + $0x1f8] sm:$0xe0] }
 0x147   : > { %2538 = vrot.lane.b32.xlu0 %v2389_v46, %s13387_s30  ;;  %v4913_v5 = vsel %vm1115_vm3, %v4879_v50, %v4833_v45  ;;  %v13198_v1 = vld [vmem:[#allocation2 + $0x158] sm:$0xff]  ;;  %v3743_v45 = vrot.slane %v18994_v35, 7  ;;  %v19162_v50 = vshll.u32 %v14283_v14, 16  ;;  %v19164_v35 = vshrl.u32 %v14193_v59, 16  ;;  %v7464_v59 = vld [vmem:[#allocation2 + $0x1c0] sm:$0x3f] }
 0x148   : > { %v4837_v52 = vpop.permute.xlu1 %4836  ;;  %v14897_v46 = vor.u32 %v18993_v31, %v3731_v22  ;;  %v14907_v22 = vld [vmem:[#allocation2 + $0x200] sm:$0x1f]  ;;  %v14921_v31 = vld [vmem:[#allocation2 + $0x1b8] sm:$0xc0] }
 0x149   : > { %v4835_v49 = vpop.permute.xlu0 %4834  ;;  %v2398_v63 = vor.u32 %v14848_v34, %v19164_v35  ;;  %v5789_v34 = vsel %vm4580_vm2, %v5787_v13, %v5788_v10  ;;  %v14942_v35 = vld [vmem:[#allocation2 + $0x1d0] sm:$0xc0] }
 0x14a   : > { %19161 = vst [vmem:[#allocation51_spill] sm:$0xff] %v14897_v46  ;;  %v4915_v58 = vsel %vm1115_vm3, %v4882_v51, %v4835_v49  ;;  %12171 = vmatmul.mubr.msk.bf16.gmra.mrb[56].mxu0 %vm1124_vm4, %v4913_v5  ;;  %2510 = vrot.lane.b32.xlu1 %v13198_v1, %s13386_s26  ;;  %v14916_v5 = vrot.slane %v19162_v50, 1  ;;  %v19163_v51 = vshll.u32 %v14302_v48, 16  ;;  %v14931_v50 = vor.u32 %v18997_v9, %v3743_v45  ;;  %v2364_v45 = vld [vmem:[#allocation2 + $0x190] sm:$0x1] }
 0x14b   : > { %2508 = vrot.lane.b32.xlu0 %v13199_v0, %s13386_s26  ;;  %12174 = vmatprep.mubr.msk.bf16.mxu0 %vm1124_vm4, %v4915_v58  ;;  %v2396_v58 = vsel %vm2375_vm5, %v2391_v3, %v2395_v29  ;;  %v2662_v0 = vld [vmem:[#allocation2 + $0x138] sm:$0x80]  ;;  %v19167_v1 = vrot.slane %v14806_v25, 5  ;;  %v7533_v3 = vrot.slane %v14921_v31, 6  ;;  %v2407_v25 = vshll.u32 %v2363_v40, 16 }
 0x14c   : > { %v2404_v49 = vrot.slane %v19163_v51, 1  ;;  %v14926_v15 = vpop.permute.xlu1 %5981  ;;  %19165 = vst [vmem:[#allocation52_spill] sm:$0xff] %v14931_v50  ;;  %v19166_v51 = vrot.slane %v14813_v19, 5  ;;  %v7532_v19 = vsel %vm7117_vm6, %v7530_v60, %v7531_v38  ;;  %v2705_v9 = vshrl.u32 %v2662_v0, 16  ;;  %v2664_v29 = vld [vmem:[#allocation2 + $0x150] sm:$0x80] }
 0x14d   : > { %v5980_v16 = vpop.permute.xlu0 %5979  ;;  %v2703_v31 = vsel %vm2166_vm7, %v2695_v62, %v13948_v61  ;;  %v7534_v40 = vrot.slane %v7464_v59, 6  ;;  %v2414_v0 = vshll.u32 %v2364_v45, 16  ;;  %v19168_v61 = vshrl.u32 %v14302_v48, 16  ;;  %v14968_v59 = vld [vmem:[#allocation2 + $0x1d0] sm:$0xff] }
 0x14e   : > { %v4628_v46 = vsel %vm4580_vm2, %v19167_v1, %v19166_v51  ;;  %7571 = vrot.lane.b32.xlu1 %v7529_v27, %s13387_s30  ;;  %v14946_v1 = vld [vmem:[#allocation2 + $0x1d8] sm:$0x3f]  ;;  %v14948_v51 = vld [vmem:[#allocation2 + $0x210] sm:$0xe0]  ;;  %v2403_v27 = vsel %vm2375_vm5, %v2398_v63, %v2402_v7  ;;  %v6045_v38 = vsel %vm272_vm0, %v5789_v34, %v5980_v16  ;;  %v2707_v63 = vrot.slane %v2705_v9, 7 }
 0x14f   : > { %2540 = vrot.lane.b32.xlu0 %v2396_v58, %s13387_s30  ;;  %v4885_v13 = vsel %vm272_vm0, %v4628_v46, %v14868_v57  ;;  %v7536_v57 = vrot.slane %v14942_v35, 6  ;;  %v7537_v46 = vrot.slane %v14946_v1, 6  ;;  %v14962_v7 = vld [vmem:[#allocation2 + $0x218] sm:$0x1f]  ;;  %v2405_v16 = vor.u32 %v2404_v49, %v19168_v61  ;;  %v13201_v61 = vld [vmem:[#allocation2 + $0x170] sm:$0xff] }
 0x150   : > { %v6014_v10 = vpop.permute.xlu1 %6013  ;;  %v4917_v58 = vsel %vm1115_vm3, %v4885_v13, %v4837_v52  ;;  %v2409_v52 = vrot.slane %v2407_v25, 1  ;;  %v2717_v62 = vshrl.u32 %v2664_v29, 16  ;;  %v19169_v34 = vrot.slane %v14842_v42, 5  ;;  %v14978_v13 = vld [vmem:[#allocation2 + $0x228] sm:$0xe0] }
 0x151   : > { %v6012_v60 = vpop.permute.xlu0 %6011  ;;  %v19170_v35 = vrot.slane %v14834_v21, 5  ;;  %v3094_v1 = vsel %vm272_vm0, %v2703_v31, %v14147_v44  ;;  %v19004_v48 = vshrl.u32 %v14968_v59, 16  ;;  %v19171_v9 = vrot.slane %v14887_v33, 5  ;;  %v13200_v31 = vld [vmem:[#allocation2 + $0x188] sm:$0xff] }
 0x152   : > { %v6092_v50 = vsel %vm1115_vm3, %v6045_v38, %v6012_v60  ;;  %12175 = vmatmul.mubr.msk.bf16.gmra.mrb[60].mxu0 %vm1124_vm4, %v4917_v58  ;;  %7573 = vrot.lane.b32.xlu1 %v7532_v19, %s13387_s30  ;;  %v19172_v49 = vrot.slane %v14878_v47, 5  ;;  %v2416_v25 = vrot.slane %v2414_v0, 1  ;;  %v14990_v58 = vld [vmem:[#allocation2 + $0x230] sm:$0x1f]  ;;  %v14992_v38 = vld [vmem:[#allocation2 + $0x1e8] sm:$0xc0] }
 0x153   : > { %2542 = vrot.lane.b32.xlu0 %v2403_v27, %s13387_s30  ;;  %12190 = vmatprep.mubr.msk.bf16.mxu0 %vm1124_vm4, %v6092_v50  ;;  %v5792_v45 = vsel %vm4580_vm2, %v19170_v35, %v19169_v34  ;;  %v5799_v50 = vrot.slane %v14948_v51, 5  ;;  %v5800_v27 = vrot.slane %v14962_v7, 5  ;;  %v3755_v47 = vrot.slane %v19004_v48, 7 }
 0x154   : > { %v3061_v19 = vpop.permute.xlu1 %3060  ;;  %v5795_v42 = vsel %vm4580_vm2, %v19172_v49, %v19171_v9  ;;  %v19005_v33 = vshll.u32 %v14968_v59, 16  ;;  %v19173_v60 = vshrl.u32 %v14283_v14, 16  ;;  %v7535_v34 = vsel %vm7117_vm6, %v7533_v3, %v7534_v40  ;;  %v2666_v9 = vld [vmem:[#allocation2 + $0x168] sm:$0x80] }
 0x155   : > { %v5984_v29 = vpop.permute.xlu0 %5983  ;;  %v3141_v21 = vsel %vm1115_vm3, %v3094_v1, %v3061_v19  ;;  %v2410_v35 = vsel %vm2375_vm5, %v2405_v16, %v2409_v52  ;;  %v2719_v19 = vrot.slane %v2717_v62, 7  ;;  %v2365_v1 = vld [vmem:[#allocation2 + $0x1a8] sm:$0x1]  ;;  %v2715_v52 = vsel %vm2166_vm7, %v2707_v63, %v13839_v2 }
 0x156   : > { %11970 = vmatprep.mubr.msk.bf16.mxu1 %vm1124_vm4, %v3141_v21  ;;  %2514 = vrot.lane.b32.xlu1 %v13200_v31, %s13386_s26  ;;  %v2412_v0 = vor.u32 %v14916_v5, %v19173_v60  ;;  %v15003_v49 = vld [vmem:[#allocation2 + $0x1e8] sm:$0xff]  ;;  %v6048_v21 = vsel %vm272_vm0, %v5792_v45, %v14926_v15  ;;  %v6051_v31 = vsel %vm272_vm0, %v5795_v42, %v5984_v29  ;;  %v5802_v62 = vrot.slane %v14978_v13, 5  ;;  %v12994_v15 = vld [vmem:[%s18896_s1 + $0x158] sm:$0xff]   ;;  %v7468_v29 = vld [vmem:[#allocation2 + $0x1f0] sm:$0x3f] }
 0x157   : > { %2512 = vrot.lane.b32.xlu0 %v13201_v61, %s13386_s26  ;;  %v15010_v5 = vor.u32 %v19005_v33, %v3755_v47  ;;  %v18998_v60 = vshrl.u32 %v15003_v49, 16  ;;  %v6094_v3 = vsel %vm1115_vm3, %v6048_v21, %v6014_v10  ;;  %v19174_v45 = vshll.u32 %v14386_v41, 16  ;;  %v2366_v21 = vld [vmem:[#allocation2 + $0x1c0] sm:$0x1] }
 0x158   : > { %v6016_v14 = vpop.permute.xlu1 %6015  ;;  %v5803_v10 = vrot.slane %v14990_v58, 5  ;;  %v19003_v2 = vshll.u32 %v15003_v49, 16  ;;  %v7538_v63 = vsel %vm7117_vm6, %v7536_v57, %v7537_v46  ;;  %v7539_v61 = vrot.slane %v14992_v38, 6  ;;  %v15128_v13 = vld [vmem:[#allocation2 + $0x220] sm:$0x3f] }
 0x159   : > { %v5986_v40 = vpop.permute.xlu0 %5985  ;;  %v6096_v16 = vsel %vm1115_vm3, %v6051_v31, %v6016_v14  ;;  %v2418_v42 = vrot.slane %v19174_v45, 1  ;;  %v3767_v47 = vrot.slane %v18998_v60, 7  ;;  %v2668_v31 = vld [vmem:[#allocation2 + $0x180] sm:$0x80]  ;;  %v2729_v45 = vshrl.u32 %v2666_v9, 16 }
 0x15a   : > { %12191 = vmatmul.mubr.msk.bf16.vlgmr.msra.gmra.mrb[32].mxu0 %vm1124_vm4, %v6094_v3  ;;  %7575 = vrot.lane.b32.xlu1 %v7535_v34, %s13387_s30  ;;  %v2421_v34 = vshll.u32 %v2365_v1, 16  ;;  %v2417_v3 = vsel %vm2375_vm5, %v2412_v0, %v2416_v25  ;;  %v12995_v60 = vld [vmem:[%s18896_s1 + $0x160] sm:$0xff]   ;;  %v19176_v57 = vrot.slane %v14907_v22, 5  ;;  %v19177_v46 = vrot.slane %v14893_v23, 5 }
 0x15b   : > { %2544 = vrot.lane.b32.xlu0 %v2410_v35, %s13387_s30  ;;  %12194 = vmatprep.mubr.msk.bf16.mxu0 %vm1124_vm4, %v6096_v16  ;;  %v15040_v35 = vor.u32 %v19003_v2, %v3767_v47  ;;  %v3097_v25 = vsel %vm272_vm0, %v2715_v52, %v14175_v53  ;;  %v7540_v1 = vrot.slane %v7468_v29, 6  ;;  %v15051_v9 = vld [vmem:[#allocation2 + $0x200] sm:$0xc0]  ;;  %v12998_v16 = vld [vmem:[%s18896_s1 + $0x8] sm:$0xff]   ;;  %v19178_v23 = vshrl.u32 %v14386_v41, 16 }
 0x15c   : > { %v6018_v14 = vpop.permute.xlu1 %6017  ;;  %12295 = vmatpush3.bf16.msra.mxu0 %v14736_v12  ;;  %v5798_v38 = vsel %vm4580_vm2, %v19177_v46, %v19176_v57  ;;  %v2727_v12 = vsel %vm2166_vm7, %v2719_v19, %v13845_v6  ;;  %v2423_v6 = vrot.slane %v2421_v34, 1  ;;  %v15062_v19 = vld [vmem:[#allocation2 + $0x208] sm:$0x3f]  ;;  %v15064_v29 = vld [vmem:[#allocation2 + $0x240] sm:$0xe0]  ;;  %v2741_v47 = vshrl.u32 %v2668_v31, 16 }
 0x15d   : > { %19175 = vst [vmem:[#allocation53_spill] sm:$0xff] %v15040_v35  ;;  %v3063_v0 = vpop.permute.xlu0 %3062  ;;  %12296 = vmatprep.subr.bf16.mxu0 %v12994_v15  ;;  %v2419_v52 = vor.u32 %v2418_v42, %v19178_v23  ;;  %v6054_v57 = vsel %vm272_vm0, %v5798_v38, %v5986_v40  ;;  %v3100_v46 = vsel %vm272_vm0, %v2727_v12, %v14196_v32  ;;  %v12997_v41 = vld [vmem:[%s18896_s1 + $0x168] sm:$0xff]   ;;  %v19179_v31 = vshll.u32 %v14363_v28, 16  ;;  %v15097_v23 = vld [vmem:[#allocation2 + $0x200] sm:$0xff] }
 0x15e   : > { %v3143_v22 = vsel %vm1115_vm3, %v3097_v25, %v3063_v0  ;;  %7577 = vrot.lane.b32.xlu1 %v7538_v63, %s13387_s30  ;;  %v2731_v63 = vrot.slane %v2729_v45, 7  ;;  %v2428_v0 = vshll.u32 %v2366_v21, 16  ;;  %v6098_v42 = vsel %vm1115_vm3, %v6054_v57, %v6018_v14  ;;  %v13203_v14 = vld [vmem:[#allocation2 + $0x1a0] sm:$0xff]  ;;  %v15102_v57 = vld [vmem:[#allocation2 + $0x1d8] sm:$0x1] }
 0x15f   : > { %11971 = vmatmul.mubr.msk.bf16.vlgmr.msra.gmra.mrb[0].mxu1 %vm1124_vm4, %v3143_v22  ;;  %2546 = vrot.lane.b32.xlu0 %v2417_v3, %s13387_s30  ;;  %v15069_v22 = vld [vmem:[#allocation2 + $0x248] sm:$0x1f]  ;;  %v5801_v40 = vsel %vm4580_vm2, %v5799_v50, %v5800_v27  ;;  %v7541_v51 = vsel %vm7117_vm6, %v7539_v61, %v7540_v1  ;;  %v7542_v7 = vrot.slane %v15051_v9, 6  ;;  %v7543_v50 = vrot.slane %v15062_v19, 6  ;;  %v13202_v27 = vld [vmem:[#allocation2 + $0x1b8] sm:$0xff] }
 0x160   : > { %v3065_v25 = vpop.permute.xlu1 %3064  ;;  %12297 = vmatpush3.bf16.msra.mxu0 %v12994_v15  ;;  %12003 = vmatpush3.bf16.msra.mxu1 %v14672_v37  ;;  %v2425_v15 = vrot.slane %v19179_v31, 1  ;;  %v13000_v37 = vld [vmem:[%s18896_s1 + $0x10] sm:$0xff]   ;;  %v2424_v3 = vsel %vm2375_vm5, %v2419_v52, %v2423_v6  ;;  %v5805_v45 = vrot.slane %v15064_v29, 5  ;;  %v5806_v38 = vrot.slane %v15069_v22, 5  ;;  %v15108_v29 = vpop.f32.mrb[0].mxu0 }
 0x161   : > { %v5988_v34 = vpop.permute.xlu0 %5987  ;;  %v3145_v21 = vsel %vm1115_vm3, %v3100_v46, %v3065_v25  ;;  %12298 = vmatprep.subr.bf16.mxu0 %v12995_v60  ;;  %12004 = vmatprep.subr.bf16.mxu1 %v12998_v16  ;;  %v2743_v12 = vrot.slane %v2741_v47, 7  ;;  %v2739_v9 = vsel %vm2166_vm7, %v2731_v63, %v13819_v56  ;;  %v2430_v19 = vrot.slane %v2428_v0, 1  ;;  %v2670_v46 = vld [vmem:[#allocation2 + $0x198] sm:$0x80]  ;;  %v12999_v52 = vld [vmem:[%s18896_s1 + $0x170] sm:$0xff]   ;;  %19180 = vst [vmem:[#allocation54_spill] sm:$0xff] %v15108_v29 }
 0x162   : > { %11974 = vmatprep.mubr.msk.bf16.mxu1 %vm1124_vm4, %v3145_v21  ;;  %12195 = vmatmul.mubr.msk.bf16.gmra.mrb[36].mxu0 %vm1124_vm4, %v6098_v42  ;;  %v6057_v61 = vsel %vm272_vm0, %v5801_v40, %v5988_v34  ;;  %v19000_v6 = vshrl.u32 %v15097_v23, 16  ;;  %v19181_v47 = vshrl.u32 %v14363_v28, 16  ;;  %v5804_v56 = vsel %vm4580_vm2, %v5802_v62, %v5803_v10  ;;  %v15118_v0 = vld [vmem:[#allocation2 + $0x258] sm:$0xe0]  ;;  %v15123_v22 = vpop.f32.mrb[1].mxu0 }
 0x163   : > { %2518 = vrot.lane.b32.xlu1 %v13202_v27, %s13386_s26  ;;  %2516 = vrot.lane.b32.xlu0 %v13203_v14, %s13386_s26  ;;  %19182 = vst [vmem:[#allocation55_spill] sm:$0xff] %v15123_v22  ;;  %v15126_v28 = vld [vmem:[#allocation2 + $0x218] sm:$0xc0]  ;;  %v19002_v62 = vshll.u32 %v15097_v23, 16  ;;  %v3103_v10 = vsel %vm272_vm0, %v2739_v9, %v14144_v17  ;;  %v7544_v42 = vsel %vm7117_vm6, %v7542_v7, %v7543_v50  ;;  %v2368_v34 = vld [vmem:[#allocation2 + $0x1f0] sm:$0x1] }
 0x164   : > { %v6020_v1 = vpop.permute.xlu1 %6019  ;;  %12299 = vmatpush3.bf16.msra.mxu0 %v12995_v60  ;;  %12005 = vmatpush3.bf16.msra.mxu1 %v12998_v16  ;;  %v2426_v25 = vor.u32 %v2425_v15, %v19181_v47  ;;  %v13002_v16 = vld [vmem:[%s18896_s1 + $0x18] sm:$0xff]   ;;  %v3779_v58 = vrot.slane %v19000_v6, 7  ;;  %v2751_v40 = vsel %vm2166_vm7, %v2743_v12, %v13861_v20  ;;  %v15140_v21 = vld [vmem:[#allocation2 + $0x1b0] sm:$0x80]  ;;  %v15142_v31 = vpop.f32.mrb[2].mxu0  ;;  %v5807_v47 = vsel %vm4580_vm2, %v5805_v45, %v5806_v38  ;;  %v13003_v45 = vld [vmem:[%s18896_s1 + $0x20] sm:$0xff]  }
 0x165   : > { %v5990_v63 = vpop.permute.xlu0 %5989  ;;  %v6100_v60 = vsel %vm1115_vm3, %v6057_v61, %v6020_v1  ;;  %12300 = vmatprep.subr.bf16.mxu0 %v12997_v41  ;;  %12006 = vmatprep.subr.bf16.mxu1 %v13000_v37  ;;  %19183 = vst [vmem:[#allocation56_spill] sm:$0xff] %v15142_v31  ;;  %v2753_v61 = vshrl.u32 %v2670_v46, 16  ;;  %v13001_v7 = vld [vmem:[%s18896_s1 + $0x178] sm:$0xff]   ;;  %v15156_v50 = vpop.f32.mrb[3].mxu0  ;;  %v13205_v6 = vld [vmem:[#allocation2 + $0x1d0] sm:$0xff] }
 0x166   : > { %12198 = vmatprep.mubr.msk.bf16.mxu0 %vm1124_vm4, %v6100_v60  ;;  %v6060_v15 = vsel %vm272_vm0, %v5804_v56, %v5990_v63  ;;  %v15154_v20 = vor.u32 %v19002_v62, %v3779_v58  ;;  %19186 = vst [vmem:[#allocation58_spill] sm:$0xff] %v15156_v50  ;;  %v2431_v9 = vsel %vm2375_vm5, %v2426_v25, %v2430_v19  ;;  %v15162_v46 = vld [vmem:[#allocation2 + $0x218] sm:$0xff]  ;;  %v19187_v56 = vshll.u32 %v14429_v4, 16  ;;  %v15169_v58 = vld [vmem:[#allocation2 + $0x230] sm:$0xc0]  ;;  %v19188_v19 = vld [vmem:[#allocation19_spill] sm:$0xff] }
 0x167   : > { %7579 = vrot.lane.b32.xlu1 %v7541_v51, %s13387_s30  ;;  %2548 = vrot.lane.b32.xlu0 %v2424_v3, %s13387_s30  ;;  %v19184_v51 = vshll.u32 %v14444_v30, 16  ;;  %v15147_v3 = vld [vmem:[#allocation2 + $0x260] sm:$0x1f]  ;;  %v5808_v60 = vrot.slane %v15118_v0, 5  ;;  %v18999_v38 = vshrl.u32 %v15162_v46, 16  ;;  %v7545_v25 = vrot.slane %v15126_v28, 6 }
 0x168   : > { %v6022_v27 = vpop.permute.xlu1 %6021  ;;  %12301 = vmatpush3.bf16.msra.mxu0 %v12997_v41  ;;  %12007 = vmatpush3.bf16.msra.mxu1 %v13000_v37  ;;  %19185 = vst [vmem:[#allocation57_spill] sm:$0xff] %v15154_v20  ;;  %v2435_v41 = vshll.u32 %v15102_v57, 16  ;;  %v2439_v63 = vrot.slane %v19187_v56, 1  ;;  %v3106_v57 = vsel %vm272_vm0, %v2751_v40, %v19188_v19  ;;  %v7474_v0 = vld [vmem:[#allocation2 + $0x238] sm:$0x3f] }
 0x169   : > { %v2432_v14 = vrot.slane %v19184_v51, 1  ;;  %v3067_v12 = vpop.permute.xlu0 %3066  ;;  %v6102_v1 = vsel %vm1115_vm3, %v6060_v15, %v6022_v27  ;;  %12302 = vmatprep.subr.bf16.mxu0 %v12999_v52  ;;  %12008 = vmatprep.subr.bf16.mxu1 %v13002_v16  ;;  %v2442_v15 = vshll.u32 %v2368_v34, 16  ;;  %v2755_v51 = vrot.slane %v2753_v61, 7  ;;  %v13004_v61 = vld [vmem:[%s18896_s1 + $0x28] sm:$0xff]   ;;  %v2370_v2 = vld [vmem:[#allocation2 + $0x220] sm:$0x1] }
 0x16a   : > { %v3147_v37 = vsel %vm1115_vm3, %v3103_v10, %v3067_v12  ;;  %12199 = vmatmul.mubr.msk.bf16.gmra.mrb[40].mxu0 %vm1124_vm4, %v6102_v1  ;;  %v7546_v10 = vrot.slane %v15128_v13, 6  ;;  %v2765_v12 = vshrl.u32 %v15140_v21, 16  ;;  %v3791_v1 = vrot.slane %v18999_v38, 7  ;;  %v2369_v62 = vld [vmem:[#allocation2 + $0x208] sm:$0x1]  ;;  %v19214_v50 = vld [vmem:[#allocation9_spill] sm:$0xff] }
 0x16b   : > { %11975 = vmatmul.mubr.msk.bf16.gmra.mrb[4].mxu1 %vm1124_vm4, %v3147_v37  ;;  %7581 = vrot.lane.b32.xlu1 %v7544_v42, %s13387_s30  ;;  %v19001_v42 = vshll.u32 %v15162_v46, 16  ;;  %v15186_v37 = vpop.f32.mrb[4].mxu0  ;;  %v19190_v13 = vshrl.u32 %v14444_v30, 16  ;;  %v2437_v56 = vrot.slane %v2435_v41, 1  ;;  %v19193_v30 = vshrl.u32 %v14429_v4, 16  ;;  %v19195_v4 = vld [vmem:[#allocation6_spill] sm:$0xff] }
 0x16c   : > { %2550 = vrot.lane.b32.xlu0 %v2431_v9, %s13387_s30  ;;  %v3069_v27 = vpop.permute.xlu1 %3068  ;;  %12303 = vmatpush3.bf16.msra.mxu0 %v12999_v52  ;;  %19189 = vst [vmem:[#allocation19_spill] sm:$0xff] %v15186_v37  ;;  %v5809_v9 = vrot.slane %v15147_v3, 5  ;;  %v15192_v21 = vpop.f32.mrb[5].mxu0  ;;  %v5739_v52 = vld [vmem:[#allocation2 + $0x270] sm:$0xe0]  ;;  %v13204_v3 = vld [vmem:[#allocation2 + $0x1e8] sm:$0xff] }
 0x16d   : > { %v5992_v40 = vpop.permute.xlu0 %5991  ;;  %v3149_v28 = vsel %vm1115_vm3, %v3106_v57, %v3069_v27  ;;  %v2433_v34 = vor.u32 %v2432_v14, %v19190_v13  ;;  %12304 = vmatprep.subr.bf16.mxu0 %v13001_v7  ;;  %12009 = vmatpush3.bf16.msra.mxu1 %v13002_v16  ;;  %19191 = vst [vmem:[#allocation59_spill] sm:$0xff] %v15192_v21  ;;  %v7548_v16 = vrot.slane %v15169_v58, 6  ;;  %v7549_v41 = vrot.slane %v7474_v0, 6  ;;  %v15206_v13 = vpop.f32.mrb[6].mxu0  ;;  %v7480_v31 = vld [vmem:[#allocation2 + $0x280] sm:$0x3f] }
 0x16e   : > { %11978 = vmatprep.mubr.msk.bf16.mxu1 %vm1124_vm4, %v3149_v28  ;;  %12010 = vmatprep.subr.bf16.mxu1 %v13003_v45  ;;  %v15200_v57 = vor.u32 %v19001_v42, %v3791_v1  ;;  %v2440_v14 = vor.u32 %v2439_v63, %v19193_v30  ;;  %v2444_v27 = vrot.slane %v2442_v15, 1  ;;  %v5740_v28 = vld [vmem:[#allocation2 + $0x278] sm:$0x1f]  ;;  %19194 = vst [vmem:[#allocation61_spill] sm:$0xff] %v15206_v13  ;;  %v2767_v30 = vrot.slane %v2765_v12, 7 }
 0x16f   : > { %2522 = vrot.lane.b32.xlu1 %v13204_v3, %s13386_s26  ;;  %v6063_v38 = vsel %vm272_vm0, %v5807_v47, %v5992_v40  ;;  %v7547_v42 = vsel %vm7117_vm6, %v7545_v25, %v7546_v10  ;;  %v2763_v63 = vsel %vm2166_vm7, %v2755_v51, %v19195_v4  ;;  %v15213_v3 = vpop.f32.mrb[7].mxu0  ;;  %v5810_v58 = vsel %vm4580_vm2, %v5808_v60, %v5809_v9  ;;  %v15218_v40 = vld [vmem:[#allocation2 + $0x288] sm:$0xe0]  ;;  %v19197_v60 = vld [vmem:[#allocation18_spill] sm:$0xff]  ;;  %v7476_v9 = vld [vmem:[#allocation2 + $0x250] sm:$0x3f] }
 0x170   : > { %19192 = vst [vmem:[#allocation60_spill] sm:$0xff] %v15200_v57  ;;  %2520 = vrot.lane.b32.xlu0 %v13205_v6, %s13386_s26  ;;  %v6024_v1 = vpop.permute.xlu1 %6023  ;;  %12305 = vmatpush3.bf16.msra.mxu0 %v13001_v7  ;;  %19196 = vst [vmem:[#allocation6_spill] sm:$0xff] %v15213_v3  ;;  %v2438_v47 = vsel %vm2375_vm5, %v2433_v34, %v2437_v56  ;;  %v15220_v6 = vld [vmem:[#allocation2 + $0x290] sm:$0x1f]  ;;  %v2674_v25 = vld [vmem:[#allocation2 + $0x1c8] sm:$0x80]  ;;  %v7550_v12 = vsel %vm7117_vm6, %v7548_v16, %v7549_v41 }
 0x171   : > { %v5994_v0 = vpop.permute.xlu0 %5993  ;;  %v6104_v15 = vsel %vm1115_vm3, %v6063_v38, %v6024_v1  ;;  %12011 = vmatpush3.bf16.msra.mxu1 %v13003_v45  ;;  %v5811_v10 = vrot.slane %v5739_v52, 5  ;;  %v5812_v7 = vrot.slane %v5740_v28, 5  ;;  %v15223_v51 = vld [vmem:[#allocation2 + $0x248] sm:$0xc0]  ;;  %v3109_v38 = vsel %vm272_vm0, %v2763_v63, %v19197_v60  ;;  %v2676_v56 = vld [vmem:[#allocation2 + $0x1e0] sm:$0x80] }
 0x172   : > { %12202 = vmatprep.mubr.msk.bf16.mxu0 %vm1124_vm4, %v6104_v15  ;;  %12012 = vmatprep.subr.bf16.mxu1 %v13004_v61  ;;  %v2445_v34 = vsel %vm2375_vm5, %v2440_v14, %v2444_v27  ;;  %v6066_v45 = vsel %vm272_vm0, %v5810_v58, %v5994_v0  ;;  %v19198_v28 = vld [vmem:[#allocation8_spill] sm:$0xff]  ;;  %v19199_v4 = vshll.u32 %v14498_v43, 16  ;;  %v2777_v15 = vshrl.u32 %v2674_v25, 16  ;;  %v15238_v16 = vpop.f32.mrb[8].mxu0  ;;  %v7060_v20 = vld [vmem:[#allocation2 + $0x58] sm:$0x3f] }
 0x173   : > { %7583 = vrot.lane.b32.xlu1 %v7547_v42, %s13387_s30  ;;  %v2775_v1 = vsel %vm2166_vm7, %v2767_v30, %v19198_v28  ;;  %v15236_v63 = vld [vmem:[#allocation2 + $0x230] sm:$0xff]  ;;  %v19200_v27 = vshll.u32 %v14486_v39, 16  ;;  %v2449_v0 = vshll.u32 %v2369_v62, 16  ;;  %v15244_v30 = vpop.f32.mrb[9].mxu0  ;;  %v5813_v25 = vsel %vm4580_vm2, %v5811_v10, %v5812_v7  ;;  %v19201_v62 = vld [vmem:[#allocation23_spill] sm:$0xff] }
 0x174   : > { %2552 = vrot.lane.b32.xlu0 %v2438_v47, %s13387_s30  ;;  %v6026_v52 = vpop.permute.xlu1 %6025  ;;  %v2446_v42 = vrot.slane %v19199_v4, 1  ;;  %v19006_v47 = vshrl.u32 %v15236_v63, 16  ;;  %v5814_v4 = vrot.slane %v15218_v40, 5  ;;  %v5815_v48 = vrot.slane %v15220_v6, 5  ;;  %v15259_v10 = vpop.f32.mrb[10].mxu0 }
 0x175   : > { %v3071_v14 = vpop.permute.xlu0 %3070  ;;  %v6106_v41 = vsel %vm1115_vm3, %v6066_v45, %v6026_v52  ;;  %v2453_v58 = vrot.slane %v19200_v27, 1  ;;  %12013 = vmatpush3.bf16.msra.mxu1 %v13004_v61  ;;  %v3112_v61 = vsel %vm272_vm0, %v2775_v1, %v19201_v62  ;;  %v7551_v45 = vrot.slane %v15223_v51, 6  ;;  %v7477_v52 = vld [vmem:[#allocation2 + $0x260] sm:$0xc0]  ;;  %19202 = vst [vmem:[#allocation18_spill] sm:$0xff] %v15259_v10 }
 0x176   : > { %v3151_v28 = vsel %vm1115_vm3, %v3109_v38, %v3071_v14  ;;  %12203 = vmatmul.mubr.msk.bf16.gmra.mrb[44].mxu0 %vm1124_vm4, %v6106_v41  ;;  %v3803_v38 = vrot.slane %v19006_v47, 7  ;;  %v19007_v14 = vshll.u32 %v15236_v63, 16  ;;  %v19203_v6 = vshrl.u32 %v14498_v43, 16  ;;  %v7478_v27 = vld [vmem:[#allocation2 + $0x268] sm:$0x3f] }
 0x177   : > { %11979 = vmatmul.mubr.msk.bf16.gmra.mrb[8].mxu1 %vm1124_vm4, %v3151_v28  ;;  %7585 = vrot.lane.b32.xlu1 %v7550_v12, %s13387_s30  ;;  %v7552_v12 = vrot.slane %v7476_v9, 6  ;;  %v2779_v41 = vrot.slane %v2777_v15, 7  ;;  %v2789_v1 = vshrl.u32 %v2676_v56, 16  ;;  %v15264_v28 = vpop.f32.mrb[11].mxu0  ;;  %v2451_v47 = vrot.slane %v2449_v0, 1 }
 0x178   : > { %2554 = vrot.lane.b32.xlu0 %v2445_v34, %s13387_s30  ;;  %v3073_v40 = vpop.permute.xlu1 %3072  ;;  %v2447_v7 = vor.u32 %v2446_v42, %v19203_v6  ;;  %19204 = vst [vmem:[#allocation8_spill] sm:$0xff] %v15264_v28  ;;  %v2456_v3 = vshll.u32 %v2370_v2, 16  ;;  %v15269_v13 = vor.u32 %v19007_v14, %v3803_v38  ;;  %v15272_v34 = vld [vmem:[#allocation2 + $0x2a0] sm:$0xe0]  ;;  %v19206_v43 = vshrl.u32 %v14486_v39, 16  ;;  %v13206_v42 = vld [vmem:[#allocation2 + $0x218] sm:$0xff] }
 0x179   : > { %v5996_v51 = vpop.permute.xlu0 %5995  ;;  %v3153_v33 = vsel %vm1115_vm3, %v3112_v61, %v3073_v40  ;;  %v5816_v56 = vsel %vm4580_vm2, %v5814_v4, %v5815_v48  ;;  %v7554_v15 = vrot.slane %v7477_v52, 6  ;;  %v7555_v61 = vrot.slane %v7478_v27, 6  ;;  %v15278_v0 = vld [vmem:[#allocation2 + $0x2a8] sm:$0x1f]  ;;  %v15283_v2 = vld [vmem:[%s18896_s1 + $0x120] sm:$0xff]  }
 0x17a   : > { %19205 = vst [vmem:[#allocation23_spill] sm:$0xff] %v15269_v13  ;;  %11982 = vmatprep.mubr.msk.bf16.mxu1 %vm1124_vm4, %v3153_v33  ;;  %v2454_v9 = vor.u32 %v2453_v58, %v19206_v43  ;;  %v6069_v33 = vsel %vm272_vm0, %v5813_v25, %v5996_v51  ;;  %v13207_v38 = vld [vmem:[#allocation2 + $0x200] sm:$0xff]  ;;  %v7553_v58 = vsel %vm7117_vm6, %v7551_v45, %v7552_v12  ;;  %v19207_v40 = vld [vmem:[#allocation7_spill] sm:$0xff]  ;;  %v2791_v4 = vrot.slane %v2789_v1, 7  ;;  %v2678_v52 = vld [vmem:[#allocation2 + $0x1f8] sm:$0x80] }
 0x17b   : > { %2526 = vrot.lane.b32.xlu1 %v13206_v42, %s13386_s26  ;;  %v2787_v48 = vsel %vm2166_vm7, %v2779_v41, %v19207_v40  ;;  %v15290_v6 = vld [vmem:[#allocation2 + $0x248] sm:$0xff]  ;;  %v2452_v42 = vsel %vm2375_vm5, %v2447_v7, %v2451_v47  ;;  %v2458_v14 = vrot.slane %v2456_v3, 1  ;;  %v15294_v25 = vld [vmem:[#allocation2 + $0x2b8] sm:$0xe0]  ;;  %v2371_v51 = vld [vmem:[#allocation2 + $0x238] sm:$0x1]  ;;  %12338 = vmatprep.subr.bf16.mxu0 %v15283_v2  ;;  %v7556_v40 = vsel %vm7117_vm6, %v7554_v15, %v7555_v61 }
 0x17c   : > { %2524 = vrot.lane.b32.xlu0 %v13207_v38, %s13386_s26  ;;  %v6028_v39 = vpop.permute.xlu1 %6027  ;;  %v15298_v45 = vpop.f32.mrb[12].mxu0  ;;  %v19209_v12 = vshrl.u32 %v14463_v24, 16  ;;  %v5817_v1 = vrot.slane %v15272_v34, 5  ;;  %v5746_v47 = vld [vmem:[#allocation2 + $0x2c0] sm:$0x1f]  ;;  %v19212_v21 = vshrl.u32 %v15290_v6, 16 }
 0x17d   : > { %v5998_v27 = vpop.permute.xlu0 %5997  ;;  %v6108_v43 = vsel %vm1115_vm3, %v6069_v33, %v6028_v39  ;;  %19208 = vst [vmem:[#allocation7_spill] sm:$0xff] %v15298_v45  ;;  %v5818_v33 = vrot.slane %v15278_v0, 5  ;;  %v15305_v3 = vpop.f32.mrb[13].mxu0  ;;  %v19211_v7 = vld [vmem:[#allocation22_spill] sm:$0xff]  ;;  %v7479_v38 = vld [vmem:[#allocation2 + $0x278] sm:$0xc0] }
 0x17e   : > { %v2807_v41 = vrot.slane %v19209_v12, 7  ;;  %12206 = vmatprep.mubr.msk.bf16.mxu0 %vm1124_vm4, %v6108_v43  ;;  %19210 = vst [vmem:[#allocation62_spill] sm:$0xff] %v15305_v3  ;;  %v3115_v39 = vsel %vm272_vm0, %v2787_v48, %v19211_v7  ;;  %v3815_v12 = vrot.slane %v19212_v21, 7  ;;  %v15314_v37 = vpop.f32.mrb[14].mxu0  ;;  %v6072_v34 = vsel %vm272_vm0, %v5816_v56, %v5998_v27  ;;  %v2680_v15 = vld [vmem:[#allocation2 + $0x210] sm:$0x80] }
 0x17f   : > { %7587 = vrot.lane.b32.xlu1 %v7553_v58, %s13387_s30  ;;  %19213 = vst [vmem:[#allocation22_spill] sm:$0xff] %v15314_v37  ;;  %v2799_v58 = vsel %vm2166_vm7, %v2791_v4, %v19214_v50  ;;  %v2463_v48 = vshll.u32 %v2371_v51, 16  ;;  %v2801_v29 = vshrl.u32 %v2678_v52, 16  ;;  %v15320_v61 = vpop.f32.mrb[15].mxu0  ;;  %v2459_v43 = vsel %vm2375_vm5, %v2454_v9, %v2458_v14  ;;  %v2372_v27 = vld [vmem:[#allocation2 + $0x250] sm:$0x1] }
 0x180   : > { %2556 = vrot.lane.b32.xlu0 %v2452_v42, %s13387_s30  ;;  %v6030_v0 = vpop.permute.xlu1 %6029  ;;  %19215 = vst [vmem:[#allocation9_spill] sm:$0xff] %v15320_v61  ;;  %v19216_v37 = vshll.u32 %v14568_v26, 16  ;;  %v19217_v42 = vshll.u32 %v15290_v6, 16  ;;  %v19219_v50 = vshll.u32 %v14463_v24, 16  ;;  %v5820_v51 = vrot.slane %v15294_v25, 5 }
 0x181   : > { %v3075_v22 = vpop.permute.xlu0 %3074  ;;  %v6110_v21 = vsel %vm1115_vm3, %v6072_v34, %v6030_v0  ;;  %v7481_v34 = vld [vmem:[#allocation2 + $0x290] sm:$0xc0]  ;;  %v19221_v9 = vshll.u32 %v14553_v36, 16  ;;  %v5821_v0 = vrot.slane %v5746_v47, 5  ;;  %v7557_v24 = vrot.slane %v7479_v38, 6 }
 0x182   : > { %v2460_v56 = vrot.slane %v19216_v37, 1  ;;  %v15328_v28 = vor.u32 %v19217_v42, %v3815_v12  ;;  %v2810_v4 = vor.u32 %v19219_v50, %v2807_v41  ;;  %v3155_v52 = vsel %vm1115_vm3, %v3115_v39, %v3075_v22  ;;  %12207 = vmatmul.mubr.msk.bf16.gmra.mrb[48].mxu0 %vm1124_vm4, %v6110_v21  ;;  %v19220_v37 = vld [vmem:[#allocation27_spill] sm:$0xff]  ;;  %v7482_v41 = vld [vmem:[#allocation2 + $0x298] sm:$0x3f]  ;;  %v15342_v50 = vpop.f32.mrb[16].mxu0 }
 0x183   : > { %11983 = vmatmul.mubr.msk.bf16.gmra.mrb[12].mxu1 %vm1124_vm4, %v3155_v52  ;;  %7589 = vrot.lane.b32.xlu1 %v7556_v40, %s13387_s30  ;;  %v3118_v14 = vsel %vm272_vm0, %v2799_v58, %v19220_v37  ;;  %v2467_v12 = vrot.slane %v19221_v9, 1  ;;  %v7558_v39 = vrot.slane %v7480_v31, 6  ;;  %v2465_v21 = vrot.slane %v2463_v48, 1  ;;  %v15348_v38 = vpop.f32.mrb[17].mxu0  ;;  %v7055_v3 = vld [vmem:[#allocation2 + $0x20] sm:$0xc0] }
 0x184   : > { %19218 = vst [vmem:[#allocation63_spill] sm:$0xff] %v15328_v28  ;;  %2558 = vrot.lane.b32.xlu0 %v2459_v43, %s13387_s30  ;;  %v3077_v22 = vpop.permute.xlu1 %3076  ;;  %v2803_v25 = vrot.slane %v2801_v29, 7  ;;  %v2470_v42 = vshll.u32 %v2372_v27, 16  ;;  %v5819_v40 = vsel %vm4580_vm2, %v5817_v1, %v5818_v33  ;;  %v19222_v61 = vshrl.u32 %v14568_v26, 16  ;;  %v13208_v29 = vld [vmem:[#allocation2 + $0x248] sm:$0xff]  ;;  %v15355_v27 = vld [vmem:[#allocation2 + $0x260] sm:$0xff] }
 0x185   : > { %v6000_v52 = vpop.permute.xlu0 %5999  ;;  %v3157_v58 = vsel %vm1115_vm3, %v3118_v14, %v3077_v22  ;;  %v2813_v47 = vshrl.u32 %v2680_v15, 16  ;;  %v19223_v31 = vshrl.u32 %v14553_v36, 16  ;;  %v5822_v48 = vsel %vm4580_vm2, %v5820_v51, %v5821_v0  ;;  %v5747_v14 = vld [vmem:[#allocation2 + $0x2d0] sm:$0xe0]  ;;  %v7056_v45 = vld [vmem:[#allocation2 + $0x28] sm:$0x3f] }
 0x186   : > { %v2461_v9 = vor.u32 %v2460_v56, %v19222_v61  ;;  %11986 = vmatprep.mubr.msk.bf16.mxu1 %vm1124_vm4, %v3157_v58  ;;  %v7560_v1 = vrot.slane %v7481_v34, 6  ;;  %v7561_v33 = vrot.slane %v7482_v41, 6  ;;  %v6075_v26 = vsel %vm272_vm0, %v5819_v40, %v6000_v52  ;;  %v13209_v61 = vld [vmem:[#allocation2 + $0x230] sm:$0xff]  ;;  %v15362_v58 = vpop.f32.mrb[18].mxu0  ;;  %v2373_v52 = vld [vmem:[#allocation2 + $0x268] sm:$0x1] }
 0x187   : > { %v2468_v43 = vor.u32 %v2467_v12, %v19223_v31  ;;  %2530 = vrot.lane.b32.xlu1 %v13208_v29, %s13386_s26  ;;  %v7559_v56 = vsel %vm7117_vm6, %v7557_v24, %v7558_v39  ;;  %v2811_v36 = vsel %vm2166_vm7, %v2803_v25, %v2810_v4  ;;  %v5748_v12 = vld [vmem:[#allocation2 + $0x2d8] sm:$0x1f]  ;;  %v19008_v22 = vshrl.u32 %v15355_v27, 16  ;;  %19224 = vst [vmem:[#allocation27_spill] sm:$0xff] %v15362_v58  ;;  %v15366_v31 = vpop.f32.mrb[19].mxu0  ;;  %v19226_v25 = vld [vmem:[#allocation26_spill] sm:$0xff] }
 0x188   : > { %2528 = vrot.lane.b32.xlu0 %v13209_v61, %s13386_s26  ;;  %v6032_v15 = vpop.permute.xlu1 %6031  ;;  %v2466_v0 = vsel %vm2375_vm5, %v2461_v9, %v2465_v21  ;;  %v2472_v41 = vrot.slane %v2470_v42, 1  ;;  %v2815_v40 = vrot.slane %v2813_v47, 7  ;;  %19225 = vst [vmem:[#allocation64_spill] sm:$0xff] %v15366_v31  ;;  %v2682_v24 = vld [vmem:[#allocation2 + $0x228] sm:$0x80]  ;;  %v19009_v39 = vshll.u32 %v15355_v27, 16 }
 0x189   : > { %v6002_v51 = vpop.permute.xlu0 %6001  ;;  %v6112_v34 = vsel %vm1115_vm3, %v6075_v26, %v6032_v15  ;;  %v3827_v4 = vrot.slane %v19008_v22, 7  ;;  %v3121_v29 = vsel %vm272_vm0, %v2811_v36, %v19226_v25  ;;  %v7562_v21 = vsel %vm7117_vm6, %v7560_v1, %v7561_v33  ;;  %v15379_v47 = vld [vmem:[%s18896_s1 + $0x60] sm:$0xff]   ;;  %v15389_v33 = vpop.f32.mrb[20].mxu0  ;;  %v7054_v58 = vld [vmem:[#allocation2 + $0x10] sm:$0x3f] }
 0x18a   : > { %12210 = vmatprep.mubr.msk.bf16.mxu0 %vm1124_vm4, %v6112_v34  ;;  %v5823_v42 = vrot.slane %v5747_v14, 5  ;;  %v5824_v9 = vrot.slane %v5748_v12, 5  ;;  %v6078_v26 = vsel %vm272_vm0, %v5822_v48, %v6002_v51  ;;  %v19227_v15 = vshll.u32 %v14604_v54, 16  ;;  %v5749_v34 = vld [vmem:[#allocation2 + $0x2e8] sm:$0xe0]  ;;  %19229 = vst [vmem:[#allocation65_spill] sm:$0xff] %v15389_v33  ;;  %12046 = vmatprep.subr.bf16.mxu1 %v15379_v47 }
 0x18b   : > { %7591 = vrot.lane.b32.xlu1 %v7559_v56, %s13387_s30  ;;  %v2477_v22 = vshll.u32 %v2373_v52, 16  ;;  %v15387_v1 = vor.u32 %v19009_v39, %v3827_v4  ;;  %v2473_v12 = vsel %vm2375_vm5, %v2468_v43, %v2472_v41  ;;  %v19230_v48 = vld [vmem:[#allocation11_spill] sm:$0xff]  ;;  %v2825_v31 = vshrl.u32 %v2682_v24, 16  ;;  %v2684_v4 = vld [vmem:[#allocation2 + $0x240] sm:$0x80] }
 0x18c   : > { %2560 = vrot.lane.b32.xlu0 %v2466_v0, %s13387_s30  ;;  %v6034_v61 = vpop.permute.xlu1 %6033  ;;  %v2474_v56 = vrot.slane %v19227_v15, 1  ;;  %v2823_v51 = vsel %vm2166_vm7, %v2815_v40, %v19230_v48  ;;  %v5750_v0 = vld [vmem:[#allocation2 + $0x2f0] sm:$0x1f]  ;;  %v15396_v15 = vpop.f32.mrb[21].mxu0  ;;  %v5825_v43 = vsel %vm4580_vm2, %v5823_v42, %v5824_v9  ;;  %v7037_v41 = vld [vmem:[#allocation2 + $0x8] sm:$0xff]  ;;  %v2837_v10 = vshrl.u32 %v2684_v4, 16 }
 0x18d   : > { %19228 = vst [vmem:[#allocation26_spill] sm:$0xff] %v15387_v1  ;;  %v3079_v36 = vpop.permute.xlu0 %3078  ;;  %v6114_v14 = vsel %vm1115_vm3, %v6078_v26, %v6034_v61  ;;  %19231 = vst [vmem:[#allocation11_spill] sm:$0xff] %v15396_v15  ;;  %v5826_v26 = vrot.slane %v5749_v34, 5  ;;  %v7053_v40 = vld [vmem:[#allocation2 + $0x8] sm:$0xc0]  ;;  %v2479_v39 = vrot.slane %v2477_v22, 1 }
 0x18e   : > { %v3159_v52 = vsel %vm1115_vm3, %v3121_v29, %v3079_v36  ;;  %12211 = vmatmul.mubr.msk.bf16.gmra.mrb[52].mxu0 %vm1124_vm4, %v6114_v14  ;;  %v19232_v24 = vld [vmem:[#allocation31_spill] sm:$0xff]  ;;  %v19233_v29 = vshrl.u32 %v14604_v54, 16  ;;  %v5827_v14 = vrot.slane %v5750_v0, 5  ;;  %v2827_v34 = vrot.slane %v2825_v31, 7  ;;  %v2374_v54 = vld [vmem:[#allocation2 + $0x280] sm:$0x1] }
 0x18f   : > { %11987 = vmatmul.mubr.msk.bf16.gmra.mrb[16].mxu1 %vm1124_vm4, %v3159_v52  ;;  %7593 = vrot.lane.b32.xlu1 %v7562_v21, %s13387_s30  ;;  %v3124_v61 = vsel %vm272_vm0, %v2823_v51, %v19232_v24  ;;  %v15408_v52 = vld [vmem:[#allocation2 + $0x278] sm:$0xff]  ;;  %v15410_v21 = vpop.f32.mrb[22].mxu0  ;;  %v19236_v22 = vld [vmem:[#allocation42_spill] sm:$0xff]  ;;  %v7118_v0 = vrot.slane %v7053_v40, 6  ;;  %v2134_v35 = vld [vmem:[#allocation2 + $0x108] sm:$0x80] }
 0x190   : > { %2562 = vrot.lane.b32.xlu0 %v2473_v12, %s13387_s30  ;;  %v3081_v48 = vpop.permute.xlu1 %3080  ;;  %v2475_v36 = vor.u32 %v2474_v56, %v19233_v29  ;;  %19234 = vst [vmem:[#allocation31_spill] sm:$0xff] %v15410_v21  ;;  %v19010_v12 = vshrl.u32 %v15408_v52, 16  ;;  %v15414_v15 = vpop.f32.mrb[23].mxu0  ;;  %v19237_v56 = vshll.u32 %v19236_v22, 16  ;;  %v7119_v29 = vrot.slane %v7054_v58, 6  ;;  %v13210_v4 = vld [vmem:[#allocation2 + $0x260] sm:$0xff] }
 0x191   : > { %v6004_v42 = vpop.permute.xlu0 %6003  ;;  %v3161_v9 = vsel %vm1115_vm3, %v3124_v61, %v3081_v48  ;;  %19235 = vst [vmem:[#allocation66_spill] sm:$0xff] %v15414_v15  ;;  %v5751_v21 = vld [vmem:[#allocation2 + $0x300] sm:$0xe0]  ;;  %v5828_v48 = vsel %vm4580_vm2, %v5826_v26, %v5827_v14  ;;  %v15427_v40 = vpop.f32.mrb[24].mxu0 }
 0x192   : > { %11990 = vmatprep.mubr.msk.bf16.mxu1 %vm1124_vm4, %v3161_v9  ;;  %v2481_v51 = vrot.slane %v19237_v56, 1  ;;  %v3839_v61 = vrot.slane %v19010_v12, 7  ;;  %v6081_v31 = vsel %vm272_vm0, %v5825_v43, %v6004_v42  ;;  %v2480_v15 = vsel %vm2375_vm5, %v2475_v36, %v2479_v39  ;;  %19238 = vst [vmem:[#allocation42_spill] sm:$0xff] %v15427_v40  ;;  %v19239_v12 = vld [vmem:[#allocation10_spill] sm:$0xff]  ;;  %v15432_v1 = vpop.f32.mrb[25].mxu0 }
 0x193   : > { %7182 = vrot.lane.b32.xlu1 %v7037_v41, %s13386_s26  ;;  %v5752_v41 = vld [vmem:[#allocation2 + $0x308] sm:$0x1f]  ;;  %v19011_v56 = vshll.u32 %v15408_v52, 16  ;;  %v2835_v43 = vsel %vm2166_vm7, %v2827_v34, %v19239_v12  ;;  %v2839_v42 = vrot.slane %v2837_v10, 7  ;;  %v2686_v39 = vld [vmem:[#allocation2 + $0x258] sm:$0x80] }
 0x194   : > { %2532 = vrot.lane.b32.xlu0 %v13210_v4, %s13386_s26  ;;  %v6036_v9 = vpop.permute.xlu1 %6035  ;;  %v2484_v4 = vshll.u32 %v2374_v54, 16  ;;  %v19241_v36 = vshrl.u32 %v19236_v22, 16  ;;  %v5829_v34 = vrot.slane %v5751_v21, 5  ;;  %v5830_v10 = vrot.slane %v5752_v41, 5  ;;  %v15443_v12 = vpop.f32.mrb[26].mxu0  ;;  %v7038_v40 = vld [vmem:[#allocation2 + $0x20] sm:$0xff] }
 0x195   : > { %v6006_v58 = vpop.permute.xlu0 %6005  ;;  %v6116_v33 = vsel %vm1115_vm3, %v6081_v31, %v6036_v9  ;;  %v15437_v26 = vor.u32 %v19011_v56, %v3839_v61  ;;  %v7120_v31 = vsel %vm7117_vm6, %v7118_v0, %v7119_v29  ;;  %19242 = vst [vmem:[#allocation67_spill] sm:$0xff] %v15443_v12  ;;  %v13211_v9 = vld [vmem:[#allocation2 + $0x278] sm:$0xff]  ;;  %v3868_v22 = vld [vmem:[#allocation2 + $0x148] sm:$0x1]  ;;  %v7339_v13 = vld [vmem:[#allocation2 + $0x120] sm:$0xfc] }
 0x196   : > { %12214 = vmatprep.mubr.msk.bf16.mxu0 %vm1124_vm4, %v6116_v33  ;;  %v2482_v14 = vor.u32 %v2481_v51, %v19241_v36  ;;  %v6084_v54 = vsel %vm272_vm0, %v5828_v48, %v6006_v58  ;;  %v19243_v33 = vld [vmem:[#allocation29_spill] sm:$0xff]  ;;  %v15449_v51 = vpop.f32.mrb[27].mxu0  ;;  %v2486_v48 = vrot.slane %v2484_v4, 1  ;;  %v5754_v36 = vld [vmem:[#allocation2 + $0x320] sm:$0x1f] }
 0x197   : > { %19240 = vst [vmem:[#allocation10_spill] sm:$0xff] %v15437_v26  ;;  %2564 = vrot.lane.b32.xlu1 %v2480_v15, %s13387_s30  ;;  %v3127_v61 = vsel %vm272_vm0, %v2835_v43, %v19243_v33  ;;  %v7121_v15 = vrot.slane %v7055_v3, 6  ;;  %v7122_v26 = vrot.slane %v7056_v45, 6  ;;  %19244 = vst [vmem:[#allocation29_spill] sm:$0xff] %v15449_v51  ;;  %v19245_v29 = vld [vmem:[#allocation13_spill] sm:$0xff]  ;;  %v3887_v51 = vshll.u32 %v3868_v22, 16 }
 0x198   : > { %2534 = vrot.lane.b32.xlu0 %v13211_v9, %s13386_s26  ;;  %v6038_v56 = vpop.permute.xlu1 %6037  ;;  %v2847_v41 = vsel %vm2166_vm7, %v2839_v42, %v19245_v29  ;;  %v5753_v58 = vld [vmem:[#allocation2 + $0x318] sm:$0xe0]  ;;  %v2849_v9 = vshrl.u32 %v2686_v39, 16  ;;  %v19248_v42 = vld [vmem:[#allocation34_spill] sm:$0xff]  ;;  %v2487_v22 = vsel %vm2375_vm5, %v2482_v14, %v2486_v48 }
 0x199   : > { %v3083_v0 = vpop.permute.xlu0 %3082  ;;  %v6118_v21 = vsel %vm1115_vm3, %v6084_v54, %v6038_v56  ;;  %v19246_v45 = vld [vmem:[#allocation45_spill] sm:$0xff]  ;;  %v2688_v56 = vld [vmem:[#allocation2 + $0x270] sm:$0x80]  ;;  %v3130_v4 = vsel %vm272_vm0, %v2847_v41, %v19248_v42  ;;  %v7123_v39 = vsel %vm7117_vm6, %v7121_v15, %v7122_v26  ;;  %v7340_v26 = vld [vmem:[#allocation2 + $0x128] sm:$0x3] }
 0x19a   : > { %v3163_v12 = vsel %vm1115_vm3, %v3127_v61, %v3083_v0  ;;  %12215 = vmatmul.mubr.msk.bf16.gmra.mrb[56].mxu0 %vm1124_vm4, %v6118_v21  ;;  %v19247_v3 = vshll.u32 %v19246_v45, 16  ;;  %v5832_v61 = vrot.slane %v5753_v58, 5  ;;  %v5833_v0 = vrot.slane %v5754_v36, 5  ;;  %v15464_v21 = vpop.f32.mrb[28].mxu0  ;;  %v15475_v36 = vld [vmem:[#allocation2 + $0x290] sm:$0xff] }
 0x19b   : > { %11991 = vmatmul.mubr.msk.bf16.gmra.mrb[20].mxu1 %vm1124_vm4, %v3163_v12  ;;  %7214 = vrot.lane.b32.xlu1 %v7120_v31, %s13387_s30  ;;  %19249 = vst [vmem:[#allocation13_spill] sm:$0xff] %v15464_v21  ;;  %v5831_v12 = vsel %vm4580_vm2, %v5829_v34, %v5830_v10  ;;  %v15469_v28 = vpop.f32.mrb[29].mxu0  ;;  %v2861_v41 = vshrl.u32 %v2688_v56, 16  ;;  %v19251_v15 = vshrl.u32 %v19246_v45, 16  ;;  %v3889_v34 = vrot.slane %v3887_v51, 1 }
 0x19c   : > { %v3884_v43 = vrot.slane %v19247_v3, 1  ;;  %7184 = vrot.lane.b32.xlu0 %v7038_v40, %s13386_s26  ;;  %v3085_v54 = vpop.permute.xlu1 %3084  ;;  %v2851_v3 = vrot.slane %v2849_v9, 7  ;;  %19250 = vst [vmem:[#allocation45_spill] sm:$0xff] %v15469_v28  ;;  %v7039_v40 = vld [vmem:[#allocation2 + $0x38] sm:$0xff]  ;;  %v2690_v10 = vld [vmem:[#allocation2 + $0x288] sm:$0x80]  ;;  %v5834_v9 = vsel %vm4580_vm2, %v5832_v61, %v5833_v0 }
 0x19d   : > { %v6008_v31 = vpop.permute.xlu0 %6007  ;;  %v3165_v29 = vsel %vm1115_vm3, %v3130_v4, %v3085_v54  ;;  %v15477_v14 = vpop.f32.mrb[30].mxu0  ;;  %v7057_v4 = vld [vmem:[#allocation2 + $0x38] sm:$0xc0]  ;;  %v7058_v54 = vld [vmem:[#allocation2 + $0x40] sm:$0x3f]  ;;  %v7404_v28 = vrot.slane %v7340_v26, 2 }
 0x19e   : > { %11994 = vmatprep.mubr.msk.bf16.mxu1 %vm1124_vm4, %v3165_v29  ;;  %v3885_v58 = vor.u32 %v3884_v43, %v19251_v15  ;;  %19252 = vst [vmem:[#allocation34_spill] sm:$0xff] %v15477_v14  ;;  %v6087_v48 = vsel %vm272_vm0, %v5831_v12, %v6008_v31  ;;  %v15483_v45 = vpop.f32.mrb[31].mxu0  ;;  %v19254_v29 = vld [vmem:[#allocation12_spill] sm:$0xff]  ;;  %v7403_v14 = vrot.slane %v7339_v13, 2  ;;  %v7341_v12 = vld [vmem:[#allocation2 + $0x138] sm:$0xfc] }
 0x19f   : > { %7216 = vrot.lane.b32.xlu1 %v7123_v39, %s13387_s30  ;;  %v19012_v39 = vshrl.u32 %v15475_v36, 16  ;;  %19253 = vst [vmem:[#allocation68_spill] sm:$0xff] %v15483_v45  ;;  %v2859_v15 = vsel %vm2166_vm7, %v2851_v3, %v19254_v29  ;;  %v7342_v31 = vld [vmem:[#allocation2 + $0x140] sm:$0x3]  ;;  %v2863_v61 = vrot.slane %v2861_v41, 7  ;;  %v2873_v0 = vshrl.u32 %v2690_v10, 16 }
 0x1a0   : > { %2566 = vrot.lane.b32.xlu0 %v2487_v22, %s13387_s30  ;;  %v6040_v56 = vpop.permute.xlu1 %6039  ;;  %v3869_v22 = vld [vmem:[#allocation2 + $0x160] sm:$0x1]  ;;  %v3852_v45 = vshll.u32 %v15475_v36, 16  ;;  %v19255_v3 = vshll.u32 %v14713_v8, 16  ;;  %v7124_v26 = vrot.slane %v7057_v4, 6  ;;  %v7406_v10 = vrot.slane %v7341_v12, 2 }
 0x1a1   : > { %v6010_v51 = vpop.permute.xlu0 %6009  ;;  %v6120_v43 = vsel %vm1115_vm3, %v6087_v48, %v6040_v56  ;;  %v3851_v21 = vrot.slane %v19012_v39, 7  ;;  %v3890_v48 = vsel %vm2375_vm5, %v3885_v58, %v3889_v34  ;;  %v7125_v56 = vrot.slane %v7058_v54, 6  ;;  %v7059_v39 = vld [vmem:[#allocation2 + $0x50] sm:$0xc0]  ;;  %v19257_v12 = vld [vmem:[#allocation15_spill] sm:$0xff] }
 0x1a2   : > { %12218 = vmatprep.mubr.msk.bf16.mxu0 %vm1124_vm4, %v6120_v43  ;;  %v3891_v13 = vrot.slane %v19255_v3, 1  ;;  %v6090_v29 = vsel %vm272_vm0, %v5834_v9, %v6010_v51  ;;  %v13212_v43 = vld [vmem:[#allocation2 + $0x140] sm:$0xff]  ;;  %v7407_v57 = vrot.slane %v7342_v31, 2  ;;  %v19256_v58 = vld [vmem:[#allocation32_spill] sm:$0xff]  ;;  %v7405_v9 = vsel %vm6988_vm8, %v7403_v14, %v7404_v28  ;;  %v15514_v28 = vld [vmem:[#allocation2 + $0x2a8] sm:$0xff] }
 0x1a3   : > { %7186 = vrot.lane.b32.xlu1 %v7039_v40, %s13386_s26  ;;  %v15500_v40 = vor.u32 %v3852_v45, %v3851_v21  ;;  %v3133_v34 = vsel %vm272_vm0, %v2859_v15, %v19256_v58  ;;  %v3894_v54 = vshll.u32 %v3869_v22, 16  ;;  %v2871_v31 = vsel %vm2166_vm7, %v2863_v61, %v19257_v12  ;;  %v13213_v14 = vld [vmem:[#allocation2 + $0x158] sm:$0xff] }
 0x1a4   : > { %4012 = vrot.lane.b32.xlu0 %v13212_v43, %s13386_s26  ;;  %v6042_v41 = vpop.permute.xlu1 %6041  ;;  %v2875_v43 = vrot.slane %v2873_v0, 7  ;;  %v19258_v21 = vshrl.u32 %v14713_v8, 16  ;;  %v7596_v22 = vsel %vm272_vm0, %v7405_v9, %v14147_v44  ;;  %v7126_v0 = vsel %vm7117_vm6, %v7124_v26, %v7125_v56  ;;  %v19260_v26 = vld [vmem:[#allocation14_spill] sm:$0xff] }
 0x1a5   : > { %v3087_v3 = vpop.permute.xlu0 %3086  ;;  %v6122_v4 = vsel %vm1115_vm3, %v6090_v29, %v6042_v41  ;;  %v7127_v29 = vrot.slane %v7059_v39, 6  ;;  %v7128_v41 = vrot.slane %v7060_v20, 6  ;;  %v19013_v8 = vshrl.u32 %v15514_v28, 16 }
 0x1a6   : > { %v3167_v51 = vsel %vm1115_vm3, %v3133_v34, %v3087_v3  ;;  %12219 = vmatmul.mubr.msk.bf16.gmra.mrb[60].mxu0 %vm1124_vm4, %v6122_v4  ;;  %v3892_v15 = vor.u32 %v3891_v13, %v19258_v21  ;;  %v7040_v34 = vld [vmem:[#allocation2 + $0x50] sm:$0xff]  ;;  %v7408_v3 = vsel %vm6988_vm8, %v7406_v10, %v7407_v57  ;;  %v19259_v13 = vld [vmem:[#allocation37_spill] sm:$0xff]  ;;  %v2168_v12 = vshrl.u32 %v2134_v35, 16 }
 0x1a7   : > { %11995 = vmatmul.mubr.msk.bf16.gmra.mrb[24].mxu1 %vm1124_vm4, %v3167_v51  ;;  %4044 = vrot.lane.b32.xlu1 %v3890_v48, %s13387_s30  ;;  %v7343_v48 = vld [vmem:[#allocation2 + $0x150] sm:$0xfc]  ;;  %v3136_v20 = vsel %vm272_vm0, %v2871_v31, %v19259_v13  ;;  %v3896_v51 = vrot.slane %v3894_v54, 1  ;;  %v7344_v21 = vld [vmem:[#allocation2 + $0x158] sm:$0x3]  ;;  %v2883_v57 = vsel %vm2166_vm7, %v2875_v43, %v19260_v26  ;;  %v3863_v56 = vrot.slane %v19013_v8, 7 }
 0x1a8   : > { %4014 = vrot.lane.b32.xlu0 %v13213_v14, %s13386_s26  ;;  %v7564_v61 = vpop.permute.xlu1 %7563  ;;  %v3870_v14 = vld [vmem:[#allocation2 + $0x178] sm:$0x1]  ;;  %v19014_v10 = vshll.u32 %v15514_v28, 16  ;;  %v7598_v35 = vsel %vm272_vm0, %v7408_v3, %v14175_v53  ;;  %v7129_v9 = vsel %vm7117_vm6, %v7127_v29, %v7128_v41  ;;  %v2136_v54 = vld [vmem:[#allocation2 + $0x120] sm:$0x80]  ;;  %v7409_v31 = vrot.slane %v7343_v48, 2 }
 0x1a9   : > { %v3089_v39 = vpop.permute.xlu0 %3088  ;;  %v7628_v4 = vsel %vm1115_vm3, %v7596_v22, %v7564_v61  ;;  %v19261_v43 = vshll.u32 %v14767_v18, 16  ;;  %v3897_v41 = vsel %vm2375_vm5, %v3892_v15, %v3896_v51  ;;  %v13006_v48 = vld [vmem:[%s18896_s1 + $0x128] sm:$0xff]   ;;  %v2180_v26 = vshrl.u32 %v2136_v54, 16 }
 0x1aa   : > { %v3169_v44 = vsel %vm1115_vm3, %v3136_v20, %v3089_v39  ;;  %12306 = vmatprep.mubr.msk.bf16.mxu0 %vm1124_vm4, %v7628_v4  ;;  %v7410_v20 = vrot.slane %v7344_v21, 2  ;;  %v3901_v39 = vshll.u32 %v3870_v14, 16  ;;  %v7345_v4 = vld [vmem:[#allocation2 + $0x168] sm:$0xfc]  ;;  %v2170_v14 = vrot.slane %v2168_v12, 7 }
 0x1ab   : > { %11998 = vmatprep.mubr.msk.bf16.mxu1 %vm1124_vm4, %v3169_v44  ;;  %7218 = vrot.lane.b32.xlu1 %v7126_v0, %s13387_s30  ;;  %v3898_v61 = vrot.slane %v19261_v43, 1  ;;  %v15542_v44 = vor.u32 %v19014_v10, %v3863_v56  ;;  %v19262_v0 = vld [vmem:[#allocation36_spill] sm:$0xff]  ;;  %v7041_v15 = vld [vmem:[#allocation2 + $0x68] sm:$0xff]  ;;  %v19263_v51 = vshrl.u32 %v14767_v18, 16 }
 0x1ac   : > { %7188 = vrot.lane.b32.xlu0 %v7040_v34, %s13386_s26  ;;  %v7566_v22 = vpop.permute.xlu1 %7565  ;;  %v3139_v53 = vsel %vm272_vm0, %v2883_v57, %v19262_v0  ;;  %v7346_v34 = vld [vmem:[#allocation2 + $0x170] sm:$0x3]  ;;  %v7412_v57 = vrot.slane %v7345_v4, 2  ;;  %v3903_v43 = vrot.slane %v3901_v39, 1  ;;  %v7061_v54 = vld [vmem:[#allocation2 + $0x68] sm:$0xc0] }
 0x1ad   : > { %v3091_v3 = vpop.permute.xlu0 %3090  ;;  %v7630_v29 = vsel %vm1115_vm3, %v7598_v35, %v7566_v22  ;;  %v3899_v35 = vor.u32 %v3898_v61, %v19263_v51  ;;  %v7411_v22 = vsel %vm6988_vm8, %v7409_v31, %v7410_v20  ;;  %v19264_v4 = vld [vmem:[#allocation16_spill] sm:$0xff]  ;;  %v2138_v20 = vld [vmem:[#allocation2 + $0x138] sm:$0x80] }
 0x1ae   : > { %v3171_v21 = vsel %vm1115_vm3, %v3139_v53, %v3091_v3  ;;  %12307 = vmatmul.mubr.msk.bf16.vlgmr.msra.gmra.mrb[64].mxu0 %vm1124_vm4, %v7630_v29  ;;  %v7413_v53 = vrot.slane %v7346_v34, 2  ;;  %v7062_v3 = vld [vmem:[#allocation2 + $0x70] sm:$0x3f]  ;;  %v2178_v29 = vsel %vm2166_vm7, %v2170_v14, %v19264_v4  ;;  %v7600_v31 = vsel %vm272_vm0, %v7411_v22, %v14196_v32  ;;  %v7347_v4 = vld [vmem:[#allocation2 + $0x180] sm:$0xfc] }
 0x1af   : > { %11999 = vmatmul.mubr.msk.bf16.gmra.mrb[28].mxu1 %vm1124_vm4, %v3171_v21  ;;  %7220 = vrot.lane.b32.xlu1 %v7129_v9, %s13387_s30  ;;  %v13007_v9 = vld [vmem:[%s18896_s1 + $0x130] sm:$0xff]   ;;  %v3904_v21 = vsel %vm2375_vm5, %v3899_v35, %v3903_v43  ;;  %v7130_v14 = vrot.slane %v7061_v54, 6  ;;  %v7063_v22 = vld [vmem:[#allocation2 + $0x80] sm:$0xc0]  ;;  %v19266_v35 = vld [vmem:[#allocation17_spill] sm:$0xff] }
 0x1b0   : > { %4046 = vrot.lane.b32.xlu0 %v3897_v41, %s13387_s30  ;;  %v2507_v56 = vpop.permute.xlu1 %2506  ;;  %12339 = vmatpush3.bf16.msra.mxu0 %v15283_v2  ;;  %v2182_v41 = vrot.slane %v2180_v26, 7  ;;  %v3871_v18 = vld [vmem:[#allocation2 + $0x190] sm:$0x1]  ;;  %v19265_v2 = vshll.u32 %v14786_v55, 16  ;;  %v7414_v51 = vsel %vm6988_vm8, %v7412_v57, %v7413_v53  ;;  %v7131_v26 = vrot.slane %v7062_v3, 6 }
 0x1b1   : > { %v2505_v12 = vpop.permute.xlu0 %2504  ;;  %12340 = vmatprep.subr.bf16.mxu0 %v13006_v48  ;;  %v13214_v39 = vld [vmem:[#allocation2 + $0x170] sm:$0xff]  ;;  %v3908_v10 = vshll.u32 %v3871_v18, 16  ;;  %v7348_v53 = vld [vmem:[#allocation2 + $0x188] sm:$0x3]  ;;  %v7415_v3 = vrot.slane %v7347_v4, 2  ;;  %v7042_v4 = vld [vmem:[#allocation2 + $0x80] sm:$0xff] }
 0x1b2   : > { %v3905_v61 = vrot.slane %v19265_v2, 1  ;;  %v7064_v2 = vld [vmem:[#allocation2 + $0x88] sm:$0x3f]  ;;  %v2190_v57 = vsel %vm2166_vm7, %v2182_v41, %v19266_v35  ;;  %v2140_v54 = vld [vmem:[#allocation2 + $0x150] sm:$0x80]  ;;  %v7132_v41 = vsel %vm7117_vm6, %v7130_v14, %v7131_v26 }
 0x1b3   : > { %7190 = vrot.lane.b32.xlu1 %v7041_v15, %s13386_s26  ;;  %v2570_v15 = vsel %vm272_vm0, %v2178_v29, %v2505_v12  ;;  %v7602_v12 = vsel %vm272_vm0, %v7414_v51, %v14144_v17  ;;  %v19267_v29 = vshrl.u32 %v14786_v55, 16  ;;  %v3910_v35 = vrot.slane %v3908_v10, 1 }
 0x1b4   : > { %4016 = vrot.lane.b32.xlu0 %v13214_v39, %s13386_s26  ;;  %v7568_v34 = vpop.permute.xlu1 %7567  ;;  %12341 = vmatpush3.bf16.msra.mxu0 %v13006_v48  ;;  %v13008_v39 = vld [vmem:[%s18896_s1 + $0x138] sm:$0xff]   ;;  %v2192_v48 = vshrl.u32 %v2138_v20, 16  ;;  %v7133_v20 = vrot.slane %v7063_v22, 6  ;;  %v7416_v55 = vrot.slane %v7348_v53, 2  ;;  %v2204_v26 = vshrl.u32 %v2140_v54, 16 }
 0x1b5   : > { %v2537_v8 = vpop.permute.xlu0 %2536  ;;  %v7632_v32 = vsel %vm1115_vm3, %v7600_v31, %v7568_v34  ;;  %12342 = vmatprep.subr.bf16.mxu0 %v13007_v9  ;;  %v3906_v18 = vor.u32 %v3905_v61, %v19267_v29  ;;  %v13215_v31 = vld [vmem:[#allocation2 + $0x188] sm:$0xff]  ;;  %v7134_v34 = vrot.slane %v7064_v2, 6 }
 0x1b6   : > { %v2617_v43 = vsel %vm1115_vm3, %v2570_v15, %v2537_v8  ;;  %12310 = vmatprep.mubr.msk.bf16.mxu0 %vm1124_vm4, %v7632_v32  ;;  %v7349_v15 = vld [vmem:[#allocation2 + $0x198] sm:$0xfc]  ;;  %v7350_v32 = vld [vmem:[#allocation2 + $0x1a0] sm:$0x3]  ;;  %v3872_v61 = vld [vmem:[#allocation2 + $0x1a8] sm:$0x1] }
 0x1b7   : > { %12014 = vmatprep.mubr.msk.bf16.mxu1 %vm1124_vm4, %v2617_v43  ;;  %4048 = vrot.lane.b32.xlu1 %v3904_v21, %s13387_s30  ;;  %v2573_v21 = vsel %vm272_vm0, %v2190_v57, %v2507_v56  ;;  %v13010_v43 = vld [vmem:[%s18896_s1 + $0x140] sm:$0xff]   ;;  %v13012_v56 = vld [vmem:[%s18896_s1 + $0x68] sm:$0xff]   ;;  %v7418_v10 = vrot.slane %v7349_v15, 2  ;;  %v7135_v2 = vsel %vm7117_vm6, %v7133_v20, %v7134_v34  ;;  %v7419_v29 = vrot.slane %v7350_v32, 2  ;;  %v19270_v20 = vld [vmem:[#allocation21_spill] sm:$0xff] }
 0x1b8   : > { %4018 = vrot.lane.b32.xlu0 %v13215_v31, %s13386_s26  ;;  %v7570_v8 = vpop.permute.xlu1 %7569  ;;  %12343 = vmatpush3.bf16.msra.mxu0 %v13007_v9  ;;  %v2194_v9 = vrot.slane %v2192_v48, 7  ;;  %v19268_v57 = vld [vmem:[#allocation50_spill] sm:$0xff]  ;;  %v3915_v54 = vshll.u32 %v3872_v61, 16  ;;  %v3911_v31 = vsel %vm2375_vm5, %v3906_v18, %v3910_v35  ;;  %v2206_v15 = vrot.slane %v2204_v26, 7  ;;  %v2142_v18 = vld [vmem:[#allocation2 + $0x168] sm:$0x80] }
 0x1b9   : > { %v7634_v17 = vsel %vm1115_vm3, %v7602_v12, %v7570_v8  ;;  %v2539_v51 = vpop.permute.xlu0 %2538  ;;  %12344 = vmatprep.subr.bf16.mxu0 %v13008_v39  ;;  %v19269_v53 = vshll.u32 %v19268_v57, 16  ;;  %v7417_v8 = vsel %vm6988_vm8, %v7415_v3, %v7416_v55  ;;  %v7043_v32 = vld [vmem:[#allocation2 + $0x98] sm:$0xff]  ;;  %v7351_v35 = vld [vmem:[#allocation2 + $0x1b0] sm:$0xfc] }
 0x1ba   : > { %v2619_v14 = vsel %vm1115_vm3, %v2573_v21, %v2539_v51  ;;  %12311 = vmatmul.mubr.msk.bf16.gmra.mrb[68].mxu0 %vm1124_vm4, %v7634_v17  ;;  %v2202_v34 = vsel %vm2166_vm7, %v2194_v9, %v19270_v20  ;;  %v19271_v21 = vshrl.u32 %v19268_v57, 16  ;;  %v7420_v51 = vsel %vm6988_vm8, %v7418_v10, %v7419_v29  ;;  %v7065_v26 = vld [vmem:[#allocation2 + $0x98] sm:$0xc0]  ;;  %v7066_v9 = vld [vmem:[#allocation2 + $0xa0] sm:$0x3f] }
 0x1bb   : > { %7222 = vrot.lane.b32.xlu1 %v7132_v41, %s13387_s30  ;;  %12015 = vmatmul.mubr.msk.bf16.vlgmr.msra.gmra.mrb[0].mxu1 %vm1124_vm4, %v2619_v14  ;;  %v3912_v12 = vrot.slane %v19269_v53, 1  ;;  %v13011_v41 = vld [vmem:[%s18896_s1 + $0x148] sm:$0xff]   ;;  %v2216_v10 = vshrl.u32 %v2142_v18, 16  ;;  %v2144_v29 = vld [vmem:[#allocation2 + $0x180] sm:$0x80]  ;;  %v7137_v20 = vrot.slane %v7066_v9, 6 }
 0x1bc   : > { %7192 = vrot.lane.b32.xlu0 %v7042_v4, %s13386_s26  ;;  %v2511_v22 = vpop.permute.xlu1 %2510  ;;  %12345 = vmatpush3.bf16.msra.mxu0 %v13008_v39  ;;  %v13013_v39 = vld [vmem:[%s18896_s1 + $0x70] sm:$0xff]   ;;  %v3917_v4 = vrot.slane %v3915_v54, 1  ;;  %v7421_v54 = vrot.slane %v7351_v35, 2  ;;  %v7353_v18 = vld [vmem:[#allocation2 + $0x1c8] sm:$0xfc] }
 0x1bd   : > { %v2509_v48 = vpop.permute.xlu0 %2508  ;;  %12346 = vmatprep.subr.bf16.mxu0 %v13010_v43  ;;  %12047 = vmatpush3.bf16.msra.mxu1 %v15379_v47  ;;  %v7604_v47 = vsel %vm272_vm0, %v7417_v8, %v19188_v19  ;;  %v3913_v17 = vor.u32 %v3912_v12, %v19271_v21  ;;  %v19272_v19 = vld [vmem:[#allocation20_spill] sm:$0xff]  ;;  %v3873_v12 = vld [vmem:[#allocation2 + $0x1c0] sm:$0x1]  ;;  %v7068_v35 = vld [vmem:[#allocation2 + $0xb8] sm:$0x3f] }
 0x1be   : > { %12048 = vmatprep.subr.bf16.mxu1 %v13012_v56  ;;  %v2576_v55 = vsel %vm272_vm0, %v2202_v34, %v2509_v48  ;;  %v2214_v53 = vsel %vm2166_vm7, %v2206_v15, %v19272_v19  ;;  %v13216_v48 = vld [vmem:[#allocation2 + $0x1a0] sm:$0xff]  ;;  %v7136_v15 = vrot.slane %v7065_v26, 6  ;;  %v7424_v19 = vrot.slane %v7353_v18, 2 }
 0x1bf   : > { %7224 = vrot.lane.b32.xlu1 %v7135_v2, %s13387_s30  ;;  %v7352_v2 = vld [vmem:[#allocation2 + $0x1b8] sm:$0x3]  ;;  %v3918_v8 = vsel %vm2375_vm5, %v3913_v17, %v3917_v4  ;;  %v2228_v17 = vshrl.u32 %v2144_v29, 16  ;;  %v2218_v4 = vrot.slane %v2216_v10, 7 }
 0x1c0   : > { %4050 = vrot.lane.b32.xlu0 %v3911_v31, %s13387_s30  ;;  %v7572_v3 = vpop.permute.xlu1 %7571  ;;  %12347 = vmatpush3.bf16.msra.mxu0 %v13010_v43  ;;  %v13014_v43 = vld [vmem:[%s18896_s1 + $0x78] sm:$0xff]   ;;  %v7422_v34 = vrot.slane %v7352_v2, 2  ;;  %v7138_v26 = vsel %vm7117_vm6, %v7136_v15, %v7137_v20  ;;  %v7140_v2 = vrot.slane %v7068_v35, 6  ;;  %v13016_v15 = vld [vmem:[%s18896_s1 + $0x88] sm:$0xff]  }
 0x1c1   : > { %v7636_v61 = vsel %vm1115_vm3, %v7604_v47, %v7572_v3  ;;  %v2541_v14 = vpop.permute.xlu0 %2540  ;;  %12348 = vmatprep.subr.bf16.mxu0 %v13011_v41  ;;  %12049 = vmatpush3.bf16.msra.mxu1 %v13012_v56  ;;  %v7606_v56 = vsel %vm272_vm0, %v7420_v51, %v19197_v60  ;;  %v2579_v47 = vsel %vm272_vm0, %v2214_v53, %v2511_v22  ;;  %v19273_v60 = vshll.u32 %v14889_v11, 16  ;;  %v7067_v51 = vld [vmem:[#allocation2 + $0xb0] sm:$0xc0]  ;;  %v13015_v22 = vld [vmem:[%s18896_s1 + $0x80] sm:$0xff]  }
 0x1c2   : > { %v2621_v57 = vsel %vm1115_vm3, %v2576_v55, %v2541_v14  ;;  %12314 = vmatprep.mubr.msk.bf16.mxu0 %vm1124_vm4, %v7636_v61  ;;  %12050 = vmatprep.subr.bf16.mxu1 %v13013_v39  ;;  %v3922_v55 = vshll.u32 %v3873_v12, 16  ;;  %v7354_v14 = vld [vmem:[#allocation2 + $0x1d0] sm:$0x3]  ;;  %v7139_v9 = vrot.slane %v7067_v51, 6  ;;  %v19274_v53 = vshrl.u32 %v14889_v11, 16 }
 0x1c3   : > { %7194 = vrot.lane.b32.xlu1 %v7043_v32, %s13386_s26  ;;  %12018 = vmatprep.mubr.msk.bf16.mxu1 %vm1124_vm4, %v2621_v57  ;;  %v3919_v21 = vrot.slane %v19273_v60, 1  ;;  %v7044_v12 = vld [vmem:[#allocation2 + $0xb0] sm:$0xff]  ;;  %v2146_v11 = vld [vmem:[#allocation2 + $0x198] sm:$0x80] }
 0x1c4   : > { %4020 = vrot.lane.b32.xlu0 %v13216_v48, %s13386_s26  ;;  %v7574_v31 = vpop.permute.xlu1 %7573  ;;  %12349 = vmatpush3.bf16.msra.mxu0 %v13011_v41  ;;  %v13217_v41 = vld [vmem:[#allocation2 + $0x1b8] sm:$0xff]  ;;  %v3924_v29 = vrot.slane %v3922_v55, 1  ;;  %v7425_v48 = vrot.slane %v7354_v14, 2  ;;  %v7355_v14 = vld [vmem:[#allocation2 + $0x1e0] sm:$0xfc] }
 0x1c5   : > { %v7638_v3 = vsel %vm1115_vm3, %v7606_v56, %v7574_v31  ;;  %v2543_v32 = vpop.permute.xlu0 %2542  ;;  %12051 = vmatpush3.bf16.msra.mxu1 %v13013_v39  ;;  %v3920_v57 = vor.u32 %v3919_v21, %v19274_v53  ;;  %v7423_v56 = vsel %vm6988_vm8, %v7421_v54, %v7422_v34  ;;  %v3874_v31 = vld [vmem:[#allocation2 + $0x1d8] sm:$0x1]  ;;  %v19276_v34 = vshll.u32 %v14968_v59, 16  ;;  %v2148_v53 = vld [vmem:[#allocation2 + $0x1b0] sm:$0x80] }
 0x1c6   : > { %v2623_v61 = vsel %vm1115_vm3, %v2579_v47, %v2543_v32  ;;  %12315 = vmatmul.mubr.msk.bf16.gmra.mrb[72].mxu0 %vm1124_vm4, %v7638_v3  ;;  %12052 = vmatprep.subr.bf16.mxu1 %v13014_v43  ;;  %v19275_v47 = vld [vmem:[#allocation25_spill] sm:$0xff]  ;;  %v7608_v54 = vsel %vm272_vm0, %v7423_v56, %v19201_v62  ;;  %v3929_v32 = vshll.u32 %v3874_v31, 16  ;;  %v7426_v55 = vsel %vm6988_vm8, %v7424_v19, %v7425_v48  ;;  %v7069_v31 = vld [vmem:[#allocation2 + $0xc8] sm:$0xc0] }
 0x1c7   : > { %4052 = vrot.lane.b32.xlu1 %v3918_v8, %s13387_s30  ;;  %12019 = vmatmul.mubr.msk.bf16.gmra.mrb[4].mxu1 %vm1124_vm4, %v2623_v61  ;;  %v2230_v8 = vrot.slane %v2228_v17, 7  ;;  %v2226_v3 = vsel %vm2166_vm7, %v2218_v4, %v19275_v47  ;;  %v3926_v18 = vrot.slane %v19276_v34, 1  ;;  %v3925_v35 = vsel %vm2375_vm5, %v3920_v57, %v3924_v29  ;;  %v19277_v61 = vld [vmem:[#allocation24_spill] sm:$0xff] }
 0x1c8   : > { %4022 = vrot.lane.b32.xlu0 %v13217_v41, %s13386_s26  ;;  %v2515_v39 = vpop.permute.xlu1 %2514  ;;  %v2240_v4 = vshrl.u32 %v2146_v11, 16  ;;  %v7356_v41 = vld [vmem:[#allocation2 + $0x1e8] sm:$0x3]  ;;  %v3931_v57 = vrot.slane %v3929_v32, 1  ;;  %v7427_v47 = vrot.slane %v7355_v14, 2  ;;  %v19280_v14 = vld [vmem:[#allocation30_spill] sm:$0xff] }
 0x1c9   : > { %v2513_v10 = vpop.permute.xlu0 %2512  ;;  %12053 = vmatpush3.bf16.msra.mxu1 %v13014_v43  ;;  %v7141_v43 = vsel %vm7117_vm6, %v7139_v9, %v7140_v2  ;;  %v2238_v62 = vsel %vm2166_vm7, %v2230_v8, %v19277_v61  ;;  %v7045_v9 = vld [vmem:[#allocation2 + $0xc8] sm:$0xff]  ;;  %v19278_v2 = vshrl.u32 %v14968_v59, 16  ;;  %v7070_v8 = vld [vmem:[#allocation2 + $0xd0] sm:$0x3f] }
 0x1ca   : > { %12054 = vmatprep.subr.bf16.mxu1 %v13015_v22  ;;  %v2582_v60 = vsel %vm272_vm0, %v2226_v3, %v2513_v10  ;;  %v13218_v10 = vld [vmem:[%s13730_s15] sm:$0xff]  ;;  %v2585_v56 = vsel %vm272_vm0, %v2238_v62, %v2515_v39  ;;  %v2242_v59 = vrot.slane %v2240_v4, 7  ;;  %v7428_v3 = vrot.slane %v7356_v41, 2  ;;  %v3875_v11 = vld [vmem:[#allocation2 + $0x1f0] sm:$0x1] }
 0x1cb   : > { %7226 = vrot.lane.b32.xlu1 %v7138_v26, %s13387_s30  ;;  %v3927_v19 = vor.u32 %v3926_v18, %v19278_v2  ;;  %v2252_v39 = vshrl.u32 %v2148_v53, 16  ;;  %v13220_v18 = vld [vmem:[#allocation2 + $0x1d0] sm:$0xff]  ;;  %v7071_v62 = vld [vmem:[#allocation2 + $0xe0] sm:$0xc0]  ;;  %v3936_v4 = vshll.u32 %v3875_v11, 16 }
 0x1cc   : > { %7196 = vrot.lane.b32.xlu0 %v7044_v12, %s13386_s26  ;;  %v7576_v20 = vpop.permute.xlu1 %7575  ;;  %v886_v12 = vsel %vm272_vm0, %v13218_v10, 0.0  ;;  %v2250_v41 = vsel %vm2166_vm7, %v2242_v59, %v19280_v14  ;;  %v13221_v53 = vld [vmem:[%s13730_s15 + $0x10] sm:$0xff]  ;;  %v13222_v10 = vld [vmem:[#allocation2 + $0x1e8] sm:$0xff]  ;;  %v7046_v11 = vld [vmem:[#allocation2 + $0xe0] sm:$0xff] }
 0x1cd   : > { %v7640_v21 = vsel %vm1115_vm3, %v7608_v54, %v7576_v20  ;;  %v2545_v51 = vpop.permute.xlu0 %2544  ;;  %12055 = vmatpush3.bf16.msra.mxu1 %v13015_v22  ;;  %v7610_v22 = vsel %vm272_vm0, %v7426_v55, %v19211_v7  ;;  %v7357_v54 = vld [vmem:[#allocation2 + $0x1f8] sm:$0xfc]  ;;  %v7358_v20 = vld [vmem:[#allocation2 + $0x200] sm:$0x3]  ;;  %v3932_v32 = vsel %vm2375_vm5, %v3927_v19, %v3931_v57  ;;  %v19279_v55 = vshll.u32 %v15003_v49, 16 }
 0x1ce   : > { %v2625_v17 = vsel %vm1115_vm3, %v2582_v60, %v2545_v51  ;;  %12318 = vmatprep.mubr.msk.bf16.mxu0 %vm1124_vm4, %v7640_v21  ;;  %12056 = vmatprep.subr.bf16.mxu1 %v13016_v15  ;;  %v7142_v60 = vrot.slane %v7069_v31, 6  ;;  %v7143_v21 = vrot.slane %v7070_v8, 6  ;;  %v2254_v19 = vrot.slane %v2252_v39, 7  ;;  %v2150_v31 = vld [vmem:[#allocation2 + $0x1c8] sm:$0x80] }
 0x1cf   : > { %7228 = vrot.lane.b32.xlu1 %v7141_v43, %s13387_s30  ;;  %12022 = vmatprep.mubr.msk.bf16.mxu1 %vm1124_vm4, %v2625_v17  ;;  %v15693_v43 = vld [vmem:[%s18896_s1 + $0x180] sm:$0xff]   ;;  %v3933_v61 = vrot.slane %v19279_v55, 1  ;;  %v7072_v17 = vld [vmem:[#allocation2 + $0xe8] sm:$0x3f]  ;;  %v889_v57 = vsel %vm272_vm0, %v13221_v53, 0.0  ;;  %v3938_v39 = vrot.slane %v3936_v4, 1 }
 0x1d0   : > { %4054 = vrot.lane.b32.xlu0 %v3925_v35, %s13387_s30  ;;  %v7578_v26 = vpop.permute.xlu1 %7577  ;;  %12382 = vmatprep.subr.bf16.mxu0 %v15693_v43  ;;  %v2152_v55 = vld [vmem:[#allocation2 + $0x1e0] sm:$0x80]  ;;  %v13223_v4 = vld [vmem:[%s13730_s15 + $0x18] sm:$0xff] }
 0x1d1   : > { %v7642_v29 = vsel %vm1115_vm3, %v7610_v22, %v7578_v26  ;;  %v2547_v48 = vpop.permute.xlu0 %2546  ;;  %12057 = vmatpush3.bf16.msra.mxu1 %v13016_v15  ;;  %v13219_v15 = vld [vmem:[%s13730_s15 + $0x8] sm:$0xff]  ;;  %v7429_v22 = vsel %vm6988_vm8, %v7427_v47, %v7428_v3  ;;  %v7430_v26 = vrot.slane %v7357_v54, 2  ;;  %v891_v14 = vsel %vm272_vm0, %v13223_v4, 0.0 }
 0x1d2   : > { %v2627_v7 = vsel %vm1115_vm3, %v2585_v56, %v2547_v48  ;;  %12319 = vmatmul.mubr.msk.bf16.gmra.mrb[76].mxu0 %vm1124_vm4, %v7642_v29  ;;  %v887_v34 = vsel %vm272_vm0, %v13219_v15, 0.0  ;;  %v7144_v56 = vsel %vm7117_vm6, %v7142_v60, %v7143_v21  ;;  %v7145_v29 = vrot.slane %v7071_v62, 6  ;;  %v3876_v54 = vld [vmem:[#allocation2 + $0x208] sm:$0x1]  ;;  %v7360_v60 = vld [vmem:[#allocation2 + $0x218] sm:$0x3] }
 0x1d3   : > { %7198 = vrot.lane.b32.xlu1 %v7045_v9, %s13386_s26  ;;  %12023 = vmatmul.mubr.msk.bf16.gmra.mrb[8].mxu1 %vm1124_vm4, %v2627_v7  ;;  %v7431_v9 = vrot.slane %v7358_v20, 2  ;;  %v888_v2 = vadd.f32 %v887_v34, %v886_v12  ;;  %v7146_v48 = vrot.slane %v7072_v17, 6  ;;  %v19281_v7 = vshrl.u32 %v15003_v49, 16 }
 0x1d4   : > { %4024 = vrot.lane.b32.xlu0 %v13220_v18, %s13386_s26  ;;  %v7612_v12 = vsel %vm272_vm0, %v7429_v22, %v19220_v37  ;;  %v19282_v18 = vld [vmem:[#allocation28_spill] sm:$0xff]  ;;  %v2264_v49 = vshrl.u32 %v2150_v31, 16  ;;  %v3943_v17 = vshll.u32 %v3876_v54, 16 }
 0x1d5   : > { %v2519_v51 = vpop.permute.xlu1 %2518  ;;  %v2517_v35 = vpop.permute.xlu0 %2516  ;;  %v3934_v59 = vor.u32 %v3933_v61, %v19281_v7  ;;  %v7432_v34 = vsel %vm6988_vm8, %v7430_v26, %v7431_v9  ;;  %v7359_v37 = vld [vmem:[#allocation2 + $0x210] sm:$0xfc]  ;;  %v890_v21 = vadd.f32 %v889_v57, %v888_v2  ;;  %v19283_v61 = vshll.u32 %v15097_v23, 16 }
 0x1d6   : > { %v2588_v8 = vsel %vm272_vm0, %v2250_v41, %v2517_v35  ;;  %v7147_v35 = vsel %vm7117_vm6, %v7145_v29, %v7146_v48  ;;  %v7614_v41 = vsel %vm272_vm0, %v7432_v34, %v19226_v25  ;;  %v7433_v53 = vrot.slane %v7359_v37, 2  ;;  %v7361_v25 = vld [vmem:[#allocation2 + $0x228] sm:$0xfc]  ;;  %v7362_v48 = vld [vmem:[#allocation2 + $0x230] sm:$0x3] }
 0x1d7   : > { %4056 = vrot.lane.b32.xlu1 %v3932_v32, %s13387_s30  ;;  %v2262_v32 = vsel %vm2166_vm7, %v2254_v19, %v19282_v18  ;;  %v3940_v62 = vrot.slane %v19283_v61, 1  ;;  %v3939_v26 = vsel %vm2375_vm5, %v3934_v59, %v3938_v39  ;;  %v7434_v57 = vrot.slane %v7360_v60, 2  ;;  %v7074_v39 = vld [vmem:[#allocation2 + $0x100] sm:$0x3f]  ;;  %v19285_v60 = vld [vmem:[#allocation35_spill] sm:$0xff] }
 0x1d8   : > { %4026 = vrot.lane.b32.xlu0 %v13222_v10, %s13386_s26  ;;  %v2591_v9 = vsel %vm272_vm0, %v2262_v32, %v2519_v51  ;;  %v2266_v29 = vrot.slane %v2264_v49, 7  ;;  %v892_v31 = vadd.f32 %v891_v14, %v890_v21  ;;  %v7047_v51 = vld [vmem:[#allocation2 + $0xf8] sm:$0xff]  ;;  %v3945_v59 = vrot.slane %v3943_v17, 1  ;;  %v3877_v18 = vld [vmem:[#allocation2 + $0x220] sm:$0x1]  ;;  %v13225_v32 = vld [vmem:[%s13730_s15 + $0x28] sm:$0xff] }
 0x1d9   : > { %v7580_v47 = vpop.permute.xlu1 %7579  ;;  %v2549_v3 = vpop.permute.xlu0 %2548  ;;  %v7437_v34 = vrot.slane %v7362_v48, 2  ;;  %v895_v49 = vsel %vm272_vm0, %v13225_v32, 0.0  ;;  %v2154_v17 = vld [vmem:[#allocation2 + $0x1f8] sm:$0x80]  ;;  %v7363_v48 = vld [vmem:[#allocation2 + $0x240] sm:$0xfc] }
 0x1da   : > { %v7644_v20 = vsel %vm1115_vm3, %v7612_v12, %v7580_v47  ;;  %v2629_v15 = vsel %vm1115_vm3, %v2588_v8, %v2549_v3  ;;  %v19284_v8 = vshrl.u32 %v15097_v23, 16  ;;  %v13224_v12 = vld [vmem:[%s13730_s15 + $0x20] sm:$0xff]  ;;  %v2274_v23 = vsel %vm2166_vm7, %v2266_v29, %v19285_v60 }
 0x1db   : > { %7230 = vrot.lane.b32.xlu1 %v7144_v56, %s13387_s30  ;;  %12322 = vmatprep.mubr.msk.bf16.mxu0 %vm1124_vm4, %v7644_v20  ;;  %v2276_v56 = vshrl.u32 %v2152_v55, 16  ;;  %v893_v47 = vsel %vm272_vm0, %v13224_v12, 0.0  ;;  %v7435_v20 = vsel %vm6988_vm8, %v7433_v53, %v7434_v57 }
 0x1dc   : > { %7200 = vrot.lane.b32.xlu0 %v7046_v11, %s13386_s26  ;;  %12026 = vmatprep.mubr.msk.bf16.mxu1 %vm1124_vm4, %v2629_v15  ;;  %v3941_v7 = vor.u32 %v3940_v62, %v19284_v8  ;;  %v7073_v11 = vld [vmem:[#allocation2 + $0xf8] sm:$0xc0]  ;;  %v7436_v15 = vrot.slane %v7361_v25, 2  ;;  %v894_v21 = vadd.f32 %v893_v47, %v892_v31  ;;  %v7149_v62 = vrot.slane %v7074_v39, 6  ;;  %v7364_v31 = vld [vmem:[#allocation2 + $0x248] sm:$0x3] }
 0x1dd   : > { %v7582_v22 = vpop.permute.xlu1 %7581  ;;  %v2278_v37 = vrot.slane %v2276_v56, 7  ;;  %v7148_v61 = vrot.slane %v7073_v11, 6  ;;  %v7616_v4 = vsel %vm272_vm0, %v7435_v20, %v19232_v24  ;;  %v19287_v56 = vld [vmem:[#allocation33_spill] sm:$0xff]  ;;  %v2288_v25 = vshrl.u32 %v2154_v17, 16  ;;  %v13228_v11 = vld [vmem:[%s13730_s15 + $0x30] sm:$0xff] }
 0x1de   : > { %v7646_v2 = vsel %vm1115_vm3, %v7614_v41, %v7582_v22  ;;  %v2551_v19 = vpop.permute.xlu0 %2550  ;;  %v3946_v55 = vsel %vm2375_vm5, %v3941_v7, %v3945_v59  ;;  %v19286_v41 = vshll.u32 %v15162_v46, 16  ;;  %v13227_v8 = vld [vmem:[#allocation2 + $0x218] sm:$0xff]  ;;  %v2156_v59 = vld [vmem:[#allocation2 + $0x210] sm:$0x80]  ;;  %v897_v39 = vsel %vm272_vm0, %v13228_v11, 0.0 }
 0x1df   : > { %v2631_v10 = vsel %vm1115_vm3, %v2591_v9, %v2551_v19  ;;  %7232 = vrot.lane.b32.xlu1 %v7147_v35, %s13387_s30  ;;  %12323 = vmatmul.mubr.msk.bf16.gmra.mrb[80].mxu0 %vm1124_vm4, %v7646_v2  ;;  %v13226_v35 = vld [vmem:[#allocation2 + $0x200] sm:$0xff]  ;;  %v7076_v9 = vld [vmem:[#allocation2 + $0x118] sm:$0x3f]  ;;  %v3950_v2 = vshll.u32 %v3877_v18, 16  ;;  %v2286_v29 = vsel %vm2166_vm7, %v2278_v37, %v19287_v56  ;;  %v7150_v7 = vsel %vm7117_vm6, %v7148_v61, %v7149_v62  ;;  %v7048_v18 = vld [vmem:[#allocation2 + $0x110] sm:$0xff] }
 0x1e0   : > { %4058 = vrot.lane.b32.xlu0 %v3939_v26, %s13387_s30  ;;  %12027 = vmatmul.mubr.msk.bf16.gmra.mrb[12].mxu1 %vm1124_vm4, %v2631_v10  ;;  %v3947_v22 = vrot.slane %v19286_v41, 1  ;;  %v7075_v26 = vld [vmem:[#allocation2 + $0x110] sm:$0xc0]  ;;  %v7438_v10 = vsel %vm6988_vm8, %v7436_v15, %v7437_v34  ;;  %v7152_v47 = vrot.slane %v7076_v9, 6  ;;  %v7365_v61 = vld [vmem:[#allocation2 + $0x258] sm:$0xfc] }
 0x1e1   : > { %v2523_v3 = vpop.permute.xlu1 %2522  ;;  %v7151_v12 = vrot.slane %v7075_v26, 6  ;;  %v7618_v15 = vsel %vm272_vm0, %v7438_v10, %v19243_v33  ;;  %v3952_v32 = vrot.slane %v3950_v2, 1  ;;  %v2290_v33 = vrot.slane %v2288_v25, 7  ;;  %v7366_v62 = vld [vmem:[#allocation2 + $0x260] sm:$0x3] }
 0x1e2   : > { %v2521_v54 = vpop.permute.xlu0 %2520  ;;  %v2597_v37 = vsel %vm272_vm0, %v2286_v29, %v2523_v3  ;;  %v7443_v10 = vrot.slane %v7366_v62, 2  ;;  %v19290_v29 = vld [vmem:[#allocation39_spill] sm:$0xff] }
 0x1e3   : > { %7202 = vrot.lane.b32.xlu1 %v7047_v51, %s13386_s26  ;;  %v2594_v19 = vsel %vm272_vm0, %v2274_v23, %v2521_v54  ;;  %v896_v51 = vadd.f32 %v895_v49, %v894_v21  ;;  %v19288_v54 = vshrl.u32 %v15162_v46, 16  ;;  %v3878_v49 = vld [vmem:[#allocation2 + $0x238] sm:$0x1]  ;;  %v7439_v21 = vrot.slane %v7363_v48, 2  ;;  %v7049_v48 = vld [vmem:[#allocation2 + $0x128] sm:$0xff] }
 0x1e4   : > { %4028 = vrot.lane.b32.xlu0 %v13226_v35, %s13386_s26  ;;  %v7440_v35 = vrot.slane %v7364_v31, 2  ;;  %v2300_v46 = vshrl.u32 %v2156_v59, 16  ;;  %v7153_v3 = vsel %vm7117_vm6, %v7151_v12, %v7152_v47  ;;  %v3957_v41 = vshll.u32 %v3878_v49, 16  ;;  %v13230_v59 = vld [vmem:[%s13730_s15 + $0x40] sm:$0xff] }
 0x1e5   : > { %v7584_v14 = vpop.permute.xlu1 %7583  ;;  %v3948_v20 = vor.u32 %v3947_v22, %v19288_v54  ;;  %v898_v17 = vadd.f32 %v897_v39, %v896_v51  ;;  %v13229_v22 = vld [vmem:[%s13730_s15 + $0x38] sm:$0xff]  ;;  %v19291_v31 = vshrl.u32 %v15236_v63, 16  ;;  %v901_v12 = vsel %vm272_vm0, %v13230_v59, 0.0  ;;  %v7077_v39 = vld [vmem:[#allocation2 + $0x128] sm:$0xc0]  ;;  %v13234_v59 = vld [vmem:[%s13730_s15 + $0x50] sm:$0xff] }
 0x1e6   : > { %v7648_v53 = vsel %vm1115_vm3, %v7616_v4, %v7584_v14  ;;  %v2553_v57 = vpop.permute.xlu0 %2552  ;;  %v19289_v4 = vshll.u32 %v15236_v63, 16  ;;  %v899_v26 = vsel %vm272_vm0, %v13229_v22, 0.0  ;;  %v2302_v56 = vrot.slane %v2300_v46, 7  ;;  %v7078_v54 = vld [vmem:[#allocation2 + $0x130] sm:$0x3f] }
 0x1e7   : > { %v2633_v24 = vsel %vm1115_vm3, %v2594_v19, %v2553_v57  ;;  %4060 = vrot.lane.b32.xlu1 %v3946_v55, %s13387_s30  ;;  %12326 = vmatprep.mubr.msk.bf16.mxu0 %vm1124_vm4, %v7648_v53  ;;  %v3953_v2 = vsel %vm2375_vm5, %v3948_v20, %v3952_v32  ;;  %v7441_v53 = vsel %vm6988_vm8, %v7439_v21, %v7440_v35  ;;  %v7442_v57 = vrot.slane %v7365_v61, 2  ;;  %v3879_v63 = vld [vmem:[#allocation2 + $0x250] sm:$0x1]  ;;  %v13231_v32 = vld [vmem:[%s13730_s15 + $0x48] sm:$0xff]  ;;  %v7367_v21 = vld [vmem:[#allocation2 + $0x270] sm:$0xfc] }
 0x1e8   : > { %4030 = vrot.lane.b32.xlu0 %v13227_v8, %s13386_s26  ;;  %12030 = vmatprep.mubr.msk.bf16.mxu1 %vm1124_vm4, %v2633_v24  ;;  %v3954_v14 = vrot.slane %v19289_v4, 1  ;;  %v2298_v24 = vsel %vm2166_vm7, %v2290_v33, %v19290_v29  ;;  %v900_v25 = vadd.f32 %v899_v26, %v898_v17  ;;  %v3959_v8 = vrot.slane %v3957_v41, 1  ;;  %v7368_v35 = vld [vmem:[#allocation2 + $0x278] sm:$0x3]  ;;  %v13232_v46 = vld [vmem:[#allocation2 + $0x230] sm:$0xff] }
 0x1e9   : > { %v7586_v34 = vpop.permute.xlu1 %7585  ;;  %v7620_v47 = vsel %vm272_vm0, %v7441_v53, %v19248_v42  ;;  %v903_v49 = vsel %vm272_vm0, %v13231_v32, 0.0  ;;  %v2160_v61 = vld [vmem:[#allocation2 + $0x240] sm:$0x80]  ;;  %v7154_v62 = vrot.slane %v7077_v39, 6  ;;  %v7155_v17 = vrot.slane %v7078_v54, 6 }
 0x1ea   : > { %v7650_v60 = vsel %vm1115_vm3, %v7618_v15, %v7586_v34  ;;  %v2555_v23 = vpop.permute.xlu0 %2554  ;;  %v3955_v51 = vor.u32 %v3954_v14, %v19291_v31  ;;  %v19293_v14 = vshll.u32 %v15290_v6, 16  ;;  %v7079_v22 = vld [vmem:[#allocation2 + $0x140] sm:$0xc0]  ;;  %v7080_v26 = vld [vmem:[#allocation2 + $0x148] sm:$0x3f] }
 0x1eb   : > { %v2635_v55 = vsel %vm1115_vm3, %v2597_v37, %v2555_v23  ;;  %7234 = vrot.lane.b32.xlu1 %v7150_v7, %s13387_s30  ;;  %12327 = vmatmul.mubr.msk.bf16.gmra.mrb[84].mxu0 %vm1124_vm4, %v7650_v60  ;;  %v2158_v7 = vld [vmem:[#allocation2 + $0x228] sm:$0x80]  ;;  %v19292_v37 = vld [vmem:[#allocation38_spill] sm:$0xff] }
 0x1ec   : > { %7204 = vrot.lane.b32.xlu0 %v7048_v18, %s13386_s26  ;;  %12031 = vmatmul.mubr.msk.bf16.gmra.mrb[16].mxu1 %vm1124_vm4, %v2635_v55  ;;  %v7444_v18 = vsel %vm6988_vm8, %v7442_v57, %v7443_v10  ;;  %v2310_v60 = vsel %vm2166_vm7, %v2302_v56, %v19292_v37  ;;  %v2312_v42 = vshrl.u32 %v2158_v7, 16  ;;  %v902_v55 = vadd.f32 %v901_v12, %v900_v25  ;;  %v7369_v25 = vld [vmem:[#allocation2 + $0x288] sm:$0xfc]  ;;  %v7050_v54 = vld [vmem:[#allocation2 + $0x140] sm:$0xff]  ;;  %v19295_v37 = vld [vmem:[#allocation41_spill] sm:$0xff] }
 0x1ed   : > { %v2527_v9 = vpop.permute.xlu1 %2526  ;;  %v3960_v33 = vsel %vm2375_vm5, %v3955_v51, %v3959_v8  ;;  %v3961_v41 = vrot.slane %v19293_v14, 1  ;;  %v7445_v10 = vrot.slane %v7367_v21, 2  ;;  %v7446_v56 = vrot.slane %v7368_v35, 2  ;;  %v15818_v51 = vld [vmem:[#allocation2 + $0x248] sm:$0xff] }
 0x1ee   : > { %v2525_v19 = vpop.permute.xlu0 %2524  ;;  %v904_v31 = vadd.f32 %v903_v49, %v902_v55  ;;  %v7157_v8 = vrot.slane %v7079_v22, 6  ;;  %v7158_v7 = vrot.slane %v7080_v26, 6  ;;  %v905_v12 = vsel %vm272_vm0, %v13234_v59, 0.0  ;;  %v19297_v26 = vld [vmem:[#allocation40_spill] sm:$0xff] }
 0x1ef   : > { %7236 = vrot.lane.b32.xlu1 %v7153_v3, %s13387_s30  ;;  %v2600_v20 = vsel %vm272_vm0, %v2298_v24, %v2525_v19  ;;  %v7622_v3 = vsel %vm272_vm0, %v7444_v18, %v19256_v58  ;;  %v2603_v19 = vsel %vm272_vm0, %v2310_v60, %v2527_v9  ;;  %v2324_v58 = vshrl.u32 %v2160_v61, 16 }
 0x1f0   : > { %4062 = vrot.lane.b32.xlu0 %v3953_v2, %s13387_s30  ;;  %v3964_v2 = vshll.u32 %v3879_v63, 16  ;;  %v2314_v24 = vrot.slane %v2312_v42, 7  ;;  %v7156_v9 = vsel %vm7117_vm6, %v7154_v62, %v7155_v17  ;;  %v7447_v18 = vsel %vm6988_vm8, %v7445_v10, %v7446_v56 }
 0x1f1   : > { %v7588_v11 = vpop.permute.xlu1 %7587  ;;  %v7448_v63 = vrot.slane %v7369_v25, 2  ;;  %v2326_v49 = vrot.slane %v2324_v58, 7  ;;  %v906_v42 = vadd.f32 %v905_v12, %v904_v31  ;;  %v19296_v21 = vshll.u32 %v15355_v27, 16  ;;  %v7082_v31 = vld [vmem:[#allocation2 + $0x160] sm:$0x3f] }
 0x1f2   : > { %v7652_v15 = vsel %vm1115_vm3, %v7620_v47, %v7588_v11  ;;  %v2557_v34 = vpop.permute.xlu0 %2556  ;;  %v19294_v47 = vshrl.u32 %v15290_v6, 16  ;;  %v2322_v60 = vsel %vm2166_vm7, %v2314_v24, %v19295_v37  ;;  %v7159_v6 = vsel %vm7117_vm6, %v7157_v8, %v7158_v7  ;;  %v3881_v12 = vld [vmem:[#allocation2 + $0x280] sm:$0x1] }
 0x1f3   : > { %v2637_v23 = vsel %vm1115_vm3, %v2600_v20, %v2557_v34  ;;  %7206 = vrot.lane.b32.xlu1 %v7049_v48, %s13386_s26  ;;  %12330 = vmatprep.mubr.msk.bf16.mxu0 %vm1124_vm4, %v7652_v15  ;;  %v7370_v48 = vld [vmem:[#allocation2 + $0x290] sm:$0x3]  ;;  %v3966_v20 = vrot.slane %v3964_v2, 1  ;;  %v3880_v15 = vld [vmem:[#allocation2 + $0x268] sm:$0x1]  ;;  %v3968_v35 = vrot.slane %v19296_v21, 1  ;;  %v7624_v61 = vsel %vm272_vm0, %v7447_v18, %v19259_v13 }
 0x1f4   : > { %4032 = vrot.lane.b32.xlu0 %v13232_v46, %s13386_s26  ;;  %12034 = vmatprep.mubr.msk.bf16.mxu1 %vm1124_vm4, %v2637_v23  ;;  %v3962_v11 = vor.u32 %v3961_v41, %v19294_v47  ;;  %v7449_v32 = vrot.slane %v7370_v48, 2  ;;  %v2162_v23 = vld [vmem:[#allocation2 + $0x258] sm:$0x80]  ;;  %v3971_v55 = vshll.u32 %v3880_v15, 16  ;;  %v2334_v2 = vsel %vm2166_vm7, %v2326_v49, %v19297_v26  ;;  %v13237_v47 = vld [vmem:[%s13730_s15 + $0x68] sm:$0xff]  ;;  %v15864_v15 = vld [vmem:[#allocation2 + $0x260] sm:$0xff] }
 0x1f5   : > { %v7590_v4 = vpop.permute.xlu1 %7589  ;;  %v13235_v46 = vld [vmem:[%s13730_s15 + $0x58] sm:$0xff]  ;;  %v2336_v22 = vshrl.u32 %v2162_v23, 16  ;;  %v19299_v49 = vshll.u32 %v15408_v52, 16  ;;  %v19301_v26 = vshrl.u32 %v15408_v52, 16 }
 0x1f6   : > { %v7654_v53 = vsel %vm1115_vm3, %v7622_v3, %v7590_v4  ;;  %v2559_v57 = vpop.permute.xlu0 %2558  ;;  %v3967_v17 = vsel %vm2375_vm5, %v3962_v11, %v3966_v20  ;;  %v7450_v41 = vsel %vm6988_vm8, %v7448_v63, %v7449_v32  ;;  %v3973_v56 = vrot.slane %v3971_v55, 1  ;;  %v7081_v48 = vld [vmem:[#allocation2 + $0x158] sm:$0xc0]  ;;  %v7084_v23 = vld [vmem:[#allocation2 + $0x178] sm:$0x3f] }
 0x1f7   : > { %v2639_v29 = vsel %vm1115_vm3, %v2603_v19, %v2559_v57  ;;  %4064 = vrot.lane.b32.xlu1 %v3960_v33, %s13387_s30  ;;  %12331 = vmatmul.mubr.msk.bf16.gmra.mrb[88].mxu0 %vm1124_vm4, %v7654_v53  ;;  %v907_v33 = vsel %vm272_vm0, %v13235_v46, 0.0  ;;  %v7051_v53 = vld [vmem:[#allocation2 + $0x158] sm:$0xff]  ;;  %v19298_v57 = vshrl.u32 %v15355_v27, 16  ;;  %v7626_v24 = vsel %vm272_vm0, %v7450_v41, %v19262_v0  ;;  %v6924_v0 = vld [vmem:[#allocation2] sm:$0xfc] }
 0x1f8   : > { %4034 = vrot.lane.b32.xlu0 %v15818_v51, %s13386_s26  ;;  %12035 = vmatmul.mubr.msk.bf16.gmra.mrb[20].mxu1 %vm1124_vm4, %v2639_v29  ;;  %v908_v13 = vadd.f32 %v907_v33, %v906_v42  ;;  %v13236_v29 = vld [vmem:[%s13730_s15 + $0x60] sm:$0xff]  ;;  %v2338_v59 = vrot.slane %v2336_v22, 7  ;;  %v911_v27 = vsel %vm272_vm0, %v13237_v47, 0.0  ;;  %v7160_v18 = vrot.slane %v7081_v48, 6 }
 0x1f9   : > { %v2531_v39 = vpop.permute.xlu1 %2530  ;;  %v3969_v10 = vor.u32 %v3968_v35, %v19298_v57  ;;  %v909_v58 = vsel %vm272_vm0, %v13236_v29, 0.0  ;;  %v7161_v63 = vrot.slane %v7082_v31, 6  ;;  %v3975_v37 = vrot.slane %v19299_v49, 1  ;;  %v19300_v35 = vld [vmem:[#allocation43_spill] sm:$0xff]  ;;  %v3882_v57 = vld [vmem:[#allocation2 + $0x298] sm:$0x1] }
 0x1fa   : > { %v2529_v34 = vpop.permute.xlu0 %2528  ;;  %v910_v20 = vadd.f32 %v909_v58, %v908_v13  ;;  %v3978_v42 = vshll.u32 %v3881_v12, 16  ;;  %v2346_v55 = vsel %vm2166_vm7, %v2338_v59, %v19300_v35  ;;  %v7052_v13 = vld [vmem:[#allocation2 + $0x170] sm:$0xff]  ;;  %v15888_v29 = vld [vmem:[%s18899_s4] ss:$0 sm:$0xff]  ;;  %v3982_v59 = vrot.slane %v3852_v45, 1 }
 0x1fb   : > { %7238 = vrot.lane.b32.xlu1 %v7156_v9, %s13387_s30  ;;  %v2606_v3 = vsel %vm272_vm0, %v2322_v60, %v2529_v34  ;;  %v2609_v9 = vsel %vm272_vm0, %v2334_v2, %v2531_v39  ;;  %v3974_v39 = vsel %vm2375_vm5, %v3969_v10, %v3973_v56  ;;  %v2164_v34 = vld [vmem:[#allocation2 + $0x270] sm:$0x80]  ;;  %v3976_v2 = vor.u32 %v3975_v37, %v19301_v26  ;;  %v8260_v35 = vld [vmem:[#allocation2 + $0x250] sm:$0x3f] }
 0x1fc   : > { %7208 = vrot.lane.b32.xlu0 %v7050_v54, %s13386_s26  ;;  %v6925_v54 = vld [vmem:[#allocation2 + $0x8] sm:$0x3]  ;;  %v7083_v60 = vld [vmem:[#allocation2 + $0x170] sm:$0xc0]  ;;  %v2348_v33 = vshrl.u32 %v2164_v34, 16  ;;  %v912_v41 = vadd.f32 %v911_v27, %v910_v20  ;;  %v576_v31 = vadd.f32 %v15238_v16, %v15888_v29  ;;  %v3985_v12 = vshll.u32 %v3882_v57, 16 }
 0x1fd   : > { %v7592_v62 = vpop.permute.xlu1 %7591  ;;  %v6990_v21 = vrot.slane %v6925_v54, 2  ;;  %v13240_v10 = vld [vmem:[%s13730_s15 + $0x70] sm:$0xff]  ;;  %v19303_v49 = vshrl.u32 %v15475_v36, 16  ;;  %v8261_v57 = vld [vmem:[#allocation2 + $0x260] sm:$0xc0] }
 0x1fe   : > { %v7656_v4 = vsel %vm1115_vm3, %v7624_v61, %v7592_v62  ;;  %v2561_v14 = vpop.permute.xlu0 %2560  ;;  %v6926_v61 = vld [vmem:[#allocation2 + $0x18] sm:$0xfc]  ;;  %v6927_v62 = vld [vmem:[#allocation2 + $0x20] sm:$0x3]  ;;  %v913_v56 = vsel %vm272_vm0, %v13240_v10, 0.0 }
 0x1ff   : > { %v2641_v19 = vsel %vm1115_vm3, %v2606_v3, %v2561_v14  ;;  %7240 = vrot.lane.b32.xlu1 %v7159_v6, %s13387_s30  ;;  %12334 = vmatprep.mubr.msk.bf16.mxu0 %vm1124_vm4, %v7656_v4  ;;  %v6989_v6 = vrot.slane %v6924_v0, 2  ;;  %v7162_v3 = vsel %vm7117_vm6, %v7160_v18, %v7161_v63  ;;  %v7163_v4 = vrot.slane %v7083_v60, 6  ;;  %v13241_v0 = vld [vmem:[%s13730_s15 + $0x78] sm:$0xff]  ;;  %v19302_v63 = vld [vmem:[#allocation44_spill] sm:$0xff] }
 0x200   : > { %4066 = vrot.lane.b32.xlu0 %v3967_v17, %s13387_s30  ;;  %12038 = vmatprep.mubr.msk.bf16.mxu1 %vm1124_vm4, %v2641_v19  ;;  %v15875_v17 = vld [vmem:[#allocation2 + $0x278] sm:$0xff]  ;;  %v7164_v14 = vrot.slane %v7084_v23, 6  ;;  %v6992_v52 = vrot.slane %v6926_v61, 2  ;;  %v6993_v48 = vrot.slane %v6927_v62, 2  ;;  %v914_v47 = vadd.f32 %v913_v56, %v912_v41  ;;  %v3646_v26 = vld [vmem:[#allocation2 + $0x150] sm:$0x80] }
 0x201   : > { %v7594_v25 = vpop.permute.xlu1 %7593  ;;  %v6991_v58 = vsel %vm6988_vm8, %v6989_v6, %v6990_v21  ;;  %v915_v54 = vsel %vm272_vm0, %v13241_v0, 0.0  ;;  %v3983_v37 = vor.u32 %v3982_v59, %v19303_v49  ;;  %v3987_v60 = vrot.slane %v3985_v12, 1  ;;  %v8259_v21 = vld [vmem:[#allocation2 + $0x248] sm:$0xc0]  ;;  %v19305_v59 = vld [vmem:[#allocation46_spill] sm:$0xff] }
 0x202   : > { %v7658_v8 = vsel %vm1115_vm3, %v7626_v24, %v7594_v25  ;;  %v2563_v7 = vpop.permute.xlu0 %2562  ;;  %v916_v23 = vadd.f32 %v915_v54, %v914_v47  ;;  %v15953_v0 = vld [vmem:[#allocation2 + $0x2a8] sm:$0xff] }
 0x203   : > { %v2643_v11 = vsel %vm1115_vm3, %v2609_v9, %v2563_v7  ;;  %7210 = vrot.lane.b32.xlu1 %v7051_v53, %s13386_s26  ;;  %12335 = vmatmul.mubr.msk.bf16.gmra.mrb[92].mxu0 %vm1124_vm4, %v7658_v8  ;;  %v3980_v53 = vrot.slane %v3978_v42, 1  ;;  %v2350_v9 = vrot.slane %v2348_v33, 7  ;;  %v3644_v8 = vld [vmem:[#allocation2 + $0x138] sm:$0x80]  ;;  %v7165_v7 = vsel %vm7117_vm6, %v7163_v4, %v7164_v14  ;;  %v3883_v4 = vld [vmem:[#allocation2 + $0x2b0] sm:$0x1] }
 0x204   : > { %4036 = vrot.lane.b32.xlu0 %v15864_v15, %s13386_s26  ;;  %12039 = vmatmul.mubr.msk.bf16.gmra.mrb[24].mxu1 %vm1124_vm4, %v2643_v11  ;;  %v3677_v18 = vshrl.u32 %v3644_v8, 16  ;;  %v568_v33 = vadd.f32 %v15888_v29, %v15244_v30  ;;  %v13018_v14 = vld [vmem:[%s18896_s1 + $0x188] sm:$0xff]   ;;  %v6929_v30 = vld [vmem:[#allocation2 + $0x38] sm:$0x3] }
 0x205   : > { %v7183_v32 = vpop.permute.xlu1 %7182  ;;  %v3981_v16 = vsel %vm2375_vm5, %v3976_v2, %v3980_v53  ;;  %v2358_v45 = vsel %vm2166_vm7, %v2350_v9, %v19302_v63  ;;  %v15930_v2 = vld [vmem:[#allocation2 + $0x290] sm:$0xff]  ;;  %v8324_v53 = vrot.slane %v8260_v35, 6  ;;  %v19306_v63 = vshrl.u32 %v15514_v28, 16 }
 0x206   : > { %v2533_v46 = vpop.permute.xlu0 %2532  ;;  %v7248_v27 = vsel %vm272_vm0, %v6991_v58, %v7183_v32  ;;  %v11156_v32 = vmul.f32 -1.442695, %v576_v31  ;;  %v19304_v58 = vshll.u32 %v15514_v28, 16  ;;  %v11154_v9 = vmul.f32 -1.442695, %v568_v33  ;;  %v13020_v28 = vld [vmem:[%s18896_s1 + $0x198] sm:$0xff]  }
 0x207   : > { %4068 = vrot.lane.b32.xlu1 %v3974_v39, %s13387_s30  ;;  %v2612_v22 = vsel %vm272_vm0, %v2346_v55, %v2533_v46  ;;  %v6994_v39 = vsel %vm6988_vm8, %v6992_v52, %v6993_v48  ;;  %v15915_v55 = vld [vmem:[%s13730_s15 + $0x80] sm:$0xff]  ;;  %v3992_v52 = vshll.u32 %v3883_v4, 16  ;;  %v13244_v48 = vld [vmem:[%s13730_s15 + $0x88] sm:$0xff] }
 0x208   : > { %4038 = vrot.lane.b32.xlu0 %v15875_v17, %s13386_s26  ;;  %v917_v46 = vsel %vm272_vm0, %v15915_v55, 0.0  ;;  %v919_v31 = vsel %vm272_vm0, %v13244_v48, 0.0  ;;  %13035 = vpow2.f32 %v11156_v32  ;;  %v3648_v33 = vld [vmem:[#allocation2 + $0x168] sm:$0x80] }
 0x209   : > { %v2565_v19 = vpop.permute.xlu1 %2564  ;;  %v918_v10 = vadd.f32 %v917_v46, %v916_v23  ;;  %v3994_v49 = vrot.slane %v3992_v52, 1  ;;  %13037 = vpow2.f32 %v11154_v9 }
 0x20a   : > { %v2645_v24 = vsel %vm1115_vm3, %v2612_v22, %v2565_v19  ;;  %v2535_v25 = vpop.permute.xlu0 %2534  ;;  %v6928_v22 = vld [vmem:[#allocation2 + $0x30] sm:$0xfc]  ;;  %v3988_v19 = vsel %vm2375_vm5, %v3983_v37, %v3987_v60 }
 0x20b   : > { %7242 = vrot.lane.b32.xlu1 %v7162_v3, %s13387_s30  ;;  %12042 = vmatprep.mubr.msk.bf16.mxu1 %vm1124_vm4, %v2645_v24  ;;  %v2615_v61 = vsel %vm272_vm0, %v2358_v45, %v2535_v25  ;;  %v3679_v3 = vrot.slane %v3677_v18, 7  ;;  %v3989_v24 = vrot.slane %v19304_v58, 1  ;;  %v8262_v25 = vld [vmem:[#allocation2 + $0x268] sm:$0x3f]  ;;  %v6995_v8 = vrot.slane %v6928_v22, 2  ;;  %v15962_v37 = vld [vmem:[%s13730_s15 + $0x90] sm:$0xff] }
 0x20c   : > { %7212 = vrot.lane.b32.xlu0 %v7052_v13, %s13386_s26  ;;  %v8323_v13 = vrot.slane %v8259_v21, 6  ;;  %v921_v60 = vsel %vm272_vm0, %v15962_v37, 0.0  ;;  %v13247_v22 = vld [vmem:[%s13730_s15 + $0x98] sm:$0xff] }
 0x20d   : > { %v7215_v11 = vpop.permute.xlu1 %7214  ;;  %v3687_v12 = vsel %vm2166_vm7, %v3679_v3, %v19305_v59  ;;  %v3990_v45 = vor.u32 %v3989_v24, %v19306_v63  ;;  %v13248_v59 = vld [vmem:[%s13730_s15 + $0xa0] sm:$0xff] }
 0x20e   : > { %v7295_v20 = vsel %vm1115_vm3, %v7248_v27, %v7215_v11  ;;  %v7185_v34 = vpop.permute.xlu0 %7184  ;;  %v13019_v27 = vld [vmem:[%s18896_s1 + $0x190] sm:$0xff]   ;;  %v6930_v11 = vld [vmem:[#allocation2 + $0x48] sm:$0xfc]  ;;  %v8325_v54 = vsel %vm7117_vm6, %v8323_v13, %v8324_v53  ;;  %v3701_v13 = vshrl.u32 %v3648_v33, 16  ;;  %v8263_v53 = vld [vmem:[#allocation2 + $0x278] sm:$0xc0] }
 0x20f   : > { %7244 = vrot.lane.b32.xlu1 %v7165_v7, %s13387_s30  ;;  %12350 = vmatprep.mubr.msk.bf16.mxu0 %vm1124_vm4, %v7295_v20  ;;  %v7251_v42 = vsel %vm272_vm0, %v6994_v39, %v7185_v34  ;;  %v6996_v7 = vrot.slane %v6929_v30, 2  ;;  %v8326_v20 = vrot.slane %v8261_v57, 6  ;;  %v8327_v39 = vrot.slane %v8262_v25, 6  ;;  %v8264_v57 = vld [vmem:[#allocation2 + $0x280] sm:$0x3f] }
 0x210   : > { %4070 = vrot.lane.b32.xlu0 %v3981_v16, %s13387_s30  ;;  %v6931_v16 = vld [vmem:[#allocation2 + $0x50] sm:$0x3]  ;;  %v920_v34 = vadd.f32 %v919_v31, %v918_v10  ;;  %v6998_v21 = vrot.slane %v6930_v11, 2  ;;  %v3995_v4 = vsel %vm2375_vm5, %v3990_v45, %v3994_v49  ;;  %v923_v30 = vsel %vm272_vm0, %v13247_v22, 0.0  ;;  %v13021_v10 = vld [vmem:[%s18896_s1 + $0x1a0] sm:$0xff]  }
 0x211   : > { %v7217_v6 = vpop.permute.xlu1 %7216  ;;  %v6997_v23 = vsel %vm6988_vm8, %v6995_v8, %v6996_v7  ;;  %v6999_v35 = vrot.slane %v6931_v16, 2  ;;  %v8329_v8 = vrot.slane %v8263_v53, 6  ;;  %v8330_v7 = vrot.slane %v8264_v57, 6  ;;  %v13022_v16 = vld [vmem:[%s18896_s1 + $0x1a8] sm:$0xff]   ;;  %v6934_v45 = vld [vmem:[#allocation2 + $0x78] sm:$0xfc] }
 0x212   : > { %v7297_v36 = vsel %vm1115_vm3, %v7251_v42, %v7217_v6  ;;  %v2567_v62 = vpop.permute.xlu0 %2566  ;;  %v13036_v48 = vpop.eup %13035  ;;  %v3703_v11 = vrot.slane %v3701_v13, 7  ;;  %v8269_v49 = vld [vmem:[#allocation2 + $0x2c0] sm:$0xc0]  ;;  %v3652_v57 = vld [vmem:[#allocation2 + $0x198] sm:$0x80] }
 0x213   : > { %v2647_v41 = vsel %vm1115_vm3, %v2615_v61, %v2567_v62  ;;  %8387 = vrot.lane.b32.xlu1 %v15818_v51, %s13386_s26  ;;  %12351 = vmatmul.mubr.msk.bf16.vlgmr.msra.gmra.mrb[64].mxu0 %vm1124_vm4, %v7297_v36  ;;  %v15939_v51 = vld [vmem:[%s18897_s2 + $0x10] sm:$0xff]   ;;  %v8328_v61 = vsel %vm7117_vm6, %v8326_v20, %v8327_v39  ;;  %v922_v36 = vadd.f32 %v921_v60, %v920_v34  ;;  %v6932_v39 = vld [vmem:[#allocation2 + $0x60] sm:$0xfc]  ;;  %v6933_v34 = vld [vmem:[#allocation2 + $0x68] sm:$0x3]  ;;  %v8338_v22 = vrot.slane %v8269_v49, 6 }
 0x214   : > { %4040 = vrot.lane.b32.xlu0 %v15930_v2, %s13386_s26  ;;  %12043 = vmatmul.mubr.msk.bf16.gmra.mrb[28].mxu1 %vm1124_vm4, %v2647_v41  ;;  %v8266_v41 = vld [vmem:[#allocation2 + $0x298] sm:$0x3f] }
 0x215   : > { %v7187_v56 = vpop.permute.xlu1 %7186  ;;  %12383 = vmatpush3.bf16.msra.mxu0 %v15693_v43  ;;  %12222 = vmatprep.subr.bf16.mxu1 %v15939_v51  ;;  %v3689_v43 = vshrl.u32 %v3646_v26, 16  ;;  %v8333_v25 = vrot.slane %v8266_v41, 6  ;;  %v924_v52 = vadd.f32 %v923_v30, %v922_v36 }
 0x216   : > { %v4013_v47 = vpop.permute.xlu0 %4012  ;;  %12384 = vmatprep.subr.bf16.mxu0 %v13018_v14  ;;  %v7254_v62 = vsel %vm272_vm0, %v6997_v23, %v7187_v56  ;;  %v19307_v56 = vld [vmem:[#allocation47_spill] sm:$0xff] }
 0x217   : > { %4072 = vrot.lane.b32.xlu1 %v3988_v19, %s13387_s30  ;;  %v4078_v18 = vsel %vm272_vm0, %v3687_v12, %v4013_v47  ;;  %v3691_v46 = vrot.slane %v3689_v43, 7  ;;  %v7000_v19 = vsel %vm6988_vm8, %v6998_v21, %v6999_v35  ;;  %v925_v12 = vsel %vm272_vm0, %v13248_v59, 0.0  ;;  %v13249_v21 = vld [vmem:[%s13730_s15 + $0xa8] sm:$0xff] }
 0x218   : > { %4042 = vrot.lane.b32.xlu0 %v15953_v0, %s13386_s26  ;;  %v926_v60 = vadd.f32 %v925_v12, %v924_v52  ;;  %v927_v35 = vsel %vm272_vm0, %v13249_v21, 0.0  ;;  %v16041_v59 = vadd.f32 %v15888_v29, %v15348_v38  ;;  %v3725_v12 = vshrl.u32 %v3652_v57, 16  ;;  %v13251_v38 = vld [vmem:[%s13730_s15 + $0xb8] sm:$0xff] }
 0x219   : > { %v4045_v32 = vpop.permute.xlu1 %4044  ;;  %12385 = vmatpush3.bf16.msra.mxu0 %v13018_v14  ;;  %v8265_v14 = vld [vmem:[#allocation2 + $0x290] sm:$0xc0]  ;;  %v3699_v58 = vsel %vm2166_vm7, %v3691_v46, %v19307_v56 }
 0x21a   : > { %v4125_v42 = vsel %vm1115_vm3, %v4078_v18, %v4045_v32  ;;  %v4015_v6 = vpop.permute.xlu0 %4014  ;;  %12386 = vmatprep.subr.bf16.mxu0 %v13019_v27  ;;  %v8332_v24 = vrot.slane %v8265_v14, 6  ;;  %v3650_v18 = vld [vmem:[#allocation2 + $0x180] sm:$0x80]  ;;  %v6935_v32 = vld [vmem:[#allocation2 + $0x80] sm:$0x3]  ;;  %v19308_v46 = vld [vmem:[#allocation48_spill] sm:$0xff] }
 0x21b   : > { %8419 = vrot.lane.b32.xlu1 %v8325_v54, %s13387_s30  ;;  %12058 = vmatprep.mubr.msk.bf16.mxu1 %vm1124_vm4, %v4125_v42  ;;  %v4081_v47 = vsel %vm272_vm0, %v3699_v58, %v4015_v6  ;;  %v13024_v54 = vld [vmem:[%s18897_s2 + $0x18] sm:$0xff]   ;;  %v8270_v42 = vld [vmem:[#allocation2 + $0x2c8] sm:$0x3f]  ;;  %v8267_v6 = vld [vmem:[#allocation2 + $0x2a8] sm:$0xc0]  ;;  %v3711_v33 = vsel %vm2166_vm7, %v3703_v11, %v19308_v46  ;;  %v3713_v36 = vshrl.u32 %v3650_v18, 16 }
 0x21c   : > { %8389 = vrot.lane.b32.xlu0 %v15864_v15, %s13386_s26  ;;  %v8334_v63 = vsel %vm7117_vm6, %v8332_v24, %v8333_v25  ;;  %v7004_v14 = vrot.slane %v6934_v45, 2  ;;  %v7005_v41 = vrot.slane %v6935_v32, 2  ;;  %v8339_v30 = vrot.slane %v8270_v42, 6 }
 0x21d   : > { %v7219_v3 = vpop.permute.xlu1 %7218  ;;  %12387 = vmatpush3.bf16.msra.mxu0 %v13019_v27  ;;  %v8335_v13 = vrot.slane %v8267_v6, 6  ;;  %v3715_v52 = vrot.slane %v3713_v36, 7  ;;  %v931_v18 = vsel %vm272_vm0, %v13251_v38, 0.0  ;;  %v19310_v38 = vld [vmem:[#allocation51_spill] sm:$0xff] }
 0x21e   : > { %v7299_v26 = vsel %vm1115_vm3, %v7254_v62, %v7219_v3  ;;  %v7189_v15 = vpop.permute.xlu0 %7188  ;;  %12388 = vmatprep.subr.bf16.mxu0 %v13020_v28  ;;  %v8268_v62 = vld [vmem:[#allocation2 + $0x2b0] sm:$0x3f]  ;;  %v13038_v3 = vpop.eup %13037 }
 0x21f   : > { %8421 = vrot.lane.b32.xlu1 %v8328_v61, %s13387_s30  ;;  %12354 = vmatprep.mubr.msk.bf16.mxu0 %vm1124_vm4, %v7299_v26  ;;  %v7257_v31 = vsel %vm272_vm0, %v7000_v19, %v7189_v15  ;;  %v928_v26 = vadd.f32 %v927_v35, %v926_v60  ;;  %v8336_v53 = vrot.slane %v8268_v62, 6  ;;  %v16022_v58 = vadd.f32 1.0, %v13038_v3 }
 0x220   : > { %4074 = vrot.lane.b32.xlu0 %v3995_v4, %s13387_s30  ;;  %v16015_v4 = vadd.f32 1.0, %v13036_v48 }
 0x221   : > { %v7221_v9 = vpop.permute.xlu1 %7220  ;;  %12389 = vmatpush3.bf16.msra.mxu0 %v13020_v28  ;;  %v7002_v28 = vrot.slane %v6933_v34, 2  ;;  %v8271_v34 = vld [vmem:[#allocation2 + $0x2d8] sm:$0xc0] }
 0x222   : > { %v7301_v27 = vsel %vm1115_vm3, %v7257_v31, %v7221_v9  ;;  %v4047_v43 = vpop.permute.xlu0 %4046  ;;  %12390 = vmatprep.subr.bf16.mxu0 %v13021_v10  ;;  %v608_v31 = vadd.f32 %v15342_v50, %v15888_v29  ;;  %v16033_v9 = vld [vmem:[%s18899_s4 + $0x2] ss:$0 sm:$0xff]  ;;  %v8340_v50 = vsel %vm7117_vm6, %v8338_v22, %v8339_v30  ;;  %v8341_v36 = vrot.slane %v8271_v34, 6 }
 0x223   : > { %v4127_v20 = vsel %vm1115_vm3, %v4081_v47, %v4047_v43  ;;  %8393 = vrot.lane.b32.xlu1 %v15930_v2, %s13386_s26  ;;  %12355 = vmatmul.mubr.msk.bf16.gmra.mrb[68].mxu0 %vm1124_vm4, %v7301_v27  ;;  %v8331_v2 = vsel %vm7117_vm6, %v8329_v8, %v8330_v7  ;;  %v16035_v8 = vld [vmem:[#allocation2 + $0x90] sm:$0xfc]  ;;  %v16037_v7 = vld [vmem:[#allocation2 + $0x98] sm:$0x3]  ;;  %v16065_v30 = vld [vmem:[%s13730_s15 + $0xc0] sm:$0xff] }
 0x224   : > { %8391 = vrot.lane.b32.xlu0 %v15875_v17, %s13386_s26  ;;  %12059 = vmatmul.mubr.msk.bf16.vlgmr.msra.gmra.mrb[0].mxu1 %vm1124_vm4, %v4127_v20  ;;  %v7001_v17 = vrot.slane %v6932_v39, 2  ;;  %v8273_v47 = vld [vmem:[#allocation2 + $0x2f0] sm:$0xc0]  ;;  %v8274_v27 = vld [vmem:[#allocation2 + $0x2f8] sm:$0x3f]  ;;  %v8337_v39 = vsel %vm7117_vm6, %v8335_v13, %v8336_v53  ;;  %v7008_v21 = vrot.slane %v16037_v7, 2 }
 0x225   : > { %v7191_v23 = vpop.permute.xlu1 %7190  ;;  %12391 = vmatpush3.bf16.msra.mxu0 %v13021_v10  ;;  %12223 = vmatpush3.bf16.msra.mxu1 %v15939_v51  ;;  %v8248_v51 = vld [vmem:[#allocation2 + $0x2c0] sm:$0xff]  ;;  %v13250_v10 = vld [vmem:[%s13730_s15 + $0xb0] sm:$0xff]  ;;  %v8344_v35 = vrot.slane %v8273_v47, 6 }
 0x226   : > { %v4017_v61 = vpop.permute.xlu0 %4016  ;;  %12392 = vmatprep.subr.bf16.mxu0 %v13022_v16  ;;  %12224 = vmatprep.subr.bf16.mxu1 %v13024_v54  ;;  %v929_v56 = vsel %vm272_vm0, %v13250_v10, 0.0  ;;  %v7003_v24 = vsel %vm6988_vm8, %v7001_v17, %v7002_v28  ;;  %v8345_v17 = vrot.slane %v8274_v27, 6  ;;  %v16071_v10 = vmul.f32 -1.442695, %v608_v31  ;;  %v16081_v31 = vld [vmem:[#allocation2 + $0xa8] sm:$0xfc] }
 0x227   : > { %8425 = vrot.lane.b32.xlu1 %v8334_v63, %s13387_s30  ;;  %v4084_v19 = vsel %vm272_vm0, %v3711_v33, %v4017_v61  ;;  %v930_v43 = vadd.f32 %v929_v56, %v928_v26  ;;  %v7260_v11 = vsel %vm272_vm0, %v7003_v24, %v7191_v23  ;;  %v19309_v63 = vld [vmem:[#allocation49_spill] sm:$0xff]  ;;  %v7007_v23 = vrot.slane %v16035_v8, 2  ;;  %v8250_v33 = vld [vmem:[#allocation2 + $0x2f0] sm:$0xff]  ;;  %v8277_v7 = vld [vmem:[#allocation2 + $0x320] sm:$0xc0] }
 0x228   : > { %8423 = vrot.lane.b32.xlu0 %v8331_v2, %s13387_s30  ;;  %v8272_v2 = vld [vmem:[#allocation2 + $0x2e0] sm:$0x3f]  ;;  %v3727_v61 = vrot.slane %v3725_v12, 7  ;;  %v933_v26 = vsel %vm272_vm0, %v16065_v30, 0.0  ;;  %v3654_v8 = vld [vmem:[#allocation2 + $0x1b0] sm:$0x80] }
 0x229   : > { %v4049_v15 = vpop.permute.xlu1 %4048  ;;  %12393 = vmatpush3.bf16.msra.mxu0 %v13022_v16  ;;  %12225 = vmatpush3.bf16.msra.mxu1 %v13024_v54  ;;  %v7006_v54 = vsel %vm6988_vm8, %v7004_v14, %v7005_v41  ;;  %v932_v62 = vadd.f32 %v931_v18, %v930_v43  ;;  %v8249_v41 = vld [vmem:[#allocation2 + $0x2d8] sm:$0xff]  ;;  %v8342_v22 = vrot.slane %v8272_v2, 6  ;;  %v7009_v34 = vsel %vm6988_vm8, %v7007_v23, %v7008_v21 }
 0x22a   : > { %v4129_v25 = vsel %vm1115_vm3, %v4084_v19, %v4049_v15  ;;  %v4019_v48 = vpop.permute.xlu0 %4018  ;;  %v3735_v18 = vsel %vm2166_vm7, %v3727_v61, %v19310_v38  ;;  %v3737_v2 = vshrl.u32 %v3654_v8, 16  ;;  %v8281_v8 = vld [vmem:[#allocation2 + $0x350] sm:$0xc0]  ;;  %v632_v38 = vadd.f32 %v15888_v29, %v15432_v1 }
 0x22b   : > { %8397 = vrot.lane.b32.xlu1 %v8248_v51, %s13386_s26  ;;  %12062 = vmatprep.mubr.msk.bf16.mxu1 %vm1124_vm4, %v4129_v25  ;;  %v8343_v43 = vsel %vm7117_vm6, %v8341_v36, %v8342_v22  ;;  %v8356_v1 = vrot.slane %v8281_v8, 6  ;;  %v8285_v8 = vld [vmem:[#allocation2 + $0x380] sm:$0xc0] }
 0x22c   : > { %8395 = vrot.lane.b32.xlu0 %v15953_v0, %s13386_s26  ;;  %v3723_v0 = vsel %vm2166_vm7, %v3715_v52, %v19309_v63 }
 0x22d   : > { %v7223_v16 = vpop.permute.xlu1 %7222  ;;  %v12192_v20 = vpop.f32.mrb[32].mxu0  ;;  %v4087_v19 = vsel %vm272_vm0, %v3723_v0, %v4019_v48  ;;  %v8346_v48 = vsel %vm7117_vm6, %v8344_v35, %v8345_v17  ;;  %v8252_v35 = vld [vmem:[#allocation2 + $0x320] sm:$0xff] }
 0x22e   : > { %v7303_v45 = vsel %vm1115_vm3, %v7260_v11, %v7223_v16  ;;  %v7193_v32 = vpop.permute.xlu0 %7192  ;;  %v6404_v49 = vadd.f32 %v12192_v20, %v16033_v9  ;;  %v6238_v60 = vpop.f32.mrb[33].mxu0  ;;  %v8278_v11 = vld [vmem:[#allocation2 + $0x328] sm:$0x3f]  ;;  %v8275_v16 = vld [vmem:[#allocation2 + $0x308] sm:$0xc0] }
 0x22f   : > { %v6402_v42 = vadd.f32 %v16033_v9, %v6238_v60  ;;  %8429 = vrot.lane.b32.xlu1 %v8340_v50, %s13387_s30  ;;  %12358 = vmatprep.mubr.msk.bf16.mxu0 %vm1124_vm4, %v7303_v45  ;;  %v12193_v6 = vpop.f32.mrb[34].mxu0  ;;  %v7263_v3 = vsel %vm272_vm0, %v7006_v54, %v7193_v32  ;;  %v934_v50 = vadd.f32 %v933_v26, %v932_v62  ;;  %v13253_v54 = vld [vmem:[%s13730_s15 + $0xc8] sm:$0xff]  ;;  %v8276_v32 = vld [vmem:[#allocation2 + $0x310] sm:$0x3f]  ;;  %v8351_v17 = vrot.slane %v8278_v11, 6 }
 0x230   : > { %8427 = vrot.lane.b32.xlu0 %v8337_v39, %s13387_s30  ;;  %v6405_v28 = vadd.f32 %v12193_v6, %v16033_v9  ;;  %v6241_v46 = vpop.f32.mrb[35].mxu0  ;;  %v6436_v15 = vmax.f32 %v6404_v49, 0.0  ;;  %v935_v20 = vsel %vm272_vm0, %v13253_v54, 0.0  ;;  %v11162_v39 = vmul.f32 -1.442695, %v16041_v59  ;;  %v8251_v62 = vld [vmem:[#allocation2 + $0x308] sm:$0xff] }
 0x231   : > { %v6403_v14 = vadd.f32 %v16033_v9, %v6241_v46  ;;  %v7225_v51 = vpop.permute.xlu1 %7224  ;;  %v6434_v56 = vmax.f32 %v6402_v42, 0.0  ;;  %v6939_v42 = vld [vmem:[#allocation2 + $0xb0] sm:$0x3]  ;;  %v7010_v59 = vrot.slane %v16081_v31, 2  ;;  %v8350_v6 = vrot.slane %v8277_v7, 6 }
 0x232   : > { %v6437_v13 = vmax.f32 %v6405_v28, 0.0  ;;  %v7305_v53 = vsel %vm1115_vm3, %v7263_v3, %v7225_v51  ;;  %v4051_v57 = vpop.permute.xlu0 %4050  ;;  %v8347_v28 = vrot.slane %v8275_v16, 6  ;;  %v936_v46 = vadd.f32 %v935_v20, %v934_v50  ;;  %v13254_v51 = vld [vmem:[%s13730_s15 + $0xd0] sm:$0xff]  ;;  %v8282_v31 = vld [vmem:[#allocation2 + $0x358] sm:$0x3f] }
 0x233   : > { %v6435_v24 = vmax.f32 %v6403_v14, 0.0  ;;  %v4131_v25 = vsel %vm1115_vm3, %v4087_v19, %v4051_v57  ;;  %8401 = vrot.lane.b32.xlu1 %v8250_v33, %s13386_s26  ;;  %12359 = vmatmul.mubr.msk.bf16.gmra.mrb[72].mxu0 %vm1124_vm4, %v7305_v53  ;;  %v8348_v3 = vrot.slane %v8276_v32, 6  ;;  %v3656_v14 = vld [vmem:[#allocation2 + $0x1c8] sm:$0x80]  ;;  %13039 = vpow2.f32 %v11162_v39  ;;  %v8279_v54 = vld [vmem:[#allocation2 + $0x338] sm:$0xc0] }
 0x234   : > { %v16076_v52 = vpack.c.bf16 %v6437_v13, %v6436_v15  ;;  %8399 = vrot.lane.b32.xlu0 %v8249_v41, %s13386_s26  ;;  %12063 = vmatmul.mubr.msk.bf16.gmra.mrb[4].mxu1 %vm1124_vm4, %v4131_v25  ;;  %v937_v41 = vsel %vm272_vm0, %v13254_v51, 0.0  ;;  %v7011_v13 = vrot.slane %v6939_v42, 2  ;;  %v8352_v25 = vsel %vm7117_vm6, %v8350_v6, %v8351_v17  ;;  %v13255_v20 = vld [vmem:[%s13730_s15 + $0xd8] sm:$0xff]  ;;  %v19311_v32 = vld [vmem:[#allocation52_spill] sm:$0xff] }
 0x235   : > { %v16083_v12 = vpack.c.bf16 %v6435_v24, %v6434_v56  ;;  %v7195_v47 = vpop.permute.xlu1 %7194  ;;  %v12196_v27 = vpop.f32.mrb[36].mxu0  ;;  %v3739_v56 = vrot.slane %v3737_v2, 7  ;;  %v938_v7 = vadd.f32 %v937_v41, %v936_v46  ;;  %v8349_v16 = vsel %vm7117_vm6, %v8347_v28, %v8348_v3  ;;  %v8254_v6 = vld [vmem:[#allocation2 + $0x350] sm:$0xff] }
 0x236   : > { %v4021_v63 = vpop.permute.xlu0 %4020  ;;  %v6408_v0 = vadd.f32 %v12196_v27, %v16033_v9  ;;  %v6254_v45 = vpop.f32.mrb[37].mxu0  ;;  %v7266_v50 = vsel %vm272_vm0, %v7009_v34, %v7195_v47  ;;  %v939_v39 = vsel %vm272_vm0, %v13255_v20, 0.0  ;;  %v8357_v29 = vrot.slane %v8282_v31, 6  ;;  %v8286_v31 = vld [vmem:[#allocation2 + $0x388] sm:$0x3f] }
 0x237   : > { %v6406_v49 = vadd.f32 %v16033_v9, %v6254_v45  ;;  %8433 = vrot.lane.b32.xlu1 %v8346_v48, %s13387_s30  ;;  %v12197_v60 = vpop.f32.mrb[38].mxu0  ;;  %v4090_v33 = vsel %vm272_vm0, %v3735_v18, %v4021_v63  ;;  %v3749_v48 = vshrl.u32 %v3656_v14, 16  ;;  %v7012_v63 = vsel %vm6988_vm8, %v7010_v59, %v7011_v13  ;;  %v8280_v45 = vld [vmem:[#allocation2 + $0x340] sm:$0x3f]  ;;  %v8283_v20 = vld [vmem:[#allocation2 + $0x368] sm:$0xc0] }
 0x238   : > { %8431 = vrot.lane.b32.xlu0 %v8343_v43, %s13387_s30  ;;  %v6409_v23 = vadd.f32 %v12197_v60, %v16033_v9  ;;  %v6257_v21 = vpop.f32.mrb[39].mxu0  ;;  %v6440_v22 = vmax.f32 %v6408_v0, 0.0  ;;  %v940_v17 = vadd.f32 %v939_v39, %v938_v7  ;;  %v8284_v39 = vld [vmem:[#allocation2 + $0x370] sm:$0x3f]  ;;  %13041 = vpow2.f32 %v16071_v10 }
 0x239   : > { %v6407_v61 = vadd.f32 %v16033_v9, %v6257_v21  ;;  %v4053_v36 = vpop.permute.xlu1 %4052  ;;  %v6438_v53 = vmax.f32 %v6406_v49, 0.0  ;;  %v3747_v49 = vsel %vm2166_vm7, %v3739_v56, %v19311_v32  ;;  %v3751_v21 = vrot.slane %v3749_v48, 7  ;;  %v3658_v48 = vld [vmem:[#allocation2 + $0x1e0] sm:$0x80]  ;;  %v6942_v32 = vld [vmem:[#allocation2 + $0xd8] sm:$0xfc] }
 0x23a   : > { %v6441_v26 = vmax.f32 %v6409_v23, 0.0  ;;  %v4133_v19 = vsel %vm1115_vm3, %v4090_v33, %v4053_v36  ;;  %v4023_v15 = vpop.permute.xlu0 %4022  ;;  %v6940_v23 = vld [vmem:[#allocation2 + $0xc0] sm:$0xfc]  ;;  %v8354_v36 = vrot.slane %v8280_v45, 6  ;;  %13043 = vrcp.f32 %v16015_v4 }
 0x23b   : > { %v6439_v57 = vmax.f32 %v6407_v61, 0.0  ;;  %8405 = vrot.lane.b32.xlu1 %v8252_v35, %s13386_s26  ;;  %12066 = vmatprep.mubr.msk.bf16.mxu1 %vm1124_vm4, %v4133_v19  ;;  %v8353_v35 = vrot.slane %v8279_v54, 6  ;;  %v8253_v61 = vld [vmem:[#allocation2 + $0x338] sm:$0xff]  ;;  %v4093_v14 = vsel %vm272_vm0, %v3747_v49, %v4023_v15  ;;  %v6941_v19 = vld [vmem:[#allocation2 + $0xc8] sm:$0x3]  ;;  %v7013_v56 = vrot.slane %v6940_v23, 2 }
 0x23c   : > { %v16105_v24 = vpack.c.bf16 %v6441_v26, %v6440_v22  ;;  %8403 = vrot.lane.b32.xlu0 %v8251_v62, %s13386_s26  ;;  %v13256_v62 = vld [vmem:[%s13730_s15 + $0xe0] sm:$0xff]  ;;  %v8358_v15 = vsel %vm7117_vm6, %v8356_v1, %v8357_v29  ;;  %v3761_v45 = vshrl.u32 %v3658_v48, 16  ;;  %v8363_v1 = vrot.slane %v8286_v31, 6  ;;  %v13258_v23 = vld [vmem:[%s13730_s15 + $0xf0] sm:$0xff]  ;;  %v13259_v48 = vld [vmem:[%s13730_s15 + $0xf8] sm:$0xff] }
 0x23d   : > { %v16110_v27 = vpack.c.bf16 %v6439_v57, %v6438_v53  ;;  %v7227_v43 = vpop.permute.xlu1 %7226  ;;  %v12200_v11 = vpop.f32.mrb[40].mxu0  ;;  %v941_v3 = vsel %vm272_vm0, %v13256_v62, 0.0  ;;  %v8355_v54 = vsel %vm7117_vm6, %v8353_v35, %v8354_v36  ;;  %v6943_v49 = vld [vmem:[#allocation2 + $0xe0] sm:$0x3]  ;;  %v8359_v29 = vrot.slane %v8283_v20, 6 }
 0x23e   : > { %v7307_v18 = vsel %vm1115_vm3, %v7266_v50, %v7227_v43  ;;  %v7197_v0 = vpop.permute.xlu0 %7196  ;;  %v6412_v47 = vadd.f32 %v12200_v11, %v16033_v9  ;;  %v6270_v34 = vpop.f32.mrb[41].mxu0  ;;  %v942_v7 = vadd.f32 %v941_v3, %v940_v17  ;;  %v7014_v11 = vrot.slane %v6941_v19, 2  ;;  %v3660_v36 = vld [vmem:[#allocation2 + $0x1f8] sm:$0x80] }
 0x23f   : > { %v6410_v60 = vadd.f32 %v16033_v9, %v6270_v34  ;;  %8437 = vrot.lane.b32.xlu1 %v8352_v25, %s13387_s30  ;;  %12362 = vmatprep.mubr.msk.bf16.mxu0 %vm1124_vm4, %v7307_v18  ;;  %v12201_v2 = vpop.f32.mrb[42].mxu0  ;;  %v7269_v28 = vsel %vm272_vm0, %v7012_v63, %v7197_v0  ;;  %v16141_v50 = vpop.eup %13039  ;;  %v13257_v18 = vld [vmem:[%s13730_s15 + $0xe8] sm:$0xff]  ;;  %v11170_v0 = vmul.f32 -1.442695, %v632_v38  ;;  %v8360_v10 = vrot.slane %v8284_v39, 6 }
 0x240   : > { %8435 = vrot.lane.b32.xlu0 %v8349_v16, %s13387_s30  ;;  %v6413_v42 = vadd.f32 %v12201_v2, %v16033_v9  ;;  %v6273_v59 = vpop.f32.mrb[43].mxu0  ;;  %v6444_v51 = vmax.f32 %v6412_v47, 0.0  ;;  %v943_v63 = vsel %vm272_vm0, %v13257_v18, 0.0  ;;  %v3759_v47 = vsel %vm2166_vm7, %v3751_v21, %v15010_v5  ;;  %v8256_v2 = vld [vmem:[#allocation2 + $0x380] sm:$0xff]  ;;  %v8287_v39 = vld [vmem:[#allocation2 + $0x398] sm:$0xc0] }
 0x241   : > { %v6411_v46 = vadd.f32 %v16033_v9, %v6273_v59  ;;  %v7229_v33 = vpop.permute.xlu1 %7228  ;;  %v6442_v13 = vmax.f32 %v6410_v60, 0.0  ;;  %v8362_v60 = vrot.slane %v8285_v8, 6  ;;  %v944_v38 = vadd.f32 %v943_v63, %v942_v7  ;;  %v8288_v18 = vld [vmem:[#allocation2 + $0x3a0] sm:$0x3f]  ;;  %v19312_v63 = vld [vmem:[#allocation53_spill] sm:$0xff] }
 0x242   : > { %v6445_v41 = vmax.f32 %v6413_v42, 0.0  ;;  %v7309_v22 = vsel %vm1115_vm3, %v7269_v28, %v7229_v33  ;;  %v4055_v26 = vpop.permute.xlu0 %4054  ;;  %13045 = vrcp.f32 %v16022_v58  ;;  %v7015_v5 = vsel %vm6988_vm8, %v7013_v56, %v7014_v11  ;;  %v8289_v56 = vld [vmem:[#allocation2 + $0x3b0] sm:$0xc0] }
 0x243   : > { %v6443_v53 = vmax.f32 %v6411_v46, 0.0  ;;  %v4135_v57 = vsel %vm1115_vm3, %v4093_v14, %v4055_v26  ;;  %8409 = vrot.lane.b32.xlu1 %v8254_v6, %s13386_s26  ;;  %12363 = vmatmul.mubr.msk.bf16.gmra.mrb[76].mxu0 %vm1124_vm4, %v7309_v22  ;;  %v8255_v6 = vld [vmem:[#allocation2 + $0x368] sm:$0xff]  ;;  %v945_v21 = vsel %vm272_vm0, %v13258_v23, 0.0  ;;  %v7016_v33 = vrot.slane %v6942_v32, 2 }
 0x244   : > { %v16136_v25 = vpack.c.bf16 %v6445_v41, %v6444_v51  ;;  %8407 = vrot.lane.b32.xlu0 %v8253_v61, %s13386_s26  ;;  %12067 = vmatmul.mubr.msk.bf16.gmra.mrb[8].mxu1 %vm1124_vm4, %v4135_v57  ;;  %v7017_v61 = vrot.slane %v6943_v49, 2  ;;  %13047 = vpow2.f32 %v11170_v0  ;;  %v3763_v58 = vrot.slane %v3761_v45, 7  ;;  %v13042_v45 = vpop.eup %13041  ;;  %v8258_v49 = vld [vmem:[#allocation2 + $0x3b0] sm:$0xff] }
 0x245   : > { %v16143_v43 = vpack.c.bf16 %v6443_v53, %v6442_v13  ;;  %v7199_v16 = vpop.permute.xlu1 %7198  ;;  %v8364_v41 = vsel %vm7117_vm6, %v8362_v60, %v8363_v1  ;;  %v8361_v22 = vsel %vm7117_vm6, %v8359_v29, %v8360_v10  ;;  %v946_v26 = vadd.f32 %v945_v21, %v944_v38  ;;  %v8257_v60 = vld [vmem:[#allocation2 + $0x398] sm:$0xff] }
 0x246   : > { %v4025_v34 = vpop.permute.xlu0 %4024  ;;  %v7272_v19 = vsel %vm272_vm0, %v7015_v5, %v7199_v16  ;;  %v3773_v57 = vshrl.u32 %v3660_v36, 16  ;;  %v947_v8 = vsel %vm272_vm0, %v13259_v48, 0.0  ;;  %v774_v16 = vadd.f32 1.0, %v16141_v50  ;;  %v16182_v50 = vpop.eup %13043 }
 0x247   : > { %8441 = vrot.lane.b32.xlu1 %v8358_v15, %s13387_s30  ;;  %v4096_v4 = vsel %vm272_vm0, %v3759_v47, %v4025_v34  ;;  %v8290_v15 = vld [vmem:[#allocation2 + $0x3b8] sm:$0x3f]  ;;  %v3771_v0 = vsel %vm2166_vm7, %v3763_v58, %v19312_v63  ;;  %v948_v29 = vadd.f32 %v947_v8, %v946_v26 }
 0x248   : > { %8439 = vrot.lane.b32.xlu0 %v8355_v54, %s13387_s30  ;;  %v7018_v54 = vsel %vm6988_vm8, %v7016_v33, %v7017_v61  ;;  %v8369_v1 = vrot.slane %v8290_v15, 6  ;;  %v776_v33 = vadd.f32 1.0, %v13042_v45  ;;  %13049 = vrcp.f32 %v774_v16  ;;  %v19313_v26 = vld [vmem:[#allocation57_spill] sm:$0xff] }
 0x249   : > { %v4057_v42 = vpop.permute.xlu1 %4056  ;;  %v12204_v59 = vpop.f32.mrb[44].mxu0 }
 0x24a   : > { %v4137_v35 = vsel %vm1115_vm3, %v4096_v4, %v4057_v42  ;;  %v4027_v17 = vpop.permute.xlu0 %4026  ;;  %v6416_v28 = vadd.f32 %v12204_v59, %v16033_v9  ;;  %v6286_v46 = vpop.f32.mrb[45].mxu0  ;;  %v6944_v4 = vld [vmem:[#allocation2 + $0xf0] sm:$0xfc]  ;;  %v6945_v42 = vld [vmem:[#allocation2 + $0xf8] sm:$0x3]  ;;  %v8365_v59 = vrot.slane %v8287_v39, 6  ;;  %13051 = vrcp.f32 %v776_v33 }
 0x24b   : > { %v6414_v62 = vadd.f32 %v16033_v9, %v6286_v46  ;;  %8413 = vrot.lane.b32.xlu1 %v8256_v2, %s13386_s26  ;;  %12070 = vmatprep.mubr.msk.bf16.mxu1 %vm1124_vm4, %v4137_v35  ;;  %v12205_v3 = vpop.f32.mrb[46].mxu0  ;;  %v8368_v2 = vrot.slane %v8289_v56, 6  ;;  %v4099_v23 = vsel %vm272_vm0, %v3771_v0, %v4027_v17  ;;  %v7019_v36 = vrot.slane %v6944_v4, 2  ;;  %v6946_v56 = vld [vmem:[#allocation2 + $0x108] sm:$0xfc]  ;;  %v13260_v0 = vld [vmem:[%s13730_s15 + $0x40] sm:$0xff] }
 0x24c   : > { %8411 = vrot.lane.b32.xlu0 %v8255_v6, %s13386_s26  ;;  %v6417_v14 = vadd.f32 %v12205_v3, %v16033_v9  ;;  %v6289_v51 = vpop.f32.mrb[47].mxu0  ;;  %v6448_v31 = vmax.f32 %v6416_v28, 0.0  ;;  %v8366_v6 = vrot.slane %v8288_v18, 6  ;;  %v3775_v28 = vrot.slane %v3773_v57, 7  ;;  %v13046_v46 = vpop.eup %13045 }
 0x24d   : > { %v6415_v13 = vadd.f32 %v16033_v9, %v6289_v51  ;;  %v7231_v53 = vpop.permute.xlu1 %7230  ;;  %v6446_v47 = vmax.f32 %v6414_v62, 0.0  ;;  %v7020_v58 = vrot.slane %v6945_v42, 2  ;;  %v8370_v17 = vsel %vm7117_vm6, %v8368_v2, %v8369_v1  ;;  %v3662_v62 = vld [vmem:[#allocation2 + $0x210] sm:$0x80] }
 0x24e   : > { %v6449_v7 = vmax.f32 %v6417_v14, 0.0  ;;  %v7311_v11 = vsel %vm1115_vm3, %v7272_v19, %v7231_v53  ;;  %v7201_v20 = vpop.permute.xlu0 %7200  ;;  %v949_v3 = vrot.slane %v948_v29, 4  ;;  %v13048_v14 = vpop.eup %13047  ;;  %v3783_v19 = vsel %vm2166_vm7, %v3775_v28, %v19313_v26  ;;  %v13261_v28 = vld [vmem:[%s13730_s15 + $0x50] sm:$0xff] }
 0x24f   : > { %v6447_v34 = vmax.f32 %v6415_v13, 0.0  ;;  %8445 = vrot.lane.b32.xlu1 %v8364_v41, %s13387_s30  ;;  %12366 = vmatprep.mubr.msk.bf16.mxu0 %vm1124_vm4, %v7311_v11  ;;  %v7275_v38 = vsel %vm272_vm0, %v7018_v54, %v7201_v20  ;;  %v3785_v8 = vshrl.u32 %v3662_v62, 16  ;;  %v7021_v11 = vsel %vm6988_vm8, %v7019_v36, %v7020_v58 }
 0x250   : > { %v16179_v32 = vpack.c.bf16 %v6449_v7, %v6448_v31  ;;  %8443 = vrot.lane.b32.xlu0 %v8361_v22, %s13387_s30  ;;  %v8367_v22 = vsel %vm7117_vm6, %v8365_v59, %v8366_v6  ;;  %v6947_v31 = vld [vmem:[#allocation2 + $0x110] sm:$0x3]  ;;  %v782_v7 = vadd.f32 1.0, %v13048_v14  ;;  %v950_v39 = vadd.f32 %v949_v3, %v948_v29  ;;  %v3664_v29 = vld [vmem:[#allocation2 + $0x228] sm:$0x80] }
 0x251   : > { %v16184_v10 = vpack.c.bf16 %v6447_v34, %v6446_v47  ;;  %v7233_v5 = vpop.permute.xlu1 %7232  ;;  %v862_v47 = vmul.f32 %v13260_v0, %v13046_v46  ;;  %v7022_v34 = vrot.slane %v6946_v56, 2  ;;  %v7023_v1 = vrot.slane %v6947_v31, 2  ;;  %v6948_v56 = vld [vmem:[#allocation2 + $0x120] sm:$0xfc] }
 0x252   : > { %v7313_v21 = vsel %vm1115_vm3, %v7275_v38, %v7233_v5  ;;  %v4059_v35 = vpop.permute.xlu0 %4058  ;;  %v3787_v4 = vrot.slane %v3785_v8, 7  ;;  %13053 = vrcp.f32 %v782_v7  ;;  %v951_v59 = vrot.slane %v950_v39, 2  ;;  %v13050_v6 = vpop.eup %13049  ;;  %v3666_v7 = vld [vmem:[#allocation2 + $0x240] sm:$0x80] }
 0x253   : > { %v4139_v61 = vsel %vm1115_vm3, %v4099_v23, %v4059_v35  ;;  %8417 = vrot.lane.b32.xlu1 %v8258_v49, %s13386_s26  ;;  %12367 = vmatmul.mubr.msk.bf16.gmra.mrb[80].mxu0 %vm1124_vm4, %v7313_v21  ;;  %v864_v46 = vmul.f32 %v13261_v28, %v16182_v50  ;;  %v3797_v58 = vshrl.u32 %v3664_v29, 16  ;;  %v870_v50 = vmul.f32 %v15915_v55, %v13050_v6  ;;  %v6951_v29 = vld [vmem:[#allocation2 + $0x140] sm:$0x3] }
 0x254   : > { %8415 = vrot.lane.b32.xlu0 %v8257_v60, %s13386_s26  ;;  %12071 = vmatmul.mubr.msk.bf16.gmra.mrb[12].mxu1 %vm1124_vm4, %v4139_v61  ;;  %v7024_v61 = vsel %vm6988_vm8, %v7022_v34, %v7023_v1  ;;  %v952_v3 = vadd.f32 %v951_v59, %v950_v39  ;;  %v13052_v14 = vpop.eup %13051  ;;  %v3809_v1 = vshrl.u32 %v3666_v7, 16 }
 0x255   : > { %v7203_v51 = vpop.permute.xlu1 %7202  ;;  %v12208_v41 = vpop.f32.mrb[48].mxu0  ;;  %v872_v0 = vmul.f32 %v15962_v37, %v13052_v14 }
 0x256   : > { %v4029_v13 = vpop.permute.xlu0 %4028  ;;  %v6420_v53 = vadd.f32 %v12208_v41, %v16033_v9  ;;  %v6302_v57 = vpop.f32.mrb[49].mxu0  ;;  %v7278_v23 = vsel %vm272_vm0, %v7021_v11, %v7203_v51 }
 0x257   : > { %v6418_v15 = vadd.f32 %v16033_v9, %v6302_v57  ;;  %8449 = vrot.lane.b32.xlu1 %v8370_v17, %s13387_s30  ;;  %v12209_v48 = vpop.f32.mrb[50].mxu0  ;;  %v4102_v18 = vsel %vm272_vm0, %v3783_v19, %v4029_v13  ;;  %v19314_v17 = vld [vmem:[#allocation60_spill] sm:$0xff] }
 0x258   : > { %8447 = vrot.lane.b32.xlu0 %v8367_v22, %s13387_s30  ;;  %v6421_v54 = vadd.f32 %v12209_v48, %v16033_v9  ;;  %v6305_v20 = vpop.f32.mrb[51].mxu0  ;;  %v6452_v45 = vmax.f32 %v6420_v53, 0.0  ;;  %v3795_v62 = vsel %vm2166_vm7, %v3787_v4, %v19314_v17  ;;  %v3799_v48 = vrot.slane %v3797_v58, 7  ;;  %v6950_v4 = vld [vmem:[#allocation2 + $0x138] sm:$0xfc] }
 0x259   : > { %v6419_v16 = vadd.f32 %v16033_v9, %v6305_v20  ;;  %v4061_v63 = vpop.permute.xlu1 %4060  ;;  %v6450_v38 = vmax.f32 %v6418_v15, 0.0  ;;  %v6949_v15 = vld [vmem:[#allocation2 + $0x128] sm:$0x3]  ;;  %v953_v20 = vrot.slane %v952_v3, 1  ;;  %v7029_v58 = vrot.slane %v6951_v29, 2 }
 0x25a   : > { %v6453_v49 = vmax.f32 %v6421_v54, 0.0  ;;  %v4141_v60 = vsel %vm1115_vm3, %v4102_v18, %v4061_v63  ;;  %v4031_v2 = vpop.permute.xlu0 %4030  ;;  %v7025_v18 = vrot.slane %v6948_v56, 2  ;;  %v3668_v17 = vld [vmem:[#allocation2 + $0x258] sm:$0x80] }
 0x25b   : > { %v6451_v5 = vmax.f32 %v6419_v16, 0.0  ;;  %1019 = vrot.lane.b32.xlu1 %v862_v47, %s13386_s26  ;;  %12074 = vmatprep.mubr.msk.bf16.mxu1 %vm1124_vm4, %v4141_v60  ;;  %v4105_v26 = vsel %vm272_vm0, %v3795_v62, %v4031_v2  ;;  %v7026_v16 = vrot.slane %v6949_v15, 2  ;;  %v954_v6 = vadd.f32 %v953_v20, %v952_v3 }
 0x25c   : > { %v16210_v42 = vpack.c.bf16 %v6453_v49, %v6452_v45  ;;  %v13054_v47 = vpop.eup %13053  ;;  %v19315_v49 = vld [vmem:[#allocation23_spill] sm:$0xff]  ;;  %v3811_v62 = vrot.slane %v3809_v1, 7 }
 0x25d   : > { %v16213_v21 = vpack.c.bf16 %v6451_v5, %v6450_v38  ;;  %v7235_v35 = vpop.permute.xlu1 %7234  ;;  %v3807_v60 = vsel %vm2166_vm7, %v3799_v48, %v19315_v49  ;;  %v878_v28 = vmul.f32 %v16065_v30, %v13054_v47  ;;  %v956_v3 = vmul.f32 0.00390625, %v954_v6  ;;  %v6952_v49 = vld [vmem:[#allocation2 + $0x150] sm:$0xfc] }
 0x25e   : > { %v7315_v33 = vsel %vm1115_vm3, %v7278_v23, %v7235_v35  ;;  %v7205_v36 = vpop.permute.xlu0 %7204  ;;  %v3821_v30 = vshrl.u32 %v3668_v17, 16  ;;  %v7031_v29 = vrot.slane %v6952_v49, 2 }
 0x25f   : > { %1023 = vrot.lane.b32.xlu1 %v864_v46, %s13386_s26  ;;  %12370 = vmatprep.mubr.msk.bf16.mxu0 %vm1124_vm4, %v7315_v33  ;;  %v7281_v51 = vsel %vm272_vm0, %v7024_v61, %v7205_v36  ;;  %v7027_v46 = vsel %vm6988_vm8, %v7025_v18, %v7026_v16  ;;  %v7028_v36 = vrot.slane %v6950_v4, 2 }
 0x260   : > { %v3823_v20 = vrot.slane %v3821_v30, 7 }
 0x261   : > { %v7237_v41 = vpop.permute.xlu1 %7236  ;;  %v12212_v22 = vpop.f32.mrb[52].mxu0 }
 0x262   : > { %v7317_v19 = vsel %vm1115_vm3, %v7281_v51, %v7237_v41  ;;  %v4063_v13 = vpop.permute.xlu0 %4062  ;;  %v6424_v53 = vadd.f32 %v12212_v22, %v16033_v9  ;;  %v6318_v57 = vpop.f32.mrb[53].mxu0  ;;  %v957_v22 = vld [vmem:[%s18898_s3] sm:$0x3] }
 0x263   : > { %v4143_v8 = vsel %vm1115_vm3, %v4105_v26, %v4063_v13  ;;  %v6422_v31 = vadd.f32 %v16033_v9, %v6318_v57  ;;  %1051 = vrot.lane.b32.xlu1 %v870_v50, %s13387_s30  ;;  %12371 = vmatmul.mubr.msk.bf16.gmra.mrb[84].mxu0 %vm1124_vm4, %v7317_v19  ;;  %v12213_v55 = vpop.f32.mrb[54].mxu0  ;;  %v7030_v26 = vsel %vm6988_vm8, %v7028_v36, %v7029_v58  ;;  %v19316_v57 = vld [vmem:[#allocation63_spill] sm:$0xff] }
 0x264   : > { %12075 = vmatmul.mubr.msk.bf16.gmra.mrb[16].mxu1 %vm1124_vm4, %v4143_v8  ;;  %v6425_v11 = vadd.f32 %v12213_v55, %v16033_v9  ;;  %v6321_v54 = vpop.f32.mrb[55].mxu0  ;;  %v6456_v34 = vmax.f32 %v6424_v53, 0.0  ;;  %v3819_v56 = vsel %vm2166_vm7, %v3811_v62, %v19316_v57  ;;  %v958_v55 = vmul.f32 %v957_v22, %v956_v3 }
 0x265   : > { %v6423_v39 = vadd.f32 %v16033_v9, %v6321_v54  ;;  %v7207_v63 = vpop.permute.xlu1 %7206  ;;  %v6454_v38 = vmax.f32 %v6422_v31, 0.0 }
 0x266   : > { %v6457_v45 = vmax.f32 %v6425_v11, 0.0  ;;  %v4033_v2 = vpop.permute.xlu0 %4032  ;;  %v7284_v14 = vsel %vm272_vm0, %v7027_v46, %v7207_v63  ;;  %v960_v1 = vsel %vm959_vm9, %v958_v55, 0.0  ;;  %v6954_v46 = vld [vmem:[#allocation2 + $0x168] sm:$0xfc] }
 0x267   : > { %v6455_v5 = vmax.f32 %v6423_v39, 0.0  ;;  %1055 = vrot.lane.b32.xlu1 %v872_v0, %s13387_s30  ;;  %v4108_v37 = vsel %vm272_vm0, %v3807_v60, %v4033_v2  ;;  %v6953_v60 = vld [vmem:[#allocation2 + $0x158] sm:$0x3]  ;;  %v7034_v62 = vrot.slane %v6954_v46, 2 }
 0x268   : > { %v16239_v59 = vpack.c.bf16 %v6457_v45, %v6456_v34  ;;  %v7032_v6 = vrot.slane %v6953_v60, 2 }
 0x269   : > { %v16241_v23 = vpack.c.bf16 %v6455_v5, %v6454_v38  ;;  %v4065_v35 = vpop.permute.xlu1 %4064  ;;  %v3670_v38 = vld [vmem:[#allocation2 + $0x270] sm:$0x80] }
 0x26a   : > { %v4145_v33 = vsel %vm1115_vm3, %v4108_v37, %v4065_v35  ;;  %v4035_v61 = vpop.permute.xlu0 %4034  ;;  %v19317_v37 = vld [vmem:[#allocation26_spill] sm:$0xff] }
 0x26b   : > { %1083 = vrot.lane.b32.xlu1 %v878_v28, %s13388_s12  ;;  %12078 = vmatprep.mubr.msk.bf16.mxu1 %vm1124_vm4, %v4145_v33  ;;  %v4111_v39 = vsel %vm272_vm0, %v3819_v56, %v4035_v61  ;;  %v3831_v35 = vsel %vm2166_vm7, %v3823_v20, %v19317_v37  ;;  %v6955_v33 = vld [vmem:[#allocation2 + $0x170] sm:$0x3]  ;;  %v3833_v61 = vshrl.u32 %v3670_v38, 16  ;;  %v19318_v20 = vld [vmem:[#allocation10_spill] sm:$0xff] }
 0x26c   : > { %v7035_v3 = vrot.slane %v6955_v33, 2 }
 0x26d   : > { %v7239_v51 = vpop.permute.xlu1 %7238  ;;  %v12216_v41 = vpop.f32.mrb[56].mxu0 }
 0x26e   : > { %v7319_v50 = vsel %vm1115_vm3, %v7284_v14, %v7239_v51  ;;  %v7209_v19 = vpop.permute.xlu0 %7208  ;;  %v6428_v13 = vadd.f32 %v12216_v41, %v16033_v9  ;;  %v6334_v53 = vpop.f32.mrb[57].mxu0  ;;  %v7033_v14 = vsel %vm6988_vm8, %v7031_v29, %v7032_v6  ;;  %v8132_v29 = vld [vmem:[#allocation2 + $0x248] sm:$0x3]  ;;  %v3674_v6 = vld [vmem:[#allocation2 + $0x2a0] sm:$0x80] }
 0x26f   : > { %v6426_v15 = vadd.f32 %v16033_v9, %v6334_v53  ;;  %12374 = vmatprep.mubr.msk.bf16.mxu0 %vm1124_vm4, %v7319_v50  ;;  %v12217_v48 = vpop.f32.mrb[58].mxu0  ;;  %v7287_v7 = vsel %vm272_vm0, %v7030_v26, %v7209_v19  ;;  %v3835_v50 = vrot.slane %v3833_v61, 7  ;;  %v3857_v61 = vshrl.u32 %v3674_v6, 16 }
 0x270   : > { %v6429_v8 = vadd.f32 %v12217_v48, %v16033_v9  ;;  %v6337_v31 = vpop.f32.mrb[59].mxu0  ;;  %v6460_v18 = vmax.f32 %v6428_v13, 0.0  ;;  %v3672_v13 = vld [vmem:[#allocation2 + $0x288] sm:$0x80] }
 0x271   : > { %v6427_v11 = vadd.f32 %v16033_v9, %v6337_v31  ;;  %v7241_v54 = vpop.permute.xlu1 %7240  ;;  %v6458_v47 = vmax.f32 %v6426_v15, 0.0 }
 0x272   : > { %v6461_v16 = vmax.f32 %v6429_v8, 0.0  ;;  %v7321_v63 = vsel %vm1115_vm3, %v7287_v7, %v7241_v54  ;;  %v4067_v0 = vpop.permute.xlu0 %4066  ;;  %v7036_v8 = vsel %vm6988_vm8, %v7034_v62, %v7035_v3  ;;  %v3845_v54 = vshrl.u32 %v3672_v13, 16 }
 0x273   : > { %v6459_v34 = vmax.f32 %v6427_v11, 0.0  ;;  %v4147_v45 = vsel %vm1115_vm3, %v4111_v39, %v4067_v0  ;;  %12375 = vmatmul.mubr.msk.bf16.gmra.mrb[88].mxu0 %vm1124_vm4, %v7321_v63  ;;  %v3843_v39 = vsel %vm2166_vm7, %v3835_v50, %v19318_v20 }
 0x274   : > { %v16267_v2 = vpack.c.bf16 %v6461_v16, %v6460_v18  ;;  %12079 = vmatmul.mubr.msk.bf16.gmra.mrb[20].mxu1 %vm1124_vm4, %v4147_v45 }
 0x275   : > { %v16271_v5 = vpack.c.bf16 %v6459_v34, %v6458_v47  ;;  %v7211_v4 = vpop.permute.xlu1 %7210 }
 0x276   : > { %v4037_v28 = vpop.permute.xlu0 %4036  ;;  %v7290_v56 = vsel %vm272_vm0, %v7033_v14, %v7211_v4  ;;  %v8131_v4 = vld [vmem:[#allocation2 + $0x240] sm:$0xfc] }
 0x277   : > { %961 = vadd.xlane.f32.xlu0 %v960_v1  ;;  %v4114_v36 = vsel %vm272_vm0, %v3831_v35, %v4037_v28  ;;  %v3847_v1 = vrot.slane %v3845_v54, 7  ;;  %v8195_v35 = vrot.slane %v8131_v4, 2  ;;  %v8196_v28 = vrot.slane %v8132_v29, 2 }
 0x279   : > { %v4069_v58 = vpop.permute.xlu1 %4068  ;;  %v12220_v17 = vpop.f32.mrb[60].mxu0  ;;  %v3855_v46 = vsel %vm2166_vm7, %v3847_v1, %v15500_v40  ;;  %v8197_v3 = vsel %vm6988_vm8, %v8195_v35, %v8196_v28  ;;  %v8139_v1 = vld [vmem:[#allocation2 + $0x2a0] sm:$0xfc] }
 0x27a   : > { %v4149_v51 = vsel %vm1115_vm3, %v4114_v36, %v4069_v58  ;;  %v4039_v41 = vpop.permute.xlu0 %4038  ;;  %v6432_v30 = vadd.f32 %v12220_v17, %v16033_v9  ;;  %v6350_v22 = vpop.f32.mrb[61].mxu0  ;;  %v8133_v36 = vld [vmem:[#allocation2 + $0x258] sm:$0xfc]  ;;  %v8134_v58 = vld [vmem:[#allocation2 + $0x260] sm:$0x3] }
 0x27b   : > { %12082 = vmatprep.mubr.msk.bf16.mxu1 %vm1124_vm4, %v4149_v51  ;;  %v6430_v26 = vadd.f32 %v16033_v9, %v6350_v22  ;;  %v12221_v19 = vpop.f32.mrb[62].mxu0  ;;  %v4117_v45 = vsel %vm272_vm0, %v3843_v39, %v4039_v41  ;;  %v8198_v41 = vrot.slane %v8133_v36, 2  ;;  %v3859_v22 = vrot.slane %v3857_v61, 7  ;;  %v13026_v36 = vld [vmem:[%s18897_s2 + $0x8] sm:$0xff]  }
 0x27c   : > { %v6433_v53 = vadd.f32 %v12221_v19, %v16033_v9  ;;  %v6353_v57 = vpop.f32.mrb[63].mxu0  ;;  %v6464_v31 = vmax.f32 %v6432_v30, 0.0  ;;  %v8199_v30 = vrot.slane %v8134_v58, 2 }
 0x27d   : > { %v6431_v15 = vadd.f32 %v16033_v9, %v6353_v57  ;;  %v7243_v48 = vpop.permute.xlu1 %7242  ;;  %v6462_v18 = vmax.f32 %v6430_v26, 0.0  ;;  %v16292_v9 = vld [vmem:[%s18897_s2] sm:$0xff]   ;;  %v8137_v57 = vld [vmem:[#allocation2 + $0x288] sm:$0xfc] }
 0x27e   : > { %v6465_v55 = vmax.f32 %v6433_v53, 0.0  ;;  %v7323_v7 = vsel %vm1115_vm3, %v7290_v56, %v7243_v48  ;;  %v7213_v11 = vpop.permute.xlu0 %7212  ;;  %12258 = vmatprep.subr.bf16.mxu1 %v16292_v9  ;;  %v8200_v19 = vsel %vm6988_vm8, %v8198_v41, %v8199_v30  ;;  %v3867_v53 = vsel %vm2166_vm7, %v3859_v22, %v15542_v44  ;;  %v8138_v56 = vld [vmem:[#allocation2 + $0x290] sm:$0x3]  ;;  %v8136_v48 = vld [vmem:[#allocation2 + $0x278] sm:$0x3] }
 0x27f   : > { %v6463_v16 = vmax.f32 %v6431_v15, 0.0  ;;  %12378 = vmatprep.mubr.msk.bf16.mxu0 %vm1124_vm4, %v7323_v7  ;;  %v7293_v47 = vsel %vm272_vm0, %v7036_v8, %v7213_v11  ;;  %v8135_v15 = vld [vmem:[#allocation2 + $0x270] sm:$0xfc]  ;;  %v8204_v54 = vrot.slane %v8137_v57, 2  ;;  %v8205_v20 = vrot.slane %v8138_v56, 2 }
 0x280   : > { %v16294_v63 = vpack.c.bf16 %v6465_v55, %v6464_v31  ;;  %v8201_v44 = vrot.slane %v8135_v15, 2  ;;  %v8143_v41 = vld [vmem:[#allocation2 + $0x2d0] sm:$0xfc] }
 0x281   : > { %v16296_v0 = vpack.c.bf16 %v6463_v16, %v6462_v18  ;;  %v7245_v34 = vpop.permute.xlu1 %7244  ;;  %v8202_v18 = vrot.slane %v8136_v48, 2 }
 0x282   : > { %v7325_v49 = vsel %vm1115_vm3, %v7293_v47, %v7245_v34  ;;  %v4071_v60 = vpop.permute.xlu0 %4070  ;;  %v8206_v47 = vsel %vm6988_vm8, %v8204_v54, %v8205_v20 }
 0x283   : > { %v4151_v38 = vsel %vm1115_vm3, %v4117_v45, %v4071_v60  ;;  %12379 = vmatmul.mubr.msk.bf16.gmra.mrb[92].mxu0 %vm1124_vm4, %v7325_v49  ;;  %v8203_v45 = vsel %vm6988_vm8, %v8201_v44, %v8202_v18  ;;  %v8141_v49 = vld [vmem:[#allocation2 + $0x2b8] sm:$0xfc]  ;;  %v8142_v60 = vld [vmem:[#allocation2 + $0x2c0] sm:$0x3] }
 0x284   : > { %12083 = vmatmul.mubr.msk.bf16.gmra.mrb[24].mxu1 %vm1124_vm4, %v4151_v38  ;;  %v8140_v38 = vld [vmem:[#allocation2 + $0x2a8] sm:$0x3]  ;;  %v8210_v28 = vrot.slane %v8141_v49, 2 }
 0x285   : > { %v8388_v37 = vpop.permute.xlu1 %8387  ;;  %v8208_v61 = vrot.slane %v8140_v38, 2  ;;  %v8154_v38 = vld [vmem:[#allocation2 + $0x350] sm:$0x3] }
 0x286   : > { %v4041_v33 = vpop.permute.xlu0 %4040  ;;  %v8453_v50 = vsel %vm272_vm0, %v8197_v3, %v8388_v37 }
 0x287   : > { %v4120_v17 = vsel %vm272_vm0, %v3855_v46, %v4041_v33  ;;  %v8207_v33 = vrot.slane %v8139_v1, 2  ;;  %v8153_v1 = vld [vmem:[#allocation2 + $0x348] sm:$0xfc] }
 0x289   : > { %v4073_v62 = vpop.permute.xlu1 %4072  ;;  %v8209_v3 = vsel %vm6988_vm8, %v8207_v33, %v8208_v61 }
 0x28a   : > { %v4153_v14 = vsel %vm1115_vm3, %v4120_v17, %v4073_v62  ;;  %v4043_v51 = vpop.permute.xlu0 %4042 }
 0x28b   : > { %12086 = vmatprep.mubr.msk.bf16.mxu1 %vm1124_vm4, %v4153_v14  ;;  %v4123_v55 = vsel %vm272_vm0, %v3867_v53, %v4043_v51  ;;  %v8145_v14 = vld [vmem:[#allocation2 + $0x2e8] sm:$0xfc]  ;;  %v8146_v51 = vld [vmem:[#allocation2 + $0x2f0] sm:$0x3] }
 0x28d   : > { %v8420_v40 = vpop.permute.xlu1 %8419 }
 0x28e   : > { %v8500_v26 = vsel %vm1115_vm3, %v8453_v50, %v8420_v40  ;;  %v8390_v13 = vpop.permute.xlu0 %8389 }
 0x28f   : > { %12394 = vmatprep.mubr.msk.bf16.mxu0 %vm1124_vm4, %v8500_v26  ;;  %v8456_v8 = vsel %vm272_vm0, %v8200_v19, %v8390_v13  ;;  %v8216_v26 = vrot.slane %v8145_v14, 2  ;;  %v8217_v19 = vrot.slane %v8146_v51, 2  ;;  %v8213_v13 = vrot.slane %v8143_v41, 2  ;;  %v8158_v14 = vld [vmem:[#allocation2 + $0x380] sm:$0x3] }
 0x290   : > { %v8155_v51 = vld [vmem:[#allocation2 + $0x360] sm:$0xfc]  ;;  %v8156_v41 = vld [vmem:[#allocation2 + $0x368] sm:$0x3] }
 0x291   : > { %v8422_v31 = vpop.permute.xlu1 %8421  ;;  %v8218_v56 = vsel %vm6988_vm8, %v8216_v26, %v8217_v19  ;;  %v8231_v26 = vrot.slane %v8155_v51, 2  ;;  %v8232_v19 = vrot.slane %v8156_v41, 2 }
 0x292   : > { %v8502_v7 = vsel %vm1115_vm3, %v8456_v8, %v8422_v31  ;;  %v4075_v11 = vpop.permute.xlu0 %4074  ;;  %v8149_v8 = vld [vmem:[#allocation2 + $0x318] sm:$0xfc]  ;;  %v8150_v31 = vld [vmem:[#allocation2 + $0x320] sm:$0x3] }
 0x293   : > { %v4155_v39 = vsel %vm1115_vm3, %v4123_v55, %v4075_v11  ;;  %12395 = vmatmul.mubr.msk.bf16.vlgmr.msra.gmra.mrb[64].mxu0 %vm1124_vm4, %v8502_v7  ;;  %v8147_v55 = vld [vmem:[#allocation2 + $0x300] sm:$0xfc]  ;;  %v8148_v7 = vld [vmem:[#allocation2 + $0x308] sm:$0x3]  ;;  %v8223_v44 = vrot.slane %v8150_v31, 2 }
 0x294   : > { %12087 = vmatmul.mubr.msk.bf16.gmra.mrb[28].mxu1 %vm1124_vm4, %v4155_v39  ;;  %v8222_v39 = vrot.slane %v8149_v8, 2  ;;  %v8160_v8 = vld [vmem:[#allocation2 + $0x398] sm:$0x3] }
 0x295   : > { %12226 = vmatprep.mubr.msk.bf16.mxu1 %vm272_vm0, %v16083_v12  ;;  %v8394_v16 = vpop.permute.xlu1 %8393  ;;  %v8211_v12 = vrot.slane %v8142_v60, 2 }
 0x296   : > { %v8392_v34 = vpop.permute.xlu0 %8391  ;;  %v8462_v4 = vsel %vm272_vm0, %v8206_v47, %v8394_v16  ;;  %v8219_v16 = vrot.slane %v8147_v55, 2  ;;  %v8220_v47 = vrot.slane %v8148_v7, 2 }
 0x297   : > { %v8459_v6 = vsel %vm272_vm0, %v8203_v45, %v8392_v34  ;;  %v8212_v17 = vsel %vm6988_vm8, %v8210_v28, %v8211_v12  ;;  %v8224_v45 = vsel %vm6988_vm8, %v8222_v39, %v8223_v44  ;;  %v8228_v28 = vrot.slane %v8153_v1, 2 }
 0x298   : > { %v8221_v60 = vsel %vm6988_vm8, %v8219_v16, %v8220_v47  ;;  %v8229_v12 = vrot.slane %v8154_v38, 2  ;;  %v8238_v39 = vrot.slane %v8160_v8, 2  ;;  %v19319_v8 = vld [vmem:[#allocation42_spill] sm:$0xff] }
 0x299   : > { %v8426_v29 = vpop.permute.xlu1 %8425 }
 0x29a   : > { %v8506_v37 = vsel %vm1115_vm3, %v8462_v4, %v8426_v29  ;;  %v8424_v35 = vpop.permute.xlu0 %8423  ;;  %v8151_v4 = vld [vmem:[#allocation2 + $0x330] sm:$0xfc]  ;;  %v8152_v29 = vld [vmem:[#allocation2 + $0x338] sm:$0x3] }
 0x29b   : > { %v8504_v46 = vsel %vm1115_vm3, %v8459_v6, %v8424_v35  ;;  %v8225_v33 = vrot.slane %v8151_v4, 2  ;;  %v8226_v61 = vrot.slane %v8152_v29, 2 }
 0x29c   : > { %12227 = vmatmul.mubr.msk.bf16.vlgmr.msra.gmra.mrb[32].mxu1 %vm272_vm0, %v16076_v52  ;;  %12398 = vmatprep.mubr.msk.bf16.mxu0 %vm1124_vm4, %v8504_v46  ;;  %v8144_v52 = vld [vmem:[#allocation2 + $0x2d8] sm:$0x3] }
 0x29d   : > { %12230 = vmatprep.mubr.msk.bf16.mxu1 %vm272_vm0, %v16110_v27  ;;  %12399 = vmatmul.mubr.msk.bf16.gmra.mrb[68].mxu0 %vm1124_vm4, %v8506_v37  ;;  %v8398_v58 = vpop.permute.xlu1 %8397  ;;  %v8214_v53 = vrot.slane %v8144_v52, 2 }
 0x29e   : > { %v8396_v62 = vpop.permute.xlu0 %8395  ;;  %12259 = vmatpush3.bf16.msra.mxu1 %v16292_v9  ;;  %v8468_v30 = vsel %vm272_vm0, %v8212_v17, %v8398_v58  ;;  %v8230_v58 = vsel %vm6988_vm8, %v8228_v28, %v8229_v12 }
 0x29f   : > { %12260 = vmatprep.subr.bf16.mxu1 %v13026_v36  ;;  %v8465_v27 = vsel %vm272_vm0, %v8209_v3, %v8396_v62  ;;  %v8215_v48 = vsel %vm6988_vm8, %v8213_v13, %v8214_v53  ;;  %v8227_v62 = vsel %vm6988_vm8, %v8225_v33, %v8226_v61  ;;  %v8157_v3 = vld [vmem:[#allocation2 + $0x378] sm:$0xfc]  ;;  %v964_v61 = vld [vmem:[%s18898_s3 + $0x2] sm:$0x3] }
 0x2a1   : > { %v8430_v22 = vpop.permute.xlu1 %8429 }
 0x2a2   : > { %v8510_v50 = vsel %vm1115_vm3, %v8468_v30, %v8430_v22  ;;  %v8428_v40 = vpop.permute.xlu0 %8427  ;;  %12261 = vmatpush3.bf16.msra.mxu1 %v13026_v36 }
 0x2a3   : > { %v8508_v9 = vsel %vm1115_vm3, %v8465_v27, %v8428_v40  ;;  %v8234_v27 = vrot.slane %v8157_v3, 2 }
 0x2a4   : > { %12231 = vmatmul.mubr.msk.bf16.gmra.mrb[36].mxu1 %vm272_vm0, %v16105_v24  ;;  %12402 = vmatprep.mubr.msk.bf16.mxu0 %vm1124_vm4, %v8508_v9 }
 0x2a5   : > { %12234 = vmatprep.mubr.msk.bf16.mxu1 %vm272_vm0, %v16143_v43  ;;  %12403 = vmatmul.mubr.msk.bf16.gmra.mrb[72].mxu0 %vm1124_vm4, %v8510_v50  ;;  %v8402_v57 = vpop.permute.xlu1 %8401  ;;  %v8235_v50 = vrot.slane %v8158_v14, 2 }
 0x2a6   : > { %v8400_v15 = vpop.permute.xlu0 %8399  ;;  %v8474_v11 = vsel %vm272_vm0, %v8218_v56, %v8402_v57  ;;  %v8233_v57 = vsel %vm6988_vm8, %v8231_v26, %v8232_v19  ;;  %v8161_v56 = vld [vmem:[#allocation2 + $0x3a8] sm:$0xfc] }
 0x2a7   : > { %v8471_v54 = vsel %vm272_vm0, %v8215_v48, %v8400_v15  ;;  %v8236_v13 = vsel %vm6988_vm8, %v8234_v27, %v8235_v50  ;;  %v8162_v15 = vld [vmem:[#allocation2 + $0x3b0] sm:$0x3]  ;;  %v13027_v48 = vld [vmem:[%s18897_s2 + $0x20] sm:$0xff]  }
 0x2a8   : > { %12570 = vmatprep.subr.bf16.mxu1 %v13027_v48  ;;  %12426 = vmatprep.subr.bf16.mxu0 %v13027_v48 }
 0x2a9   : > { %v8434_v24 = vpop.permute.xlu1 %8433  ;;  %12427 = vmatpush3.bf16.msra.mxu0 %v13027_v48 }
 0x2aa   : > { %v8514_v20 = vsel %vm1115_vm3, %v8474_v11, %v8434_v24  ;;  %v8432_v43 = vpop.permute.xlu0 %8431  ;;  %v8240_v24 = vrot.slane %v8161_v56, 2 }
 0x2ab   : > { %v8512_v18 = vsel %vm1115_vm3, %v8471_v54, %v8432_v43  ;;  %v8241_v54 = vrot.slane %v8162_v15, 2 }
 0x2ac   : > { %12235 = vmatmul.mubr.msk.bf16.gmra.mrb[40].mxu1 %vm272_vm0, %v16136_v25  ;;  %12406 = vmatprep.mubr.msk.bf16.mxu0 %vm1124_vm4, %v8512_v18 }
 0x2ad   : > { %12238 = vmatprep.mubr.msk.bf16.mxu1 %vm272_vm0, %v16184_v10  ;;  %12407 = vmatmul.mubr.msk.bf16.gmra.mrb[76].mxu0 %vm1124_vm4, %v8514_v20  ;;  %v8406_v34 = vpop.permute.xlu1 %8405  ;;  %v8242_v18 = vsel %vm6988_vm8, %v8240_v24, %v8241_v54 }
 0x2ae   : > { %v8404_v49 = vpop.permute.xlu0 %8403  ;;  %v8480_v6 = vsel %vm272_vm0, %v8224_v45, %v8406_v34 }
 0x2af   : > { %v8477_v37 = vsel %vm272_vm0, %v8221_v60, %v8404_v49 }
 0x2b1   : > { %v8438_v25 = vpop.permute.xlu1 %8437 }
 0x2b2   : > { %v8518_v35 = vsel %vm1115_vm3, %v8480_v6, %v8438_v25  ;;  %v8436_v10 = vpop.permute.xlu0 %8435 }
 0x2b3   : > { %v8516_v46 = vsel %vm1115_vm3, %v8477_v37, %v8436_v10 }
 0x2b4   : > { %12239 = vmatmul.mubr.msk.bf16.gmra.mrb[44].mxu1 %vm272_vm0, %v16179_v32  ;;  %12410 = vmatprep.mubr.msk.bf16.mxu0 %vm1124_vm4, %v8516_v46 }
 0x2b5   : > { %12242 = vmatprep.mubr.msk.bf16.mxu1 %vm272_vm0, %v16213_v21  ;;  %12411 = vmatmul.mubr.msk.bf16.gmra.mrb[80].mxu0 %vm1124_vm4, %v8518_v35  ;;  %v8410_v36 = vpop.permute.xlu1 %8409 }
 0x2b6   : > { %v8408_v17 = vpop.permute.xlu0 %8407  ;;  %v8486_v52 = vsel %vm272_vm0, %v8230_v58, %v8410_v36  ;;  %v16438_v58 = vld [vmem:[%s18896_s1 + $0x1f0] sm:$0xff]  }
 0x2b7   : > { %v8483_v30 = vsel %vm272_vm0, %v8227_v62, %v8408_v17 }
 0x2b9   : > { %v8442_v32 = vpop.permute.xlu1 %8441 }
 0x2ba   : > { %v8522_v22 = vsel %vm1115_vm3, %v8486_v52, %v8442_v32  ;;  %v8440_v21 = vpop.permute.xlu0 %8439 }
 0x2bb   : > { %v8520_v40 = vsel %vm1115_vm3, %v8483_v30, %v8440_v21 }
 0x2bc   : > { %12243 = vmatmul.mubr.msk.bf16.gmra.mrb[48].mxu1 %vm272_vm0, %v16210_v42  ;;  %12414 = vmatprep.mubr.msk.bf16.mxu0 %vm1124_vm4, %v8520_v40  ;;  %v8159_v42 = vld [vmem:[#allocation2 + $0x390] sm:$0xfc] }
 0x2bd   : > { %12246 = vmatprep.mubr.msk.bf16.mxu1 %vm272_vm0, %v16241_v23  ;;  %12415 = vmatmul.mubr.msk.bf16.gmra.mrb[84].mxu0 %vm1124_vm4, %v8522_v22  ;;  %v8414_v9 = vpop.permute.xlu1 %8413  ;;  %v8237_v43 = vrot.slane %v8159_v42, 2  ;;  %v16451_v42 = vld [vmem:[%s18899_s4] ss:$0 sm:$0xff] }
 0x2be   : > { %v8412_v53 = vpop.permute.xlu0 %8411  ;;  %v8492_v31 = vsel %vm272_vm0, %v8236_v13, %v8414_v9 }
 0x2bf   : > { %v8489_v23 = vsel %vm272_vm0, %v8233_v57, %v8412_v53  ;;  %v8239_v47 = vsel %vm6988_vm8, %v8237_v43, %v8238_v39 }
 0x2c1   : > { %v8446_v55 = vpop.permute.xlu1 %8445 }
 0x2c2   : > { %v8526_v7 = vsel %vm1115_vm3, %v8492_v31, %v8446_v55  ;;  %v8444_v11 = vpop.permute.xlu0 %8443  ;;  %v640_v31 = vadd.f32 %v16451_v42, %v19319_v8 }
 0x2c3   : > { %v8524_v20 = vsel %vm1115_vm3, %v8489_v23, %v8444_v11 }
 0x2c4   : > { %12247 = vmatmul.mubr.msk.bf16.gmra.mrb[52].mxu1 %vm272_vm0, %v16239_v59  ;;  %12418 = vmatprep.mubr.msk.bf16.mxu0 %vm1124_vm4, %v8524_v20  ;;  %v11172_v20 = vmul.f32 -1.442695, %v640_v31 }
 0x2c5   : > { %12250 = vmatprep.mubr.msk.bf16.mxu1 %vm272_vm0, %v16271_v5  ;;  %12419 = vmatmul.mubr.msk.bf16.gmra.mrb[88].mxu0 %vm1124_vm4, %v8526_v7  ;;  %v8418_v44 = vpop.permute.xlu1 %8417  ;;  %v13028_v5 = vld [vmem:[%s18897_s2 + $0x28] sm:$0xff]  }
 0x2c6   : > { %v8416_v16 = vpop.permute.xlu0 %8415  ;;  %v8498_v34 = vsel %vm272_vm0, %v8242_v18, %v8418_v44  ;;  %12428 = vmatprep.subr.bf16.mxu0 %v13028_v5 }
 0x2c7   : > { %v8495_v49 = vsel %vm272_vm0, %v8239_v47, %v8416_v16  ;;  %12429 = vmatpush3.bf16.msra.mxu0 %v13028_v5 }
 0x2c9   : > { %v8450_v45 = vpop.permute.xlu1 %8449 }
 0x2ca   : > { %v8530_v59 = vsel %vm1115_vm3, %v8498_v34, %v8450_v45  ;;  %v8448_v60 = vpop.permute.xlu0 %8447 }
 0x2cb   : > { %v8528_v1 = vsel %vm1115_vm3, %v8495_v49, %v8448_v60 }
 0x2cc   : > { %12251 = vmatmul.mubr.msk.bf16.gmra.mrb[56].mxu1 %vm272_vm0, %v16267_v2  ;;  %12422 = vmatprep.mubr.msk.bf16.mxu0 %vm1124_vm4, %v8528_v1  ;;  %v16424_v2 = vld [vmem:[%s18899_s4 + $0x1] ss:$0 sm:$0xff] }
 0x2cd   : > { %12254 = vmatprep.mubr.msk.bf16.mxu1 %vm272_vm0, %v16296_v0  ;;  %12423 = vmatmul.mubr.msk.bf16.gmra.mrb[92].mxu0 %vm1124_vm4, %v8530_v59 }
 0x2d4   : > { %12255 = vmatmul.mubr.msk.bf16.gmra.mrb[60].mxu1 %vm272_vm0, %v16294_v63 }
 0x2f7   : > { %v12060_v38 = vpop.f32.mrb[0].mxu1 }
 0x2f8   : > { %v4437_v4 = vadd.f32 %v12060_v38, %v16424_v2  ;;  %v4271_v0 = vpop.f32.mrb[1].mxu1 }
 0x2f9   : > { %v4435_v29 = vadd.f32 %v16424_v2, %v4271_v0  ;;  %v12061_v6 = vpop.f32.mrb[2].mxu1 }
 0x2fa   : > { %v4438_v63 = vadd.f32 %v12061_v6, %v16424_v2  ;;  %v4274_v25 = vpop.f32.mrb[3].mxu1  ;;  %v4469_v35 = vmax.f32 %v4437_v4, 0.0 }
 0x2fb   : > { %v4436_v37 = vadd.f32 %v16424_v2, %v4274_v25  ;;  %v4467_v28 = vmax.f32 %v4435_v29, 0.0 }
 0x2fc   : > { %v4470_v10 = vmax.f32 %v4438_v63, 0.0 }
 0x2fd   : > { %v4468_v12 = vmax.f32 %v4436_v37, 0.0 }
 0x2fe   : > { %v4500_v46 = vpack.c.bf16 %v4470_v10, %v4469_v35 }
 0x2ff   : > { %v4499_v33 = vpack.c.bf16 %v4468_v12, %v4467_v28 }
 0x301   : > { %12262 = vmatprep.mubr.msk.bf16.mxu1 %vm272_vm0, %v4499_v33 }
 0x302   : > { %12263 = vmatmul.mubr.msk.bf16.vlgmr.msra.gmra.mrb[32].mxu1 %vm272_vm0, %v4500_v46 }
 0x303   : > { %12572 = vmatpush3.bf16.msra.mxu1 %v13027_v48 }
 0x304   : > { %v962_v36 = vpop.xlane.xlu0 %961  ;;  %12571 = vmatprep.subr.bf16.mxu1 %v13028_v5 }
 0x305   : > { %v963_v17 = vmax.f32 %v962_v36, 0.0  ;;  %v13263_v36 = vld [vmem:[%s13730_s15 + $0x18] sm:$0xff] }
 0x307   : > { %v965_v62 = vmul.f32 %v964_v61, %v963_v17  ;;  %v12064_v3 = vpop.f32.mrb[4].mxu1  ;;  %12573 = vmatpush3.bf16.msra.mxu1 %v13028_v5 }
 0x308   : > { %v4441_v14 = vadd.f32 %v12064_v3, %v16424_v2  ;;  %v4287_v51 = vpop.f32.mrb[5].mxu1  ;;  %12462 = vmatprep.subr.bf16.mxu1 %v16438_v58 }
 0x309   : > { %v966_v41 = vsel %vm959_vm9, %v965_v62, 0.0  ;;  %v4439_v52 = vadd.f32 %v16424_v2, %v4287_v51  ;;  %v12065_v32 = vpop.f32.mrb[6].mxu1  ;;  %v13264_v62 = vld [vmem:[%s13730_s15] sm:$0xff] }
 0x30a   : > { %v967_v30 = vrot.slane %v966_v41, 4  ;;  %v4442_v22 = vadd.f32 %v12065_v32, %v16424_v2  ;;  %v4290_v21 = vpop.f32.mrb[7].mxu1  ;;  %v4473_v40 = vmax.f32 %v4441_v14, 0.0  ;;  %v19320_v14 = vld [vmem:[#allocation7_spill] sm:$0xff] }
 0x30b   : > { %v4440_v27 = vadd.f32 %v16424_v2, %v4290_v21  ;;  %v4471_v19 = vmax.f32 %v4439_v52, 0.0  ;;  %v592_v51 = vadd.f32 %v16451_v42, %v19320_v14  ;;  %v13266_v32 = vld [vmem:[%s13730_s15 + $0x8] sm:$0xff]  ;;  %v13267_v21 = vld [vmem:[%s13730_s15 + $0x10] sm:$0xff] }
 0x30c   : > { %v968_v50 = vadd.f32 %v967_v30, %v966_v41  ;;  %v4474_v26 = vmax.f32 %v4442_v22, 0.0  ;;  %v13265_v41 = vld [vmem:[%s13730_s15 + $0x28] sm:$0xff] }
 0x30d   : > { %v4472_v9 = vmax.f32 %v4440_v27, 0.0  ;;  %v11160_v22 = vmul.f32 -1.442695, %v592_v51  ;;  %v19324_v51 = vld [vmem:[#allocation11_spill] sm:$0xff] }
 0x30e   : > { %v969_v13 = vrot.slane %v968_v50, 2  ;;  %v4502_v53 = vpack.c.bf16 %v4474_v26, %v4473_v40 }
 0x30f   : > { %v4501_v57 = vpack.c.bf16 %v4472_v9, %v4471_v19 }
 0x310   : > { %v970_v56 = vadd.f32 %v969_v13, %v968_v50 }
 0x311   : > { %12266 = vmatprep.mubr.msk.bf16.mxu1 %vm272_vm0, %v4501_v57 }
 0x312   : > { %v971_v15 = vrot.slane %v970_v56, 1  ;;  %12267 = vmatmul.mubr.msk.bf16.gmra.mrb[36].mxu1 %vm272_vm0, %v4502_v53  ;;  %v19321_v53 = vld [vmem:[#allocation65_spill] sm:$0xff] }
 0x313   : > { %v624_v57 = vadd.f32 %v16451_v42, %v19321_v53  ;;  %v16569_v53 = vld [vmem:[%s13730_s15 + $0x70] sm:$0xff] }
 0x314   : > { %v972_v48 = vadd.f32 %v971_v15, %v970_v56 }
 0x316   : > { %v11178_v55 = vmul.f32 -1.442695, %v972_v48 }
 0x317   : > { %v12068_v23 = vpop.f32.mrb[8].mxu1 }
 0x318   : > { %13055 = vpow2.f32 %v11178_v55  ;;  %v4445_v7 = vadd.f32 %v12068_v23, %v16424_v2  ;;  %v4303_v11 = vpop.f32.mrb[9].mxu1  ;;  %v13268_v55 = vld [vmem:[%s13730_s15 + $0xd0] sm:$0xff] }
 0x319   : > { %v4443_v24 = vadd.f32 %v16424_v2, %v4303_v11  ;;  %v12069_v54 = vpop.f32.mrb[10].mxu1  ;;  %13057 = vpow2.f32 %v11172_v20 }
 0x31a   : > { %v4446_v43 = vadd.f32 %v12069_v54, %v16424_v2  ;;  %v4306_v39 = vpop.f32.mrb[11].mxu1  ;;  %v4477_v18 = vmax.f32 %v4445_v7, 0.0 }
 0x31b   : > { %v4444_v44 = vadd.f32 %v16424_v2, %v4306_v39  ;;  %v4475_v47 = vmax.f32 %v4443_v24, 0.0  ;;  %v11168_v24 = vmul.f32 -1.442695, %v624_v57 }
 0x31c   : > { %v4478_v16 = vmax.f32 %v4446_v43, 0.0  ;;  %v13269_v43 = vld [vmem:[%s13730_s15 + $0x38] sm:$0xff] }
 0x31d   : > { %v4476_v34 = vmax.f32 %v4444_v44, 0.0 }
 0x31e   : > { %v4504_v45 = vpack.c.bf16 %v4478_v16, %v4477_v18  ;;  %v19322_v18 = vld [vmem:[#allocation62_spill] sm:$0xff] }
 0x31f   : > { %v4503_v49 = vpack.c.bf16 %v4476_v34, %v4475_v47  ;;  %v584_v16 = vadd.f32 %v16451_v42, %v19322_v18  ;;  %v19323_v47 = vld [vmem:[#allocation13_spill] sm:$0xff] }
 0x320   : > { %v656_v34 = vadd.f32 %v16451_v42, %v19323_v47 }
 0x321   : > { %12270 = vmatprep.mubr.msk.bf16.mxu1 %vm272_vm0, %v4503_v49 }
 0x322   : > { %v13056_v59 = vpop.eup %13055  ;;  %12271 = vmatmul.mubr.msk.bf16.gmra.mrb[40].mxu1 %vm272_vm0, %v4504_v45 }
 0x323   : > { %v976_v60 = vadd.f32 1.0, %v13056_v59  ;;  %v13058_v5 = vpop.eup %13057  ;;  %v11158_v59 = vmul.f32 -1.442695, %v584_v16 }
 0x324   : > { %v784_v25 = vadd.f32 1.0, %v13058_v5  ;;  %v11176_v5 = vmul.f32 -1.442695, %v656_v34  ;;  %v16585_v34 = vld [vmem:[%s13730_s15 + $0xb0] sm:$0xff] }
 0x325   : > { %13059 = vrcp.f32 %v976_v60 }
 0x326   : > { %13061 = vrcp.f32 %v784_v25 }
 0x327   : > { %v12072_v1 = vpop.f32.mrb[12].mxu1  ;;  %13063 = vpow2.f32 %v11160_v22 }
 0x328   : > { %v4449_v38 = vadd.f32 %v12072_v1, %v16424_v2  ;;  %v4319_v4 = vpop.f32.mrb[13].mxu1  ;;  %13065 = vpow2.f32 %v11168_v24 }
 0x329   : > { %v4447_v0 = vadd.f32 %v16424_v2, %v4319_v4  ;;  %v12073_v29 = vpop.f32.mrb[14].mxu1 }
 0x32a   : > { %v4450_v6 = vadd.f32 %v12073_v29, %v16424_v2  ;;  %v4322_v63 = vpop.f32.mrb[15].mxu1  ;;  %v4481_v35 = vmax.f32 %v4449_v38, 0.0 }
 0x32b   : > { %v4448_v37 = vadd.f32 %v16424_v2, %v4322_v63  ;;  %v4479_v28 = vmax.f32 %v4447_v0, 0.0 }
 0x32c   : > { %v4482_v10 = vmax.f32 %v4450_v6, 0.0 }
 0x32d   : > { %v4480_v12 = vmax.f32 %v4448_v37, 0.0 }
 0x32e   : > { %v4506_v46 = vpack.c.bf16 %v4482_v10, %v4481_v35 }
 0x32f   : > { %v16465_v33 = vpop.eup %13059  ;;  %v4505_v61 = vpack.c.bf16 %v4480_v12, %v4479_v28  ;;  %v13270_v12 = vld [vmem:[%s13730_s15 + $0x40] sm:$0xff] }
 0x330   : > { %v16469_v17 = vmul.f32 %v13263_v36, %v16465_v33  ;;  %v16473_v3 = vmul.f32 %v13264_v62, %v16465_v33  ;;  %v16484_v52 = vmul.f32 %v13265_v41, %v16465_v33  ;;  %v16488_v30 = vmul.f32 %v13266_v32, %v16465_v33  ;;  %v13062_v19 = vpop.eup %13061  ;;  %v13272_v32 = vld [vmem:[%s13730_s15 + $0x30] sm:$0xff] }
 0x331   : > { %12274 = vmatprep.mubr.msk.bf16.mxu1 %vm272_vm0, %v4505_v61  ;;  %v16497_v27 = vmul.f32 %v13267_v21, %v16465_v33  ;;  %v880_v23 = vmul.f32 %v13268_v55, %v13062_v19  ;;  %v16520_v39 = vmul.f32 %v13269_v43, %v16465_v33  ;;  %v13064_v44 = vpop.eup %13063  ;;  %v13271_v61 = vld [vmem:[%s13730_s15 + $0x20] sm:$0xff]  ;;  %v616_v41 = vadd.f32 %v16451_v42, %v19324_v51 }
 0x332   : > { %1171 = vrot.lane.b32.xlu0 %v16469_v17, %s13386_s26  ;;  %1165 = vrot.lane.b32.xlu1 %v16473_v3, %s13386_s26  ;;  %v772_v45 = vadd.f32 1.0, %v13064_v44  ;;  %v13066_v63 = vpop.eup %13065  ;;  %v16549_v36 = vmul.f32 %v13271_v61, %v16465_v33  ;;  %v16560_v22 = vmul.f32 %v13272_v32, %v16465_v33 }
 0x333   : > { %12275 = vmatmul.mubr.msk.bf16.gmra.mrb[44].mxu1 %vm272_vm0, %v4506_v46  ;;  %v16545_v46 = vmul.f32 %v13270_v12, %v16465_v33  ;;  %v780_v62 = vadd.f32 1.0, %v13066_v63 }
 0x334   : > { %13067 = vrcp.f32 %v772_v45 }
 0x335   : > { %13069 = vpow2.f32 %v11158_v59 }
 0x336   : > { %1175 = vrot.lane.b32.xlu0 %v16484_v52, %s13386_s26  ;;  %1167 = vrot.lane.b32.xlu1 %v16488_v30, %s13386_s26  ;;  %13071 = vpow2.f32 %v11176_v5 }
 0x337   : > { %v12076_v50 = vpop.f32.mrb[16].mxu1  ;;  %13073 = vrcp.f32 %v780_v62  ;;  %v19328_v62 = vld [vmem:[#allocation27_spill] sm:$0xff] }
 0x338   : > { %v4453_v40 = vadd.f32 %v12076_v50, %v16424_v2  ;;  %v4335_v26 = vpop.f32.mrb[17].mxu1  ;;  %v11166_v50 = vmul.f32 -1.442695, %v616_v41 }
 0x339   : > { %v4451_v9 = vadd.f32 %v16424_v2, %v4335_v26  ;;  %v12077_v13 = vpop.f32.mrb[18].mxu1 }
 0x33a   : > { %v4454_v56 = vadd.f32 %v12077_v13, %v16424_v2  ;;  %1359 = vrot.lane.b32.xlu0 %v16488_v30, %s13388_s12  ;;  %1169 = vrot.lane.b32.xlu1 %v16497_v27, %s13386_s26  ;;  %v4338_v15 = vpop.f32.mrb[19].mxu1  ;;  %v4485_v8 = vmax.f32 %v4453_v40, 0.0  ;;  %13075 = vpow2.f32 %v11166_v50 }
 0x33b   : > { %v4452_v48 = vadd.f32 %v16424_v2, %v4338_v15  ;;  %v4483_v7 = vmax.f32 %v4451_v9, 0.0 }
 0x33c   : > { %v4486_v31 = vmax.f32 %v4454_v56, 0.0 }
 0x33d   : > { %v4484_v11 = vmax.f32 %v4452_v48, 0.0 }
 0x33e   : > { %v4508_v54 = vpack.c.bf16 %v4486_v31, %v4485_v8  ;;  %1363 = vrot.lane.b32.xlu0 %v16469_v17, %s13388_s12  ;;  %1087 = vrot.lane.b32.xlu1 %v880_v23, %s13388_s12  ;;  %v13068_v21 = vpop.eup %13067  ;;  %v19325_v31 = vld [vmem:[#allocation45_spill] sm:$0xff] }
 0x33f   : > { %v4507_v20 = vpack.c.bf16 %v4484_v11, %v4483_v7  ;;  %v13070_v40 = vpop.eup %13069  ;;  %v868_v57 = vmul.f32 %v16569_v53, %v13068_v21  ;;  %v648_v55 = vadd.f32 %v16451_v42, %v19325_v31 }
 0x340   : > { %v13072_v26 = vpop.eup %13071  ;;  %v770_v56 = vadd.f32 1.0, %v13070_v40 }
 0x341   : > { %12278 = vmatprep.mubr.msk.bf16.mxu1 %vm272_vm0, %v4507_v20  ;;  %v788_v8 = vadd.f32 1.0, %v13072_v26  ;;  %v13074_v20 = vpop.eup %13073  ;;  %v11174_v18 = vmul.f32 -1.442695, %v648_v55 }
 0x342   : > { %1271 = vrot.lane.b32.xlu0 %v16484_v52, %s13387_s30  ;;  %1261 = vrot.lane.b32.xlu1 %v16473_v3, %s13387_s30  ;;  %13077 = vrcp.f32 %v770_v56  ;;  %v876_v45 = vmul.f32 %v16585_v34, %v13074_v20  ;;  %v16631_v20 = vld [vmem:[%s13730_s15 + $0x58] sm:$0xff] }
 0x343   : > { %12279 = vmatmul.mubr.msk.bf16.gmra.mrb[48].mxu1 %vm272_vm0, %v4508_v54  ;;  %13079 = vrcp.f32 %v788_v8 }
 0x344   : > { %13081 = vpow2.f32 %v11174_v18  ;;  %v13076_v5 = vpop.eup %13075 }
 0x346   : > { %1179 = vrot.lane.b32.xlu0 %v16520_v39, %s13386_s26  ;;  %1263 = vrot.lane.b32.xlu1 %v16488_v30, %s13387_s30 }
 0x347   : > { %v12080_v49 = vpop.f32.mrb[20].mxu1 }
 0x348   : > { %v4457_v60 = vadd.f32 %v12080_v49, %v16424_v2  ;;  %v4351_v1 = vpop.f32.mrb[21].mxu1  ;;  %v19326_v49 = vld [vmem:[#allocation18_spill] sm:$0xff] }
 0x349   : > { %v4455_v38 = vadd.f32 %v16424_v2, %v4351_v1  ;;  %v12081_v4 = vpop.f32.mrb[22].mxu1  ;;  %v579_v59 = vadd.f32 %v16451_v42, %v19326_v49 }
 0x34a   : > { %v4458_v0 = vadd.f32 %v12081_v4, %v16424_v2  ;;  %1367 = vrot.lane.b32.xlu0 %v16484_v52, %s13388_s12  ;;  %1265 = vrot.lane.b32.xlu1 %v16497_v27, %s13387_s30  ;;  %v4354_v29 = vpop.f32.mrb[23].mxu1  ;;  %v4489_v25 = vmax.f32 %v4457_v60, 0.0  ;;  %v13275_v60 = vld [vmem:[%s13730_s15 + $0x50] sm:$0xff] }
 0x34b   : > { %v4456_v6 = vadd.f32 %v16424_v2, %v4354_v29  ;;  %v4487_v35 = vmax.f32 %v4455_v38, 0.0  ;;  %v16596_v1 = vmul.f32 %v13275_v60, %v16465_v33  ;;  %v16602_v38 = vld [vmem:[%s18899_s4 + $0x3] ss:$0 sm:$0xff]  ;;  %v11157_v4 = vmul.f32 -1.442695, %v579_v59 }
 0x34c   : > { %v4490_v37 = vmax.f32 %v4458_v0, 0.0  ;;  %v778_v0 = vadd.f32 1.0, %v13076_v5 }
 0x34d   : > { %v4488_v10 = vmax.f32 %v4456_v6, 0.0  ;;  %19327 = vst [vmem:[#allocation12_spill] sm:$0xff] %v16596_v1  ;;  %v13078_v6 = vpop.eup %13077  ;;  %13083 = vpow2.f32 %v11157_v4 }
 0x34e   : > { %v4510_v28 = vpack.c.bf16 %v4490_v37, %v4489_v25  ;;  %1275 = vrot.lane.b32.xlu0 %v16520_v39, %s13387_s30  ;;  %1267 = vrot.lane.b32.xlu1 %v16469_v17, %s13387_s30  ;;  %13085 = vrcp.f32 %v778_v0 }
 0x34f   : > { %v4509_v14 = vpack.c.bf16 %v4488_v10, %v4487_v35  ;;  %v13080_v35 = vpop.eup %13079 }
 0x350   : > { %v13082_v8 = vpop.eup %13081 }
 0x351   : > { %12282 = vmatprep.mubr.msk.bf16.mxu1 %vm272_vm0, %v4509_v14  ;;  %v611_v14 = vadd.f32 %v16451_v42, %v19328_v62 }
 0x352   : > { %1181 = vrot.lane.b32.xlu0 %v16545_v46, %s13386_s26  ;;  %1173 = vrot.lane.b32.xlu1 %v16549_v36, %s13386_s26 }
 0x353   : > { %12283 = vmatmul.mubr.msk.bf16.gmra.mrb[52].mxu1 %vm272_vm0, %v4510_v28 }
 0x356   : > { %1369 = vrot.lane.b32.xlu0 %v16560_v22, %s13388_s12  ;;  %1357 = vrot.lane.b32.xlu1 %v16473_v3, %s13388_s12 }
 0x357   : > { %v12084_v19 = vpop.f32.mrb[24].mxu1 }
 0x358   : > { %v4461_v9 = vadd.f32 %v12084_v19, %v16424_v2  ;;  %v4367_v13 = vpop.f32.mrb[25].mxu1  ;;  %v16622_v19 = vld [vmem:[%s13730_s15 + $0x60] sm:$0xff] }
 0x359   : > { %v4459_v15 = vadd.f32 %v16424_v2, %v4367_v13  ;;  %v12085_v48 = vpop.f32.mrb[26].mxu1 }
 0x35a   : > { %v4462_v23 = vadd.f32 %v12085_v48, %v16424_v2  ;;  %1031 = vrot.lane.b32.xlu0 %v868_v57, %s13386_s26  ;;  %1361 = vrot.lane.b32.xlu1 %v16497_v27, %s13388_s12  ;;  %v4370_v7 = vpop.f32.mrb[27].mxu1  ;;  %v4493_v24 = vmax.f32 %v4461_v9, 0.0  ;;  %v866_v9 = vmul.f32 %v16622_v19, %v13078_v6 }
 0x35b   : > { %v4460_v11 = vadd.f32 %v16424_v2, %v4370_v7  ;;  %v4491_v43 = vmax.f32 %v4459_v15, 0.0  ;;  %v16627_v15 = vld [vmem:[%s13730_s15 + $0xf0] sm:$0xff] }
 0x35c   : > { %v4494_v54 = vmax.f32 %v4462_v23, 0.0  ;;  %v884_v48 = vmul.f32 %v16627_v15, %v13080_v35 }
 0x35d   : > { %v4492_v44 = vmax.f32 %v4460_v11, 0.0 }
 0x35e   : > { %v4512_v16 = vpack.c.bf16 %v4494_v54, %v4493_v24  ;;  %1277 = vrot.lane.b32.xlu0 %v16545_v46, %s13387_s30  ;;  %1269 = vrot.lane.b32.xlu1 %v16549_v36, %s13387_s30 }
 0x35f   : > { %v4511_v47 = vpack.c.bf16 %v4492_v44, %v4491_v43  ;;  %v16635_v43 = vmul.f32 %v16631_v20, %v16465_v33 }
 0x361   : > { %12286 = vmatprep.mubr.msk.bf16.mxu1 %vm272_vm0, %v4511_v47  ;;  %19329 = vst [vmem:[#allocation32_spill] sm:$0xff] %v16635_v43 }
 0x362   : > { %1063 = vrot.lane.b32.xlu0 %v876_v45, %s13387_s30  ;;  %1177 = vrot.lane.b32.xlu1 %v16560_v22, %s13386_s26  ;;  %v786_v45 = vadd.f32 1.0, %v13082_v8 }
 0x363   : > { %12287 = vmatmul.mubr.msk.bf16.gmra.mrb[56].mxu1 %vm272_vm0, %v4512_v16  ;;  %v16640_v16 = vld [vmem:[%s13730_s15 + $0x48] sm:$0xff] }
 0x364   : > { %v16644_v47 = vmul.f32 %v16640_v16, %v16465_v33 }
 0x366   : > { %1185 = vrot.lane.b32.xlu0 %v16596_v1, %s13386_s26  ;;  %1365 = vrot.lane.b32.xlu1 %v16549_v36, %s13388_s12  ;;  %v12396_v29 = vpop.f32.mrb[64].mxu0 }
 0x367   : > { %v12088_v63 = vpop.f32.mrb[28].mxu1  ;;  %v8812_v25 = vadd.f32 %v12396_v29, %v16602_v38  ;;  %v8646_v37 = vpop.f32.mrb[65].mxu0  ;;  %v16656_v29 = vld [vmem:[%s13730_s15 + $0x68] sm:$0xff] }
 0x368   : > { %v4465_v10 = vadd.f32 %v12088_v63, %v16424_v2  ;;  %v4383_v28 = vpop.f32.mrb[29].mxu1  ;;  %v8810_v12 = vadd.f32 %v16602_v38, %v8646_v37  ;;  %v12397_v61 = vpop.f32.mrb[66].mxu0  ;;  %v16660_v6 = vmul.f32 %v16656_v29, %v16465_v33 }
 0x369   : > { %v4463_v51 = vadd.f32 %v16424_v2, %v4383_v28  ;;  %v12089_v41 = vpop.f32.mrb[30].mxu1  ;;  %v8813_v32 = vadd.f32 %v12397_v61, %v16602_v38  ;;  %v8649_v21 = vpop.f32.mrb[67].mxu0  ;;  %v8844_v13 = vmax.f32 %v8812_v25, 0.0  ;;  %v19331_v28 = vld [vmem:[#allocation8_spill] sm:$0xff] }
 0x36a   : > { %v4466_v50 = vadd.f32 %v12089_v41, %v16424_v2  ;;  %v8811_v40 = vadd.f32 %v16602_v38, %v8649_v21  ;;  %1373 = vrot.lane.b32.xlu0 %v16545_v46, %s13388_s12  ;;  %1273 = vrot.lane.b32.xlu1 %v16560_v22, %s13387_s30  ;;  %v4386_v26 = vpop.f32.mrb[31].mxu1  ;;  %v4497_v31 = vmax.f32 %v4465_v10, 0.0  ;;  %v8842_v55 = vmax.f32 %v8810_v12, 0.0  ;;  %19330 = vst [vmem:[#allocation15_spill] sm:$0xff] %v16660_v6  ;;  %v13084_v63 = vpop.eup %13083 }
 0x36b   : > { %v8845_v57 = vmax.f32 %v8813_v32, 0.0  ;;  %v4464_v56 = vadd.f32 %v16424_v2, %v4386_v26  ;;  %v4495_v11 = vmax.f32 %v4463_v51, 0.0  ;;  %v11165_v2 = vmul.f32 -1.442695, %v611_v14  ;;  %v13086_v35 = vpop.eup %13085  ;;  %v19332_v14 = vld [vmem:[#allocation67_spill] sm:$0xff] }
 0x36c   : > { %v4498_v23 = vmax.f32 %v4466_v50, 0.0  ;;  %v8843_v7 = vmax.f32 %v8811_v40, 0.0  ;;  %v571_v12 = vadd.f32 %v16451_v42, %v19331_v28  ;;  %v643_v51 = vadd.f32 %v16451_v42, %v19332_v14 }
 0x36d   : > { %v8875_v24 = vpack.c.bf16 %v8845_v57, %v8844_v13  ;;  %v4496_v54 = vmax.f32 %v4464_v56, 0.0  ;;  %13087 = vpow2.f32 %v11165_v2  ;;  %v769_v21 = vadd.f32 1.0, %v13084_v63  ;;  %v16699_v63 = vld [vmem:[%s13730_s15 + $0xe0] sm:$0xff] }
 0x36e   : > { %v4514_v44 = vpack.c.bf16 %v4498_v23, %v4497_v31  ;;  %v8874_v18 = vpack.c.bf16 %v8843_v7, %v8842_v55  ;;  %1095 = vrot.lane.b32.xlu0 %v884_v48, %s13388_s12  ;;  %1027 = vrot.lane.b32.xlu1 %v866_v9, %s13386_s26  ;;  %13089 = vrcp.f32 %v786_v45  ;;  %v16674_v9 = vld [vmem:[%s13730_s15 + $0xa0] sm:$0xff]  ;;  %v11155_v57 = vmul.f32 -1.442695, %v571_v12 }
 0x36f   : > { %v4513_v49 = vpack.c.bf16 %v4496_v54, %v4495_v11  ;;  %v874_v13 = vmul.f32 %v16674_v9, %v13086_v35  ;;  %v11173_v8 = vmul.f32 -1.442695, %v643_v51  ;;  %13091 = vrcp.f32 %v769_v21  ;;  %v13030_v11 = vld [vmem:[%s18896_s1 + $0x1f8] sm:$0xff]   ;;  %v19334_v35 = vld [vmem:[#allocation64_spill] sm:$0xff] }
 0x370   : > { %v12400_v59 = vpop.f32.mrb[68].mxu0  ;;  %12430 = vmatprep.mubr.msk.bf16.mxu0 %vm272_vm0, %v8874_v18  ;;  %13093 = vpow2.f32 %v11155_v57  ;;  %v16711_v12 = vmul.f32 %v16622_v19, %v16465_v33  ;;  %v16721_v57 = vpop.permute.xlu1 %1019 }
 0x371   : > { %v8816_v60 = vadd.f32 %v12400_v59, %v16602_v38  ;;  %12290 = vmatprep.mubr.msk.bf16.mxu1 %vm272_vm0, %v4513_v49  ;;  %v8662_v5 = vpop.f32.mrb[69].mxu0  ;;  %12431 = vmatmul.mubr.msk.bf16.vlgmr.msra.gmra.mrb[96].mxu0 %vm272_vm0, %v8875_v24  ;;  %13095 = vpow2.f32 %v11173_v8  ;;  %v16696_v59 = vmul.f32 %v16569_v53, %v16465_v33 }
 0x372   : > { %v8814_v4 = vadd.f32 %v16602_v38, %v8662_v5  ;;  %v12401_v0 = vpop.f32.mrb[70].mxu0  ;;  %1283 = vrot.lane.b32.xlu0 %v16635_v43, %s13387_s30  ;;  %1183 = vrot.lane.b32.xlu1 %v16644_v47, %s13386_s26  ;;  %19335 = vst [vmem:[#allocation14_spill] sm:$0xff] %v16711_v12 }
 0x373   : > { %v8817_v25 = vadd.f32 %v12401_v0, %v16602_v38  ;;  %12291 = vmatmul.mubr.msk.bf16.gmra.mrb[60].mxu1 %vm272_vm0, %v4514_v44  ;;  %v8665_v37 = vpop.f32.mrb[71].mxu0  ;;  %v8848_v61 = vmax.f32 %v8816_v60, 0.0  ;;  %19333 = vst [vmem:[#allocation37_spill] sm:$0xff] %v16696_v59 }
 0x374   : > { %v8815_v10 = vadd.f32 %v16602_v38, %v8665_v37  ;;  %v8846_v41 = vmax.f32 %v8814_v4, 0.0 }
 0x375   : > { %v8849_v62 = vmax.f32 %v8817_v25, 0.0 }
 0x376   : > { %v8847_v32 = vmax.f32 %v8815_v10, 0.0  ;;  %1191 = vrot.lane.b32.xlu0 %v16660_v6, %s13386_s26  ;;  %1371 = vrot.lane.b32.xlu1 %v16520_v39, %s13388_s12  ;;  %v603_v10 = vadd.f32 %v16451_v42, %v19334_v35 }
 0x377   : > { %v8877_v50 = vpack.c.bf16 %v8849_v62, %v8848_v61  ;;  %v13088_v24 = vpop.eup %13087 }
 0x378   : > { %v8876_v40 = vpack.c.bf16 %v8847_v32, %v8846_v41  ;;  %v12404_v26 = vpop.f32.mrb[72].mxu0  ;;  %v13090_v2 = vpop.eup %13089  ;;  %v777_v60 = vadd.f32 1.0, %v13088_v24  ;;  %v11163_v21 = vmul.f32 -1.442695, %v603_v10  ;;  %v16742_v10 = vld [vmem:[%s13730_s15 + $0x98] sm:$0xff] }
 0x379   : > { %v8820_v56 = vadd.f32 %v12404_v26, %v16602_v38  ;;  %v8678_v48 = vpop.f32.mrb[73].mxu0  ;;  %v13092_v51 = vpop.eup %13091 }
 0x37a   : > { %v8818_v31 = vadd.f32 %v16602_v38, %v8678_v48  ;;  %v12405_v55 = vpop.f32.mrb[74].mxu0  ;;  %1379 = vrot.lane.b32.xlu0 %v16635_v43, %s13388_s12  ;;  %1059 = vrot.lane.b32.xlu1 %v874_v13, %s13387_s30  ;;  %13097 = vrcp.f32 %v777_v60  ;;  %v13094_v19 = vpop.eup %13093  ;;  %v865_v8 = vmul.f32 %v16631_v20, %v13092_v51  ;;  %v13284_v51 = vld [vmem:[%s13730_s15 + $0x80] sm:$0xff] }
 0x37b   : > { %v8821_v23 = vadd.f32 %v12405_v55, %v16602_v38  ;;  %12434 = vmatprep.mubr.msk.bf16.mxu1 %vm272_vm0, %v8876_v40  ;;  %v8681_v7 = vpop.f32.mrb[75].mxu0  ;;  %v8852_v44 = vmax.f32 %v8820_v56, 0.0  ;;  %v13096_v13 = vpop.eup %13095  ;;  %13099 = vpow2.f32 %v11163_v21 }
 0x37c   : > { %v8819_v54 = vadd.f32 %v16602_v38, %v8681_v7  ;;  %12435 = vmatmul.mubr.msk.bf16.vlgmr.msra.gmra.mrb[36].mxu1 %vm272_vm0, %v8877_v50  ;;  %v8850_v45 = vmax.f32 %v8818_v31, 0.0  ;;  %v19336_v7 = vld [vmem:[#allocation29_spill] sm:$0xff] }
 0x37d   : > { %v8853_v18 = vmax.f32 %v8821_v23, 0.0  ;;  %12463 = vmatpush3.bf16.msra.mxu1 %v16438_v58  ;;  %v882_v58 = vmul.f32 %v16699_v63, %v13090_v2  ;;  %v767_v23 = vadd.f32 1.0, %v13094_v19  ;;  %v785_v2 = vadd.f32 1.0, %v13096_v13 }
 0x37e   : > { %v8851_v49 = vmax.f32 %v8819_v54, 0.0  ;;  %1287 = vrot.lane.b32.xlu0 %v16660_v6, %s13387_s30  ;;  %1279 = vrot.lane.b32.xlu1 %v16644_v47, %s13387_s30 }
 0x37f   : > { %v8879_v5 = vpack.c.bf16 %v8853_v18, %v8852_v44  ;;  %12464 = vmatprep.subr.bf16.mxu1 %v13030_v11  ;;  %13101 = vrcp.f32 %v767_v23 }
 0x380   : > { %v8878_v4 = vpack.c.bf16 %v8851_v49, %v8850_v45  ;;  %v12408_v0 = vpop.f32.mrb[76].mxu0  ;;  %13103 = vrcp.f32 %v785_v2 }
 0x381   : > { %v8824_v25 = vadd.f32 %v12408_v0, %v16602_v38  ;;  %v8694_v37 = vpop.f32.mrb[77].mxu0  ;;  %12465 = vmatpush3.bf16.msra.mxu1 %v13030_v11  ;;  %v635_v11 = vadd.f32 %v16451_v42, %v19336_v7 }
 0x382   : > { %v8822_v28 = vadd.f32 %v16602_v38, %v8694_v37  ;;  %v12409_v53 = vpop.f32.mrb[78].mxu0  ;;  %1193 = vrot.lane.b32.xlu0 %v16696_v59, %s13386_s26  ;;  %1091 = vrot.lane.b32.xlu1 %v882_v58, %s13388_s12 }
 0x383   : > { %v8825_v61 = vadd.f32 %v12409_v53, %v16602_v38  ;;  %12438 = vmatprep.mubr.msk.bf16.mxu1 %vm272_vm0, %v8878_v4  ;;  %v8697_v62 = vpop.f32.mrb[79].mxu0  ;;  %v8856_v41 = vmax.f32 %v8824_v25, 0.0  ;;  %v16735_v4 = vpop.permute.xlu1 %1023 }
 0x384   : > { %v8823_v14 = vadd.f32 %v16602_v38, %v8697_v62  ;;  %12439 = vmatmul.mubr.msk.bf16.gmra.mrb[40].mxu1 %vm272_vm0, %v8879_v5  ;;  %v8854_v50 = vmax.f32 %v8822_v28, 0.0  ;;  %v13098_v45 = vpop.eup %13097  ;;  %v11171_v5 = vmul.f32 -1.442695, %v635_v11 }
 0x385   : > { %v8857_v32 = vmax.f32 %v8825_v61, 0.0  ;;  %v873_v28 = vmul.f32 %v16742_v10, %v13098_v45 }
 0x386   : > { %v8855_v40 = vmax.f32 %v8823_v14, 0.0  ;;  %1381 = vrot.lane.b32.xlu0 %v16711_v12, %s13388_s12  ;;  %1187 = vrot.lane.b32.xlu1 %v16635_v43, %s13386_s26  ;;  %13105 = vpow2.f32 %v11171_v5  ;;  %v16777_v5 = vld [vmem:[%s13730_s15 + $0xd8] sm:$0xff]  ;;  %v19369_v43 = vld [vmem:[#allocation56_spill] sm:$0xff] }
 0x387   : > { %v8881_v26 = vpack.c.bf16 %v8857_v32, %v8856_v41  ;;  %v16752_v41 = vmul.f32 %v13284_v51, %v16465_v33  ;;  %v16790_v51 = vld [vmem:[%s13730_s15 + $0x78] sm:$0xff] }
 0x388   : > { %v8880_v56 = vpack.c.bf16 %v8855_v40, %v8854_v50  ;;  %v12412_v48 = vpop.f32.mrb[80].mxu0  ;;  %v13100_v50 = vpop.eup %13099 }
 0x389   : > { %v8828_v31 = vadd.f32 %v12412_v48, %v16602_v38  ;;  %v8710_v55 = vpop.f32.mrb[81].mxu0  ;;  %19337 = vst [vmem:[#allocation36_spill] sm:$0xff] %v16752_v41  ;;  %v16756_v40 = vpop.permute.xlu1 %1051 }
 0x38a   : > { %v8826_v24 = vadd.f32 %v16602_v38, %v8710_v55  ;;  %v12413_v54 = vpop.f32.mrb[82].mxu0  ;;  %1025 = vrot.lane.b32.xlu0 %v865_v8, %s13386_s26  ;;  %1375 = vrot.lane.b32.xlu1 %v16644_v47, %s13388_s12  ;;  %v775_v8 = vadd.f32 1.0, %v13100_v50  ;;  %v13102_v55 = vpop.eup %13101 }
 0x38b   : > { %v8829_v44 = vadd.f32 %v12413_v54, %v16602_v38  ;;  %12442 = vmatprep.mubr.msk.bf16.mxu1 %vm272_vm0, %v8880_v56  ;;  %v8713_v20 = vpop.f32.mrb[83].mxu0  ;;  %v8860_v49 = vmax.f32 %v8828_v31, 0.0  ;;  %v13104_v11 = vpop.eup %13103 }
 0x38c   : > { %v8827_v18 = vadd.f32 %v16602_v38, %v8713_v20  ;;  %12443 = vmatmul.mubr.msk.bf16.gmra.mrb[44].mxu1 %vm272_vm0, %v8881_v26  ;;  %v8858_v0 = vmax.f32 %v8826_v24, 0.0  ;;  %13107 = vrcp.f32 %v775_v8 }
 0x38d   : > { %v8861_v60 = vmax.f32 %v8829_v44, 0.0  ;;  %v16765_v2 = vpop.permute.xlu1 %1055 }
 0x38e   : > { %v8859_v58 = vmax.f32 %v8827_v18, 0.0  ;;  %1289 = vrot.lane.b32.xlu0 %v16696_v59, %s13387_s30  ;;  %1281 = vrot.lane.b32.xlu1 %v16596_v1, %s13387_s30 }
 0x38f   : > { %v8883_v25 = vpack.c.bf16 %v8861_v60, %v8860_v49 }
 0x390   : > { %v8882_v37 = vpack.c.bf16 %v8859_v58, %v8858_v0  ;;  %v12416_v35 = vpop.f32.mrb[84].mxu0  ;;  %v13106_v49 = vpop.eup %13105  ;;  %v881_v0 = vmul.f32 %v16777_v5, %v13104_v11  ;;  %v863_v58 = vmul.f32 %v16640_v16, %v13102_v55  ;;  %v16794_v16 = vmul.f32 %v16790_v51, %v16465_v33 }
 0x391   : > { %v8832_v53 = vadd.f32 %v12416_v35, %v16602_v38  ;;  %v8726_v61 = vpop.f32.mrb[85].mxu0  ;;  %v16796_v50 = vpop.permute.xlu1 %1083  ;;  %v16806_v55 = vmul.f32 %v16742_v10, %v16465_v33  ;;  %v19342_v10 = vld [vmem:[#allocation31_spill] sm:$0xff] }
 0x392   : > { %v8830_v62 = vadd.f32 %v16602_v38, %v8726_v61  ;;  %v12417_v14 = vpop.f32.mrb[86].mxu0  ;;  %1057 = vrot.lane.b32.xlu0 %v873_v28, %s13387_s30  ;;  %1189 = vrot.lane.b32.xlu1 %v16711_v12, %s13386_s26  ;;  %19340 = vst [vmem:[#allocation17_spill] sm:$0xff] %v16794_v16 }
 0x393   : > { %v8833_v32 = vadd.f32 %v12417_v14, %v16602_v38  ;;  %12446 = vmatprep.mubr.msk.bf16.mxu1 %vm272_vm0, %v8882_v37  ;;  %v8729_v21 = vpop.f32.mrb[87].mxu0  ;;  %v8864_v26 = vmax.f32 %v8832_v53, 0.0  ;;  %19341 = vst [vmem:[#allocation50_spill] sm:$0xff] %v16806_v55 }
 0x394   : > { %v8831_v19 = vadd.f32 %v16602_v38, %v8729_v21  ;;  %12447 = vmatmul.mubr.msk.bf16.gmra.mrb[48].mxu1 %vm272_vm0, %v8883_v25  ;;  %v8862_v56 = vmax.f32 %v8830_v62, 0.0  ;;  %v19338_v25 = vld [vmem:[#allocation22_spill] sm:$0xff]  ;;  %v13286_v62 = vld [vmem:[%s13730_s15 + $0x88] sm:$0xff] }
 0x395   : > { %v8865_v13 = vmax.f32 %v8833_v32, 0.0  ;;  %v595_v37 = vadd.f32 %v16451_v42, %v19338_v25  ;;  %v16787_v14 = vmul.f32 %v13286_v62, %v16465_v33  ;;  %v783_v32 = vadd.f32 1.0, %v13106_v49 }
 0x396   : > { %v8863_v48 = vmax.f32 %v8831_v19, 0.0  ;;  %1197 = vrot.lane.b32.xlu0 %v16752_v41, %s13386_s26  ;;  %1377 = vrot.lane.b32.xlu1 %v16596_v1, %s13388_s12  ;;  %v13303_v1 = vld [vmem:[#allocation2 + $0x218] sm:$0xff] }
 0x397   : > { %v8885_v31 = vpack.c.bf16 %v8865_v13, %v8864_v26  ;;  %19339 = vst [vmem:[#allocation16_spill] sm:$0xff] %v16787_v14  ;;  %13109 = vrcp.f32 %v783_v32  ;;  %v13288_v32 = vld [vmem:[#allocation2 + $0x128] sm:$0xff] }
 0x398   : > { %v8884_v23 = vpack.c.bf16 %v8863_v48, %v8862_v56  ;;  %v12420_v7 = vpop.f32.mrb[88].mxu0  ;;  %v11161_v48 = vmul.f32 -1.442695, %v595_v37 }
 0x399   : > { %v8836_v24 = vadd.f32 %v12420_v7, %v16602_v38  ;;  %v8742_v54 = vpop.f32.mrb[89].mxu0 }
 0x39a   : > { %v8834_v44 = vadd.f32 %v16602_v38, %v8742_v54  ;;  %v12421_v20 = vpop.f32.mrb[90].mxu0  ;;  %1385 = vrot.lane.b32.xlu0 %v16696_v59, %s13388_s12  ;;  %1285 = vrot.lane.b32.xlu1 %v16711_v12, %s13387_s30  ;;  %13111 = vpow2.f32 %v11161_v48 }
 0x39b   : > { %v8837_v18 = vadd.f32 %v12421_v20, %v16602_v38  ;;  %12450 = vmatprep.mubr.msk.bf16.mxu1 %vm272_vm0, %v8884_v23  ;;  %v8745_v45 = vpop.f32.mrb[91].mxu0  ;;  %v8868_v35 = vmax.f32 %v8836_v24, 0.0 }
 0x39c   : > { %v8835_v60 = vadd.f32 %v16602_v38, %v8745_v45  ;;  %12451 = vmatmul.mubr.msk.bf16.gmra.mrb[52].mxu1 %vm272_vm0, %v8885_v31  ;;  %v8866_v53 = vmax.f32 %v8834_v44, 0.0  ;;  %v13108_v44 = vpop.eup %13107  ;;  %v627_v45 = vadd.f32 %v16451_v42, %v19342_v10 }
 0x39d   : > { %v8869_v28 = vmax.f32 %v8837_v18, 0.0  ;;  %v871_v37 = vmul.f32 %v13286_v62, %v13108_v44  ;;  %v16841_v62 = vld [vmem:[%s13730_s15 + $0xa8] sm:$0xff]  ;;  %v13291_v44 = vld [vmem:[#allocation2 + $0x140] sm:$0xff] }
 0x39e   : > { %v8867_v61 = vmax.f32 %v8835_v60, 0.0  ;;  %1089 = vrot.lane.b32.xlu0 %v881_v0, %s13388_s12  ;;  %1021 = vrot.lane.b32.xlu1 %v863_v58, %s13386_s26 }
 0x39f   : > { %v8887_v21 = vpack.c.bf16 %v8869_v28, %v8868_v35  ;;  %v11169_v35 = vmul.f32 -1.442695, %v627_v45  ;;  %v13292_v45 = vld [vmem:[#allocation2 + $0x158] sm:$0xff] }
 0x3a0   : > { %v8886_v19 = vpack.c.bf16 %v8867_v61, %v8866_v53  ;;  %v12424_v26 = vpop.f32.mrb[92].mxu0 }
 0x3a1   : > { %v8840_v13 = vadd.f32 %v12424_v26, %v16602_v38  ;;  %v8758_v56 = vpop.f32.mrb[93].mxu0  ;;  %v13110_v61 = vpop.eup %13109  ;;  %13113 = vpow2.f32 %v11169_v35 }
 0x3a2   : > { %v8838_v8 = vadd.f32 %v16602_v38, %v8758_v56  ;;  %v12425_v31 = vpop.f32.mrb[94].mxu0  ;;  %1295 = vrot.lane.b32.xlu0 %v16787_v14, %s13387_s30  ;;  %1195 = vrot.lane.b32.xlu1 %v16794_v16, %s13386_s26  ;;  %v16852_v56 = vld [vmem:[%s13730_s15 + $0xc8] sm:$0xff] }
 0x3a3   : > { %v8841_v23 = vadd.f32 %v12425_v31, %v16602_v38  ;;  %12454 = vmatprep.mubr.msk.bf16.mxu1 %vm272_vm0, %v8886_v19  ;;  %v8761_v7 = vpop.f32.mrb[95].mxu0  ;;  %v8872_v20 = vmax.f32 %v8840_v13, 0.0  ;;  %v879_v48 = vmul.f32 %v16852_v56, %v13110_v61  ;;  %v13293_v61 = vld [vmem:[#allocation2 + $0x170] sm:$0xff] }
 0x3a4   : > { %v8839_v11 = vadd.f32 %v16602_v38, %v8761_v7  ;;  %12455 = vmatmul.mubr.msk.bf16.gmra.mrb[56].mxu1 %vm272_vm0, %v8887_v21  ;;  %v16812_v24 = vpop.permute.xlu0 %1171  ;;  %v16814_v54 = vpop.permute.xlu1 %1165  ;;  %v8870_v49 = vmax.f32 %v8838_v8, 0.0  ;;  %v16845_v21 = vmul.f32 %v16841_v62, %v16465_v33  ;;  %v19344_v8 = vld [vmem:[#allocation9_spill] sm:$0xff] }
 0x3a5   : > { %v8873_v18 = vmax.f32 %v8841_v23, 0.0  ;;  %v13112_v19 = vpop.eup %13111  ;;  %v587_v31 = vadd.f32 %v16451_v42, %v19344_v8  ;;  %v19345_v23 = vld [vmem:[#allocation34_spill] sm:$0xff] }
 0x3a6   : > { %v8871_v60 = vmax.f32 %v8839_v11, 0.0  ;;  %1203 = vrot.lane.b32.xlu0 %v16806_v55, %s13386_s26  ;;  %1383 = vrot.lane.b32.xlu1 %v16660_v6, %s13388_s12  ;;  %19343 = vst [vmem:[#allocation21_spill] sm:$0xff] %v16845_v21  ;;  %v659_v7 = vadd.f32 %v16451_v42, %v19345_v23  ;;  %v773_v11 = vadd.f32 1.0, %v13112_v19  ;;  %v19347_v8 = vld [vmem:[#allocation66_spill] sm:$0xff]  ;;  %v13295_v23 = vld [vmem:[%s13730_s15 + $0x90] sm:$0xff] }
 0x3a7   : > { %v8889_v38 = vpack.c.bf16 %v8873_v18, %v8872_v20  ;;  %v11159_v10 = vmul.f32 -1.442695, %v587_v31  ;;  %v619_v31 = vadd.f32 %v16451_v42, %v19347_v8  ;;  %v13297_v8 = vld [vmem:[#allocation2 + $0x1b8] sm:$0xff] }
 0x3a8   : > { %v8888_v0 = vpack.c.bf16 %v8871_v60, %v8870_v49  ;;  %v16822_v58 = vpop.permute.xlu0 %1175  ;;  %v16824_v25 = vpop.permute.xlu1 %1167  ;;  %v11177_v49 = vmul.f32 -1.442695, %v659_v7  ;;  %13115 = vrcp.f32 %v773_v11  ;;  %v16902_v7 = vmul.f32 %v13295_v23, %v16465_v33  ;;  %v19350_v23 = vld [vmem:[#allocation68_spill] sm:$0xff] }
 0x3a9   : > { %13117 = vpow2.f32 %v11159_v10  ;;  %v651_v59 = vadd.f32 %v16451_v42, %v19350_v23  ;;  %v13298_v42 = vld [vmem:[#allocation2 + $0x1d0] sm:$0xff] }
 0x3aa   : > { %1391 = vrot.lane.b32.xlu0 %v16787_v14, %s13388_s12  ;;  %1053 = vrot.lane.b32.xlu1 %v871_v37, %s13387_s30  ;;  %13119 = vpow2.f32 %v11177_v49  ;;  %v16882_v37 = vmul.f32 %v16585_v34, %v16465_v33  ;;  %v16898_v34 = vmul.f32 %v16674_v9, %v16465_v33  ;;  %19349 = vst [vmem:[#allocation24_spill] sm:$0xff] %v16902_v7 }
 0x3ab   : > { %12458 = vmatprep.mubr.msk.bf16.mxu1 %vm272_vm0, %v8888_v0  ;;  %v13114_v60 = vpop.eup %13113 }
 0x3ac   : > { %12459 = vmatmul.mubr.msk.bf16.gmra.mrb[60].mxu1 %vm272_vm0, %v8889_v38  ;;  %v16831_v28 = vpop.permute.xlu0 %1359  ;;  %v16833_v53 = vpop.permute.xlu1 %1169  ;;  %19346 = vst [vmem:[#allocation20_spill] sm:$0xff] %v16882_v37  ;;  %v781_v35 = vadd.f32 1.0, %v13114_v60  ;;  %19348 = vst [vmem:[#allocation25_spill] sm:$0xff] %v16898_v34  ;;  %v13296_v60 = vld [vmem:[#allocation2 + $0x1a0] sm:$0xff] }
 0x3ad   : > { %12466 = vmatprep.mubr.msk.bf16.mxu1 %vm272_vm0, %v13288_v32 }
 0x3ae   : > { %1299 = vrot.lane.b32.xlu0 %v16806_v55, %s13387_s30  ;;  %1291 = vrot.lane.b32.xlu1 %v16794_v16, %s13387_s30  ;;  %13121 = vrcp.f32 %v781_v35 }
 0x3b0   : > { %v16847_v26 = vpop.permute.xlu0 %1363  ;;  %v16849_v13 = vpop.permute.xlu1 %1087 }
 0x3b2   : > { %1207 = vrot.lane.b32.xlu0 %v16845_v21, %s13386_s26  ;;  %1085 = vrot.lane.b32.xlu1 %v879_v48, %s13388_s12  ;;  %v13294_v48 = vld [vmem:[#allocation2 + $0x188] sm:$0xff]  ;;  %v13116_v10 = vpop.eup %13115 }
 0x3b3   : > { %v13118_v49 = vpop.eup %13117 }
 0x3b4   : > { %12467 = vmatmul.mubr.msk.bf16.vlgmr.msra.gmra.mrb[64].mxu1 %vm272_vm0, %v13291_v44  ;;  %v16863_v20 = vpop.permute.xlu0 %1271  ;;  %v16865_v18 = vpop.permute.xlu1 %1261 }
 0x3b5   : > { %12470 = vmatprep.mubr.msk.bf16.mxu1 %vm272_vm0, %v13292_v45  ;;  %v11167_v45 = vmul.f32 -1.442695, %v619_v31  ;;  %v13120_v9 = vpop.eup %13119  ;;  %v771_v31 = vadd.f32 1.0, %v13118_v49 }
 0x3b6   : > { %1395 = vrot.lane.b32.xlu0 %v16806_v55, %s13388_s12  ;;  %1199 = vrot.lane.b32.xlu1 %v16787_v14, %s13386_s26 }
 0x3b7   : > { %13123 = vpow2.f32 %v11167_v45 }
 0x3b8   : > { %v16872_v38 = vpop.permute.xlu0 %1179  ;;  %v16874_v0 = vpop.permute.xlu1 %1263  ;;  %13125 = vrcp.f32 %v771_v31 }
 0x3ba   : > { %1303 = vrot.lane.b32.xlu0 %v16845_v21, %s13387_s30  ;;  %1387 = vrot.lane.b32.xlu1 %v16794_v16, %s13388_s12 }
 0x3bc   : > { %12471 = vmatmul.mubr.msk.bf16.gmra.mrb[68].mxu1 %vm272_vm0, %v13293_v61  ;;  %v16885_v32 = vpop.permute.xlu0 %1367  ;;  %v16887_v19 = vpop.permute.xlu1 %1265 }
 0x3bd   : > { %12474 = vmatprep.mubr.msk.bf16.mxu1 %vm272_vm0, %v13294_v48  ;;  %v869_v48 = vmul.f32 %v16790_v51, %v13116_v10  ;;  %v13122_v51 = vpop.eup %13121  ;;  %v11175_v10 = vmul.f32 -1.442695, %v651_v59  ;;  %v13301_v59 = vld [vmem:[%s13730_s15 + $0xc0] sm:$0xff] }
 0x3be   : > { %1209 = vrot.lane.b32.xlu0 %v16882_v37, %s13386_s26  ;;  %1293 = vrot.lane.b32.xlu1 %v16752_v41, %s13387_s30  ;;  %v16944_v31 = vmul.f32 %v13301_v59, %v16465_v33 }
 0x3c0   : > { %v16904_v11 = vpop.permute.xlu0 %1275  ;;  %v16906_v44 = vpop.permute.xlu1 %1267  ;;  %19353 = vst [vmem:[#allocation35_spill] sm:$0xff] %v16944_v31 }
 0x3c1   : > { %v13124_v23 = vpop.eup %13123 }
 0x3c2   : > { %1397 = vrot.lane.b32.xlu0 %v16898_v34, %s13388_s12  ;;  %1201 = vrot.lane.b32.xlu1 %v16902_v7, %s13386_s26 }
 0x3c4   : > { %12475 = vmatmul.mubr.msk.bf16.gmra.mrb[72].mxu1 %vm272_vm0, %v13296_v60  ;;  %v16913_v61 = vpop.permute.xlu0 %1181  ;;  %v16915_v35 = vpop.permute.xlu1 %1173  ;;  %v789_v60 = vadd.f32 1.0, %v13120_v9  ;;  %v13299_v9 = vld [vmem:[%s13730_s15 + $0xb8] sm:$0xff] }
 0x3c5   : > { %12478 = vmatprep.mubr.msk.bf16.mxu1 %vm272_vm0, %v13297_v8  ;;  %v13300_v8 = vld [vmem:[#allocation2 + $0x1e8] sm:$0xff] }
 0x3c6   : > { %1033 = vrot.lane.b32.xlu0 %v869_v48, %s13386_s26  ;;  %1389 = vrot.lane.b32.xlu1 %v16752_v41, %s13388_s12  ;;  %13127 = vrcp.f32 %v789_v60  ;;  %v877_v48 = vmul.f32 %v13299_v9, %v13122_v51  ;;  %v13031_v51 = vld [vmem:[%s18897_s2 + $0x30] sm:$0xff]  }
 0x3c7   : > { %13129 = vpow2.f32 %v11175_v10  ;;  %v779_v10 = vadd.f32 1.0, %v13124_v23  ;;  %12498 = vmatprep.subr.bf16.mxu1 %v13031_v51 }
 0x3c8   : > { %v16924_v14 = vpop.permute.xlu0 %1369  ;;  %v16926_v55 = vpop.permute.xlu1 %1357  ;;  %12499 = vmatpush3.bf16.msra.mxu1 %v13031_v51 }
 0x3c9   : > { %19351 = vst [vmem:[#allocation30_spill] sm:$0xff] %v16924_v14  ;;  %13131 = vrcp.f32 %v779_v10  ;;  %v16988_v10 = vmul.f32 %v16852_v56, %v16465_v33  ;;  %v17005_v56 = vmul.f32 %v16777_v5, %v16465_v33  ;;  %v13308_v5 = vld [vmem:[#allocation2 + $0x260] sm:$0xff]  ;;  %v19373_v14 = vld [vmem:[#allocation19_spill] sm:$0xff] }
 0x3ca   : > { %1305 = vrot.lane.b32.xlu0 %v16882_v37, %s13387_s30  ;;  %1297 = vrot.lane.b32.xlu1 %v16902_v7, %s13387_s30 }
 0x3cb   : > { %19360 = vst [vmem:[#allocation44_spill] sm:$0xff] %v16988_v10  ;;  %19363 = vst [vmem:[#allocation48_spill] sm:$0xff] %v17005_v56 }
 0x3cc   : > { %12479 = vmatmul.mubr.msk.bf16.gmra.mrb[76].mxu1 %vm272_vm0, %v13298_v42  ;;  %v16933_v45 = vpop.permute.xlu0 %1031  ;;  %v16935_v49 = vpop.permute.xlu1 %1361 }
 0x3cd   : > { %19352 = vst [vmem:[#allocation28_spill] sm:$0xff] %v16933_v45  ;;  %12482 = vmatprep.mubr.msk.bf16.mxu1 %vm272_vm0, %v13300_v8  ;;  %v13302_v8 = vld [vmem:[#allocation2 + $0x200] sm:$0xff] }
 0x3ce   : > { %1065 = vrot.lane.b32.xlu0 %v877_v48, %s13387_s30  ;;  %1205 = vrot.lane.b32.xlu1 %v16898_v34, %s13386_s26  ;;  %v13126_v48 = vpop.eup %13125 }
 0x3cf   : > { %v867_v51 = vmul.f32 %v16656_v29, %v13126_v48  ;;  %v13306_v48 = vld [vmem:[#allocation2 + $0x248] sm:$0xff] }
 0x3d0   : > { %v16946_v60 = vpop.permute.xlu0 %1277  ;;  %v16948_v42 = vpop.permute.xlu1 %1269 }
 0x3d1   : > { %v13128_v16 = vpop.eup %13127 }
 0x3d2   : > { %1213 = vrot.lane.b32.xlu0 %v16944_v31, %s13386_s26  ;;  %1393 = vrot.lane.b32.xlu1 %v16902_v7, %s13388_s12  ;;  %v13130_v7 = vpop.eup %13129 }
 0x3d4   : > { %12483 = vmatmul.mubr.msk.bf16.gmra.mrb[80].mxu1 %vm272_vm0, %v13302_v8  ;;  %v16958_v59 = vpop.permute.xlu0 %1063  ;;  %v16960_v41 = vpop.permute.xlu1 %1177 }
 0x3d5   : > { %19354 = vst [vmem:[#allocation33_spill] sm:$0xff] %v16958_v59  ;;  %v16962_v12 = vpop.f32.mrb[32].mxu1  ;;  %12486 = vmatprep.mubr.msk.bf16.mxu1 %vm272_vm0, %v13303_v1 }
 0x3d6   : > { %19355 = vst [vmem:[#allocation39_spill] sm:$0xff] %v16962_v12  ;;  %1401 = vrot.lane.b32.xlu0 %v16882_v37, %s13388_s12  ;;  %1301 = vrot.lane.b32.xlu1 %v16898_v34, %s13387_s30  ;;  %v16969_v23 = vpop.f32.mrb[33].mxu1  ;;  %v16978_v12 = vld [vmem:[%s13730_s15 + $0xf8] sm:$0xff]  ;;  %v13305_v34 = vld [vmem:[#allocation2 + $0x230] sm:$0xff] }
 0x3d7   : > { %19356 = vst [vmem:[#allocation38_spill] sm:$0xff] %v16969_v23  ;;  %v16971_v8 = vpop.f32.mrb[34].mxu1  ;;  %v885_v1 = vmul.f32 %v16978_v12, %v13128_v16  ;;  %v787_v23 = vadd.f32 1.0, %v13130_v7 }
 0x3d8   : > { %19357 = vst [vmem:[#allocation41_spill] sm:$0xff] %v16971_v8  ;;  %v16973_v6 = vpop.permute.xlu0 %1185  ;;  %v16975_v59 = vpop.permute.xlu1 %1365  ;;  %v16991_v8 = vmul.f32 %v13299_v9, %v16465_v33 }
 0x3d9   : > { %19358 = vst [vmem:[#allocation40_spill] sm:$0xff] %v16973_v6  ;;  %v16982_v37 = vpop.f32.mrb[35].mxu1  ;;  %13133 = vrcp.f32 %v787_v23  ;;  %v13132_v9 = vpop.eup %13131 }
 0x3da   : > { %19359 = vst [vmem:[#allocation43_spill] sm:$0xff] %v16982_v37  ;;  %1097 = vrot.lane.b32.xlu0 %v885_v1, %s13388_s12  ;;  %1029 = vrot.lane.b32.xlu1 %v867_v51, %s13386_s26  ;;  %19361 = vst [vmem:[#allocation46_spill] sm:$0xff] %v16991_v8  ;;  %v17014_v1 = vld [vmem:[%s18899_s4] ss:$0 sm:$0xff]  ;;  %v19366_v51 = vld [vmem:[#allocation55_spill] sm:$0xff] }
 0x3dc   : > { %12487 = vmatmul.mubr.msk.bf16.gmra.mrb[84].mxu1 %vm272_vm0, %v13305_v34  ;;  %v16994_v16 = vpop.permute.xlu0 %1373  ;;  %v16996_v29 = vpop.permute.xlu1 %1273 }
 0x3dd   : > { %19362 = vst [vmem:[#allocation47_spill] sm:$0xff] %v16994_v16  ;;  %12490 = vmatprep.mubr.msk.bf16.mxu1 %vm272_vm0, %v13306_v48  ;;  %v536_v48 = vadd.f32 %v17014_v1, %v19366_v51  ;;  %v13309_v16 = vld [vmem:[#allocation2 + $0x278] sm:$0xff] }
 0x3de   : > { %1311 = vrot.lane.b32.xlu0 %v16988_v10, %s13387_s30  ;;  %1211 = vrot.lane.b32.xlu1 %v16991_v8, %s13386_s26 }
 0x3df   : > { %v11146_v51 = vmul.f32 -1.442695, %v536_v48 }
 0x3e0   : > { %v17007_v7 = vpop.permute.xlu0 %1095  ;;  %v17009_v34 = vpop.permute.xlu1 %1027 }
 0x3e1   : > { %19364 = vst [vmem:[#allocation49_spill] sm:$0xff] %v17007_v7  ;;  %19365 = vst [vmem:[#allocation51_spill] sm:$0xff] %v17009_v34  ;;  %v875_v34 = vmul.f32 %v16841_v62, %v13132_v9  ;;  %v19368_v7 = vld [vmem:[#allocation54_spill] sm:$0xff]  ;;  %13135 = vpow2.f32 %v11146_v51 }
 0x3e2   : > { %1219 = vrot.lane.b32.xlu0 %v17005_v56, %s13386_s26  ;;  %1399 = vrot.lane.b32.xlu1 %v16845_v21, %s13388_s12  ;;  %v544_v6 = vadd.f32 %v17014_v1, %v19368_v7  ;;  %v547_v21 = vadd.f32 %v17014_v1, %v19369_v43  ;;  %v13310_v43 = vld [vmem:[%s13730_s15 + $0xe8] sm:$0xff] }
 0x3e3   : > { %v13134_v7 = vpop.eup %13133 }
 0x3e4   : > { %12491 = vmatmul.mubr.msk.bf16.gmra.mrb[88].mxu1 %vm272_vm0, %v13308_v5  ;;  %v17023_v23 = vpop.permute.xlu0 %1283  ;;  %v17025_v37 = vpop.permute.xlu1 %1183  ;;  %v19370_v5 = vld [vmem:[#allocation58_spill] sm:$0xff]  ;;  %v11148_v45 = vmul.f32 -1.442695, %v544_v6  ;;  %v11149_v48 = vmul.f32 -1.442695, %v547_v21 }
 0x3e5   : > { %19367 = vst [vmem:[#allocation52_spill] sm:$0xff] %v17023_v23  ;;  %12494 = vmatprep.mubr.msk.bf16.mxu1 %vm272_vm0, %v13309_v16  ;;  %v539_v23 = vadd.f32 %v17014_v1, %v19370_v5  ;;  %v560_v16 = vadd.f32 %v17014_v1, %v19373_v14  ;;  %v883_v14 = vmul.f32 %v13310_v43, %v13134_v7 }
 0x3e6   : > { %1407 = vrot.lane.b32.xlu0 %v16988_v10, %s13388_s12  ;;  %1061 = vrot.lane.b32.xlu1 %v875_v34, %s13387_s30  ;;  %v17050_v34 = vmul.f32 %v13310_v43, %v16465_v33  ;;  %13137 = vpow2.f32 %v11148_v45  ;;  %v19381_v43 = vld [vmem:[#allocation61_spill] sm:$0xff] }
 0x3e7   : > { %v11147_v5 = vmul.f32 -1.442695, %v539_v23  ;;  %v11152_v21 = vmul.f32 -1.442695, %v560_v16  ;;  %13139 = vpow2.f32 %v11149_v48 }
 0x3e8   : > { %v17038_v62 = vpop.permute.xlu0 %1191  ;;  %v17040_v9 = vpop.permute.xlu1 %1371  ;;  %19374 = vst [vmem:[#allocation60_spill] sm:$0xff] %v17050_v34 }
 0x3e9   : > { %19371 = vst [vmem:[#allocation53_spill] sm:$0xff] %v17038_v62  ;;  %19372 = vst [vmem:[#allocation57_spill] sm:$0xff] %v17040_v9  ;;  %v13311_v62 = vld [vmem:[#allocation2 + $0x290] sm:$0xff]  ;;  %13141 = vpow2.f32 %v11147_v5  ;;  %v563_v5 = vadd.f32 %v17014_v1, %v19381_v43 }
 0x3ea   : > { %1315 = vrot.lane.b32.xlu0 %v17005_v56, %s13387_s30  ;;  %1307 = vrot.lane.b32.xlu1 %v16991_v8, %s13387_s30  ;;  %13143 = vpow2.f32 %v11152_v21  ;;  %v17085_v21 = vmul.f32 %v16978_v12, %v16465_v33 }
 0x3eb   : > { %v13136_v45 = vpop.eup %13135 }
 0x3ec   : > { %12495 = vmatmul.mubr.msk.bf16.gmra.mrb[92].mxu1 %vm272_vm0, %v13311_v62  ;;  %v17053_v6 = vpop.permute.xlu0 %1379  ;;  %v17055_v9 = vpop.permute.xlu1 %1059  ;;  %v19378_v62 = vld [vmem:[#allocation59_spill] sm:$0xff]  ;;  %19382 = vst [vmem:[#allocation7_spill] sm:$0xff] %v17085_v21 }
 0x3ed   : > { %19375 = vst [vmem:[#allocation23_spill] sm:$0xff] %v17053_v6  ;;  %19376 = vst [vmem:[#allocation63_spill] sm:$0xff] %v17055_v9  ;;  %v552_v6 = vadd.f32 %v17014_v1, %v19378_v62 }
 0x3ee   : > { %1223 = vrot.lane.b32.xlu0 %v17050_v34, %s13386_s26  ;;  %1093 = vrot.lane.b32.xlu1 %v883_v14, %s13388_s12  ;;  %v13032_v14 = vld [vmem:[%s18897_s2 + $0x38] sm:$0xff]  }
 0x3ef   : > { %v11150_v48 = vmul.f32 -1.442695, %v552_v6  ;;  %v758_v6 = vadd.f32 1.0, %v13136_v45  ;;  %12500 = vmatprep.subr.bf16.mxu1 %v13032_v14 }
 0x3f0   : > { %v17060_v51 = vpop.permute.xlu0 %1287  ;;  %v17062_v23 = vpop.permute.xlu1 %1279  ;;  %12501 = vmatpush3.bf16.msra.mxu1 %v13032_v14 }
 0x3f1   : > { %19377 = vst [vmem:[#allocation26_spill] sm:$0xff] %v17060_v51  ;;  %v13138_v62 = vpop.eup %13137  ;;  %13145 = vpow2.f32 %v11150_v48 }
 0x3f2   : > { %1411 = vrot.lane.b32.xlu0 %v17005_v56, %s13388_s12  ;;  %1215 = vrot.lane.b32.xlu1 %v16988_v10, %s13386_s26  ;;  %v13140_v10 = vpop.eup %13139  ;;  %13147 = vrcp.f32 %v758_v6 }
 0x3f3   : > { %v13142_v9 = vpop.eup %13141  ;;  %v761_v45 = vadd.f32 1.0, %v13140_v10 }
 0x3f4   : > { %v17070_v7 = vpop.permute.xlu0 %1193  ;;  %v17072_v16 = vpop.permute.xlu1 %1091  ;;  %v759_v48 = vadd.f32 1.0, %v13142_v9 }
 0x3f5   : > { %19379 = vst [vmem:[#allocation10_spill] sm:$0xff] %v17070_v7  ;;  %19380 = vst [vmem:[#allocation42_spill] sm:$0xff] %v17072_v16  ;;  %v11153_v16 = vmul.f32 -1.442695, %v563_v5  ;;  %v760_v7 = vadd.f32 1.0, %v13138_v62  ;;  %v13144_v12 = vpop.eup %13143 }
 0x3f6   : > { %1319 = vrot.lane.b32.xlu0 %v17050_v34, %s13387_s30  ;;  %1403 = vrot.lane.b32.xlu1 %v16991_v8, %s13388_s12  ;;  %v13312_v8 = vld [vmem:[%s13730_s15 + $0xd0] sm:$0xff]  ;;  %v764_v5 = vadd.f32 1.0, %v13144_v12 }
 0x3f7   : > { %v17097_v51 = vmul.f32 %v13312_v8, %v16465_v33  ;;  %13149 = vpow2.f32 %v11153_v16  ;;  %v19389_v8 = vld [vmem:[#allocation6_spill] sm:$0xff] }
 0x3f8   : > { %v17087_v43 = vpop.permute.xlu0 %1381  ;;  %v17089_v56 = vpop.permute.xlu1 %1187  ;;  %13151 = vrcp.f32 %v760_v7  ;;  %v555_v6 = vadd.f32 %v17014_v1, %v19389_v8  ;;  %v1549_v7 = vlaneseq  ;;  %v17127_v8 = vmul.f32 %v16699_v63, %v16465_v33 }
 0x3f9   : > { %19383 = vst [vmem:[#allocation65_spill] sm:$0xff] %v17087_v43  ;;  %19384 = vst [vmem:[#allocation62_spill] sm:$0xff] %v17097_v51  ;;  %13153 = vrcp.f32 %v761_v45 }
 0x3fa   : > { %1227 = vrot.lane.b32.xlu0 %v17085_v21, %s13386_s26  ;;  %1309 = vrot.lane.b32.xlu1 %v16944_v31, %s13387_s30  ;;  %13155 = vrcp.f32 %v759_v48  ;;  %19392 = vst [vmem:[#allocation67_spill] sm:$0xff] %v17127_v8 }
 0x3fb   : > { %13157 = vrcp.f32 %v764_v5  ;;  %v13146_v9 = vpop.eup %13145  ;;  %v1550_v5 = vshrl.u32 %v1549_v7, 7 }
 0x3fc   : > { %v17099_v43 = vpop.permute.xlu0 %1025  ;;  %v17101_v14 = vpop.permute.xlu1 %1375  ;;  %v762_v48 = vadd.f32 1.0, %v13146_v9 }
 0x3fd   : > { %19385 = vst [vmem:[#allocation13_spill] sm:$0xff] %v17099_v43  ;;  %19386 = vst [vmem:[#allocation11_spill] sm:$0xff] %v17101_v14  ;;  %v13148_v45 = vpop.eup %13147 }
 0x3fe   : > { %1415 = vrot.lane.b32.xlu0 %v17050_v34, %s13388_s12  ;;  %1217 = vrot.lane.b32.xlu1 %v17097_v51, %s13386_s26  ;;  %v11151_v34 = vmul.f32 -1.442695, %v555_v6 }
 0x400   : > { %v17107_v10 = vpop.permute.xlu0 %1289  ;;  %v17109_v62 = vpop.permute.xlu1 %1281  ;;  %13159 = vpow2.f32 %v11151_v34 }
 0x401   : > { %19387 = vst [vmem:[#allocation45_spill] sm:$0xff] %v17107_v10  ;;  %19388 = vst [vmem:[#allocation18_spill] sm:$0xff] %v17109_v62  ;;  %v13150_v1 = vpop.eup %13149  ;;  %v13313_v10 = vld [vmem:[%s13730_s15] sm:$0xff]  ;;  %13161 = vrcp.f32 %v762_v48  ;;  %v13314_v62 = vld [vmem:[%s13730_s15 + $0x10] sm:$0xff] }
 0x402   : > { %1323 = vrot.lane.b32.xlu0 %v17085_v21, %s13387_s30  ;;  %1405 = vrot.lane.b32.xlu1 %v16944_v31, %s13388_s12  ;;  %v13152_v31 = vpop.eup %13151 }
 0x403   : > { %v13154_v9 = vpop.eup %13153  ;;  %v856_v63 = vmul.f32 %v13314_v62, %v13152_v31  ;;  %v17152_v31 = vsub.s32 1, %v1550_v5  ;;  %v13315_v62 = vld [vmem:[%s13730_s15 + $0x18] sm:$0xff] }
 0x404   : > { %v17117_v16 = vpop.permute.xlu0 %1057  ;;  %v17119_v12 = vpop.permute.xlu1 %1189 }
 0x405   : > { %19390 = vst [vmem:[#allocation27_spill] sm:$0xff] %v17117_v16  ;;  %19391 = vst [vmem:[#allocation8_spill] sm:$0xff] %v17119_v12  ;;  %v854_v16 = vmul.f32 %v13313_v10, %v13148_v45  ;;  %v13156_v12 = vpop.eup %13155  ;;  %v1456_v10 = vsel %vm272_vm0, %v16469_v17, %v16812_v24  ;;  %v17144_v45 = vsub.s32 0, %v1550_v5  ;;  %v1454_v24 = vsel %vm272_vm0, %v16488_v30, %v16824_v25  ;;  %v13316_v25 = vld [vmem:[%s13730_s15 + $0x30] sm:$0xff] }
 0x406   : > { %1419 = vrot.lane.b32.xlu0 %v17085_v21, %s13388_s12  ;;  %1313 = vrot.lane.b32.xlu1 %v17097_v51, %s13387_s30  ;;  %v17134_v21 = vadd.f32 1.0, %v13150_v1  ;;  %v13158_v34 = vpop.eup %13157  ;;  %19397 = vst [vmem:[#allocation9_spill] sm:$0xff] %v17152_v31  ;;  %v17164_v1 = vsub.s32 4, %v1550_v5 }
 0x407   : > { %v1107_v7 = vsel %vm272_vm0, %v854_v16, %v16721_v57  ;;  %19395 = vst [vmem:[#allocation22_spill] sm:$0xff] %v17144_v45  ;;  %v17150_v57 = vsub.s32 2, %v1550_v5 }
 0x408   : > { %v17130_v43 = vpop.permute.xlu0 %1197  ;;  %v17132_v6 = vpop.permute.xlu1 %1377  ;;  %19394 = vst [vmem:[#allocation29_spill] sm:$0xff] %v17134_v21  ;;  %v1116_v14 = vsel %vm1115_vm3, %v1107_v7, %v16756_v40  ;;  %v17155_v40 = vmul.f32 %v13315_v62, %v13154_v9  ;;  %19399 = vst [vmem:[#allocation66_spill] sm:$0xff] %v17164_v1  ;;  %v1109_v7 = vsel %vm272_vm0, %v856_v63, %v16735_v4  ;;  %v17174_v62 = vsub.s32 7, %v1550_v5  ;;  %v13317_v4 = vld [vmem:[%s13730_s15 + $0x8] sm:$0xff] }
 0x409   : > { %19393 = vst [vmem:[#allocation64_spill] sm:$0xff] %v17130_v43  ;;  %v1125_v48 = vsel %vm1124_vm4, %v1116_v14, %v16796_v50  ;;  %19396 = vst [vmem:[#allocation31_spill] sm:$0xff] %v17150_v57  ;;  %v17166_v50 = vsub.s32 3, %v1550_v5  ;;  %v17168_v14 = vsub.s32 5, %v1550_v5  ;;  %v1488_v9 = vsel %vm1115_vm3, %v1456_v10, %v16906_v44 }
 0x40a   : > { %1221 = vrot.lane.b32.xlu1 %v17127_v8, %s13386_s26  ;;  %19400 = vst [vmem:[#allocation68_spill] sm:$0xff] %v17174_v62  ;;  %v1118_v21 = vsel %vm1115_vm3, %v1109_v7, %v16765_v2  ;;  %v17181_v30 = vrot.slane %v1125_v48, %v17144_v45  ;;  %v17184_v43 = vmul.f32 %v13316_v25, %v13158_v34 }
 0x40b   : > { %v17189_v63 = vmul.f32 %v13317_v4, %v13156_v12  ;;  %v1127_v44 = vsel %vm1124_vm4, %v1118_v21, %v16849_v13  ;;  %v17196_v2 = vrot.slane %v1125_v48, %v17150_v57  ;;  %v1576_v10 = vrot.slane %v1125_v48, %v17152_v31 }
 0x40c   : > { %v17157_v16 = vpop.permute.xlu0 %1385  ;;  %v17159_v17 = vpop.permute.xlu1 %1285  ;;  %v1458_v12 = vsel %vm272_vm0, %v16484_v52, %v16822_v58  ;;  %v1455_v13 = vsel %vm272_vm0, %v16497_v27, %v16833_v53  ;;  %v17214_v21 = vrot.slane %v1125_v48, %v17164_v1  ;;  %v17220_v25 = vrot.slane %v1125_v48, %v17168_v14 }
 0x40d   : > { %19398 = vst [vmem:[#allocation34_spill] sm:$0xff] %v17157_v16  ;;  %v17176_v16 = vsub.s32 6, %v1550_v5  ;;  %v1486_v5 = vsel %vm1115_vm3, %v1454_v24, %v16874_v0  ;;  %v17211_v0 = vsel %vm1124_vm4, %v1488_v9, %v16847_v26  ;;  %v17217_v24 = vrot.slane %v1125_v48, %v17166_v50  ;;  %v17228_v27 = vpop.eup %13159 }
 0x40e   : > { %1409 = vrot.lane.b32.xlu1 %v17097_v51, %s13388_s12  ;;  %v17223_v4 = vrot.slane %v1125_v48, %v17174_v62  ;;  %19402 = vst [vmem:[#allocation54_spill] sm:$0xff] %v17228_v27  ;;  %v1453_v58 = vsel %vm272_vm0, %v16473_v3, %v16814_v54  ;;  %v1556_v53 = vrot.slane %v1127_v44, %v17144_v45 }
 0x40f   : > { %v17226_v52 = vrot.slane %v1125_v48, %v17176_v16  ;;  %v17236_v26 = vsel %vm1124_vm4, %v1486_v5, %v16831_v28  ;;  %v17242_v9 = vmul.f32 %v16627_v15, %v16465_v33  ;;  %v17244_v48 = vpop.eup %13161  ;;  %v1490_v51 = vsel %vm1115_vm3, %v1458_v12, %v16863_v20 }
 0x410   : > { %v17199_v7 = vpop.permute.xlu0 %1089  ;;  %v17201_v34 = vpop.permute.xlu1 %1021  ;;  %19401 = vst [vmem:[#allocation55_spill] sm:$0xff] %v17223_v4  ;;  %v1612_v3 = vrot.slane %v1127_v44, %v17150_v57  ;;  %v1487_v54 = vsel %vm1115_vm3, %v1455_v13, %v16887_v19  ;;  %v1590_v28 = vmul.f32 %v1576_v10, %v17211_v0  ;;  %v1580_v4 = vrot.slane %v1127_v44, %v17152_v31 }
 0x411   : > { %19403 = vst [vmem:[#allocation56_spill] sm:$0xff] %v17242_v9  ;;  %v1457_v33 = vsel %vm272_vm0, %v16549_v36, %v16915_v35  ;;  %v17261_v15 = vrot.slane %v1127_v44, %v17164_v1  ;;  %v1644_v20 = vrot.slane %v1127_v44, %v17166_v50  ;;  %v1485_v19 = vsel %vm1115_vm3, %v1453_v58, %v16865_v18 }
 0x412   : > { %1317 = vrot.lane.b32.xlu1 %v17127_v8, %s13387_s30  ;;  %v1566_v12 = vmul.f32 %v17181_v30, %v17236_v26  ;;  %v1459_v13 = vsel %vm272_vm0, %v16560_v22, %v16960_v41  ;;  %v17272_v57 = vrot.slane %v1127_v44, %v17168_v14  ;;  %v17276_v36 = vsel %vm1124_vm4, %v1490_v51, %v16885_v32 }
 0x413   : > { %v1592_v35 = vmul.f32 %v1580_v4, %v17211_v0  ;;  %v17281_v1 = vsel %vm1124_vm4, %v1487_v54, %v16935_v49  ;;  %v17284_v18 = vrot.slane %v1127_v44, %v17174_v62  ;;  %v1460_v22 = vsel %vm272_vm0, %v16520_v39, %v16872_v38 }
 0x414   : > { %v17252_v5 = vpop.permute.xlu0 %1295  ;;  %v17254_v27 = vpop.permute.xlu1 %1195  ;;  %v1598_v41 = vadd.f32 %v1590_v28, %v1566_v12  ;;  %v1489_v32 = vsel %vm1115_vm3, %v1457_v33, %v16948_v42  ;;  %v17294_v51 = vrot.slane %v1127_v44, %v17176_v16  ;;  %v1568_v54 = vmul.f32 %v1556_v53, %v17236_v26 }
 0x415   : > { %v1461_v62 = vsel %vm272_vm0, %v16545_v46, %v16913_v61  ;;  %v17306_v39 = vsel %vm1124_vm4, %v1485_v19, %v16926_v55  ;;  %v1491_v38 = vsel %vm1115_vm3, %v1459_v13, %v16996_v29  ;;  %v1622_v42 = vmul.f32 %v17196_v2, %v17276_v36  ;;  %v19405_v13 = vld [vmem:[#allocation28_spill] sm:$0xff] }
 0x416   : > { %1225 = vrot.lane.b32.xlu1 %v17242_v9, %s13386_s26  ;;  %v1624_v44 = vmul.f32 %v1612_v3, %v17276_v36  ;;  %v1589_v28 = vmul.f32 %v1576_v10, %v17281_v1  ;;  %v1462_v33 = vsel %vm272_vm0, %v16644_v47, %v17025_v37  ;;  %v1492_v46 = vsel %vm1115_vm3, %v1460_v22, %v16904_v11  ;;  %v19404_v47 = vld [vmem:[#allocation30_spill] sm:$0xff] }
 0x417   : > { %v1600_v61 = vadd.f32 %v1592_v35, %v1568_v54  ;;  %v1591_v55 = vmul.f32 %v1580_v4, %v17281_v1  ;;  %v17322_v29 = vsel %vm1124_vm4, %v1489_v32, %v16975_v59  ;;  %v1565_v10 = vmul.f32 %v17181_v30, %v17306_v39  ;;  %v19407_v54 = vld [vmem:[#allocation57_spill] sm:$0xff] }
 0x418   : > { %v17296_v58 = vpop.permute.xlu0 %1203  ;;  %v17298_v49 = vpop.permute.xlu1 %1383  ;;  %v1493_v19 = vsel %vm1115_vm3, %v1461_v62, %v16946_v60  ;;  %v17332_v37 = vsel %vm1124_vm4, %v1491_v38, %v19404_v47  ;;  %v1630_v11 = vadd.f32 %v1622_v42, %v1598_v41  ;;  %v1567_v59 = vmul.f32 %v1556_v53, %v17306_v39  ;;  %v19406_v60 = vld [vmem:[#allocation32_spill] sm:$0xff]  ;;  %v19408_v42 = vld [vmem:[#allocation33_spill] sm:$0xff]  ;;  %v19409_v47 = vld [vmem:[#allocation47_spill] sm:$0xff] }
 0x419   : > { %v1113_v35 = vsel %vm272_vm0, %v17184_v43, %v19405_v13  ;;  %v1494_v30 = vsel %vm1115_vm3, %v1462_v33, %v17062_v23  ;;  %v1464_v62 = vsel %vm272_vm0, %v19406_v60, %v17089_v56  ;;  %v1597_v22 = vadd.f32 %v1589_v28, %v1565_v10  ;;  %v19411_v28 = vld [vmem:[#allocation15_spill] sm:$0xff]  ;;  %v19415_v60 = vld [vmem:[#allocation12_spill] sm:$0xff] }
 0x41a   : > { %1413 = vrot.lane.b32.xlu1 %v17127_v8, %s13388_s12  ;;  %v1621_v41 = vmul.f32 %v17196_v2, %v17322_v29  ;;  %v1623_v32 = vmul.f32 %v1612_v3, %v17322_v29  ;;  %v17352_v53 = vsel %vm1124_vm4, %v1492_v46, %v19407_v54  ;;  %v1599_v38 = vadd.f32 %v1591_v55, %v1567_v59  ;;  %v19410_v3 = vld [vmem:[#allocation53_spill] sm:$0xff]  ;;  %v19412_v46 = vld [vmem:[#allocation52_spill] sm:$0xff]  ;;  %v19413_v10 = vld [vmem:[#allocation11_spill] sm:$0xff] }
 0x41b   : > { %v1122_v43 = vsel %vm1115_vm3, %v1113_v35, %v19408_v42  ;;  %v17358_v23 = vsel %vm1124_vm4, %v1493_v19, %v19409_v47  ;;  %v1653_v56 = vmul.f32 %v17217_v24, %v17332_v37  ;;  %v1655_v2 = vmul.f32 %v1644_v20, %v17332_v37  ;;  %v19414_v35 = vld [vmem:[#allocation40_spill] sm:$0xff]  ;;  %v19416_v42 = vld [vmem:[#allocation49_spill] sm:$0xff] }
 0x41c   : > { %v17334_v12 = vpop.permute.xlu0 %1391  ;;  %v17336_v4 = vpop.permute.xlu1 %1053  ;;  %v1466_v33 = vsel %vm272_vm0, %v19411_v28, %v19410_v3  ;;  %v1496_v55 = vsel %vm1115_vm3, %v1464_v62, %v19412_v46  ;;  %v17372_v59 = vsel %vm1124_vm4, %v1494_v30, %v19413_v10  ;;  %v1463_v54 = vsel %vm272_vm0, %v19415_v60, %v19414_v35  ;;  %v19417_v35 = vld [vmem:[#allocation26_spill] sm:$0xff] }
 0x41d   : > { %v17379_v47 = vsel %vm1124_vm4, %v1122_v43, %v19416_v42  ;;  %v1632_v8 = vadd.f32 %v1624_v44, %v1600_v61  ;;  %v1654_v3 = vmul.f32 %v17217_v24, %v17352_v53  ;;  %v1629_v28 = vadd.f32 %v1621_v41, %v1597_v22  ;;  %v19418_v43 = vld [vmem:[#allocation23_spill] sm:$0xff] }
 0x41e   : > { %1321 = vrot.lane.b32.xlu1 %v17242_v9, %s13387_s30  ;;  %v1631_v62 = vadd.f32 %v1623_v32, %v1599_v38  ;;  %v1685_v30 = vmul.f32 %v17214_v21, %v17358_v23  ;;  %v1656_v46 = vmul.f32 %v1644_v20, %v17352_v53  ;;  %v17388_v10 = vmul.f32 %v17261_v15, %v17358_v23 }
 0x41f   : > { %v1498_v60 = vsel %vm1115_vm3, %v1466_v33, %v19417_v35  ;;  %v17394_v44 = vsel %vm1124_vm4, %v1496_v55, %v19418_v43  ;;  %v1686_v24 = vmul.f32 %v17214_v21, %v17372_v59  ;;  %v1661_v61 = vadd.f32 %v1653_v56, %v1629_v28  ;;  %v19420_v55 = vld [vmem:[#allocation18_spill] sm:$0xff]  ;;  %v19421_v56 = vld [vmem:[#allocation8_spill] sm:$0xff] }
 0x420   : > { %v1300_v19 = vpop.permute.xlu0 %1299  ;;  %v1292_v13 = vpop.permute.xlu1 %1291  ;;  %19419 = vst [vmem:[#allocation58_spill] sm:$0xff] %v17394_v44  ;;  %v1663_v22 = vadd.f32 %v1655_v2, %v1631_v62  ;;  %v17402_v20 = vrot.slane %v17379_v47, %v17144_v45  ;;  %v1688_v41 = vmul.f32 %v17261_v15, %v17372_v59  ;;  %v17410_v33 = vrot.slane %v17379_v47, %v17152_v31  ;;  %v19422_v2 = vld [vmem:[#allocation14_spill] sm:$0xff]  ;;  %v19423_v15 = vld [vmem:[#allocation13_spill] sm:$0xff] }
 0x421   : > { %v1662_v21 = vadd.f32 %v1654_v3, %v1630_v11  ;;  %v1495_v42 = vsel %vm1115_vm3, %v1463_v54, %v19420_v55  ;;  %v1465_v28 = vsel %vm272_vm0, %v19422_v2, %v19421_v56  ;;  %v1664_v62 = vadd.f32 %v1656_v46, %v1632_v8  ;;  %v19424_v3 = vld [vmem:[#allocation27_spill] sm:$0xff]  ;;  %v19425_v8 = vld [vmem:[#allocation17_spill] sm:$0xff] }
 0x422   : > { %1417 = vrot.lane.b32.xlu1 %v17242_v9, %s13388_s12  ;;  %v1718_v35 = vmul.f32 %v17220_v25, %v17394_v44  ;;  %v1110_v43 = vsel %vm272_vm0, %v17155_v40, %v19423_v15  ;;  %v17424_v9 = vsel %vm1124_vm4, %v1498_v60, %v17298_v49  ;;  %v1720_v11 = vmul.f32 %v17272_v57, %v17394_v44  ;;  %v19429_v15 = vld [vmem:[#allocation37_spill] sm:$0xff] }
 0x423   : > { %v1694_v54 = vadd.f32 %v1686_v24, %v1662_v21  ;;  %v1119_v55 = vsel %vm1115_vm3, %v1110_v43, %v19424_v3  ;;  %v1468_v46 = vsel %vm272_vm0, %v19425_v8, %v17254_v27  ;;  %v1696_v56 = vadd.f32 %v1688_v41, %v1664_v62  ;;  %v19426_v27 = vld [vmem:[#allocation50_spill] sm:$0xff] }
 0x424   : > { %v17406_v32 = vpop.permute.xlu0 %1207  ;;  %v1086_v38 = vpop.permute.xlu1 %1085  ;;  %v17435_v2 = vsel %vm1124_vm4, %v1495_v42, %v17132_v6  ;;  %v1497_v40 = vsel %vm1115_vm3, %v1465_v28, %v17159_v17  ;;  %v17441_v49 = vsel %vm1124_vm4, %v1119_v55, %v17199_v7  ;;  %v1108_v21 = vsel %vm272_vm0, %v17189_v63, %v17201_v34  ;;  %v19427_v42 = vld [vmem:[#allocation16_spill] sm:$0xff]  ;;  %v19428_v34 = vld [vmem:[#allocation10_spill] sm:$0xff] }
 0x425   : > { %v1472_v41 = vsel %vm272_vm0, %v19426_v27, %v17296_v58  ;;  %v1750_v6 = vmul.f32 %v17226_v52, %v17424_v9  ;;  %v1752_v7 = vmul.f32 %v17294_v51, %v17424_v9  ;;  %v1117_v28 = vsel %vm1115_vm3, %v1108_v21, %v17336_v4 }
 0x426   : > { %v1500_v62 = vsel %vm1115_vm3, %v1468_v46, %v1292_v13  ;;  %v1467_v58 = vsel %vm272_vm0, %v19429_v15, %v19428_v34  ;;  %v1693_v43 = vadd.f32 %v1685_v30, %v1661_v61  ;;  %v1726_v3 = vadd.f32 %v1718_v35, %v1694_v54 }
 0x427   : > { %v17464_v55 = vsel %vm1124_vm4, %v1117_v28, %v1086_v38  ;;  %v1717_v8 = vmul.f32 %v17220_v25, %v17435_v2  ;;  %v1728_v13 = vadd.f32 %v1720_v11, %v1696_v56  ;;  %v1504_v46 = vsel %vm1115_vm3, %v1472_v41, %v1300_v19  ;;  %v19433_v19 = vld [vmem:[#allocation55_spill] sm:$0xff] }
 0x428   : > { %v1396_v60 = vpop.permute.xlu0 %1395  ;;  %v1200_v24 = vpop.permute.xlu1 %1199  ;;  %v1758_v27 = vadd.f32 %v1750_v6, %v1726_v3  ;;  %v1804_v30 = vrot.slane %v17441_v49, %v17144_v45  ;;  %v1800_v35 = vrot.slane %v17464_v55, %v17144_v45  ;;  %v1719_v56 = vmul.f32 %v17272_v57, %v17435_v2 }
 0x429   : > { %v1470_v17 = vsel %vm272_vm0, %v19427_v42, %v1200_v24  ;;  %v19430_v24 = vld [vmem:[#allocation65_spill] sm:$0xff]  ;;  %v1760_v38 = vadd.f32 %v1752_v7, %v1728_v13  ;;  %v17501_v41 = vrot.slane %v17464_v55, %v17152_v31  ;;  %v1695_v34 = vadd.f32 %v17388_v10, %v1663_v22 }
 0x42a   : > { %v1502_v63 = vsel %vm1115_vm3, %v1470_v17, %v17252_v5  ;;  %v17470_v4 = vsel %vm1124_vm4, %v1497_v40, %v19430_v24  ;;  %v17497_v40 = vsel %vm1124_vm4, %v1504_v46, %v1396_v60  ;;  %v1571_v10 = vmul.f32 %v17402_v20, %v17306_v39 }
 0x42b   : > { %19431 = vst [vmem:[#allocation19_spill] sm:$0xff] %v17470_v4  ;;  %v17479_v61 = vsel %vm1124_vm4, %v1502_v63, %v17334_v12  ;;  %v17494_v12 = vrot.slane %v17441_v49, %v17152_v31  ;;  %v1749_v60 = vmul.f32 %v17226_v52, %v17470_v4  ;;  %v1751_v15 = vmul.f32 %v17294_v51, %v17470_v4 }
 0x42c   : > { %v17473_v5 = vpop.permute.xlu0 %1303  ;;  %v1388_v21 = vpop.permute.xlu1 %1387  ;;  %v1814_v6 = vmul.f32 %v1800_v35, %v17479_v61  ;;  %v1816_v42 = vmul.f32 %v1804_v30, %v17479_v61  ;;  %v1846_v3 = vmul.f32 %v17501_v41, %v17497_v40  ;;  %v1595_v52 = vmul.f32 %v17410_v33, %v17281_v1 }
 0x42d   : > { %19432 = vst [vmem:[#allocation59_spill] sm:$0xff] %v17473_v5  ;;  %v17482_v25 = vsel %vm1124_vm4, %v1500_v62, %v1388_v21  ;;  %v19434_v62 = vld [vmem:[#allocation45_spill] sm:$0xff]  ;;  %v1848_v24 = vmul.f32 %v17494_v12, %v17497_v40  ;;  %v19435_v21 = vld [vmem:[#allocation64_spill] sm:$0xff]  ;;  %v1725_v22 = vadd.f32 %v1717_v8, %v1693_v43  ;;  %v1727_v51 = vadd.f32 %v1719_v56, %v1695_v34  ;;  %v19442_v34 = vld [vmem:[#allocation54_spill] sm:$0xff] }
 0x42e   : > { %v1782_v11 = vmul.f32 %v19433_v19, %v17482_v25  ;;  %v1784_v54 = vmul.f32 %v17284_v18, %v17482_v25  ;;  %v1499_v63 = vsel %vm1115_vm3, %v1467_v58, %v19434_v62 }
 0x42f   : > { %v1757_v43 = vadd.f32 %v1749_v60, %v1725_v22  ;;  %v1759_v8 = vadd.f32 %v1751_v15, %v1727_v51  ;;  %v1596_v22 = vmul.f32 %v17410_v33, %v17211_v0  ;;  %v19445_v51 = vld [vmem:[#allocation42_spill] sm:$0xff] }
 0x430   : > { %v1790_v17 = vadd.f32 %v1782_v11, %v1758_v27  ;;  %v1792_v7 = vadd.f32 %v1784_v54, %v1760_v38  ;;  %v17505_v28 = vpop.permute.xlu0 %1209  ;;  %v1294_v57 = vpop.permute.xlu1 %1293  ;;  %v19436_v27 = vld [vmem:[#allocation36_spill] sm:$0xff] }
 0x431   : > { %v1469_v58 = vsel %vm272_vm0, %v19436_v27, %v19435_v21  ;;  %v19441_v27 = vld [vmem:[#allocation34_spill] sm:$0xff] }
 0x432   : > { %v1822_v13 = vadd.f32 %v1814_v6, %v1790_v17  ;;  %v1824_v46 = vadd.f32 %v1816_v42, %v1792_v7  ;;  %v19439_v6 = vld [vmem:[#allocation29_spill] sm:$0xff]  ;;  %v13318_v42 = vld [vmem:[%s13730_s15 + $0x20] sm:$0xff]  ;;  %v19440_v7 = vld [vmem:[#allocation31_spill] sm:$0xff]  ;;  %v17538_v5 = vsel %vm1124_vm4, %v1499_v63, %v19441_v27  ;;  %v1501_v56 = vsel %vm1115_vm3, %v1469_v58, %v1294_v57 }
 0x433   : > { %13163 = vrcp.f32 %v19439_v6  ;;  %v858_v17 = vmul.f32 %v13318_v42, %v17244_v48  ;;  %v1620_v21 = vrot.slane %v17379_v47, %v19440_v7  ;;  %v1603_v48 = vadd.f32 %v1595_v52, %v1571_v10  ;;  %v19444_v42 = vld [vmem:[#allocation63_spill] sm:$0xff] }
 0x434   : > { %v17525_v38 = vpop.permute.xlu0 %1397  ;;  %v1202_v11 = vpop.permute.xlu1 %1201  ;;  %v17527_v54 = vadd.f32 %v1846_v3, %v1822_v13  ;;  %v17529_v62 = vadd.f32 %v1848_v24, %v1824_v46  ;;  %v763_v3 = vadd.f32 1.0, %v19442_v34  ;;  %v19443_v24 = vld [vmem:[#allocation51_spill] sm:$0xff]  ;;  %v1652_v46 = vrot.slane %v17379_v47, %v17166_v50  ;;  %v19446_v34 = vld [vmem:[#allocation66_spill] sm:$0xff] }
 0x435   : > { %v1111_v13 = vsel %vm272_vm0, %v858_v17, %v19443_v24  ;;  %v1572_v6 = vmul.f32 %v17402_v20, %v17236_v26  ;;  %v1781_v60 = vmul.f32 %v19433_v19, %v17538_v5  ;;  %v1783_v57 = vmul.f32 %v17284_v18, %v17538_v5 }
 0x436   : > { %19437 = vst [vmem:[#allocation61_spill] sm:$0xff] %v17527_v54  ;;  %19438 = vst [vmem:[#allocation6_spill] sm:$0xff] %v17529_v62  ;;  %v1120_v63 = vsel %vm1115_vm3, %v1111_v13, %v19444_v42  ;;  %v1627_v20 = vmul.f32 %v1620_v21, %v17322_v29  ;;  %v1684_v24 = vrot.slane %v17379_v47, %v19446_v34  ;;  %13165 = vrcp.f32 %v763_v3 }
 0x437   : > { %v17560_v10 = vsel %vm1124_vm4, %v1120_v63, %v19445_v51  ;;  %v1789_v17 = vadd.f32 %v1781_v60, %v1757_v43  ;;  %v1791_v19 = vadd.f32 %v1783_v57, %v1759_v8  ;;  %v1604_v43 = vadd.f32 %v1596_v22, %v1572_v6  ;;  %v19447_v57 = vld [vmem:[#allocation24_spill] sm:$0xff] }
 0x438   : > { %v17554_v15 = vpop.permute.xlu0 %1033  ;;  %v1390_v58 = vpop.permute.xlu1 %1389  ;;  %v1635_v13 = vadd.f32 %v1627_v20, %v1603_v48  ;;  %v1560_v33 = vrot.slane %v17560_v10, %v17144_v45  ;;  %v1584_v42 = vrot.slane %v17560_v10, %v17152_v31  ;;  %v1659_v8 = vmul.f32 %v1652_v46, %v17332_v37 }
 0x439   : > { %v17564_v52 = vsel %vm1124_vm4, %v1501_v56, %v1390_v58  ;;  %v1660_v48 = vmul.f32 %v1652_v46, %v17352_v53  ;;  %v1471_v20 = vsel %vm272_vm0, %v19447_v57, %v1202_v11  ;;  %v1691_v22 = vmul.f32 %v1684_v24, %v17358_v23 }
 0x43a   : > { %v1813_v27 = vmul.f32 %v1800_v35, %v17564_v52  ;;  %v1815_v18 = vmul.f32 %v1804_v30, %v17564_v52  ;;  %v1628_v30 = vmul.f32 %v1620_v21, %v17276_v36  ;;  %v1667_v60 = vadd.f32 %v1659_v8, %v1635_v13  ;;  %v19448_v8 = vld [vmem:[#allocation68_spill] sm:$0xff] }
 0x43b   : > { %v1593_v6 = vmul.f32 %v1584_v42, %v17281_v1  ;;  %v1570_v21 = vmul.f32 %v1560_v33, %v17236_v26  ;;  %v1594_v46 = vmul.f32 %v1584_v42, %v17211_v0  ;;  %v1692_v13 = vmul.f32 %v1684_v24, %v17372_v59 }
 0x43c   : > { %v1821_v63 = vadd.f32 %v1813_v27, %v1789_v17  ;;  %v1823_v51 = vadd.f32 %v1815_v18, %v1791_v19  ;;  %v1306_v56 = vpop.permute.xlu0 %1305  ;;  %v1298_v58 = vpop.permute.xlu1 %1297  ;;  %v1616_v17 = vrot.slane %v17560_v10, %v19440_v7  ;;  %v1569_v19 = vmul.f32 %v1560_v33, %v17306_v39  ;;  %v13319_v39 = vld [vmem:[%s13730_s15 + $0x38] sm:$0xff] }
 0x43d   : > { %v13164_v35 = vpop.eup %13163  ;;  %v1636_v18 = vadd.f32 %v1628_v30, %v1604_v43  ;;  %v1716_v11 = vrot.slane %v17379_v47, %v17168_v14  ;;  %v1780_v57 = vrot.slane %v17379_v47, %v19448_v8  ;;  %v1503_v1 = vsel %vm1115_vm3, %v1471_v20, %v1298_v58 }
 0x43e   : > { %v861_v62 = vmul.f32 %v13319_v39, %v13164_v35  ;;  %v17595_v43 = vrot.slane %v17560_v10, %v17166_v50  ;;  %v1699_v26 = vadd.f32 %v1691_v22, %v1667_v60  ;;  %v1748_v0 = vrot.slane %v17379_v47, %v17176_v16  ;;  %v19450_v22 = vld [vmem:[#allocation20_spill] sm:$0xff] }
 0x43f   : > { %v1668_v54 = vadd.f32 %v1660_v48, %v1636_v18  ;;  %v17600_v24 = vmul.f32 %v1616_v17, %v17276_v36  ;;  %v17604_v33 = vrot.slane %v17560_v10, %v19446_v34  ;;  %v1601_v42 = vadd.f32 %v1593_v6, %v1569_v19  ;;  %v19455_v34 = vld [vmem:[#allocation41_spill] sm:$0xff] }
 0x440   : > { %v1066_v3 = vpop.permute.xlu0 %1065  ;;  %v1206_v27 = vpop.permute.xlu1 %1205  ;;  %v1625_v35 = vmul.f32 %v1616_v17, %v17322_v29  ;;  %v17609_v48 = vadd.f32 %v1594_v46, %v1570_v21  ;;  %v1723_v60 = vmul.f32 %v1716_v11, %v17435_v2  ;;  %v1475_v18 = vsel %vm272_vm0, %v19450_v22, %v17505_v28  ;;  %v19451_v17 = vld [vmem:[#allocation39_spill] sm:$0xff] }
 0x441   : > { %v1700_v20 = vadd.f32 %v1692_v13, %v1668_v54  ;;  %v1724_v21 = vmul.f32 %v1716_v11, %v17394_v44  ;;  %v1755_v46 = vmul.f32 %v1748_v0, %v17470_v4  ;;  %v19453_v13 = vld [vmem:[#allocation25_spill] sm:$0xff]  ;;  %v17632_v22 = vpop.eup %13165  ;;  %v1507_v8 = vsel %vm1115_vm3, %v1475_v18, %v1306_v56  ;;  %v19456_v4 = vld [vmem:[#allocation43_spill] sm:$0xff] }
 0x442   : > { %v1473_v39 = vsel %vm272_vm0, %v19453_v13, %v1206_v27  ;;  %v1731_v11 = vadd.f32 %v1723_v60, %v1699_v26  ;;  %v1756_v13 = vmul.f32 %v1748_v0, %v17424_v9  ;;  %v1788_v26 = vmul.f32 %v1780_v57, %v17482_v25 }
 0x443   : > { %v1732_v44 = vadd.f32 %v1724_v21, %v1700_v20  ;;  %v1114_v56 = vsel %vm272_vm0, %v861_v62, %v17554_v15 }
 0x444   : > { %v17607_v58 = vpop.permute.xlu0 %1213  ;;  %v1394_v30 = vpop.permute.xlu1 %1393  ;;  %v1123_v0 = vsel %vm1115_vm3, %v1114_v56, %v1066_v3 }
 0x445   : > { %19449 = vst [vmem:[#allocation30_spill] sm:$0xff] %v17607_v58  ;;  %v17613_v47 = vsel %vm1124_vm4, %v1503_v1, %v1394_v30  ;;  %v12432_v36 = vpop.f32.mrb[96].mxu0  ;;  %v19454_v1 = vld [vmem:[#allocation38_spill] sm:$0xff]  ;;  %v1764_v3 = vadd.f32 %v1756_v13, %v1732_v44 }
 0x446   : > { %v1845_v19 = vmul.f32 %v17501_v41, %v17613_v47  ;;  %v1847_v29 = vmul.f32 %v17494_v12, %v17613_v47  ;;  %v17623_v6 = vadd.f32 %v12432_v36, %v19451_v17  ;;  %v8984_v54 = vpop.f32.mrb[97].mxu0  ;;  %v1633_v41 = vadd.f32 %v1625_v35, %v1601_v42 }
 0x447   : > { %v17630_v30 = vadd.f32 %v8984_v54, %v19454_v1  ;;  %v12433_v28 = vpop.f32.mrb[98].mxu0  ;;  %v1864_v42 = vrot.slane %v17464_v55, %v19440_v7 }
 0x448   : > { %19452 = vst [vmem:[#allocation28_spill] sm:$0xff] %v17623_v6  ;;  %v1853_v58 = vadd.f32 %v1845_v19, %v1821_v63  ;;  %v1855_v12 = vadd.f32 %v1847_v29, %v1823_v51  ;;  %v17635_v36 = vadd.f32 %v12433_v28, %v19455_v34  ;;  %v8987_v17 = vpop.f32.mrb[99].mxu0  ;;  %v1402_v6 = vpop.permute.xlu0 %1401  ;;  %v1868_v63 = vrot.slane %v17441_v49, %v19440_v7 }
 0x449   : > { %v17639_v27 = vadd.f32 %v8987_v17, %v19456_v4  ;;  %v1302_v54 = vpop.permute.xlu1 %1301  ;;  %v1763_v51 = vadd.f32 %v1755_v46, %v1731_v11  ;;  %v17656_v35 = vsel %vm1124_vm4, %v1507_v8, %v1402_v6  ;;  %v1787_v19 = vmul.f32 %v1780_v57, %v17538_v5  ;;  %v19458_v46 = vld [vmem:[#allocation21_spill] sm:$0xff] }
 0x44a   : > { %v1505_v34 = vsel %vm1115_vm3, %v1473_v39, %v1302_v54  ;;  %v17663_v29 = vrot.slane %v17441_v49, %v17166_v50  ;;  %v1474_v39 = vsel %vm272_vm0, %v19458_v46, %v17406_v32  ;;  %v1796_v17 = vadd.f32 %v1788_v26, %v1764_v3 }
 0x44b   : > { %19457 = vst [vmem:[#allocation32_spill] sm:$0xff] %v17639_v27  ;;  %v17652_v4 = vsel %vm1124_vm4, %v1505_v34, %v17525_v38  ;;  %v17667_v38 = vrot.slane %v17464_v55, %v17166_v50  ;;  %v1795_v57 = vadd.f32 %v1787_v19, %v1763_v51  ;;  %v1657_v54 = vmul.f32 %v17595_v43, %v17332_v37 }
 0x44c   : > { %v1877_v20 = vmul.f32 %v1864_v42, %v17652_v4  ;;  %v1879_v60 = vmul.f32 %v1868_v63, %v17652_v4  ;;  %v1098_v18 = vpop.permute.xlu0 %1097  ;;  %v1911_v32 = vmul.f32 %v17663_v29, %v17656_v35  ;;  %v1634_v37 = vadd.f32 %v17600_v24, %v17609_v48 }
 0x44d   : > { %v17670_v62 = vsel %vm1124_vm4, %v1123_v0, %v1098_v18  ;;  %v17672_v15 = vpop.permute.xlu1 %1029  ;;  %v1909_v1 = vmul.f32 %v17667_v38, %v17656_v35  ;;  %v1665_v3 = vadd.f32 %v1657_v54, %v1633_v41  ;;  %v1689_v24 = vmul.f32 %v17604_v33, %v17358_v23 }
 0x44e   : > { %v1885_v8 = vadd.f32 %v1877_v20, %v1853_v58  ;;  %v1887_v6 = vadd.f32 %v1879_v60, %v1855_v12  ;;  %v1812_v21 = vrot.slane %v17670_v62, %v17144_v45  ;;  %v1844_v28 = vrot.slane %v17670_v62, %v17152_v31  ;;  %v19459_v60 = vld [vmem:[#allocation59_spill] sm:$0xff] }
 0x44f   : > { %v1876_v58 = vrot.slane %v17670_v62, %v19440_v7  ;;  %v17697_v34 = vrot.slane %v17670_v62, %v17166_v50  ;;  %v1506_v18 = vsel %vm1115_vm3, %v1474_v39, %v19459_v60  ;;  %v1697_v54 = vadd.f32 %v1689_v24, %v1665_v3 }
 0x450   : > { %v17683_v11 = vpop.permute.xlu0 %1311  ;;  %v1820_v44 = vmul.f32 %v1812_v21, %v17479_v61  ;;  %v1819_v12 = vmul.f32 %v1812_v21, %v17564_v52  ;;  %v17699_v51 = vadd.f32 %v1909_v1, %v1885_v8  ;;  %v1852_v56 = vmul.f32 %v1844_v28, %v17497_v40 }
 0x451   : > { %v17693_v13 = vpop.permute.xlu1 %1211  ;;  %v1851_v20 = vmul.f32 %v1844_v28, %v17613_v47  ;;  %v17707_v19 = vadd.f32 %v1911_v32, %v1887_v6  ;;  %v1883_v8 = vmul.f32 %v1876_v58, %v17652_v4  ;;  %v1712_v1 = vrot.slane %v17560_v10, %v17168_v14 }
 0x452   : > { %v1828_v26 = vadd.f32 %v1820_v44, %v1796_v17  ;;  %v1827_v0 = vadd.f32 %v1819_v12, %v1795_v57  ;;  %v1658_v57 = vmul.f32 %v17595_v43, %v17352_v53  ;;  %v1744_v6 = vrot.slane %v17560_v10, %v17176_v16 }
 0x453   : > { %v1915_v28 = vmul.f32 %v17697_v34, %v17656_v35  ;;  %v1721_v17 = vmul.f32 %v1712_v1, %v17435_v2  ;;  %v1690_v12 = vmul.f32 %v17604_v33, %v17372_v59  ;;  %v19462_v2 = vld [vmem:[#allocation6_spill] sm:$0xff]  ;;  %v19463_v59 = vld [vmem:[#allocation68_spill] sm:$0xff] }
 0x454   : > { %v1220_v21 = vpop.permute.xlu0 %1219  ;;  %v1860_v46 = vadd.f32 %v1852_v56, %v1828_v26  ;;  %v1859_v27 = vadd.f32 %v1851_v20, %v1827_v0  ;;  %v1666_v23 = vadd.f32 %v1658_v57, %v1634_v37  ;;  %v19461_v0 = vld [vmem:[#allocation61_spill] sm:$0xff]  ;;  %v1776_v33 = vrot.slane %v17560_v10, %v19463_v59  ;;  %v19464_v57 = vld [vmem:[#allocation58_spill] sm:$0xff] }
 0x455   : > { %v1400_v48 = vpop.permute.xlu1 %1399  ;;  %v1729_v37 = vadd.f32 %v1721_v17, %v1697_v54  ;;  %v1722_v24 = vmul.f32 %v1712_v1, %v19464_v57 }
 0x456   : > { %v17719_v41 = vsel %vm1124_vm4, %v1506_v18, %v1400_v48  ;;  %v1891_v39 = vadd.f32 %v1883_v8, %v1859_v27  ;;  %v19460_v27 = vld [vmem:[#allocation19_spill] sm:$0xff]  ;;  %v1698_v60 = vadd.f32 %v1690_v12, %v1666_v23  ;;  %v1754_v48 = vmul.f32 %v1744_v6, %v17424_v9 }
 0x457   : > { %v1878_v44 = vmul.f32 %v1864_v42, %v17719_v41  ;;  %v1880_v53 = vmul.f32 %v1868_v63, %v17719_v41  ;;  %v1884_v43 = vmul.f32 %v1876_v58, %v17719_v41  ;;  %v1753_v56 = vmul.f32 %v1744_v6, %v19460_v27 }
 0x458   : > { %v1408_v32 = vpop.permute.xlu0 %1407  ;;  %v17729_v26 = vadd.f32 %v1915_v28, %v1891_v39  ;;  %v13320_v39 = vld [vmem:[%s13730_s15 + $0x28] sm:$0xff]  ;;  %v17755_v9 = vrot.slane %v17441_v49, %v17168_v14  ;;  %v17771_v27 = vrot.slane %v17464_v55, %v17168_v14 }
 0x459   : > { %v17733_v20 = vadd.f32 %v1878_v44, %v19461_v0  ;;  %v17736_v42 = vadd.f32 %v1880_v53, %v19462_v2  ;;  %v17738_v63 = vadd.f32 %v1884_v43, %v1860_v46  ;;  %v1062_v58 = vpop.permute.xlu1 %1061  ;;  %v1761_v3 = vadd.f32 %v1753_v56, %v1729_v37  ;;  %v19465_v43 = vld [vmem:[#allocation48_spill] sm:$0xff] }
 0x45a   : > { %v859_v28 = vmul.f32 %v13320_v39, %v17632_v22  ;;  %v1785_v44 = vmul.f32 %v1776_v33, %v17538_v5  ;;  %v1730_v46 = vadd.f32 %v1722_v24, %v1698_v60  ;;  %v1786_v53 = vmul.f32 %v1776_v33, %v17482_v25  ;;  %v19466_v25 = vld [vmem:[#allocation66_spill] sm:$0xff] }
 0x45b   : > { %v1480_v10 = vsel %vm272_vm0, %v19465_v43, %v1220_v21  ;;  %v17762_v6 = vrot.slane %v17441_v49, %v19466_v25  ;;  %v17783_v60 = vrot.slane %v17464_v55, %v19466_v25  ;;  %v19467_v33 = vld [vmem:[#allocation46_spill] sm:$0xff] }
 0x45c   : > { %v1316_v18 = vpop.permute.xlu0 %1315  ;;  %v1112_v17 = vsel %vm272_vm0, %v859_v28, %v17672_v15  ;;  %v1793_v12 = vadd.f32 %v1785_v44, %v1761_v3  ;;  %v1762_v22 = vadd.f32 %v1754_v48, %v1730_v46  ;;  %v17766_v15 = vrot.slane %v17441_v49, %v17176_v16  ;;  %v19468_v28 = vld [vmem:[#allocation60_spill] sm:$0xff] }
 0x45d   : > { %v1308_v8 = vpop.permute.xlu1 %1307  ;;  %v1121_v1 = vsel %vm1115_vm3, %v1112_v17, %v1062_v58  ;;  %v1512_v21 = vsel %vm1115_vm3, %v1480_v10, %v1316_v18  ;;  %v17779_v58 = vrot.slane %v17670_v62, %v17168_v14  ;;  %v17787_v18 = vrot.slane %v17464_v55, %v17176_v16  ;;  %v19469_v17 = vld [vmem:[#allocation44_spill] sm:$0xff] }
 0x45e   : > { %v1794_v2 = vadd.f32 %v1786_v53, %v1762_v22  ;;  %v1476_v3 = vsel %vm272_vm0, %v19467_v33, %v17693_v13  ;;  %v17801_v53 = vrot.slane %v17670_v62, %v19466_v25 }
 0x460   : > { %v1224_v23 = vpop.permute.xlu0 %1223 }
 0x461   : > { %v1094_v54 = vpop.permute.xlu1 %1093  ;;  %v1482_v44 = vsel %vm272_vm0, %v19468_v28, %v1224_v23 }
 0x462   : > { %v17758_v5 = vsel %vm1124_vm4, %v1121_v1, %v1094_v54 }
 0x463   : > { %v1808_v56 = vrot.slane %v17758_v5, %v17144_v45  ;;  %v1840_v0 = vrot.slane %v17758_v5, %v17152_v31  ;;  %v1872_v48 = vrot.slane %v17758_v5, %v19440_v7  ;;  %v1904_v13 = vrot.slane %v17758_v5, %v17166_v50 }
 0x464   : > { %v1412_v37 = vpop.permute.xlu0 %1411  ;;  %v17811_v23 = vrot.slane %v17758_v5, %v17168_v14  ;;  %v17815_v54 = vrot.slane %v17758_v5, %v19466_v25 }
 0x465   : > { %v1216_v57 = vpop.permute.xlu1 %1215  ;;  %v1818_v24 = vmul.f32 %v1808_v56, %v17479_v61  ;;  %v1817_v39 = vmul.f32 %v1808_v56, %v17564_v52  ;;  %v1544_v46 = vsel %vm1124_vm4, %v1512_v21, %v1412_v37  ;;  %v1850_v10 = vmul.f32 %v1840_v0, %v17497_v40 }
 0x466   : > { %v1478_v61 = vsel %vm272_vm0, %v19469_v17, %v1216_v57  ;;  %v1508_v52 = vsel %vm1115_vm3, %v1476_v3, %v1308_v8  ;;  %v1882_v40 = vmul.f32 %v1872_v48, %v17719_v41  ;;  %v1849_v8 = vmul.f32 %v1840_v0, %v17613_v47 }
 0x467   : > { %v1826_v43 = vadd.f32 %v1818_v24, %v1794_v2  ;;  %v1825_v1 = vadd.f32 %v1817_v39, %v1793_v12  ;;  %v1510_v22 = vsel %vm1115_vm3, %v1478_v61, %v17683_v11  ;;  %v1974_v37 = vmul.f32 %v17771_v27, %v1544_v46 }
 0x468   : > { %v1320_v21 = vpop.permute.xlu0 %1319  ;;  %v1542_v56 = vsel %vm1124_vm4, %v1510_v22, %v1408_v32  ;;  %v1881_v3 = vmul.f32 %v1872_v48, %v17652_v4  ;;  %v1913_v57 = vmul.f32 %v1904_v13, %v17656_v35 }
 0x469   : > { %v1858_v2 = vadd.f32 %v1850_v10, %v1826_v43  ;;  %v1404_v12 = vpop.permute.xlu1 %1403  ;;  %v1514_v33 = vsel %vm1115_vm3, %v1482_v44, %v1320_v21  ;;  %v1942_v24 = vmul.f32 %v17783_v60, %v1542_v56  ;;  %v1857_v32 = vadd.f32 %v1849_v8, %v1825_v1  ;;  %v19471_v8 = vld [vmem:[#allocation35_spill] sm:$0xff] }
 0x46a   : > { %v1540_v39 = vsel %vm1124_vm4, %v1508_v52, %v1404_v12  ;;  %v1944_v44 = vmul.f32 %v17762_v6, %v1542_v56  ;;  %v1946_v4 = vmul.f32 %v17815_v54, %v1542_v56  ;;  %v1948_v35 = vmul.f32 %v17801_v53, %v1542_v56  ;;  %v19470_v12 = vld [vmem:[#allocation30_spill] sm:$0xff] }
 0x46b   : > { %v1890_v11 = vadd.f32 %v1882_v40, %v1858_v2  ;;  %v1910_v28 = vmul.f32 %v17667_v38, %v1540_v39  ;;  %v1912_v41 = vmul.f32 %v17663_v29, %v1540_v39  ;;  %v1914_v17 = vmul.f32 %v1904_v13, %v1540_v39 }
 0x46c   : > { %v1916_v47 = vmul.f32 %v17697_v34, %v1540_v39  ;;  %v1228_v0 = vpop.permute.xlu0 %1227  ;;  %v1889_v61 = vadd.f32 %v1881_v3, %v1857_v32  ;;  %v1976_v29 = vmul.f32 %v17755_v9, %v1544_v46  ;;  %v1978_v34 = vmul.f32 %v17811_v23, %v1544_v46 }
 0x46d   : > { %v1310_v48 = vpop.permute.xlu1 %1309  ;;  %v1918_v43 = vadd.f32 %v1910_v28, %v17733_v20  ;;  %v1920_v10 = vadd.f32 %v1912_v41, %v17736_v42  ;;  %v1922_v1 = vadd.f32 %v1914_v17, %v1890_v11  ;;  %v1980_v13 = vmul.f32 %v17779_v58, %v1544_v46 }
 0x46e   : > { %v1924_v38 = vadd.f32 %v1916_v47, %v17738_v63  ;;  %v1921_v52 = vadd.f32 %v1913_v57, %v1889_v61  ;;  %v1477_v20 = vsel %vm272_vm0, %v19471_v8, %v19470_v12  ;;  %v17845_v42 = vrot.slane %v17670_v62, %v17176_v16 }
 0x46f   : > { %v1950_v22 = vadd.f32 %v1942_v24, %v1918_v43  ;;  %v1952_v21 = vadd.f32 %v1944_v44, %v1920_v10  ;;  %v1954_v2 = vadd.f32 %v1946_v4, %v1922_v1  ;;  %v17850_v3 = vrot.slane %v17758_v5, %v17176_v16 }
 0x470   : > { %v1956_v56 = vadd.f32 %v1948_v35, %v1924_v38  ;;  %v1416_v40 = vpop.permute.xlu0 %1415  ;;  %v1509_v47 = vsel %vm1115_vm3, %v1477_v20, %v1310_v48  ;;  %v17862_v38 = vrot.slane %v17441_v49, %v19463_v59  ;;  %v17879_v49 = vrot.slane %v17758_v5, %v19463_v59 }
 0x471   : > { %v1546_v63 = vsel %vm1124_vm4, %v1514_v33, %v1416_v40  ;;  %v1218_v46 = vpop.permute.xlu1 %1217  ;;  %v1982_v57 = vadd.f32 %v1974_v37, %v1950_v22  ;;  %v1984_v24 = vadd.f32 %v1976_v29, %v1952_v21  ;;  %v1986_v11 = vadd.f32 %v1978_v34, %v1954_v2  ;;  %v19472_v37 = vld [vmem:[#allocation7_spill] sm:$0xff] }
 0x472   : > { %v1988_v39 = vadd.f32 %v1980_v13, %v1956_v56  ;;  %v2006_v32 = vmul.f32 %v17787_v18, %v1546_v63  ;;  %v2008_v28 = vmul.f32 %v17766_v15, %v1546_v63  ;;  %v2010_v41 = vmul.f32 %v17850_v3, %v1546_v63 }
 0x473   : > { %v2012_v17 = vmul.f32 %v17845_v42, %v1546_v63  ;;  %v1484_v10 = vsel %vm272_vm0, %v19472_v37, %v1228_v0  ;;  %v17871_v21 = vrot.slane %v17670_v62, %v19463_v59  ;;  %v17875_v2 = vrot.slane %v17464_v55, %v19463_v59 }
 0x474   : > { %v1324_v33 = vpop.permute.xlu0 %1323  ;;  %v2014_v44 = vadd.f32 %v2006_v32, %v1982_v57  ;;  %v2016_v4 = vadd.f32 %v2008_v28, %v1984_v24  ;;  %v2018_v35 = vadd.f32 %v2010_v41, %v1986_v11 }
 0x475   : > { %v2020_v61 = vadd.f32 %v2012_v17, %v1988_v39  ;;  %v1406_v43 = vpop.permute.xlu1 %1405  ;;  %v1516_v22 = vsel %vm1115_vm3, %v1484_v10, %v1324_v33 }
 0x476   : > { %v1541_v1 = vsel %vm1124_vm4, %v1509_v47, %v1406_v43 }
 0x477   : > { %v1941_v29 = vmul.f32 %v17783_v60, %v1541_v1  ;;  %v1943_v34 = vmul.f32 %v17762_v6, %v1541_v1  ;;  %v1945_v48 = vmul.f32 %v17815_v54, %v1541_v1  ;;  %v1947_v13 = vmul.f32 %v17801_v53, %v1541_v1  ;;  %v19474_v1 = vld [vmem:[#allocation67_spill] sm:$0xff] }
 0x478   : > { %v1420_v0 = vpop.permute.xlu0 %1419 }
 0x479   : > { %v1949_v6 = vadd.f32 %v1941_v29, %v17699_v51  ;;  %v1951_v60 = vadd.f32 %v1943_v34, %v17707_v19  ;;  %v1953_v53 = vadd.f32 %v1945_v48, %v1921_v52  ;;  %v1955_v54 = vadd.f32 %v1947_v13, %v17729_v26  ;;  %v1314_v56 = vpop.permute.xlu1 %1313  ;;  %v19473_v52 = vld [vmem:[#allocation62_spill] sm:$0xff] }
 0x47a   : > { %v1548_v62 = vsel %vm1124_vm4, %v1516_v22, %v1420_v0  ;;  %v1479_v63 = vsel %vm272_vm0, %v19473_v52, %v1218_v46  ;;  %v17908_v46 = vld [vmem:[%s18899_s4 + $0x4] ss:$0 sm:$0xff] }
 0x47b   : > { %v2038_v40 = vmul.f32 %v17875_v2, %v1548_v62  ;;  %v2040_v12 = vmul.f32 %v17862_v38, %v1548_v62  ;;  %v2042_v55 = vmul.f32 %v17879_v49, %v1548_v62  ;;  %v2044_v8 = vmul.f32 %v17871_v21, %v1548_v62 }
 0x47c   : > { %v1511_v57 = vsel %vm1115_vm3, %v1479_v63, %v1314_v56 }
 0x47d   : > { %v17889_v5 = vadd.f32 %v2038_v40, %v2014_v44  ;;  %v17891_v20 = vadd.f32 %v2040_v12, %v2016_v4  ;;  %v17893_v51 = vadd.f32 %v2042_v55, %v2018_v35  ;;  %v17895_v19 = vadd.f32 %v2044_v8, %v2020_v61  ;;  %v1222_v26 = vpop.permute.xlu1 %1221 }
 0x47e   : > { %v1481_v29 = vsel %vm272_vm0, %v19474_v1, %v1222_v26 }
 0x481   : > { %v1410_v24 = vpop.permute.xlu1 %1409 }
 0x482   : > { %v1543_v11 = vsel %vm1124_vm4, %v1511_v57, %v1410_v24 }
 0x483   : > { %v1973_v39 = vmul.f32 %v17771_v27, %v1543_v11  ;;  %v1975_v32 = vmul.f32 %v17755_v9, %v1543_v11  ;;  %v1977_v28 = vmul.f32 %v17811_v23, %v1543_v11  ;;  %v1979_v41 = vmul.f32 %v17779_v58, %v1543_v11 }
 0x485   : > { %v1981_v17 = vadd.f32 %v1973_v39, %v1949_v6  ;;  %v1983_v47 = vadd.f32 %v1975_v32, %v1951_v60  ;;  %v1985_v33 = vadd.f32 %v1977_v28, %v1953_v53  ;;  %v1987_v44 = vadd.f32 %v1979_v41, %v1955_v54  ;;  %v1318_v4 = vpop.permute.xlu1 %1317  ;;  %v19475_v41 = vld [vmem:[#allocation56_spill] sm:$0xff] }
 0x486   : > { %v1513_v13 = vsel %vm1115_vm3, %v1481_v29, %v1318_v4 }
 0x487   : > { %v12468_v35 = vpop.f32.mrb[64].mxu1 }
 0x488   : > { %v9240_v61 = vadd.f32 %v12468_v35, %v17908_v46  ;;  %v9231_v27 = vpop.f32.mrb[65].mxu1 }
 0x489   : > { %v9232_v9 = vadd.f32 %v17908_v46, %v9231_v27  ;;  %v1226_v43 = vpop.permute.xlu1 %1225  ;;  %v12469_v23 = vpop.f32.mrb[66].mxu1 }
 0x48a   : > { %v9243_v58 = vadd.f32 %v12469_v23, %v17908_v46  ;;  %v9234_v37 = vpop.f32.mrb[67].mxu1  ;;  %v9360_v34 = vmax.f32 %v9240_v61, 0.0 }
 0x48b   : > { %v9235_v10 = vadd.f32 %v17908_v46, %v9234_v37  ;;  %v9358_v22 = vmax.f32 %v9232_v9, 0.0 }
 0x48c   : > { %v9361_v48 = vmax.f32 %v9243_v58, 0.0 }
 0x48d   : > { %v9359_v0 = vmax.f32 %v9235_v10, 0.0  ;;  %v1414_v6 = vpop.permute.xlu1 %1413 }
 0x48e   : > { %v9391_v60 = vpack.c.bf16 %v9361_v48, %v9360_v34  ;;  %v1545_v53 = vsel %vm1124_vm4, %v1513_v13, %v1414_v6 }
 0x48f   : > { %v9390_v54 = vpack.c.bf16 %v9359_v0, %v9358_v22  ;;  %v2005_v56 = vmul.f32 %v17787_v18, %v1545_v53  ;;  %v2007_v62 = vmul.f32 %v17766_v15, %v1545_v53  ;;  %v2009_v40 = vmul.f32 %v17850_v3, %v1545_v53  ;;  %v12472_v12 = vpop.f32.mrb[68].mxu1 }
 0x490   : > { %v2011_v55 = vmul.f32 %v17845_v42, %v1545_v53  ;;  %v9256_v8 = vadd.f32 %v12472_v12, %v17908_v46  ;;  %v9247_v26 = vpop.f32.mrb[69].mxu1 }
 0x491   : > { %v2013_v52 = vadd.f32 %v2005_v56, %v1981_v17  ;;  %v2015_v63 = vadd.f32 %v2007_v62, %v1983_v47  ;;  %v2017_v57 = vadd.f32 %v2009_v40, %v1985_v33  ;;  %v9248_v24 = vadd.f32 %v17908_v46, %v9247_v26  ;;  %v1322_v11 = vpop.permute.xlu1 %1321  ;;  %v12473_v39 = vpop.f32.mrb[70].mxu1  ;;  %12502 = vmatprep.mubr.msk.bf16.mxu1 %vm272_vm0, %v9390_v54 }
 0x492   : > { %v2019_v18 = vadd.f32 %v2011_v55, %v1987_v44  ;;  %v9364_v32 = vmax.f32 %v9256_v8, 0.0  ;;  %v9259_v15 = vadd.f32 %v12473_v39, %v17908_v46  ;;  %v9250_v3 = vpop.f32.mrb[71].mxu1  ;;  %12503 = vmatmul.mubr.msk.bf16.vlgmr.msra.gmra.mrb[96].mxu1 %vm272_vm0, %v9391_v60  ;;  %v1483_v17 = vsel %vm272_vm0, %v19475_v41, %v1226_v43 }
 0x493   : > { %v9362_v42 = vmax.f32 %v9248_v24, 0.0  ;;  %v9251_v28 = vadd.f32 %v17908_v46, %v9250_v3  ;;  %v1515_v33 = vsel %vm1115_vm3, %v1483_v17, %v1322_v11 }
 0x494   : > { %v9365_v47 = vmax.f32 %v9259_v15, 0.0 }
 0x495   : > { %v9363_v4 = vmax.f32 %v9251_v28, 0.0  ;;  %v1418_v35 = vpop.permute.xlu1 %1417 }
 0x496   : > { %v9393_v61 = vpack.c.bf16 %v9365_v47, %v9364_v32  ;;  %v1547_v44 = vsel %vm1124_vm4, %v1515_v33, %v1418_v35 }
 0x497   : > { %v9392_v27 = vpack.c.bf16 %v9363_v4, %v9362_v42  ;;  %v2037_v9 = vmul.f32 %v17875_v2, %v1547_v44  ;;  %v2039_v23 = vmul.f32 %v17862_v38, %v1547_v44  ;;  %v2041_v58 = vmul.f32 %v17879_v49, %v1547_v44  ;;  %v12476_v37 = vpop.f32.mrb[72].mxu1 }
 0x498   : > { %v2043_v10 = vmul.f32 %v17871_v21, %v1547_v44  ;;  %v9272_v43 = vadd.f32 %v12476_v37, %v17908_v46  ;;  %v9263_v1 = vpop.f32.mrb[73].mxu1 }
 0x499   : > { %v17937_v29 = vadd.f32 %v2037_v9, %v2013_v52  ;;  %v17939_v34 = vadd.f32 %v2039_v23, %v2015_v63  ;;  %v17941_v48 = vadd.f32 %v2041_v58, %v2017_v57  ;;  %v9264_v13 = vadd.f32 %v17908_v46, %v9263_v1  ;;  %v12477_v22 = vpop.f32.mrb[74].mxu1  ;;  %12506 = vmatprep.mubr.msk.bf16.mxu1 %vm272_vm0, %v9392_v27 }
 0x49a   : > { %v17945_v38 = vadd.f32 %v2043_v10, %v2019_v18  ;;  %v9368_v2 = vmax.f32 %v9272_v43, 0.0  ;;  %v9275_v49 = vadd.f32 %v12477_v22, %v17908_v46  ;;  %v9266_v21 = vpop.f32.mrb[75].mxu1  ;;  %12507 = vmatmul.mubr.msk.bf16.gmra.mrb[36].mxu1 %vm272_vm0, %v9393_v61 }
 0x49b   : > { %v2053_v0 = vmax.f32 %v17937_v29, %v17889_v5  ;;  %v2060_v6 = vmax.f32 %v17939_v34, %v17891_v20  ;;  %v2067_v60 = vmax.f32 %v17941_v48, %v17893_v51  ;;  %v9366_v54 = vmax.f32 %v9264_v13, 0.0 }
 0x49c   : > { %v2074_v53 = vmax.f32 %v17945_v38, %v17895_v19  ;;  %v9369_v56 = vmax.f32 %v9275_v49, 0.0  ;;  %v9267_v62 = vadd.f32 %v17908_v46, %v9266_v21 }
 0x49d   : > { %v2054_v40 = vrot.slane %v2053_v0, 4  ;;  %v2061_v12 = vrot.slane %v2060_v6, 4  ;;  %v2068_v55 = vrot.slane %v2067_v60, 4 }
 0x49e   : > { %v2075_v8 = vrot.slane %v2074_v53, 4  ;;  %v9395_v26 = vpack.c.bf16 %v9369_v56, %v9368_v2  ;;  %v9367_v52 = vmax.f32 %v9267_v62, 0.0 }
 0x49f   : > { %v2055_v63 = vmax.f32 %v2053_v0, %v2054_v40  ;;  %v2062_v57 = vmax.f32 %v2060_v6, %v2061_v12  ;;  %v2069_v24 = vmax.f32 %v2067_v60, %v2068_v55  ;;  %v12480_v11 = vpop.f32.mrb[76].mxu1 }
 0x4a0   : > { %v2076_v39 = vmax.f32 %v2074_v53, %v2075_v8  ;;  %v9394_v18 = vpack.c.bf16 %v9367_v52, %v9366_v54  ;;  %v9288_v32 = vadd.f32 %v12480_v11, %v17908_v46  ;;  %v9279_v15 = vpop.f32.mrb[77].mxu1 }
 0x4a1   : > { %v2056_v3 = vrot.slane %v2055_v63, 2  ;;  %v2063_v42 = vrot.slane %v2062_v57, 2  ;;  %v2070_v28 = vrot.slane %v2069_v24, 2  ;;  %v9280_v41 = vadd.f32 %v17908_v46, %v9279_v15  ;;  %v12481_v17 = vpop.f32.mrb[78].mxu1 }
 0x4a2   : > { %v2077_v47 = vrot.slane %v2076_v39, 2  ;;  %v9372_v33 = vmax.f32 %v9288_v32, 0.0  ;;  %v9291_v4 = vadd.f32 %v12481_v17, %v17908_v46  ;;  %12510 = vmatprep.mubr.msk.bf16.mxu1 %vm272_vm0, %v9394_v18  ;;  %v9282_v35 = vpop.f32.mrb[79].mxu1 }
 0x4a3   : > { %v2057_v61 = vmax.f32 %v2055_v63, %v2056_v3  ;;  %v2064_v44 = vmax.f32 %v2062_v57, %v2063_v42  ;;  %v2071_v27 = vmax.f32 %v2069_v24, %v2070_v28  ;;  %12511 = vmatmul.mubr.msk.bf16.gmra.mrb[40].mxu1 %vm272_vm0, %v9395_v26  ;;  %v9370_v23 = vmax.f32 %v9280_v41, 0.0 }
 0x4a4   : > { %v2078_v9 = vmax.f32 %v2076_v39, %v2077_v47  ;;  %v9373_v58 = vmax.f32 %v9291_v4, 0.0  ;;  %v9283_v37 = vadd.f32 %v17908_v46, %v9282_v35 }
 0x4a5   : > { %v2058_v10 = vrot.slane %v2057_v61, 1  ;;  %v2065_v43 = vrot.slane %v2064_v44, 1  ;;  %v2072_v1 = vrot.slane %v2071_v27, 1 }
 0x4a6   : > { %v2079_v13 = vrot.slane %v2078_v9, 1  ;;  %v9397_v22 = vpack.c.bf16 %v9373_v58, %v9372_v33  ;;  %v9371_v2 = vmax.f32 %v9283_v37, 0.0 }
 0x4a7   : > { %v2059_v49 = vmax.f32 %v2057_v61, %v2058_v10  ;;  %v2066_v21 = vmax.f32 %v2064_v44, %v2065_v43  ;;  %v2073_v0 = vmax.f32 %v2071_v27, %v2072_v1  ;;  %v12484_v6 = vpop.f32.mrb[80].mxu1 }
 0x4a8   : > { %v2080_v60 = vmax.f32 %v2078_v9, %v2079_v13  ;;  %v9396_v53 = vpack.c.bf16 %v9371_v2, %v9370_v23  ;;  %v9304_v54 = vadd.f32 %v12484_v6, %v17908_v46  ;;  %v9295_v56 = vpop.f32.mrb[81].mxu1 }
 0x4a9   : > { %v2081_v62 = vsub.f32 %v17937_v29, %v2059_v49  ;;  %v2082_v40 = vsub.f32 %v17889_v5, %v2059_v49  ;;  %v2083_v12 = vsub.f32 %v17939_v34, %v2066_v21  ;;  %v2084_v55 = vsub.f32 %v17891_v20, %v2066_v21  ;;  %v12485_v8 = vpop.f32.mrb[82].mxu1 }
 0x4aa   : > { %v2085_v26 = vsub.f32 %v17941_v48, %v2073_v0  ;;  %v2086_v52 = vsub.f32 %v17893_v51, %v2073_v0  ;;  %v2087_v63 = vsub.f32 %v17945_v38, %v2080_v60  ;;  %v2088_v57 = vsub.f32 %v17895_v19, %v2080_v60  ;;  %12514 = vmatprep.mubr.msk.bf16.mxu1 %vm272_vm0, %v9396_v53  ;;  %v9298_v24 = vpop.f32.mrb[83].mxu1 }
 0x4ab   : > { %v9296_v29 = vadd.f32 %v17908_v46, %v9295_v56  ;;  %12515 = vmatmul.mubr.msk.bf16.gmra.mrb[44].mxu1 %vm272_vm0, %v9397_v22  ;;  %v9307_v5 = vadd.f32 %v12485_v8, %v17908_v46  ;;  %v9376_v34 = vmax.f32 %v9304_v54, 0.0  ;;  %v9299_v48 = vadd.f32 %v17908_v46, %v9298_v24 }
 0x4ac   : > { %v2089_v33 = vmul.f32 1.442695, %v2081_v62  ;;  %v2091_v35 = vmul.f32 1.442695, %v2082_v40  ;;  %v2093_v44 = vmul.f32 1.442695, %v2083_v12 }
 0x4ad   : > { %v9374_v20 = vmax.f32 %v9296_v29, 0.0  ;;  %v9377_v11 = vmax.f32 %v9307_v5, 0.0  ;;  %v9375_v18 = vmax.f32 %v9299_v48, 0.0  ;;  %v2095_v9 = vmul.f32 1.442695, %v2084_v55 }
 0x4ae   : > { %13167 = vpow2.f32 %v2089_v33  ;;  %v2097_v37 = vmul.f32 1.442695, %v2085_v26  ;;  %v2099_v1 = vmul.f32 1.442695, %v2086_v52  ;;  %v2101_v2 = vmul.f32 1.442695, %v2087_v63 }
 0x4af   : > { %v12488_v39 = vpop.f32.mrb[84].mxu1  ;;  %v9399_v51 = vpack.c.bf16 %v9377_v11, %v9376_v34  ;;  %v9398_v3 = vpack.c.bf16 %v9375_v18, %v9374_v20  ;;  %13169 = vpow2.f32 %v2091_v35  ;;  %v2103_v6 = vmul.f32 1.442695, %v2088_v57  ;;  %v19484_v33 = vld [vmem:[#allocation28_spill] sm:$0xff] }
 0x4b0   : > { %v9320_v38 = vadd.f32 %v12488_v39, %v17908_v46  ;;  %v9311_v19 = vpop.f32.mrb[85].mxu1  ;;  %13171 = vpow2.f32 %v2093_v44 }
 0x4b1   : > { %v9312_v32 = vadd.f32 %v17908_v46, %v9311_v19  ;;  %v12489_v15 = vpop.f32.mrb[86].mxu1  ;;  %12518 = vmatprep.mubr.msk.bf16.mxu1 %vm272_vm0, %v9398_v3  ;;  %13173 = vpow2.f32 %v2095_v9 }
 0x4b2   : > { %v9380_v42 = vmax.f32 %v9320_v38, 0.0  ;;  %v9323_v28 = vadd.f32 %v12489_v15, %v17908_v46  ;;  %v9314_v41 = vpop.f32.mrb[87].mxu1  ;;  %13175 = vpow2.f32 %v2097_v37 }
 0x4b3   : > { %v9378_v17 = vmax.f32 %v9312_v32, 0.0  ;;  %v9315_v47 = vadd.f32 %v17908_v46, %v9314_v41  ;;  %12519 = vmatmul.mubr.msk.bf16.gmra.mrb[48].mxu1 %vm272_vm0, %v9399_v51  ;;  %13177 = vpow2.f32 %v2099_v1 }
 0x4b4   : > { %v9381_v4 = vmax.f32 %v9323_v28, 0.0  ;;  %13179 = vpow2.f32 %v2101_v2 }
 0x4b5   : > { %v9379_v61 = vmax.f32 %v9315_v47, 0.0  ;;  %13181 = vpow2.f32 %v2103_v6 }
 0x4b6   : > { %v9401_v27 = vpack.c.bf16 %v9381_v4, %v9380_v42 }
 0x4b7   : > { %v9400_v23 = vpack.c.bf16 %v9379_v61, %v9378_v17  ;;  %v12492_v58 = vpop.f32.mrb[88].mxu1  ;;  %v18033_v17 = vld [vmem:[%s18899_s4 + $0x5] ss:$0 sm:$0xff] }
 0x4b8   : > { %v9336_v10 = vadd.f32 %v12492_v58, %v17908_v46  ;;  %v9327_v43 = vpop.f32.mrb[89].mxu1  ;;  %v17993_v63 = vpop.eup %13167  ;;  %v19485_v58 = vld [vmem:[#allocation32_spill] sm:$0xff] }
 0x4b9   : > { %v9328_v13 = vadd.f32 %v17908_v46, %v9327_v43  ;;  %v12493_v22 = vpop.f32.mrb[90].mxu1  ;;  %12522 = vmatprep.mubr.msk.bf16.mxu1 %vm272_vm0, %v9400_v23  ;;  %v17996_v5 = vpop.eup %13169 }
 0x4ba   : > { %v9384_v49 = vmax.f32 %v9336_v10, 0.0  ;;  %v9339_v21 = vadd.f32 %v12493_v22, %v17908_v46  ;;  %v9330_v0 = vpop.f32.mrb[91].mxu1  ;;  %19476 = vst [vmem:[#allocation57_spill] sm:$0xff] %v17996_v5  ;;  %v17999_v11 = vpop.eup %13171 }
 0x4bb   : > { %v9382_v60 = vmax.f32 %v9328_v13, 0.0  ;;  %v9331_v53 = vadd.f32 %v17908_v46, %v9330_v0  ;;  %12523 = vmatmul.mubr.msk.bf16.gmra.mrb[52].mxu1 %vm272_vm0, %v9401_v27  ;;  %v18001_v39 = vpop.eup %13173 }
 0x4bc   : > { %v9385_v54 = vmax.f32 %v9339_v21, 0.0  ;;  %19477 = vst [vmem:[#allocation33_spill] sm:$0xff] %v18001_v39  ;;  %v18004_v18 = vpop.eup %13175  ;;  %v18019_v42 = vadd.f32 %v18001_v39, %v17999_v11 }
 0x4bd   : > { %v9383_v56 = vmax.f32 %v9331_v53, 0.0  ;;  %v18006_v19 = vpop.eup %13177 }
 0x4be   : > { %v9403_v62 = vpack.c.bf16 %v9385_v54, %v9384_v49  ;;  %19478 = vst [vmem:[#allocation47_spill] sm:$0xff] %v18006_v19  ;;  %v18008_v15 = vpop.eup %13179  ;;  %19481 = vst [vmem:[#allocation52_spill] sm:$0xff] %v18019_v42  ;;  %v18023_v28 = vadd.f32 %v18006_v19, %v18004_v18 }
 0x4bf   : > { %v9402_v40 = vpack.c.bf16 %v9383_v56, %v9382_v60  ;;  %v12496_v12 = vpop.f32.mrb[92].mxu1  ;;  %v18010_v3 = vpop.eup %13181 }
 0x4c0   : > { %v9352_v55 = vadd.f32 %v12496_v12, %v17908_v46  ;;  %v9343_v8 = vpop.f32.mrb[93].mxu1  ;;  %19479 = vst [vmem:[#allocation53_spill] sm:$0xff] %v18010_v3  ;;  %19482 = vst [vmem:[#allocation11_spill] sm:$0xff] %v18023_v28  ;;  %v18027_v41 = vadd.f32 %v18010_v3, %v18008_v15 }
 0x4c1   : > { %v9344_v26 = vadd.f32 %v17908_v46, %v9343_v8  ;;  %v12497_v52 = vpop.f32.mrb[94].mxu1  ;;  %12526 = vmatprep.mubr.msk.bf16.mxu1 %vm272_vm0, %v9402_v40 }
 0x4c2   : > { %v9388_v57 = vmax.f32 %v9352_v55, 0.0  ;;  %v9355_v24 = vadd.f32 %v12497_v52, %v17908_v46  ;;  %v9346_v29 = vpop.f32.mrb[95].mxu1  ;;  %19483 = vst [vmem:[#allocation40_spill] sm:$0xff] %v18027_v41 }
 0x4c3   : > { %v9386_v34 = vmax.f32 %v9344_v26, 0.0  ;;  %v9347_v20 = vadd.f32 %v17908_v46, %v9346_v29  ;;  %12527 = vmatmul.mubr.msk.bf16.gmra.mrb[56].mxu1 %vm272_vm0, %v9403_v62  ;;  %v18015_v46 = vadd.f32 %v17996_v5, %v17993_v63 }
 0x4c4   : > { %v9389_v48 = vmax.f32 %v9355_v24, 0.0 }
 0x4c5   : > { %v9387_v51 = vmax.f32 %v9347_v20, 0.0  ;;  %19480 = vst [vmem:[#allocation15_spill] sm:$0xff] %v18015_v46 }
 0x4c6   : > { %v9405_v38 = vpack.c.bf16 %v9389_v48, %v9388_v57 }
 0x4c7   : > { %v9404_v32 = vpack.c.bf16 %v9387_v51, %v9386_v34 }
 0x4c9   : > { %12530 = vmatprep.mubr.msk.bf16.mxu1 %vm272_vm0, %v9404_v32 }
 0x4cb   : > { %12531 = vmatmul.mubr.msk.bf16.gmra.mrb[60].mxu1 %vm272_vm0, %v9405_v38 }
 0x565   : > { %v12504_v47 = vpop.f32.mrb[96].mxu1 }
 0x566   : > { %v12575_v4 = vadd.f32 %v19484_v33, %v12504_v47  ;;  %v9500_v35 = vpop.f32.mrb[97].mxu1 }
 0x567   : > { %v12577_v61 = vadd.f32 %v17630_v30, %v9500_v35  ;;  %v12505_v44 = vpop.f32.mrb[98].mxu1 }
 0x568   : > { %v18038_v27 = vadd.f32 %v12575_v4, %v18033_v17  ;;  %v12579_v9 = vadd.f32 %v17635_v36, %v12505_v44  ;;  %v9503_v23 = vpop.f32.mrb[99].mxu1 }
 0x569   : > { %v12581_v37 = vadd.f32 %v19485_v58, %v9503_v23  ;;  %v18056_v13 = vadd.f32 %v12577_v61, %v18033_v17 }
 0x56a   : > { %v18043_v10 = vadd.f32 %v12579_v9, %v18033_v17  ;;  %9731 = vrot.lane.b32.xlu1 %v18038_v27, %s13386_s26 }
 0x56b   : > { %v18061_v22 = vadd.f32 %v12581_v37, %v18033_v17 }
 0x56c   : > { %9733 = vrot.lane.b32.xlu0 %v18043_v10, %s13386_s26 }
 0x56d   : > { %v12508_v43 = vpop.f32.mrb[36].mxu1 }
 0x56e   : > { %9827 = vrot.lane.b32.xlu1 %v18038_v27, %s13387_s30  ;;  %v9516_v30 = vpop.f32.mrb[37].mxu1  ;;  %v18081_v54 = vadd.f32 %v12508_v43, %v18033_v17 }
 0x56f   : > { %v12509_v1 = vpop.f32.mrb[38].mxu1  ;;  %v18117_v48 = vadd.f32 %v18033_v17, %v9516_v30 }
 0x570   : > { %9829 = vrot.lane.b32.xlu0 %v18043_v10, %s13387_s30  ;;  %v9519_v36 = vpop.f32.mrb[39].mxu1  ;;  %v18092_v55 = vadd.f32 %v12509_v1, %v18033_v17 }
 0x571   : > { %v18125_v38 = vadd.f32 %v18033_v17, %v9519_v36 }
 0x572   : > { %9923 = vrot.lane.b32.xlu1 %v18038_v27, %s13388_s12 }
 0x574   : > { %9925 = vrot.lane.b32.xlu0 %v18043_v10, %s13388_s12 }
 0x576   : > { %v12512_v2 = vpop.f32.mrb[40].mxu1  ;;  %9727 = vrot.lane.b32.xlu1 %v18056_v13, %s13386_s26 }
 0x577   : > { %v18065_v49 = vpop.f32.mrb[41].mxu1  ;;  %v18150_v23 = vadd.f32 %v12512_v2, %v18033_v17 }
 0x578   : > { %v12513_v21 = vpop.f32.mrb[42].mxu1  ;;  %9729 = vrot.lane.b32.xlu0 %v18061_v22, %s13386_s26 }
 0x579   : > { %v18069_v0 = vpop.f32.mrb[43].mxu1  ;;  %v18158_v30 = vadd.f32 %v12513_v21, %v18033_v17 }
 0x57a   : > { %9823 = vrot.lane.b32.xlu1 %v18056_v13, %s13387_s30 }
 0x57c   : > { %9825 = vrot.lane.b32.xlu0 %v18061_v22, %s13387_s30 }
 0x57e   : > { %v12516_v6 = vpop.f32.mrb[44].mxu1  ;;  %9919 = vrot.lane.b32.xlu1 %v18056_v13, %s13388_s12 }
 0x57f   : > { %v18078_v60 = vadd.f32 %v12516_v6, %v18033_v17  ;;  %v9548_v53 = vpop.f32.mrb[45].mxu1 }
 0x580   : > { %v18084_v56 = vadd.f32 %v18033_v17, %v9548_v53  ;;  %v12517_v62 = vpop.f32.mrb[46].mxu1  ;;  %9921 = vrot.lane.b32.xlu0 %v18061_v22, %s13388_s12 }
 0x581   : > { %v18089_v40 = vadd.f32 %v12517_v62, %v18033_v17  ;;  %v9551_v12 = vpop.f32.mrb[47].mxu1 }
 0x582   : > { %v18095_v8 = vadd.f32 %v18033_v17, %v9551_v12  ;;  %9739 = vrot.lane.b32.xlu1 %v18081_v54, %s13386_s26 }
 0x584   : > { %9741 = vrot.lane.b32.xlu0 %v18092_v55, %s13386_s26 }
 0x586   : > { %9835 = vrot.lane.b32.xlu1 %v18081_v54, %s13387_s30  ;;  %v12520_v26 = vpop.f32.mrb[48].mxu1 }
 0x587   : > { %v18106_v52 = vadd.f32 %v12520_v26, %v18033_v17  ;;  %v9564_v57 = vpop.f32.mrb[49].mxu1 }
 0x588   : > { %9837 = vrot.lane.b32.xlu0 %v18092_v55, %s13387_s30  ;;  %v18109_v24 = vadd.f32 %v18033_v17, %v9564_v57  ;;  %v12521_v29 = vpop.f32.mrb[50].mxu1 }
 0x589   : > { %v18114_v34 = vadd.f32 %v12521_v29, %v18033_v17  ;;  %v9567_v20 = vpop.f32.mrb[51].mxu1 }
 0x58a   : > { %19486 = vst [vmem:[#allocation12_spill] sm:$0xff] %v18109_v24  ;;  %9931 = vrot.lane.b32.xlu1 %v18081_v54, %s13388_s12  ;;  %v18120_v51 = vadd.f32 %v18033_v17, %v9567_v20 }
 0x58b   : > { %19487 = vst [vmem:[#allocation49_spill] sm:$0xff] %v18114_v34 }
 0x58c   : > { %19488 = vst [vmem:[#allocation26_spill] sm:$0xff] %v18120_v51  ;;  %9933 = vrot.lane.b32.xlu0 %v18092_v55, %s13388_s12 }
 0x58e   : > { %9735 = vrot.lane.b32.xlu1 %v18117_v48, %s13386_s26  ;;  %v12524_v32 = vpop.f32.mrb[52].mxu1 }
 0x58f   : > { %v18132_v47 = vadd.f32 %v12524_v32, %v18033_v17  ;;  %v9580_v33 = vpop.f32.mrb[53].mxu1  ;;  %v18190_v32 = vadd.f32 %v18033_v17, %v18065_v49 }
 0x590   : > { %9737 = vrot.lane.b32.xlu0 %v18125_v38, %s13386_s26  ;;  %v18135_v4 = vadd.f32 %v18033_v17, %v9580_v33  ;;  %v12525_v35 = vpop.f32.mrb[54].mxu1 }
 0x591   : > { %19489 = vst [vmem:[#allocation23_spill] sm:$0xff] %v18132_v47  ;;  %v18140_v61 = vadd.f32 %v12525_v35, %v18033_v17  ;;  %v9583_v44 = vpop.f32.mrb[55].mxu1  ;;  %v18199_v35 = vadd.f32 %v18033_v17, %v18069_v0 }
 0x592   : > { %9831 = vrot.lane.b32.xlu1 %v18117_v48, %s13387_s30  ;;  %v18143_v9 = vadd.f32 %v18033_v17, %v9583_v44 }
 0x593   : > { %19490 = vst [vmem:[#allocation18_spill] sm:$0xff] %v18140_v61 }
 0x594   : > { %9833 = vrot.lane.b32.xlu0 %v18125_v38, %s13387_s30 }
 0x596   : > { %9927 = vrot.lane.b32.xlu1 %v18117_v48, %s13388_s12  ;;  %v12528_v58 = vpop.f32.mrb[56].mxu1 }
 0x597   : > { %v18155_v37 = vadd.f32 %v12528_v58, %v18033_v17  ;;  %v9596_v43 = vpop.f32.mrb[57].mxu1 }
 0x598   : > { %9929 = vrot.lane.b32.xlu0 %v18125_v38, %s13388_s12  ;;  %v18161_v1 = vadd.f32 %v18033_v17, %v9596_v43  ;;  %v12529_v36 = vpop.f32.mrb[58].mxu1 }
 0x599   : > { %19491 = vst [vmem:[#allocation8_spill] sm:$0xff] %v18155_v37  ;;  %v18166_v2 = vadd.f32 %v12529_v36, %v18033_v17  ;;  %v9599_v6 = vpop.f32.mrb[59].mxu1 }
 0x59a   : > { %9747 = vrot.lane.b32.xlu1 %v18150_v23, %s13386_s26  ;;  %v18169_v53 = vadd.f32 %v18033_v17, %v9599_v6 }
 0x59b   : > { %19492 = vst [vmem:[#allocation14_spill] sm:$0xff] %v18166_v2 }
 0x59c   : > { %9749 = vrot.lane.b32.xlu0 %v18158_v30, %s13386_s26 }
 0x59e   : > { %9843 = vrot.lane.b32.xlu1 %v18150_v23, %s13387_s30  ;;  %v12532_v21 = vpop.f32.mrb[60].mxu1 }
 0x59f   : > { %v18178_v62 = vadd.f32 %v12532_v21, %v18033_v17  ;;  %v9612_v12 = vpop.f32.mrb[61].mxu1 }
 0x5a0   : > { %9845 = vrot.lane.b32.xlu0 %v18158_v30, %s13387_s30  ;;  %v18181_v26 = vadd.f32 %v18033_v17, %v9612_v12  ;;  %v12533_v57 = vpop.f32.mrb[62].mxu1 }
 0x5a1   : > { %v18186_v29 = vadd.f32 %v12533_v57, %v18033_v17  ;;  %v9615_v20 = vpop.f32.mrb[63].mxu1 }
 0x5a2   : > { %9939 = vrot.lane.b32.xlu1 %v18150_v23, %s13388_s12  ;;  %v18193_v33 = vadd.f32 %v18033_v17, %v9615_v20 }
 0x5a4   : > { %9941 = vrot.lane.b32.xlu0 %v18158_v30, %s13388_s12 }
 0x5a6   : > { %9743 = vrot.lane.b32.xlu1 %v18190_v32, %s13386_s26 }
 0x5a8   : > { %9745 = vrot.lane.b32.xlu0 %v18199_v35, %s13386_s26 }
 0x5aa   : > { %9839 = vrot.lane.b32.xlu1 %v18190_v32, %s13387_s30 }
 0x5ac   : > { %9841 = vrot.lane.b32.xlu0 %v18199_v35, %s13387_s30 }
 0x5ae   : > { %9935 = vrot.lane.b32.xlu1 %v18190_v32, %s13388_s12 }
 0x5b0   : > { %9937 = vrot.lane.b32.xlu0 %v18199_v35, %s13388_s12 }
 0x5b2   : > { %9755 = vrot.lane.b32.xlu1 %v18078_v60, %s13386_s26 }
 0x5b4   : > { %9757 = vrot.lane.b32.xlu0 %v18089_v40, %s13386_s26 }
 0x5b6   : > { %9851 = vrot.lane.b32.xlu1 %v18078_v60, %s13387_s30 }
 0x5b8   : > { %9853 = vrot.lane.b32.xlu0 %v18089_v40, %s13387_s30 }
 0x5ba   : > { %9947 = vrot.lane.b32.xlu1 %v18078_v60, %s13388_s12 }
 0x5bc   : > { %9949 = vrot.lane.b32.xlu0 %v18089_v40, %s13388_s12 }
 0x5be   : > { %9751 = vrot.lane.b32.xlu1 %v18084_v56, %s13386_s26 }
 0x5c0   : > { %9753 = vrot.lane.b32.xlu0 %v18095_v8, %s13386_s26 }
 0x5c2   : > { %9847 = vrot.lane.b32.xlu1 %v18084_v56, %s13387_s30 }
 0x5c4   : > { %9849 = vrot.lane.b32.xlu0 %v18095_v8, %s13387_s30 }
 0x5c6   : > { %9943 = vrot.lane.b32.xlu1 %v18084_v56, %s13388_s12 }
 0x5c8   : > { %9945 = vrot.lane.b32.xlu0 %v18095_v8, %s13388_s12 }
 0x5ca   : > { %9763 = vrot.lane.b32.xlu1 %v18106_v52, %s13386_s26 }
 0x5cc   : > { %9765 = vrot.lane.b32.xlu0 %v18114_v34, %s13386_s26 }
 0x5ce   : > { %9859 = vrot.lane.b32.xlu1 %v18106_v52, %s13387_s30 }
 0x5d0   : > { %9861 = vrot.lane.b32.xlu0 %v18114_v34, %s13387_s30 }
 0x5d2   : > { %9955 = vrot.lane.b32.xlu1 %v18106_v52, %s13388_s12 }
 0x5d4   : > { %9957 = vrot.lane.b32.xlu0 %v18114_v34, %s13388_s12 }
 0x5d6   : > { %9759 = vrot.lane.b32.xlu1 %v18109_v24, %s13386_s26 }
 0x5d8   : > { %9761 = vrot.lane.b32.xlu0 %v18120_v51, %s13386_s26 }
 0x5da   : > { %9855 = vrot.lane.b32.xlu1 %v18109_v24, %s13387_s30 }
 0x5dc   : > { %v9732_v17 = vpop.permute.xlu1 %9731  ;;  %9857 = vrot.lane.b32.xlu0 %v18120_v51, %s13387_s30 }
 0x5dd   : > { %v10017_v6 = vsel %vm272_vm0, %v18038_v27, %v9732_v17  ;;  %v10138_v27 = vrot.slane %v17993_v63, %v17152_v31  ;;  %v10142_v17 = vrot.slane %v17999_v11, %v17152_v31 }
 0x5de   : > { %v9734_v49 = vpop.permute.xlu0 %9733  ;;  %9951 = vrot.lane.b32.xlu1 %v18109_v24, %s13388_s12 }
 0x5df   : > { %v10018_v57 = vsel %vm272_vm0, %v18043_v10, %v9734_v49  ;;  %v10146_v10 = vrot.slane %v18004_v18, %v17152_v31 }
 0x5e0   : > { %v9828_v0 = vpop.permute.xlu1 %9827  ;;  %9953 = vrot.lane.b32.xlu0 %v18120_v51, %s13388_s12 }
 0x5e1   : > { %v10049_v12 = vsel %vm1115_vm3, %v10017_v6, %v9828_v0  ;;  %v10114_v0 = vrot.slane %v17993_v63, %v17144_v45  ;;  %v10122_v6 = vrot.slane %v18004_v18, %v17144_v45 }
 0x5e2   : > { %v9830_v44 = vpop.permute.xlu0 %9829  ;;  %9771 = vrot.lane.b32.xlu1 %v18132_v47, %s13386_s26 }
 0x5e3   : > { %v10050_v28 = vsel %vm1115_vm3, %v10018_v57, %v9830_v44  ;;  %v10118_v44 = vrot.slane %v17999_v11, %v17144_v45 }
 0x5e4   : > { %v9924_v58 = vpop.permute.xlu1 %9923  ;;  %9773 = vrot.lane.b32.xlu0 %v18140_v61, %s13386_s26 }
 0x5e5   : > { %v10081_v20 = vsel %vm1124_vm4, %v10049_v12, %v9924_v58  ;;  %v10150_v12 = vrot.slane %v18008_v15, %v17152_v31 }
 0x5e6   : > { %v9926_v43 = vpop.permute.xlu0 %9925  ;;  %9867 = vrot.lane.b32.xlu1 %v18132_v47, %s13387_s30  ;;  %v10151_v57 = vmul.f32 %v10138_v27, %v10081_v20  ;;  %v10155_v46 = vmul.f32 %v10146_v10, %v10081_v20 }
 0x5e7   : > { %v10082_v49 = vsel %vm1124_vm4, %v10050_v28, %v9926_v43  ;;  %v10126_v28 = vrot.slane %v18008_v15, %v17144_v45  ;;  %v10153_v43 = vmul.f32 %v10142_v17, %v10081_v20  ;;  %v10157_v24 = vmul.f32 %v10150_v12, %v10081_v20 }
 0x5e8   : > { %v9728_v36 = vpop.permute.xlu1 %9727  ;;  %9869 = vrot.lane.b32.xlu0 %v18140_v61, %s13387_s30  ;;  %v10152_v3 = vmul.f32 %v10138_v27, %v10082_v49 }
 0x5e9   : > { %v10015_v42 = vsel %vm272_vm0, %v18056_v13, %v9728_v36 }
 0x5ea   : > { %v9730_v21 = vpop.permute.xlu0 %9729  ;;  %9963 = vrot.lane.b32.xlu1 %v18132_v47, %s13388_s12 }
 0x5ec   : > { %v9824_v41 = vpop.permute.xlu1 %9823  ;;  %9965 = vrot.lane.b32.xlu0 %v18140_v61, %s13388_s12  ;;  %v10016_v61 = vsel %vm272_vm0, %v18061_v22, %v9730_v21  ;;  %v10154_v22 = vmul.f32 %v10142_v17, %v10082_v49 }
 0x5ed   : > { %v10047_v47 = vsel %vm1115_vm3, %v10015_v42, %v9824_v41  ;;  %v10156_v42 = vmul.f32 %v10146_v10, %v10082_v49  ;;  %v10158_v41 = vmul.f32 %v10150_v12, %v10082_v49  ;;  %v10214_v12 = vrot.slane %v18008_v15, %v17166_v50 }
 0x5ee   : > { %v9826_v58 = vpop.permute.xlu0 %9825  ;;  %9767 = vrot.lane.b32.xlu1 %v18135_v4, %s13386_s26 }
 0x5ef   : > { %v10048_v19 = vsel %vm1115_vm3, %v10016_v61, %v9826_v58 }
 0x5f0   : > { %v9920_v51 = vpop.permute.xlu1 %9919  ;;  %9769 = vrot.lane.b32.xlu0 %v18143_v9, %s13386_s26 }
 0x5f1   : > { %v10079_v13 = vsel %vm1124_vm4, %v10047_v47, %v9920_v51 }
 0x5f2   : > { %v10127_v36 = vmul.f32 %v10114_v0, %v10079_v13  ;;  %v10129_v39 = vmul.f32 %v10118_v44, %v10079_v13  ;;  %v10131_v45 = vmul.f32 %v10122_v6, %v10079_v13  ;;  %v10133_v5 = vmul.f32 %v10126_v28, %v10079_v13  ;;  %v9922_v31 = vpop.permute.xlu0 %9921  ;;  %9863 = vrot.lane.b32.xlu1 %v18135_v4, %s13387_s30 }
 0x5f3   : > { %v10080_v21 = vsel %vm1124_vm4, %v10048_v19, %v9922_v31 }
 0x5f4   : > { %v18311_v34 = vadd.f32 %v10151_v57, %v10127_v36  ;;  %v18313_v20 = vadd.f32 %v10153_v43, %v10129_v39  ;;  %v18315_v61 = vadd.f32 %v10155_v46, %v10131_v45  ;;  %v18317_v51 = vadd.f32 %v10157_v24, %v10133_v5  ;;  %v9740_v47 = vpop.permute.xlu1 %9739  ;;  %9865 = vrot.lane.b32.xlu0 %v18143_v9, %s13387_s30 }
 0x5f5   : > { %v10128_v27 = vmul.f32 %v10114_v0, %v10080_v21  ;;  %v10130_v58 = vmul.f32 %v10118_v44, %v10080_v21  ;;  %v10132_v13 = vmul.f32 %v10122_v6, %v10080_v21  ;;  %v10134_v17 = vmul.f32 %v10126_v28, %v10080_v21 }
 0x5f6   : > { %v9742_v10 = vpop.permute.xlu0 %9741  ;;  %9959 = vrot.lane.b32.xlu1 %v18135_v4, %s13388_s12  ;;  %v10021_v19 = vsel %vm272_vm0, %v18081_v54, %v9740_v47  ;;  %v10202_v44 = vrot.slane %v17993_v63, %v17166_v50  ;;  %v10206_v54 = vrot.slane %v17999_v11, %v17166_v50  ;;  %v10210_v6 = vrot.slane %v18004_v18, %v17166_v50 }
 0x5f7   : > { %v18323_v31 = vadd.f32 %v10152_v3, %v10128_v27  ;;  %v18325_v39 = vadd.f32 %v10154_v22, %v10130_v58  ;;  %v18327_v45 = vadd.f32 %v10156_v42, %v10132_v13  ;;  %v18329_v5 = vadd.f32 %v10158_v41, %v10134_v17 }
 0x5f8   : > { %v9836_v46 = vpop.permute.xlu1 %9835  ;;  %9961 = vrot.lane.b32.xlu0 %v18143_v9, %s13388_s12  ;;  %v10022_v0 = vsel %vm272_vm0, %v18092_v55, %v9742_v10 }
 0x5f9   : > { %v10053_v24 = vsel %vm1115_vm3, %v10021_v19, %v9836_v46 }
 0x5fa   : > { %v9838_v3 = vpop.permute.xlu0 %9837  ;;  %9779 = vrot.lane.b32.xlu1 %v18155_v37, %s13386_s26 }
 0x5fb   : > { %v10054_v49 = vsel %vm1115_vm3, %v10022_v0, %v9838_v3 }
 0x5fc   : > { %v9932_v57 = vpop.permute.xlu1 %9931  ;;  %9781 = vrot.lane.b32.xlu0 %v18166_v2, %s13386_s26 }
 0x5fd   : > { %v10085_v55 = vsel %vm1124_vm4, %v10053_v24, %v9932_v57 }
 0x5fe   : > { %v10215_v28 = vmul.f32 %v10202_v44, %v10085_v55  ;;  %v10217_v43 = vmul.f32 %v10206_v54, %v10085_v55  ;;  %v10219_v36 = vmul.f32 %v10210_v6, %v10085_v55  ;;  %v10221_v22 = vmul.f32 %v10214_v12, %v10085_v55  ;;  %v9934_v42 = vpop.permute.xlu0 %9933  ;;  %9875 = vrot.lane.b32.xlu1 %v18155_v37, %s13387_s30 }
 0x5ff   : > { %v10086_v41 = vsel %vm1124_vm4, %v10054_v49, %v9934_v42  ;;  %v10170_v49 = vrot.slane %v17993_v63, %v19440_v7 }
 0x600   : > { %v10216_v21 = vmul.f32 %v10202_v44, %v10086_v41  ;;  %v10218_v47 = vmul.f32 %v10206_v54, %v10086_v41  ;;  %v10220_v27 = vmul.f32 %v10210_v6, %v10086_v41  ;;  %v10222_v58 = vmul.f32 %v10214_v12, %v10086_v41  ;;  %v9736_v13 = vpop.permute.xlu1 %9735  ;;  %9877 = vrot.lane.b32.xlu0 %v18166_v2, %s13387_s30 }
 0x601   : > { %v10019_v10 = vsel %vm272_vm0, %v18117_v48, %v9736_v13  ;;  %v10174_v48 = vrot.slane %v17999_v11, %v19440_v7  ;;  %v10178_v44 = vrot.slane %v18004_v18, %v19440_v7  ;;  %v10182_v54 = vrot.slane %v18008_v15, %v19440_v7 }
 0x602   : > { %v9738_v17 = vpop.permute.xlu0 %9737  ;;  %9971 = vrot.lane.b32.xlu1 %v18155_v37, %s13388_s12 }
 0x603   : > { %v10020_v24 = vsel %vm272_vm0, %v18125_v38, %v9738_v17 }
 0x604   : > { %v9832_v19 = vpop.permute.xlu1 %9831  ;;  %9973 = vrot.lane.b32.xlu0 %v18166_v2, %s13388_s12 }
 0x605   : > { %v10051_v46 = vsel %vm1115_vm3, %v10019_v10, %v9832_v19 }
 0x606   : > { %v9834_v0 = vpop.permute.xlu0 %9833  ;;  %9775 = vrot.lane.b32.xlu1 %v18161_v1, %s13386_s26 }
 0x607   : > { %v10052_v3 = vsel %vm1115_vm3, %v10020_v24, %v9834_v0 }
 0x608   : > { %v9928_v6 = vpop.permute.xlu1 %9927  ;;  %9777 = vrot.lane.b32.xlu0 %v18169_v53, %s13386_s26 }
 0x609   : > { %v10083_v38 = vsel %vm1124_vm4, %v10051_v46, %v9928_v6 }
 0x60a   : > { %v10183_v12 = vmul.f32 %v10170_v49, %v10083_v38  ;;  %v10185_v57 = vmul.f32 %v10174_v48, %v10083_v38  ;;  %v10187_v55 = vmul.f32 %v10178_v44, %v10083_v38  ;;  %v10189_v42 = vmul.f32 %v10182_v54, %v10083_v38  ;;  %v9930_v41 = vpop.permute.xlu0 %9929  ;;  %9871 = vrot.lane.b32.xlu1 %v18161_v1, %s13387_s30 }
 0x60b   : > { %v10084_v13 = vsel %vm1124_vm4, %v10052_v3, %v9930_v41 }
 0x60c   : > { %v10191_v17 = vadd.f32 %v10183_v12, %v18311_v34  ;;  %v10193_v10 = vadd.f32 %v10185_v57, %v18313_v20  ;;  %v10195_v19 = vadd.f32 %v10187_v55, %v18315_v61  ;;  %v10197_v24 = vadd.f32 %v10189_v42, %v18317_v51  ;;  %v9748_v0 = vpop.permute.xlu1 %9747  ;;  %9873 = vrot.lane.b32.xlu0 %v18169_v53, %s13387_s30 }
 0x60d   : > { %v10184_v46 = vmul.f32 %v10170_v49, %v10084_v13  ;;  %v10186_v6 = vmul.f32 %v10174_v48, %v10084_v13  ;;  %v10188_v38 = vmul.f32 %v10178_v44, %v10084_v13  ;;  %v10190_v2 = vmul.f32 %v10182_v54, %v10084_v13 }
 0x60e   : > { %v9750_v37 = vpop.permute.xlu0 %9749  ;;  %9967 = vrot.lane.b32.xlu1 %v18161_v1, %s13388_s12  ;;  %v18391_v3 = vadd.f32 %v10215_v28, %v10191_v17  ;;  %v18393_v34 = vadd.f32 %v10217_v43, %v10193_v10  ;;  %v18395_v20 = vadd.f32 %v10219_v36, %v10195_v19  ;;  %v10025_v48 = vsel %vm272_vm0, %v18150_v23, %v9748_v0 }
 0x60f   : > { %v10192_v61 = vadd.f32 %v10184_v46, %v18323_v31  ;;  %v10194_v51 = vadd.f32 %v10186_v6, %v18325_v39  ;;  %v10196_v12 = vadd.f32 %v10188_v38, %v18327_v45  ;;  %v10198_v49 = vadd.f32 %v10190_v2, %v18329_v5 }
 0x610   : > { %v9844_v44 = vpop.permute.xlu1 %9843  ;;  %9969 = vrot.lane.b32.xlu0 %v18169_v53, %s13388_s12  ;;  %v10229_v28 = vadd.f32 %v10221_v22, %v10197_v24  ;;  %v10026_v39 = vsel %vm272_vm0, %v18158_v30, %v9750_v37  ;;  %v10266_v5 = vrot.slane %v17993_v63, %v17168_v14  ;;  %v10270_v22 = vrot.slane %v17999_v11, %v17168_v14 }
 0x611   : > { %v10057_v43 = vsel %vm1115_vm3, %v10025_v48, %v9844_v44  ;;  %v18406_v36 = vadd.f32 %v10216_v21, %v10192_v61  ;;  %v18408_v54 = vadd.f32 %v10218_v47, %v10194_v51  ;;  %v18410_v31 = vadd.f32 %v10220_v27, %v10196_v12 }
 0x612   : > { %v9846_v2 = vpop.permute.xlu0 %9845  ;;  %9787 = vrot.lane.b32.xlu1 %v18178_v62, %s13386_s26  ;;  %v18416_v23 = vadd.f32 %v10222_v58, %v10198_v49  ;;  %v10274_v21 = vrot.slane %v18004_v18, %v17168_v14  ;;  %v10278_v37 = vrot.slane %v18008_v15, %v17168_v14  ;;  %v10234_v49 = vrot.slane %v17993_v63, %v19466_v25 }
 0x613   : > { %v10058_v45 = vsel %vm1115_vm3, %v10026_v39, %v9846_v2  ;;  %v10242_v48 = vrot.slane %v18004_v18, %v19466_v25  ;;  %v10246_v44 = vrot.slane %v18008_v15, %v19466_v25 }
 0x614   : > { %v9940_v30 = vpop.permute.xlu1 %9939  ;;  %9789 = vrot.lane.b32.xlu0 %v18186_v29, %s13386_s26 }
 0x615   : > { %v10089_v47 = vsel %vm1124_vm4, %v10057_v43, %v9940_v30 }
 0x616   : > { %v10279_v27 = vmul.f32 %v10266_v5, %v10089_v47  ;;  %v10281_v58 = vmul.f32 %v10270_v22, %v10089_v47  ;;  %v10283_v57 = vmul.f32 %v10274_v21, %v10089_v47  ;;  %v10285_v55 = vmul.f32 %v10278_v37, %v10089_v47  ;;  %v9942_v42 = vpop.permute.xlu0 %9941  ;;  %9883 = vrot.lane.b32.xlu1 %v18178_v62, %s13387_s30 }
 0x617   : > { %v10090_v41 = vsel %vm1124_vm4, %v10058_v45, %v9942_v42 }
 0x618   : > { %v10280_v13 = vmul.f32 %v10266_v5, %v10090_v41  ;;  %v10282_v17 = vmul.f32 %v10270_v22, %v10090_v41  ;;  %v10284_v10 = vmul.f32 %v10274_v21, %v10090_v41  ;;  %v10286_v19 = vmul.f32 %v10278_v37, %v10090_v41  ;;  %v9744_v24 = vpop.permute.xlu1 %9743  ;;  %9885 = vrot.lane.b32.xlu0 %v18186_v29, %s13387_s30  ;;  %v13033_v37 = vld [vmem:[%s18897_s2 + $0x50] sm:$0xff]  }
 0x619   : > { %v10023_v46 = vsel %vm272_vm0, %v18190_v32, %v9744_v24  ;;  %v10238_v32 = vrot.slane %v17999_v11, %v19466_v25  ;;  %12534 = vmatprep.subr.bf16.mxu0 %v13033_v37 }
 0x61a   : > { %v9746_v0 = vpop.permute.xlu0 %9745  ;;  %9783 = vrot.lane.b32.xlu1 %v18181_v26, %s13386_s26  ;;  %12535 = vmatpush3.bf16.msra.mxu0 %v13033_v37 }
 0x61b   : > { %v10024_v61 = vsel %vm272_vm0, %v18199_v35, %v9746_v0  ;;  %v13034_v0 = vld [vmem:[%s18897_s2 + $0x58] sm:$0xff]  }
 0x61c   : > { %v9840_v6 = vpop.permute.xlu1 %9839  ;;  %9785 = vrot.lane.b32.xlu0 %v18193_v33, %s13386_s26  ;;  %12536 = vmatprep.subr.bf16.mxu0 %v13034_v0 }
 0x61d   : > { %v10055_v38 = vsel %vm1115_vm3, %v10023_v46, %v9840_v6 }
 0x61e   : > { %v9842_v51 = vpop.permute.xlu0 %9841  ;;  %9879 = vrot.lane.b32.xlu1 %v18181_v26, %s13387_s30  ;;  %12537 = vmatpush3.bf16.msra.mxu0 %v13034_v0 }
 0x61f   : > { %v10056_v12 = vsel %vm1115_vm3, %v10024_v61, %v9842_v51 }
 0x620   : > { %v9936_v43 = vpop.permute.xlu1 %9935  ;;  %9881 = vrot.lane.b32.xlu0 %v18193_v33, %s13387_s30 }
 0x621   : > { %v10087_v35 = vsel %vm1124_vm4, %v10055_v38, %v9936_v43 }
 0x622   : > { %v10247_v39 = vmul.f32 %v10234_v49, %v10087_v35  ;;  %v10249_v2 = vmul.f32 %v10238_v32, %v10087_v35  ;;  %v10251_v45 = vmul.f32 %v10242_v48, %v10087_v35  ;;  %v10253_v5 = vmul.f32 %v10246_v44, %v10087_v35  ;;  %v9938_v22 = vpop.permute.xlu0 %9937  ;;  %9975 = vrot.lane.b32.xlu1 %v18181_v26, %s13388_s12 }
 0x623   : > { %v10088_v21 = vsel %vm1124_vm4, %v10056_v12, %v9938_v22 }
 0x624   : > { %v10255_v30 = vadd.f32 %v10247_v39, %v18391_v3  ;;  %v10257_v47 = vadd.f32 %v10249_v2, %v18393_v34  ;;  %v10259_v42 = vadd.f32 %v10251_v45, %v18395_v20  ;;  %v10261_v41 = vadd.f32 %v10253_v5, %v10229_v28  ;;  %v9756_v24 = vpop.permute.xlu1 %9755  ;;  %9977 = vrot.lane.b32.xlu0 %v18193_v33, %s13388_s12 }
 0x625   : > { %v10248_v46 = vmul.f32 %v10234_v49, %v10088_v21  ;;  %v10250_v6 = vmul.f32 %v10238_v32, %v10088_v21  ;;  %v10252_v38 = vmul.f32 %v10242_v48, %v10088_v21  ;;  %v10254_v61 = vmul.f32 %v10246_v44, %v10088_v21 }
 0x626   : > { %v9758_v51 = vpop.permute.xlu0 %9757  ;;  %9979 = vrot.lane.b32.xlu1 %v18178_v62, %s13388_s12  ;;  %v10287_v3 = vadd.f32 %v10279_v27, %v10255_v30  ;;  %v10289_v34 = vadd.f32 %v10281_v58, %v10257_v47  ;;  %v10291_v20 = vadd.f32 %v10283_v57, %v10259_v42  ;;  %v10029_v49 = vsel %vm272_vm0, %v18078_v60, %v9756_v24 }
 0x627   : > { %v10256_v28 = vadd.f32 %v10248_v46, %v18406_v36  ;;  %v10258_v12 = vadd.f32 %v10250_v6, %v18408_v54  ;;  %v10260_v43 = vadd.f32 %v10252_v38, %v18410_v31  ;;  %v10262_v35 = vadd.f32 %v10254_v61, %v18416_v23 }
 0x628   : > { %v9852_v32 = vpop.permute.xlu1 %9851  ;;  %9981 = vrot.lane.b32.xlu0 %v18186_v29, %s13388_s12  ;;  %v10293_v48 = vadd.f32 %v10285_v55, %v10261_v41  ;;  %v10030_v54 = vsel %vm272_vm0, %v18089_v40, %v9758_v51  ;;  %v10330_v60 = vrot.slane %v17993_v63, %v19463_v59  ;;  %v10334_v55 = vrot.slane %v17999_v11, %v19463_v59 }
 0x629   : > { %v10061_v27 = vsel %vm1115_vm3, %v10029_v49, %v9852_v32  ;;  %v10288_v58 = vadd.f32 %v10280_v13, %v10256_v28  ;;  %v10290_v36 = vadd.f32 %v10282_v17, %v10258_v12  ;;  %v10292_v57 = vadd.f32 %v10284_v10, %v10260_v43 }
 0x62a   : > { %v9854_v31 = vpop.permute.xlu0 %9853  ;;  %v10294_v23 = vadd.f32 %v10286_v19, %v10262_v35  ;;  %v10338_v39 = vrot.slane %v18004_v18, %v19463_v59  ;;  %v10342_v13 = vrot.slane %v18008_v15, %v19463_v59  ;;  %v10298_v51 = vrot.slane %v17993_v63, %v17176_v16 }
 0x62b   : > { %v10062_v44 = vsel %vm1115_vm3, %v10030_v54, %v9854_v31  ;;  %v10302_v28 = vrot.slane %v17999_v11, %v17176_v16  ;;  %v10306_v12 = vrot.slane %v18004_v18, %v17176_v16 }
 0x62c   : > { %v9948_v17 = vpop.permute.xlu1 %9947 }
 0x62d   : > { %v10093_v40 = vsel %vm1124_vm4, %v10061_v27, %v9948_v17 }
 0x62e   : > { %v10343_v10 = vmul.f32 %v10330_v60, %v10093_v40  ;;  %v10345_v19 = vmul.f32 %v10334_v55, %v10093_v40  ;;  %v10347_v2 = vmul.f32 %v10338_v39, %v10093_v40  ;;  %v10349_v45 = vmul.f32 %v10342_v13, %v10093_v40  ;;  %v9950_v5 = vpop.permute.xlu0 %9949 }
 0x62f   : > { %v10094_v22 = vsel %vm1124_vm4, %v10062_v44, %v9950_v5 }
 0x630   : > { %v10344_v21 = vmul.f32 %v10330_v60, %v10094_v22  ;;  %v10346_v37 = vmul.f32 %v10334_v55, %v10094_v22  ;;  %v10348_v30 = vmul.f32 %v10338_v39, %v10094_v22  ;;  %v10350_v47 = vmul.f32 %v10342_v13, %v10094_v22  ;;  %v9752_v42 = vpop.permute.xlu1 %9751 }
 0x631   : > { %v10027_v24 = vsel %vm272_vm0, %v18084_v56, %v9752_v42  ;;  %v10310_v56 = vrot.slane %v18008_v15, %v17176_v16 }
 0x632   : > { %v9754_v41 = vpop.permute.xlu0 %9753 }
 0x633   : > { %v10028_v6 = vsel %vm272_vm0, %v18095_v8, %v9754_v41 }
 0x634   : > { %v9848_v0 = vpop.permute.xlu1 %9847 }
 0x635   : > { %v10059_v46 = vsel %vm1115_vm3, %v10027_v24, %v9848_v0 }
 0x636   : > { %v9850_v38 = vpop.permute.xlu0 %9849 }
 0x637   : > { %v10060_v61 = vsel %vm1115_vm3, %v10028_v6, %v9850_v38 }
 0x638   : > { %v9944_v43 = vpop.permute.xlu1 %9943 }
 0x639   : > { %v10091_v35 = vsel %vm1124_vm4, %v10059_v46, %v9944_v43 }
 0x63a   : > { %v10311_v49 = vmul.f32 %v10298_v51, %v10091_v35  ;;  %v10313_v8 = vmul.f32 %v10302_v28, %v10091_v35  ;;  %v10315_v32 = vmul.f32 %v10306_v12, %v10091_v35  ;;  %v10317_v27 = vmul.f32 %v10310_v56, %v10091_v35  ;;  %v9946_v54 = vpop.permute.xlu0 %9945 }
 0x63b   : > { %v10092_v31 = vsel %vm1124_vm4, %v10060_v61, %v9946_v54  ;;  %v19493_v61 = vld [vmem:[#allocation49_spill] sm:$0xff] }
 0x63c   : > { %v10319_v63 = vadd.f32 %v10311_v49, %v10287_v3  ;;  %v10321_v44 = vadd.f32 %v10313_v8, %v10289_v34  ;;  %v10323_v60 = vadd.f32 %v10315_v32, %v10291_v20  ;;  %v10325_v11 = vadd.f32 %v10317_v27, %v10293_v48  ;;  %v9764_v55 = vpop.permute.xlu1 %9763 }
 0x63d   : > { %v10312_v39 = vmul.f32 %v10298_v51, %v10092_v31  ;;  %v10314_v18 = vmul.f32 %v10302_v28, %v10092_v31  ;;  %v10316_v13 = vmul.f32 %v10306_v12, %v10092_v31  ;;  %v10318_v17 = vmul.f32 %v10310_v56, %v10092_v31 }
 0x63e   : > { %v9766_v15 = vpop.permute.xlu0 %9765  ;;  %v10351_v40 = vadd.f32 %v10343_v10, %v10319_v63  ;;  %v10353_v5 = vadd.f32 %v10345_v19, %v10321_v44  ;;  %v10355_v22 = vadd.f32 %v10347_v2, %v10323_v60  ;;  %v10033_v46 = vsel %vm272_vm0, %v18106_v52, %v9764_v55  ;;  %v19496_v2 = vld [vmem:[#allocation33_spill] sm:$0xff]  ;;  %v19499_v55 = vld [vmem:[#allocation12_spill] sm:$0xff] }
 0x63f   : > { %v10320_v42 = vadd.f32 %v10312_v39, %v10288_v58  ;;  %v10322_v41 = vadd.f32 %v10314_v18, %v10290_v36  ;;  %v10324_v24 = vadd.f32 %v10316_v13, %v10292_v57  ;;  %v10326_v0 = vadd.f32 %v10318_v17, %v10294_v23  ;;  %v19494_v36 = vld [vmem:[#allocation9_spill] sm:$0xff]  ;;  %v19500_v18 = vld [vmem:[#allocation22_spill] sm:$0xff] }
 0x640   : > { %v9860_v3 = vpop.permute.xlu1 %9859  ;;  %v10357_v34 = vadd.f32 %v10349_v45, %v10325_v11  ;;  %v10034_v51 = vsel %vm272_vm0, %v19493_v61, %v9766_v15  ;;  %v19495_v57 = vld [vmem:[#allocation57_spill] sm:$0xff]  ;;  %v10398_v52 = vrot.slane %v19496_v2, %v19494_v36  ;;  %v19497_v45 = vld [vmem:[#allocation47_spill] sm:$0xff]  ;;  %v10366_v17 = vrot.slane %v19496_v2, %v19500_v18  ;;  %v19501_v15 = vld [vmem:[#allocation26_spill] sm:$0xff] }
 0x641   : > { %v10065_v20 = vsel %vm1115_vm3, %v10033_v46, %v9860_v3  ;;  %v10352_v48 = vadd.f32 %v10344_v21, %v10320_v42  ;;  %v10354_v6 = vadd.f32 %v10346_v37, %v10322_v41  ;;  %v10356_v38 = vadd.f32 %v10348_v30, %v10324_v24  ;;  %v19498_v21 = vld [vmem:[#allocation53_spill] sm:$0xff] }
 0x642   : > { %v9862_v10 = vpop.permute.xlu0 %9861  ;;  %v10358_v19 = vadd.f32 %v10350_v47, %v10326_v0  ;;  %v10394_v23 = vrot.slane %v19495_v57, %v19494_v36  ;;  %v10402_v28 = vrot.slane %v19497_v45, %v19494_v36  ;;  %v10406_v37 = vrot.slane %v19498_v21, %v19494_v36 }
 0x643   : > { %v10066_v58 = vsel %vm1115_vm3, %v10034_v51, %v9862_v10  ;;  %v10362_v13 = vrot.slane %v19495_v57, %v19500_v18  ;;  %v10370_v24 = vrot.slane %v19497_v45, %v19500_v18  ;;  %v10374_v0 = vrot.slane %v19498_v21, %v19500_v18 }
 0x644   : > { %v9956_v30 = vpop.permute.xlu1 %9955 }
 0x645   : > { %v10097_v12 = vsel %vm1124_vm4, %v10065_v20, %v9956_v30 }
 0x646   : > { %v10407_v56 = vmul.f32 %v10394_v23, %v10097_v12  ;;  %v10409_v43 = vmul.f32 %v10398_v52, %v10097_v12  ;;  %v10411_v47 = vmul.f32 %v10402_v28, %v10097_v12  ;;  %v10413_v35 = vmul.f32 %v10406_v37, %v10097_v12  ;;  %v9958_v49 = vpop.permute.xlu0 %9957 }
 0x647   : > { %v10098_v8 = vsel %vm1124_vm4, %v10066_v58, %v9958_v49 }
 0x648   : > { %v10408_v32 = vmul.f32 %v10394_v23, %v10098_v8  ;;  %v10410_v27 = vmul.f32 %v10398_v52, %v10098_v8  ;;  %v10412_v54 = vmul.f32 %v10402_v28, %v10098_v8  ;;  %v10414_v31 = vmul.f32 %v10406_v37, %v10098_v8  ;;  %v9760_v63 = vpop.permute.xlu1 %9759 }
 0x649   : > { %v10031_v39 = vsel %vm272_vm0, %v19499_v55, %v9760_v63 }
 0x64a   : > { %v9762_v44 = vpop.permute.xlu0 %9761 }
 0x64b   : > { %v10032_v42 = vsel %vm272_vm0, %v19501_v15, %v9762_v44 }
 0x64c   : > { %v9856_v60 = vpop.permute.xlu1 %9855 }
 0x64d   : > { %v10063_v41 = vsel %vm1115_vm3, %v10031_v39, %v9856_v60 }
 0x64e   : > { %v9858_v11 = vpop.permute.xlu0 %9857 }
 0x64f   : > { %v10064_v3 = vsel %vm1115_vm3, %v10032_v42, %v9858_v11 }
 0x650   : > { %v9952_v46 = vpop.permute.xlu1 %9951 }
 0x651   : > { %v10095_v20 = vsel %vm1124_vm4, %v10063_v41, %v9952_v46 }
 0x652   : > { %v10375_v61 = vmul.f32 %v10362_v13, %v10095_v20  ;;  %v10377_v51 = vmul.f32 %v10366_v17, %v10095_v20  ;;  %v10379_v10 = vmul.f32 %v10370_v24, %v10095_v20  ;;  %v10381_v58 = vmul.f32 %v10374_v0, %v10095_v20  ;;  %v9954_v36 = vpop.permute.xlu0 %9953 }
 0x653   : > { %v10096_v23 = vsel %vm1124_vm4, %v10064_v3, %v9954_v36  ;;  %v10434_v36 = vrot.slane %v19497_v45, %v19440_v7 }
 0x654   : > { %v10383_v52 = vadd.f32 %v10375_v61, %v10351_v40  ;;  %v10385_v28 = vadd.f32 %v10377_v51, %v10353_v5  ;;  %v10387_v37 = vadd.f32 %v10379_v10, %v10355_v22  ;;  %v10389_v30 = vadd.f32 %v10381_v58, %v10357_v34  ;;  %v9772_v12 = vpop.permute.xlu1 %9771 }
 0x655   : > { %v10376_v49 = vmul.f32 %v10362_v13, %v10096_v23  ;;  %v10378_v8 = vmul.f32 %v10366_v17, %v10096_v23  ;;  %v10380_v63 = vmul.f32 %v10370_v24, %v10096_v23  ;;  %v10382_v44 = vmul.f32 %v10374_v0, %v10096_v23  ;;  %v19502_v0 = vld [vmem:[#allocation23_spill] sm:$0xff] }
 0x656   : > { %v9774_v60 = vpop.permute.xlu0 %9773  ;;  %v10415_v11 = vadd.f32 %v10407_v56, %v10383_v52  ;;  %v10417_v55 = vadd.f32 %v10409_v43, %v10385_v28  ;;  %v10419_v39 = vadd.f32 %v10411_v47, %v10387_v37  ;;  %v10421_v20 = vadd.f32 %v10413_v35, %v10389_v30  ;;  %v19503_v35 = vld [vmem:[#allocation18_spill] sm:$0xff] }
 0x657   : > { %v10384_v18 = vadd.f32 %v10376_v49, %v10352_v48  ;;  %v10386_v15 = vadd.f32 %v10378_v8, %v10354_v6  ;;  %v10388_v42 = vadd.f32 %v10380_v63, %v10356_v38  ;;  %v10390_v41 = vadd.f32 %v10382_v44, %v10358_v19 }
 0x658   : > { %v9868_v46 = vpop.permute.xlu1 %9867  ;;  %v10037_v56 = vsel %vm272_vm0, %v19502_v0, %v9772_v12  ;;  %v10458_v6 = vrot.slane %v19495_v57, %v17166_v50  ;;  %v10462_v38 = vrot.slane %v19496_v2, %v17166_v50  ;;  %v10466_v19 = vrot.slane %v19497_v45, %v17166_v50 }
 0x659   : > { %v10416_v3 = vadd.f32 %v10408_v32, %v10384_v18  ;;  %v10418_v40 = vadd.f32 %v10410_v27, %v10386_v15  ;;  %v10420_v5 = vadd.f32 %v10412_v54, %v10388_v42  ;;  %v10422_v34 = vadd.f32 %v10414_v31, %v10390_v41 }
 0x65a   : > { %v9870_v22 = vpop.permute.xlu0 %9869  ;;  %v10069_v43 = vsel %vm1115_vm3, %v10037_v56, %v9868_v46  ;;  %v10038_v32 = vsel %vm272_vm0, %v19503_v35, %v9774_v60  ;;  %v10470_v27 = vrot.slane %v19498_v21, %v17166_v50  ;;  %v10426_v31 = vrot.slane %v19495_v57, %v19440_v7 }
 0x65b   : > { %v10430_v51 = vrot.slane %v19496_v2, %v19440_v7  ;;  %v10070_v10 = vsel %vm1115_vm3, %v10038_v32, %v9870_v22  ;;  %v10438_v23 = vrot.slane %v19498_v21, %v19440_v7 }
 0x65c   : > { %v9964_v61 = vpop.permute.xlu1 %9963 }
 0x65d   : > { %v10101_v47 = vsel %vm1124_vm4, %v10069_v43, %v9964_v61 }
 0x65e   : > { %v9966_v13 = vpop.permute.xlu0 %9965  ;;  %v10471_v52 = vmul.f32 %v10458_v6, %v10101_v47  ;;  %v10473_v12 = vmul.f32 %v10462_v38, %v10101_v47  ;;  %v10475_v49 = vmul.f32 %v10466_v19, %v10101_v47  ;;  %v10477_v15 = vmul.f32 %v10470_v27, %v10101_v47 }
 0x65f   : > { %v10102_v50 = vsel %vm1124_vm4, %v10070_v10, %v9966_v13 }
 0x660   : > { %v9768_v17 = vpop.permute.xlu1 %9767  ;;  %v10472_v42 = vmul.f32 %v10458_v6, %v10102_v50  ;;  %v10474_v41 = vmul.f32 %v10462_v38, %v10102_v50 }
 0x661   : > { %v10035_v58 = vsel %vm272_vm0, %v18135_v4, %v9768_v17 }
 0x662   : > { %v9770_v24 = vpop.permute.xlu0 %9769 }
 0x663   : > { %v10036_v28 = vsel %vm272_vm0, %v18143_v9, %v9770_v24 }
 0x664   : > { %v9864_v48 = vpop.permute.xlu1 %9863 }
 0x665   : > { %v10067_v37 = vsel %vm1115_vm3, %v10035_v58, %v9864_v48  ;;  %v10476_v48 = vmul.f32 %v10466_v19, %v10102_v50 }
 0x666   : > { %v9866_v54 = vpop.permute.xlu0 %9865 }
 0x667   : > { %v10068_v8 = vsel %vm1115_vm3, %v10036_v28, %v9866_v54  ;;  %v19505_v28 = vld [vmem:[#allocation52_spill] sm:$0xff] }
 0x668   : > { %v9960_v30 = vpop.permute.xlu1 %9959 }
 0x669   : > { %v10099_v4 = vsel %vm1124_vm4, %v10067_v37, %v9960_v30  ;;  %v2113_v37 = vrot.slane %v19505_v28, 4 }
 0x66a   : > { %v10439_v63 = vmul.f32 %v10426_v31, %v10099_v4  ;;  %v10441_v44 = vmul.f32 %v10430_v51, %v10099_v4  ;;  %v10443_v60 = vmul.f32 %v10434_v36, %v10099_v4  ;;  %v10445_v18 = vmul.f32 %v10438_v23, %v10099_v4  ;;  %v9962_v7 = vpop.permute.xlu0 %9961 }
 0x66b   : > { %v10100_v46 = vsel %vm1124_vm4, %v10068_v8, %v9962_v7 }
 0x66c   : > { %v10447_v9 = vadd.f32 %v10439_v63, %v10415_v11  ;;  %v10449_v22 = vadd.f32 %v10441_v44, %v10417_v55  ;;  %v10451_v61 = vadd.f32 %v10443_v60, %v10419_v39  ;;  %v10453_v13 = vadd.f32 %v10445_v18, %v10421_v20  ;;  %v9780_v17 = vpop.permute.xlu1 %9779  ;;  %v19508_v44 = vld [vmem:[#allocation8_spill] sm:$0xff] }
 0x66d   : > { %v10440_v24 = vmul.f32 %v10426_v31, %v10100_v46  ;;  %v10442_v0 = vmul.f32 %v10430_v51, %v10100_v46  ;;  %v10444_v56 = vmul.f32 %v10434_v36, %v10100_v46  ;;  %v10446_v43 = vmul.f32 %v10438_v23, %v10100_v46  ;;  %v19504_v23 = vld [vmem:[#allocation15_spill] sm:$0xff] }
 0x66e   : > { %v9782_v35 = vpop.permute.xlu0 %9781  ;;  %v18576_v32 = vadd.f32 %v10471_v52, %v10447_v9  ;;  %v18578_v54 = vadd.f32 %v10473_v12, %v10449_v22  ;;  %v18580_v47 = vadd.f32 %v10475_v49, %v10451_v61  ;;  %v10478_v55 = vmul.f32 %v10470_v27, %v10102_v50  ;;  %v19507_v27 = vld [vmem:[#allocation40_spill] sm:$0xff] }
 0x66f   : > { %v10448_v6 = vadd.f32 %v10440_v24, %v10416_v3  ;;  %v10450_v38 = vadd.f32 %v10442_v0, %v10418_v40  ;;  %v10452_v10 = vadd.f32 %v10444_v56, %v10420_v5  ;;  %v10454_v11 = vadd.f32 %v10446_v43, %v10422_v34  ;;  %v19506_v5 = vld [vmem:[#allocation11_spill] sm:$0xff]  ;;  %v19509_v0 = vld [vmem:[#allocation14_spill] sm:$0xff] }
 0x670   : > { %v9876_v39 = vpop.permute.xlu1 %9875  ;;  %v10485_v20 = vadd.f32 %v10477_v15, %v10453_v13  ;;  %v2106_v52 = vrot.slane %v19504_v23, 4  ;;  %v2120_v34 = vrot.slane %v19506_v5, 4  ;;  %v2127_v50 = vrot.slane %v19507_v27, 4 }
 0x671   : > { %v18582_v58 = vadd.f32 %v10472_v42, %v10448_v6  ;;  %v18584_v31 = vadd.f32 %v10474_v41, %v10450_v38  ;;  %v18586_v51 = vadd.f32 %v10476_v48, %v10452_v10  ;;  %v18588_v36 = vadd.f32 %v10478_v55, %v10454_v11 }
 0x672   : > { %v9878_v19 = vpop.permute.xlu0 %9877  ;;  %v2107_v30 = vadd.f32 %v2106_v52, %v19504_v23  ;;  %v2114_v12 = vadd.f32 %v2113_v37, %v19505_v28  ;;  %v18597_v4 = vadd.f32 %v2120_v34, %v19506_v5  ;;  %v18600_v63 = vadd.f32 %v2127_v50, %v19507_v27 }
 0x673   : > { %v10041_v60 = vsel %vm272_vm0, %v19508_v44, %v9780_v17  ;;  %v10522_v18 = vrot.slane %v19495_v57, %v17168_v14  ;;  %v10526_v41 = vrot.slane %v19496_v2, %v17168_v14  ;;  %v10530_v46 = vrot.slane %v19497_v45, %v17168_v14 }
 0x674   : > { %v9972_v3 = vpop.permute.xlu1 %9971  ;;  %v2108_v7 = vrot.slane %v2107_v30, 2  ;;  %v2115_v15 = vrot.slane %v2114_v12, 2  ;;  %v10073_v42 = vsel %vm1115_vm3, %v10041_v60, %v9876_v39  ;;  %v10534_v9 = vrot.slane %v19498_v21, %v17168_v14 }
 0x675   : > { %v10105_v61 = vsel %vm1124_vm4, %v10073_v42, %v9972_v3  ;;  %v10490_v13 = vrot.slane %v19495_v57, %v19466_v25  ;;  %v10494_v17 = vrot.slane %v19496_v2, %v19466_v25  ;;  %v10498_v24 = vrot.slane %v19497_v45, %v19466_v25 }
 0x676   : > { %v9974_v40 = vpop.permute.xlu0 %9973  ;;  %v10042_v56 = vsel %vm272_vm0, %v19509_v0, %v9782_v35  ;;  %v10502_v48 = vrot.slane %v19498_v21, %v19466_v25  ;;  %v2122_v14 = vrot.slane %v18597_v4, 2  ;;  %v2129_v6 = vrot.slane %v18600_v63, 2 }
 0x677   : > { %v10074_v38 = vsel %vm1115_vm3, %v10042_v56, %v9878_v19  ;;  %v2109_v11 = vadd.f32 %v2108_v7, %v2107_v30  ;;  %v2116_v55 = vadd.f32 %v2115_v15, %v2114_v12  ;;  %v10535_v39 = vmul.f32 %v10522_v18, %v10105_v61 }
 0x678   : > { %v9776_v49 = vpop.permute.xlu1 %9775  ;;  %v10106_v23 = vsel %vm1124_vm4, %v10074_v38, %v9974_v40  ;;  %v10537_v28 = vmul.f32 %v10526_v41, %v10105_v61  ;;  %v10539_v37 = vmul.f32 %v10530_v46, %v10105_v61  ;;  %v10541_v30 = vmul.f32 %v10534_v9, %v10105_v61 }
 0x679   : > { %v10039_v10 = vsel %vm272_vm0, %v18161_v1, %v9776_v49  ;;  %v10536_v12 = vmul.f32 %v10522_v18, %v10106_v23  ;;  %v10538_v40 = vmul.f32 %v10526_v41, %v10106_v23  ;;  %v10540_v56 = vmul.f32 %v10530_v46, %v10106_v23 }
 0x67a   : > { %v9778_v8 = vpop.permute.xlu0 %9777 }
 0x67b   : > { %v10040_v35 = vsel %vm272_vm0, %v18169_v53, %v9778_v8 }
 0x67c   : > { %v9872_v22 = vpop.permute.xlu1 %9871 }
 0x67d   : > { %v10071_v52 = vsel %vm1115_vm3, %v10039_v10, %v9872_v22 }
 0x67e   : > { %v9874_v43 = vpop.permute.xlu0 %9873 }
 0x67f   : > { %v10072_v3 = vsel %vm1115_vm3, %v10040_v35, %v9874_v43 }
 0x680   : > { %v9968_v25 = vpop.permute.xlu1 %9967 }
 0x681   : > { %v10103_v19 = vsel %vm1124_vm4, %v10071_v52, %v9968_v25  ;;  %v2110_v25 = vrot.slane %v2109_v11, 1 }
 0x682   : > { %v10503_v5 = vmul.f32 %v10490_v13, %v10103_v19  ;;  %v10505_v34 = vmul.f32 %v10494_v17, %v10103_v19  ;;  %v10507_v1 = vmul.f32 %v10498_v24, %v10103_v19  ;;  %v10509_v27 = vmul.f32 %v10502_v48, %v10103_v19  ;;  %v9970_v50 = vpop.permute.xlu0 %9969 }
 0x683   : > { %v10104_v49 = vsel %vm1124_vm4, %v10072_v3, %v9970_v50  ;;  %v2111_v3 = vadd.f32 %v2110_v25, %v2109_v11  ;;  %v10566_v11 = vrot.slane %v19498_v21, %v17176_v16 }
 0x684   : > { %v10511_v53 = vadd.f32 %v10503_v5, %v18576_v32  ;;  %v10513_v8 = vadd.f32 %v10505_v34, %v18578_v54  ;;  %v10515_v44 = vadd.f32 %v10507_v1, %v18580_v47  ;;  %v10517_v60 = vadd.f32 %v10509_v27, %v10485_v20  ;;  %v9788_v7 = vpop.permute.xlu1 %9787 }
 0x685   : > { %v10504_v15 = vmul.f32 %v10490_v13, %v10104_v49  ;;  %v10506_v42 = vmul.f32 %v10494_v17, %v10104_v49  ;;  %v10508_v22 = vmul.f32 %v10498_v24, %v10104_v49  ;;  %v10510_v0 = vmul.f32 %v10502_v48, %v10104_v49 }
 0x686   : > { %v9790_v43 = vpop.permute.xlu0 %9789  ;;  %v10543_v38 = vadd.f32 %v10535_v39, %v10511_v53  ;;  %v10545_v61 = vadd.f32 %v10537_v28, %v10513_v8  ;;  %v10547_v18 = vadd.f32 %v10539_v37, %v10515_v44  ;;  %v10542_v47 = vmul.f32 %v10534_v9, %v10106_v23 }
 0x687   : > { %v10512_v41 = vadd.f32 %v10504_v15, %v18582_v58  ;;  %v10514_v10 = vadd.f32 %v10506_v42, %v18584_v31  ;;  %v10516_v32 = vadd.f32 %v10508_v22, %v18586_v51  ;;  %v10518_v54 = vadd.f32 %v10510_v0, %v18588_v36 }
 0x688   : > { %v9884_v20 = vpop.permute.xlu1 %9883  ;;  %v10549_v35 = vadd.f32 %v10541_v30, %v10517_v60  ;;  %v2123_v13 = vadd.f32 %v2122_v14, %v18597_v4  ;;  %v2130_v48 = vadd.f32 %v2129_v6, %v18600_v63  ;;  %v2117_v58 = vrot.slane %v2116_v55, 1 }
 0x689   : > { %v10544_v17 = vadd.f32 %v10536_v12, %v10512_v41  ;;  %v10546_v24 = vadd.f32 %v10538_v40, %v10514_v10  ;;  %v10548_v46 = vadd.f32 %v10540_v56, %v10516_v32  ;;  %v10550_v52 = vadd.f32 %v10542_v47, %v10518_v54 }
 0x68a   : > { %v9886_v39 = vpop.permute.xlu0 %9885  ;;  %v2124_v31 = vrot.slane %v2123_v13, 1  ;;  %v2131_v37 = vrot.slane %v2130_v48, 1  ;;  %v2118_v36 = vadd.f32 %v2117_v58, %v2116_v55  ;;  %v10554_v4 = vrot.slane %v19495_v57, %v17176_v16 }
 0x68b   : > { %v10558_v63 = vrot.slane %v19496_v2, %v17176_v16  ;;  %13183 = vrcp.f32 %v2111_v3  ;;  %v10562_v6 = vrot.slane %v19497_v45, %v17176_v16  ;;  %v10586_v27 = vrot.slane %v19495_v57, %v19463_v59 }
 0x68c   : > { %v9784_v28 = vpop.permute.xlu1 %9783  ;;  %v2125_v23 = vadd.f32 %v2124_v31, %v2123_v13  ;;  %v2132_v19 = vadd.f32 %v2131_v37, %v2130_v48  ;;  %13185 = vrcp.f32 %v2118_v36  ;;  %v10046_v53 = vsel %vm272_vm0, %v18186_v29, %v9790_v43 }
 0x68d   : > { %v10043_v14 = vsel %vm272_vm0, %v18181_v26, %v9784_v28  ;;  %v10045_v26 = vsel %vm272_vm0, %v18178_v62, %v9788_v7  ;;  %v10590_v62 = vrot.slane %v19496_v2, %v19463_v59  ;;  %v10078_v10 = vsel %vm1115_vm3, %v10046_v53, %v9886_v39 }
 0x68e   : > { %v9786_v51 = vpop.permute.xlu0 %9785  ;;  %13187 = vrcp.f32 %v2125_v23  ;;  %v10077_v8 = vsel %vm1115_vm3, %v10045_v26, %v9884_v20  ;;  %v10594_v29 = vrot.slane %v19497_v45, %v19463_v59  ;;  %v10598_v43 = vrot.slane %v19498_v21, %v19463_v59 }
 0x68f   : > { %v10044_v55 = vsel %vm272_vm0, %v18193_v33, %v9786_v51  ;;  %13189 = vrcp.f32 %v2132_v19 }
 0x690   : > { %v9880_v9 = vpop.permute.xlu1 %9879 }
 0x691   : > { %v10075_v34 = vsel %vm1115_vm3, %v10043_v14, %v9880_v9 }
 0x692   : > { %v9882_v5 = vpop.permute.xlu0 %9881 }
 0x693   : > { %v10076_v50 = vsel %vm1115_vm3, %v10044_v55, %v9882_v5 }
 0x694   : > { %v9976_v1 = vpop.permute.xlu1 %9975 }
 0x695   : > { %v10107_v30 = vsel %vm1124_vm4, %v10075_v34, %v9976_v1  ;;  %v13184_v47 = vpop.eup %13183 }
 0x696   : > { %v10567_v16 = vmul.f32 %v10554_v4, %v10107_v30  ;;  %v10569_v12 = vmul.f32 %v10558_v63, %v10107_v30  ;;  %v10571_v40 = vmul.f32 %v10562_v6, %v10107_v30  ;;  %v10573_v49 = vmul.f32 %v10566_v11, %v10107_v30  ;;  %v9978_v33 = vpop.permute.xlu0 %9977  ;;  %v13186_v25 = vpop.eup %13185 }
 0x697   : > { %v10108_v57 = vsel %vm1124_vm4, %v10076_v50, %v9978_v33 }
 0x698   : > { %v10575_v44 = vadd.f32 %v10567_v16, %v10543_v38  ;;  %v10577_v60 = vadd.f32 %v10569_v12, %v10545_v61  ;;  %v10579_v7 = vadd.f32 %v10571_v40, %v10547_v18  ;;  %v10581_v15 = vadd.f32 %v10573_v49, %v10549_v35  ;;  %v9980_v42 = vpop.permute.xlu1 %9979  ;;  %v13188_v58 = vpop.eup %13187 }
 0x699   : > { %v10568_v22 = vmul.f32 %v10554_v4, %v10108_v57  ;;  %v10570_v0 = vmul.f32 %v10558_v63, %v10108_v57  ;;  %v10572_v56 = vmul.f32 %v10562_v6, %v10108_v57  ;;  %v10574_v41 = vmul.f32 %v10566_v11, %v10108_v57  ;;  %v13190_v21 = vpop.eup %13189 }
 0x69a   : > { %v10109_v32 = vsel %vm1124_vm4, %v10077_v8, %v9980_v42  ;;  %v9982_v2 = vpop.permute.xlu0 %9981 }
 0x69b   : > { %v10576_v38 = vadd.f32 %v10568_v22, %v10544_v17  ;;  %v10578_v61 = vadd.f32 %v10570_v0, %v10546_v24  ;;  %v10580_v18 = vadd.f32 %v10572_v56, %v10548_v46  ;;  %v10582_v54 = vadd.f32 %v10574_v41, %v10550_v52 }
 0x69c   : > { %v10599_v20 = vmul.f32 %v10586_v27, %v10109_v32  ;;  %v10601_v35 = vmul.f32 %v10590_v62, %v10109_v32  ;;  %v10603_v13 = vmul.f32 %v10594_v29, %v10109_v32  ;;  %v10605_v48 = vmul.f32 %v10598_v43, %v10109_v32 }
 0x69d   : > { %v10110_v39 = vsel %vm1124_vm4, %v10078_v10, %v9982_v2 }
 0x69e   : > { %v10607_v45 = vadd.f32 %v10599_v20, %v10575_v44  ;;  %v10609_v28 = vadd.f32 %v10601_v35, %v10577_v60  ;;  %v10611_v31 = vadd.f32 %v10603_v13, %v10579_v7  ;;  %v10613_v59 = vadd.f32 %v10605_v48, %v10581_v15 }
 0x69f   : > { %v10600_v37 = vmul.f32 %v10586_v27, %v10110_v39  ;;  %v10602_v51 = vmul.f32 %v10590_v62, %v10110_v39  ;;  %v10604_v17 = vmul.f32 %v10594_v29, %v10110_v39  ;;  %v10606_v24 = vmul.f32 %v10598_v43, %v10110_v39 }
 0x6a0   : > { %v10619_v46 = vmul.f32 %v13184_v47, %v10607_v45  ;;  %v10621_v52 = vmul.f32 %v13186_v25, %v10609_v28  ;;  %v10623_v3 = vmul.f32 %v13188_v58, %v10611_v31  ;;  %v10625_v36 = vmul.f32 %v13190_v21, %v10613_v59 }
 0x6a1   : > { %v10608_v9 = vadd.f32 %v10600_v37, %v10576_v38  ;;  %v10610_v23 = vadd.f32 %v10602_v51, %v10578_v61  ;;  %v10612_v19 = vadd.f32 %v10604_v17, %v10580_v18  ;;  %v10614_v5 = vadd.f32 %v10606_v24, %v10582_v54 }
 0x6a3   : > { %v10620_v4 = vmul.f32 %v13184_v47, %v10608_v9  ;;  %v10622_v63 = vmul.f32 %v13186_v25, %v10610_v23  ;;  %v10624_v14 = vmul.f32 %v13188_v58, %v10612_v19  ;;  %v10626_v6 = vmul.f32 %v13190_v21, %v10614_v5  ;;  %v18709_v9 = vld [vmem:[%s18899_s4 + $0x6] ss:$0 sm:$0xff]  ;;  %v10709_v23 = vld [vmem:[%s13730_s15 + $0x10] sm:$0xff] }
 0x6a5   : > { %v12912_v11 = vpack.i.bf16 %v10622_v63, %v10621_v52  ;;  %v12907_v55 = vpack.i.bf16 %v10620_v4, %v10619_v46  ;;  %v10739_v34 = vpack.c.bf16 %v10620_v4, %v10619_v46  ;;  %v10740_v1 = vpack.c.bf16 %v10622_v63, %v10621_v52  ;;  %v10707_v4 = vld [vmem:[%s13730_s15] sm:$0xff] }
 0x6a6   : > { %v10741_v27 = vpack.c.bf16 %v10624_v14, %v10623_v3  ;;  %v12922_v26 = vpack.i.bf16 %v10626_v6, %v10625_v36  ;;  %v12917_v50 = vpack.i.bf16 %v10624_v14, %v10623_v3  ;;  %v10742_v30 = vpack.c.bf16 %v10626_v6, %v10625_v36  ;;  %v10710_v6 = vld [vmem:[%s13730_s15 + $0x18] sm:$0xff] }
 0x6a7   : > { %12913 = vrot.lane.b32.xlu0 %v12912_v11, %s13388_s12  ;;  %12908 = vrot.lane.b32.xlu1 %v12907_v55, %s13388_s12 }
 0x6a8   : > { %12538 = vmatprep.mubr.msk.bf16.mxu0 %vm272_vm0, %v10739_v34 }
 0x6a9   : > { %12539 = vmatmul.mubr.msk.bf16.vlgmr.msra.gmra.mrb[100].mxu0 %vm272_vm0, %v10740_v1  ;;  %v10708_v1 = vld [vmem:[%s13730_s15 + $0x8] sm:$0xff] }
 0x6aa   : > { %12542 = vmatprep.mubr.msk.bf16.mxu0 %vm272_vm0, %v10741_v27 }
 0x6ab   : > { %12923 = vrot.lane.b32.xlu0 %v12922_v26, %s13388_s12  ;;  %12918 = vrot.lane.b32.xlu1 %v12917_v50, %s13388_s12 }
 0x6af   : > { %12933 = vrot.lane.b32.xlu0 %v12912_v11, %s13387_s30  ;;  %12928 = vrot.lane.b32.xlu1 %v12907_v55, %s13387_s30 }
 0x6b1   : > { %12543 = vmatmul.mubr.msk.bf16.gmra.mrb[104].mxu0 %vm272_vm0, %v10742_v30 }
 0x6b3   : > { %12943 = vrot.lane.b32.xlu0 %v12922_v26, %s13387_s30  ;;  %12938 = vrot.lane.b32.xlu1 %v12917_v50, %s13387_s30 }
 0x6b7   : > { %12953 = vrot.lane.b32.xlu0 %v12912_v11, %s13386_s26  ;;  %12948 = vrot.lane.b32.xlu1 %v12907_v55, %s13386_s26 }
 0x6bb   : > { %12963 = vrot.lane.b32.xlu0 %v12922_v26, %s13386_s26  ;;  %12958 = vrot.lane.b32.xlu1 %v12917_v50, %s13386_s26  ;;  %s215_s26 = sand.u32 1, %s13375_s19  }
 0x6bc   : > { %s11124_s13 = sshll.u32 %s215_s26, 8  ;;  %s18854_s22 = scalar_lea.sflag [#allocation4], %s215_s26 }
 0x6bd   : > { %s18721_s14 = scalar_lea.vmem [#allocation3], %s11124_s13 }
 0x6be   : > { %s11058_s17 = sshll.u32 %s18721_s14, 4  ;;  %s18844_s17 = int_to_ptr.vmem [resolvable:$true] %s11058_s17 }
 0x6bf   : > { %p13328_p0 = scmp.lt.s32.totalorder %s18844_s17, %s13326_s8 }
 0x719   : > { %v12914_v16 = vpop.permute.xlu0 %12913  ;;  %v12909_v12 = vpop.permute.xlu1 %12908 }
 0x71a   : > { %v12916_v40 = vunpack.i.h.bf16 %v12914_v16  ;;  %v12915_v49 = vunpack.i.l.bf16 %v12914_v16  ;;  %v12911_v33 = vunpack.i.h.bf16 %v12909_v12  ;;  %v12910_v53 = vunpack.i.l.bf16 %v12909_v12  ;;  %v10713_v12 = vld [vmem:[%s13730_s15 + $0x30] sm:$0xff] }
 0x71c   : > { %v10744_v8 = vpack.c.bf16 %v12916_v40, %v12915_v49  ;;  %v10743_v57 = vpack.c.bf16 %v12911_v33, %v12910_v53  ;;  %v10711_v33 = vld [vmem:[%s13730_s15 + $0x20] sm:$0xff] }
 0x71d   : > { %v12919_v62 = vpop.permute.xlu1 %12918  ;;  %v12924_v44 = vpop.permute.xlu0 %12923 }
 0x71e   : > { %v12921_v60 = vunpack.i.h.bf16 %v12919_v62  ;;  %v12920_v7 = vunpack.i.l.bf16 %v12919_v62  ;;  %12546 = vmatprep.mubr.msk.bf16.mxu0 %vm272_vm0, %v10743_v57  ;;  %v12926_v42 = vunpack.i.h.bf16 %v12924_v44  ;;  %v12925_v22 = vunpack.i.l.bf16 %v12924_v44  ;;  %v10714_v57 = vld [vmem:[%s13730_s15 + $0x38] sm:$0xff] }
 0x71f   : > { %12547 = vmatmul.mubr.msk.bf16.gmra.mrb[108].mxu0 %vm272_vm0, %v10744_v8 }
 0x720   : > { %v10745_v15 = vpack.c.bf16 %v12921_v60, %v12920_v7  ;;  %v10746_v10 = vpack.c.bf16 %v12926_v42, %v12925_v22  ;;  %v10712_v7 = vld [vmem:[%s13730_s15 + $0x28] sm:$0xff] }
 0x721   : > { %v12929_v0 = vpop.permute.xlu1 %12928  ;;  %v12934_v29 = vpop.permute.xlu0 %12933 }
 0x722   : > { %v12931_v56 = vunpack.i.h.bf16 %v12929_v0  ;;  %v12930_v41 = vunpack.i.l.bf16 %v12929_v0  ;;  %12550 = vmatprep.mubr.msk.bf16.mxu0 %vm272_vm0, %v10745_v15  ;;  %v12936_v2 = vunpack.i.h.bf16 %v12934_v29  ;;  %v12935_v38 = vunpack.i.l.bf16 %v12934_v29 }
 0x724   : > { %v10747_v43 = vpack.c.bf16 %v12931_v56, %v12930_v41  ;;  %v10748_v54 = vpack.c.bf16 %v12936_v2, %v12935_v38  ;;  %v10717_v41 = vld [vmem:[%s13730_s15 + $0x50] sm:$0xff]  ;;  %v10718_v38 = vld [vmem:[%s13730_s15 + $0x58] sm:$0xff] }
 0x725   : > { %v12939_v32 = vpop.permute.xlu1 %12938  ;;  %v12944_v47 = vpop.permute.xlu0 %12943 }
 0x726   : > { %v12941_v61 = vunpack.i.h.bf16 %v12939_v32  ;;  %v12940_v18 = vunpack.i.l.bf16 %v12939_v32  ;;  %v12946_v13 = vunpack.i.h.bf16 %v12944_v47  ;;  %v12945_v48 = vunpack.i.l.bf16 %v12944_v47  ;;  %v10716_v47 = vld [vmem:[%s13730_s15 + $0x48] sm:$0xff] }
 0x727   : > { %12551 = vmatmul.mubr.msk.bf16.gmra.mrb[112].mxu0 %vm272_vm0, %v10746_v10 }
 0x728   : > { %12554 = vmatprep.mubr.msk.bf16.mxu0 %vm272_vm0, %v10747_v43  ;;  %v10749_v20 = vpack.c.bf16 %v12941_v61, %v12940_v18  ;;  %v10750_v58 = vpack.c.bf16 %v12946_v13, %v12945_v48  ;;  %v10715_v43 = vld [vmem:[%s13730_s15 + $0x40] sm:$0xff] }
 0x729   : > { %v12949_v35 = vpop.permute.xlu1 %12948  ;;  %v12954_v45 = vpop.permute.xlu0 %12953 }
 0x72a   : > { %v12951_v25 = vunpack.i.h.bf16 %v12949_v35  ;;  %v12950_v39 = vunpack.i.l.bf16 %v12949_v35  ;;  %v12956_v59 = vunpack.i.h.bf16 %v12954_v45  ;;  %v12955_v21 = vunpack.i.l.bf16 %v12954_v45 }
 0x72c   : > { %v10751_v28 = vpack.c.bf16 %v12951_v25, %v12950_v39  ;;  %v10752_v17 = vpack.c.bf16 %v12956_v59, %v12955_v21  ;;  %v10721_v39 = vld [vmem:[%s13730_s15 + $0x70] sm:$0xff]  ;;  %v10722_v21 = vld [vmem:[%s13730_s15 + $0x78] sm:$0xff] }
 0x72d   : > { %v12959_v31 = vpop.permute.xlu1 %12958  ;;  %v12964_v24 = vpop.permute.xlu0 %12963 }
 0x72e   : > { %v12961_v37 = vunpack.i.h.bf16 %v12959_v31  ;;  %v12960_v51 = vunpack.i.l.bf16 %v12959_v31  ;;  %v12966_v52 = vunpack.i.h.bf16 %v12964_v24  ;;  %v12965_v3 = vunpack.i.l.bf16 %v12964_v24  ;;  %v10720_v24 = vld [vmem:[%s13730_s15 + $0x68] sm:$0xff] }
 0x72f   : > { %12555 = vmatmul.mubr.msk.bf16.gmra.mrb[116].mxu0 %vm272_vm0, %v10748_v54 }
 0x730   : > { %12558 = vmatprep.mubr.msk.bf16.mxu0 %vm272_vm0, %v10749_v20  ;;  %v10753_v46 = vpack.c.bf16 %v12961_v37, %v12960_v51  ;;  %v10754_v36 = vpack.c.bf16 %v12966_v52, %v12965_v3 }
 0x737   : > { %12559 = vmatmul.mubr.msk.bf16.gmra.mrb[120].mxu0 %vm272_vm0, %v10750_v58 }
 0x738   : > { %12562 = vmatprep.mubr.msk.bf16.mxu0 %vm272_vm0, %v10751_v28  ;;  %v10719_v28 = vld [vmem:[%s13730_s15 + $0x60] sm:$0xff] }
 0x73f   : > { %12563 = vmatmul.mubr.msk.bf16.gmra.mrb[124].mxu0 %vm272_vm0, %v10752_v17 }
 0x740   : > { %12566 = vmatprep.mubr.msk.bf16.mxu0 %vm272_vm0, %v10753_v46 }
 0x747   : > { %12567 = vmatmul.mubr.msk.bf16.gmra.mrb[128].mxu0 %vm272_vm0, %v10754_v36 }
 0x77c   : > { %v12540_v19 = vpop.f32.mrb[100].mxu0 }
 0x77d   : > { %v10862_v5 = vadd.f32 %v12540_v19, %v18709_v9  ;;  %v10853_v63 = vpop.f32.mrb[101].mxu0  ;;  %v10725_v19 = vld [vmem:[%s13730_s15 + $0x90] sm:$0xff] }
 0x77e   : > { %v10854_v14 = vadd.f32 %v18709_v9, %v10853_v63  ;;  %v12541_v11 = vpop.f32.mrb[102].mxu0  ;;  %v10723_v63 = vld [vmem:[%s13730_s15 + $0x80] sm:$0xff] }
 0x77f   : > { %v10982_v55 = vadd.f32 %v10862_v5, %v10709_v23  ;;  %v10865_v34 = vadd.f32 %v12541_v11, %v18709_v9  ;;  %v10856_v27 = vpop.f32.mrb[103].mxu0  ;;  %v10726_v11 = vld [vmem:[%s13730_s15 + $0x98] sm:$0xff] }
 0x780   : > { %v10980_v26 = vadd.f32 %v10854_v14, %v10707_v4  ;;  %v10857_v50 = vadd.f32 %v18709_v9, %v10856_v27  ;;  %v10724_v27 = vld [vmem:[%s13730_s15 + $0x88] sm:$0xff] }
 0x781   : > { %11014 = vst.msk [vmem:[%s18721_s14 + $0x10] sm:$0xff] %vm272_vm0, %v10982_v55  ;;  %v10983_v30 = vadd.f32 %v10865_v34, %v10710_v6 }
 0x782   : > { %11012 = vst.msk [vmem:[%s18721_s14] sm:$0xff] %vm272_vm0, %v10980_v26  ;;  %v10981_v16 = vadd.f32 %v10857_v50, %v10708_v1 }
 0x783   : > { %11015 = vst.msk [vmem:[%s18721_s14 + $0x18] sm:$0xff] %vm272_vm0, %v10983_v30 }
 0x784   : > { %11013 = vst.msk [vmem:[%s18721_s14 + $0x8] sm:$0xff] %vm272_vm0, %v10981_v16  ;;  %v12544_v40 = vpop.f32.mrb[104].mxu0 }
 0x785   : > { %v10878_v49 = vadd.f32 %v12544_v40, %v18709_v9  ;;  %v10869_v53 = vpop.f32.mrb[105].mxu0  ;;  %v10729_v40 = vld [vmem:[%s13730_s15 + $0xb0] sm:$0xff] }
 0x786   : > { %v10870_v8 = vadd.f32 %v18709_v9, %v10869_v53  ;;  %v12545_v62 = vpop.f32.mrb[106].mxu0  ;;  %v10727_v53 = vld [vmem:[%s13730_s15 + $0xa0] sm:$0xff] }
 0x787   : > { %v10986_v44 = vadd.f32 %v10878_v49, %v10713_v12  ;;  %v10881_v60 = vadd.f32 %v12545_v62, %v18709_v9  ;;  %v10872_v15 = vpop.f32.mrb[107].mxu0  ;;  %v10730_v62 = vld [vmem:[%s13730_s15 + $0xb8] sm:$0xff] }
 0x788   : > { %v10984_v42 = vadd.f32 %v10870_v8, %v10711_v33  ;;  %v10873_v22 = vadd.f32 %v18709_v9, %v10872_v15  ;;  %v10728_v15 = vld [vmem:[%s13730_s15 + $0xa8] sm:$0xff] }
 0x789   : > { %11018 = vst.msk [vmem:[%s18721_s14 + $0x30] sm:$0xff] %vm272_vm0, %v10986_v44  ;;  %v10987_v0 = vadd.f32 %v10881_v60, %v10714_v57 }
 0x78a   : > { %11016 = vst.msk [vmem:[%s18721_s14 + $0x20] sm:$0xff] %vm272_vm0, %v10984_v42  ;;  %v10985_v56 = vadd.f32 %v10873_v22, %v10712_v7 }
 0x78b   : > { %11019 = vst.msk [vmem:[%s18721_s14 + $0x38] sm:$0xff] %vm272_vm0, %v10987_v0 }
 0x78c   : > { %11017 = vst.msk [vmem:[%s18721_s14 + $0x28] sm:$0xff] %vm272_vm0, %v10985_v56 }
 0x7f2   : > { %v12548_v10 = vpop.f32.mrb[108].mxu0 }
 0x7f3   : > { %v10894_v29 = vadd.f32 %v12548_v10, %v18709_v9  ;;  %v10885_v32 = vpop.f32.mrb[109].mxu0  ;;  %v10733_v10 = vld [vmem:[%s13730_s15 + $0xd0] sm:$0xff] }
 0x7f4   : > { %v10886_v2 = vadd.f32 %v18709_v9, %v10885_v32  ;;  %v12549_v61 = vpop.f32.mrb[110].mxu0  ;;  %v10731_v32 = vld [vmem:[%s13730_s15 + $0xc0] sm:$0xff] }
 0x7f5   : > { %v10990_v18 = vadd.f32 %v10894_v29, %v10717_v41  ;;  %v10897_v54 = vadd.f32 %v12549_v61, %v18709_v9  ;;  %v10888_v20 = vpop.f32.mrb[111].mxu0  ;;  %v10734_v61 = vld [vmem:[%s13730_s15 + $0xd8] sm:$0xff] }
 0x7f6   : > { %v10988_v35 = vadd.f32 %v10886_v2, %v10715_v43  ;;  %v10889_v13 = vadd.f32 %v18709_v9, %v10888_v20  ;;  %v10732_v20 = vld [vmem:[%s13730_s15 + $0xc8] sm:$0xff] }
 0x7f7   : > { %11022 = vst.msk [vmem:[%s18721_s14 + $0x50] sm:$0xff] %vm272_vm0, %v10990_v18  ;;  %v10991_v48 = vadd.f32 %v10897_v54, %v10718_v38 }
 0x7f8   : > { %11020 = vst.msk [vmem:[%s18721_s14 + $0x40] sm:$0xff] %vm272_vm0, %v10988_v35  ;;  %v10989_v25 = vadd.f32 %v10889_v13, %v10716_v47 }
 0x7f9   : > { %11023 = vst.msk [vmem:[%s18721_s14 + $0x58] sm:$0xff] %vm272_vm0, %v10991_v48 }
 0x7fa   : > { %11021 = vst.msk [vmem:[%s18721_s14 + $0x48] sm:$0xff] %vm272_vm0, %v10989_v25  ;;  %v12552_v58 = vpop.f32.mrb[112].mxu0 }
 0x7fb   : > { %v10910_v45 = vadd.f32 %v12552_v58, %v18709_v9  ;;  %v10901_v31 = vpop.f32.mrb[113].mxu0  ;;  %v10737_v58 = vld [vmem:[%s13730_s15 + $0xf0] sm:$0xff] }
 0x7fc   : > { %v10902_v59 = vadd.f32 %v18709_v9, %v10901_v31  ;;  %v12553_v37 = vpop.f32.mrb[114].mxu0  ;;  %v10735_v31 = vld [vmem:[%s13730_s15 + $0xe0] sm:$0xff] }
 0x7fd   : > { %v10994_v51 = vadd.f32 %v10910_v45, %v10721_v39  ;;  %v10913_v17 = vadd.f32 %v12553_v37, %v18709_v9  ;;  %v10904_v46 = vpop.f32.mrb[115].mxu0  ;;  %v10738_v37 = vld [vmem:[%s13730_s15 + $0xf8] sm:$0xff] }
 0x7fe   : > { %v10992_v52 = vadd.f32 %v10902_v59, %v10719_v28  ;;  %v10905_v3 = vadd.f32 %v18709_v9, %v10904_v46  ;;  %v10736_v46 = vld [vmem:[%s13730_s15 + $0xe8] sm:$0xff]  ;;  %s13321_s15 = scalar_lea.vmem %s18844_s17, 4096 }
 0x7ff   : > { %11026 = vst.msk [vmem:[%s18721_s14 + $0x70] sm:$0xff] %vm272_vm0, %v10994_v51  ;;  %v10995_v36 = vadd.f32 %v10913_v17, %v10722_v21  ;;  %p13322_p11 = scmp.ne.s32.totalorder %s18844_s17, %s13321_s15  ;;  %p13329_p1 = scmp.lt.s32.totalorder %s13327_s9, %s13321_s15 }
 0x800   : > { %11024 = vst.msk [vmem:[%s18721_s14 + $0x60] sm:$0xff] %vm272_vm0, %v10992_v52  ;;  %v10993_v23 = vadd.f32 %v10905_v3, %v10720_v24 }
 0x801   : > { %11027 = vst.msk [vmem:[%s18721_s14 + $0x78] sm:$0xff] %vm272_vm0, %v10995_v36  ;;  %p13323_p12 = pnand %p13322_p11, %p13460_p5  ;;  %p13330_p2 = por %p13329_p1, %p13328_p0 }
 0x802   : > { %11025 = vst.msk [vmem:[%s18721_s14 + $0x68] sm:$0xff] %vm272_vm0, %v10993_v23  ;;  %v12556_v5 = vpop.f32.mrb[116].mxu0 }
 0x803   : > { %v10926_v4 = vadd.f32 %v12556_v5, %v18709_v9  ;;  %v10917_v14 = vpop.f32.mrb[117].mxu0  ;;  %p13324_p13 = pneg %p13323_p12 }
 0x804   : > { %v10918_v6 = vadd.f32 %v18709_v9, %v10917_v14  ;;  %v12557_v55 = vpop.f32.mrb[118].mxu0 }
 0x805   : > { %v10998_v34 = vadd.f32 %v10926_v4, %v10725_v19  ;;  %v10929_v1 = vadd.f32 %v12557_v55, %v18709_v9  ;;  %v10920_v26 = vpop.f32.mrb[119].mxu0  ;;  %p13331_p3 = pnand %p13330_p2, %p13324_p13 }
 0x806   : > { %v10996_v50 = vadd.f32 %v10918_v6, %v10723_v63  ;;  %v10921_v30 = vadd.f32 %v18709_v9, %v10920_v26 }
 0x807   : > { %11030 = vst.msk [vmem:[%s18721_s14 + $0x90] sm:$0xff] %vm272_vm0, %v10998_v34  ;;  %v10999_v16 = vadd.f32 %v10929_v1, %v10726_v11 }
 0x808   : > { %11028 = vst.msk [vmem:[%s18721_s14 + $0x80] sm:$0xff] %vm272_vm0, %v10996_v50  ;;  %v10997_v12 = vadd.f32 %v10921_v30, %v10724_v27 }
 0x809   : > { %11031 = vst.msk [vmem:[%s18721_s14 + $0x98] sm:$0xff] %vm272_vm0, %v10999_v16 }
 0x80a   : > { %11029 = vst.msk [vmem:[%s18721_s14 + $0x88] sm:$0xff] %vm272_vm0, %v10997_v12  ;;  %v12560_v49 = vpop.f32.mrb[120].mxu0 }
 0x80b   : > { %v10942_v33 = vadd.f32 %v12560_v49, %v18709_v9  ;;  %v10933_v8 = vpop.f32.mrb[121].mxu0 }
 0x80c   : > { %v10934_v57 = vadd.f32 %v18709_v9, %v10933_v8  ;;  %v12561_v44 = vpop.f32.mrb[122].mxu0 }
 0x80d   : > { %v11002_v60 = vadd.f32 %v10942_v33, %v10729_v40  ;;  %v10945_v7 = vadd.f32 %v12561_v44, %v18709_v9  ;;  %v10936_v42 = vpop.f32.mrb[123].mxu0 }
 0x80e   : > { %v11000_v22 = vadd.f32 %v10934_v57, %v10727_v53  ;;  %v10937_v0 = vadd.f32 %v18709_v9, %v10936_v42 }
 0x80f   : > { %11034 = vst.msk [vmem:[%s18721_s14 + $0xb0] sm:$0xff] %vm272_vm0, %v11002_v60  ;;  %v11003_v56 = vadd.f32 %v10945_v7, %v10730_v62 }
 0x810   : > { %11032 = vst.msk [vmem:[%s18721_s14 + $0xa0] sm:$0xff] %vm272_vm0, %v11000_v22  ;;  %v11001_v41 = vadd.f32 %v10937_v0, %v10728_v15 }
 0x811   : > { %11035 = vst.msk [vmem:[%s18721_s14 + $0xb8] sm:$0xff] %vm272_vm0, %v11003_v56 }
 0x812   : > { %11033 = vst.msk [vmem:[%s18721_s14 + $0xa8] sm:$0xff] %vm272_vm0, %v11001_v41  ;;  %v12564_v29 = vpop.f32.mrb[124].mxu0 }
 0x813   : > { %v10958_v43 = vadd.f32 %v12564_v29, %v18709_v9  ;;  %v10949_v2 = vpop.f32.mrb[125].mxu0 }
 0x814   : > { %v10950_v38 = vadd.f32 %v18709_v9, %v10949_v2  ;;  %v12565_v18 = vpop.f32.mrb[126].mxu0 }
 0x815   : > { %v11006_v54 = vadd.f32 %v10958_v43, %v10733_v10  ;;  %v10961_v47 = vadd.f32 %v12565_v18, %v18709_v9  ;;  %v10952_v35 = vpop.f32.mrb[127].mxu0 }
 0x816   : > { %v11004_v13 = vadd.f32 %v10950_v38, %v10731_v32  ;;  %v10953_v48 = vadd.f32 %v18709_v9, %v10952_v35 }
 0x817   : > { %11038 = vst.msk [vmem:[%s18721_s14 + $0xd0] sm:$0xff] %vm272_vm0, %v11006_v54  ;;  %v11007_v25 = vadd.f32 %v10961_v47, %v10734_v61 }
 0x818   : > { %11036 = vst.msk [vmem:[%s18721_s14 + $0xc0] sm:$0xff] %vm272_vm0, %v11004_v13  ;;  %v11005_v39 = vadd.f32 %v10953_v48, %v10732_v20 }
 0x819   : > { %11039 = vst.msk [vmem:[%s18721_s14 + $0xd8] sm:$0xff] %vm272_vm0, %v11007_v25 }
 0x81a   : > { %11037 = vst.msk [vmem:[%s18721_s14 + $0xc8] sm:$0xff] %vm272_vm0, %v11005_v39  ;;  %v12568_v45 = vpop.f32.mrb[128].mxu0 }
 0x81b   : > { %v10974_v28 = vadd.f32 %v12568_v45, %v18709_v9  ;;  %v10965_v59 = vpop.f32.mrb[129].mxu0 }
 0x81c   : > { %v10966_v21 = vadd.f32 %v18709_v9, %v10965_v59  ;;  %v12569_v51 = vpop.f32.mrb[130].mxu0 }
 0x81d   : > { %v11010_v17 = vadd.f32 %v10974_v28, %v10737_v58  ;;  %v10977_v24 = vadd.f32 %v12569_v51, %v18709_v9  ;;  %v10968_v52 = vpop.f32.mrb[131].mxu0 }
 0x81e   : > { %v11008_v3 = vadd.f32 %v10966_v21, %v10735_v31  ;;  %v10969_v36 = vadd.f32 %v18709_v9, %v10968_v52 }
 0x81f   : > { %11042 = vst.msk [vmem:[%s18721_s14 + $0xf0] sm:$0xff] %vm272_vm0, %v11010_v17  ;;  %v11011_v23 = vadd.f32 %v10977_v24, %v10738_v37 }
 0x820   : > { %11040 = vst.msk [vmem:[%s18721_s14 + $0xe0] sm:$0xff] %vm272_vm0, %v11008_v3  ;;  %v11009_v19 = vadd.f32 %v10969_v36, %v10736_v46 }
 0x821   : > { %11043 = vst.msk [vmem:[%s18721_s14 + $0xf8] sm:$0xff] %vm272_vm0, %v11011_v23 }
 0x822   : > { %11041 = vst.msk [vmem:[%s18721_s14 + $0xe8] sm:$0xff] %vm272_vm0, %v11009_v19 }
 0x823   : > { %13334 = shalt.err (!%p13331_p3)
}
 0x824   : > { %s13335_s10 = scalar_lea.hbm %s18842_s6, 4096  ;;  %s13339_s30 = scalar_lea.hbm %s18900_s5, 8192 }
 0x825   : > { %p13336_p4 = scmp.ne.s32.totalorder %s18842_s6, %s13335_s10  ;;  %p13340_p9 = scmp.lt.u32.totalorder %s18842_s6, %s18900_s5 }
 0x826   : > { %p13341_p10 = scmp.lt.u32.totalorder %s13339_s30, %s13335_s10  ;;  %p13343_p12 = scmp.lt.u32.totalorder %s13335_s10, %s18842_s6 }
 0x827   : > { %p13337_p7 = pnand %p13336_p4, %p13460_p5 }
 0x828   : > { %p13342_p11 = por %p13341_p10, %p13340_p9 }
 0x829   : > { %p13338_p8 = pneg %p13337_p7 }
 0x82a   : > { %p13344_p13 = por %p13343_p12, %p13342_p11 }
 0x82c   : > { %p13345_p0 = pnand %p13344_p13, %p13338_p8 }
 0x82e   : > { %13348 = shalt.err (!%p13345_p0)
}
 0x82f   : > { %s13390_s14 = smov 128   ;;  %s13391_s16 = smov 8  }
 0x830   : > { %12862 = dma.vmem_to_hbm [thread:$0]  (%p13460_p5), %s18844_s17, 4096, %s18842_s6, %s18854_s22, %s13390_s14, %s13390_s14, %s13391_s16  }
 0x831 PF: > { %p12868_p1 = scmp.ge.s32.totalorder %s13383_s21, 2  ;;  %s11073_s23 = sand.u32 1, %s13371_s18  }
 0x832   : > { %s11074_s25 = scalar_lea.sflag [#allocation4], %s11073_s23 }
 0x833   : > { %p12865_p2 = pnand %p12868_p1, %p13464_p6 }
 0x835   : > { %13366 = dma.done.wait (!%p12865_p2), %s11074_s25, 4096  }
 0x836   : > { %13368 = vsyncadd (!%p12865_p2), %s11074_s25, 4294963200  ;;  %p15_p3 = scmp.ge.s32.totalorder %s13447_s24, 4   ;;  %s19510_s18 = smov %s13375_s19 }
 0x837   : > { %s19511_s19 = smov %s13379_s20  ;;  %s19512_s20 = smov %s13458_s27 }
 0x838   : > { %s19513_s21 = smov %s13447_s24  ;;  %17 = sbr.rel (!%p15_p3) target bundleno = 3 (0x3), region = 90 }
 0x83f   :  { %11079 = vsyncpa [#allocation4], 1 }
 0x840   :  { %11081 = vsyncpa [#allocation4 + $0x1], 1 }

</bundles_post_ra>
